<compile_context>
chip_gen: v7x
topology: tpu7x:2x2x1
jax: 0.10.0
libtpu: 0.0.40
codegen_flags: <defaults>
</compile_context>

<pallas_src>
import jax
import jax.numpy as jnp
from jax.experimental import pallas as pl
from jax.experimental.pallas import tpu as pltpu


def _round_up(x, m):
    return ((x + m - 1) // m) * m


# -----------------------------------------------------------------------------
# Fused forward kernel: one grid step per TB-row batch block.
# -----------------------------------------------------------------------------
def _pointer_kernel(vq_ref, q_key_ref, q_mask_ref, p_key_ref, p_mask_ref,
                    qp_wk_ref, qp_wq_ref, qp_v_ref,
                    pp_wk_ref, pp_wq_ref, pp_v_ref,
                    wih_ref, whh_ref, bih_ref, bhh_ref,
                    begin_ref, end_ref):
    q_key = q_key_ref[...]            # (Tq, TB, Dq)  f32 or bf16
    p_key = p_key_ref[...]            # (Tp, TB, Dp)  f32 or bf16
    q_mask = q_mask_ref[...]          # (TB, Tq)      f32
    p_mask = p_mask_ref[...]          # (TB, Tp)      f32
    Tq, TB, Dq = q_key.shape
    Tp, _, Dp = p_key.shape
    A = qp_wk_ref.shape[-1]

    def attn_scores(kp, qp, v, mask_bt):
        # kp: (T, TB, A) f32 key projection; qp: (Q, A) query projection with
        # Q in {1, TB}; v: (1, A).  Returns masked scores in (TB, T) layout
        # (lane-dense, directly storable).
        t = jnp.tanh(kp + qp[None, :, :])                        # (T, TB, A)
        # VPU multiply + cross-lane reduce instead of an M=1 MXU push.
        s_tb = jnp.sum(t * v[None, :, :], axis=-1)               # (T, TB)
        s_bt = jnp.transpose(s_tb)                               # (TB, T)
        return jnp.where(mask_bt > 0.5, s_bt, jnp.full_like(s_bt, -1e30))

    def softmax_pool(s_bt, key):
        # masked softmax over T (lane axis), then weighted sum of keys.
        m = jnp.max(s_bt, axis=-1, keepdims=True)
        e = jnp.exp(s_bt - m)
        denom = jnp.maximum(jnp.sum(e, axis=-1, keepdims=True), 1e-30)
        alpha = e * pl.reciprocal(denom, approx=True)            # (TB, T)
        alpha_tb = jnp.transpose(alpha)                          # (T, TB)
        return jnp.sum(alpha_tb[:, :, None] * key, axis=0).astype(jnp.float32)

    # ---- question pooling (query = V_q, broadcast over the batch) ----------
    kp_q = jnp.dot(q_key.reshape(Tq * TB, Dq), qp_wk_ref[...],
                   preferred_element_type=jnp.float32).reshape(Tq, TB, A)
    qp_q = jnp.dot(vq_ref[...], qp_wq_ref[...],
                   preferred_element_type=jnp.float32)           # (1, A)
    s_q = attn_scores(kp_q, qp_q, qp_v_ref[...], q_mask)         # (TB, Tq)
    hidden = softmax_pool(s_q, q_key)                            # (TB, Dq) f32

    # ---- passage key projection: computed ONCE, reused for begin & end -----
    kp_p = jnp.dot(p_key.reshape(Tp * TB, Dp), pp_wk_ref[...],
                   preferred_element_type=jnp.float32).reshape(Tp, TB, A)

    qp_b = jnp.dot(hidden, pp_wq_ref[...],
                   preferred_element_type=jnp.float32)           # (TB, A)
    s_begin = attn_scores(kp_p, qp_b, pp_v_ref[...], p_mask)     # (TB, Tp)
    begin_ref[...] = s_begin
    inputs = softmax_pool(s_begin, p_key)                        # (TB, Dp) f32

    # ---- GRU cell (PyTorch nn.GRUCell), gates fused in two wide matmuls ----
    H = Dq
    gi = jnp.dot(inputs, wih_ref[...],
                 preferred_element_type=jnp.float32) + bih_ref[...]
    gh = jnp.dot(hidden, whh_ref[...],
                 preferred_element_type=jnp.float32) + bhh_ref[...]
    r = jax.nn.sigmoid(gi[:, 0:H] + gh[:, 0:H])
    z = jax.nn.sigmoid(gi[:, H:2 * H] + gh[:, H:2 * H])
    n = jnp.tanh(gi[:, 2 * H:3 * H] + r * gh[:, 2 * H:3 * H])
    h_new = (1.0 - z) * n + z * hidden                           # (TB, Dq)

    # ---- second passage pooling: reuses kp_p, only the scores are needed ---
    qp_e = jnp.dot(h_new, pp_wq_ref[...], preferred_element_type=jnp.float32)
    end_ref[...] = attn_scores(kp_p, qp_e, pp_v_ref[...], p_mask)


# -----------------------------------------------------------------------------
# Parameter construction (deterministic, mirrors the PyTorch module's shapes)
# -----------------------------------------------------------------------------
def init_params(rng, question_size, passage_size, attn_size=None):
    if attn_size is None:
        attn_size = question_size
    v_q_size = question_size
    H = question_size
    ks = jax.random.split(rng, 11)

    def lin(k, fan_in, shape):
        bound = 1.0 / jnp.sqrt(jnp.float32(fan_in))
        return jax.random.uniform(k, shape, jnp.float32, -bound, bound)

    return {
        # question_pooling = AttentionPooling(question_size, v_q_size, attn_size)
        "qp_wk": lin(ks[0], question_size, (question_size, attn_size)),
        "qp_wq": lin(ks[1], v_q_size, (v_q_size, attn_size)),
        "qp_v":  lin(ks[2], attn_size, (1, attn_size)),
        # passage_pooling = AttentionPooling(passage_size, question_size, attn_size)
        "pp_wk": lin(ks[3], passage_size, (passage_size, attn_size)),
        "pp_wq": lin(ks[4], question_size, (question_size, attn_size)),
        "pp_v":  lin(ks[5], attn_size, (1, attn_size)),
        # V_q ~ randn(1, 1, v_q_size)
        "V_q": jax.random.normal(ks[6], (1, 1, v_q_size), jnp.float32),
        # GRUCell(question_size, question_size) — stored transposed with gates
        # concatenated on the output axis: columns are [r | z | n].
        "gru_wih": lin(ks[7], question_size, (passage_size, 3 * H)),
        "gru_whh": lin(ks[8], question_size, (H, 3 * H)),
        "gru_bih": lin(ks[9], question_size, (1, 3 * H)),
        "gru_bhh": lin(ks[10], question_size, (1, 3 * H)),
    }


# -----------------------------------------------------------------------------
# PointerNetwork forward (num_layers = 1) — single fused, batch-blocked call
# -----------------------------------------------------------------------------
def pointer_network_forward(params, question_pad, question_mask,
                            passage_pad, passage_mask, *,
                            batch_block=None, use_bf16=False,
                            vmem_limit_bytes=None):
    Tq, B, Dq = question_pad.shape
    Tp, _, Dp = passage_pad.shape
    A = params["qp_wk"].shape[-1]
    H = Dq   # GRUCell(question_size, question_size) => Dp must equal Dq
    f32 = jnp.float32
    key_dtype = jnp.bfloat16 if use_bf16 else f32

    # ---- generation-aware VMEM budget (v7x: 64 MiB, v5e/v6e: 128 MiB) ------
    if vmem_limit_bytes is None:
        try:
            cap = pltpu.get_tpu_info().vmem_capacity_bytes
            vmem_limit_bytes = min(int(0.70 * cap), 96 * 1024 * 1024)
        except Exception:
            vmem_limit_bytes = 48 * 1024 * 1024

    # ---- lane / sublane padding ---------------------------------------------
    Tq_p = _round_up(Tq, 8)        # sublane-aligned (keeps in-kernel transposes clean)
    Tp_p = _round_up(Tp, 128)      # lane-dense scores and output stores
    A_p = _round_up(A, 128)        # lane-dense attention projections

    # ---- batch tile TB: multiple of 8, sized against the VMEM budget -------
    TB = batch_block if batch_block is not None else min(64, _round_up(B, 8))
    TB = max(8, _round_up(TB, 8))
    key_bytes = 2 if use_bf16 else 4

    def est_vmem(tb):
        keys = 2 * tb * (Tp_p * Dp + Tq_p * Dq) * key_bytes   # double-buffered key tiles
        inter = 2 * tb * Tp_p * A_p * 4                       # kp_p + tanh temp (f32)
        outs = 2 * 2 * tb * Tp_p * 4                          # two double-buffered outputs
        masks = 2 * tb * (Tp_p + Tq_p) * 4
        weights = 2 * 4 * (3 * Dq * A_p + Dp * A_p + 2 * A_p
                           + (Dp + H + 2) * 3 * H + Dq)
        return keys + inter + outs + masks + weights

    while TB > 8 and est_vmem(TB) > int(0.6 * vmem_limit_bytes):
        TB -= 8
    Bp = _round_up(B, TB)
    grid = (Bp // TB,)

    # ---- pad operands (zero-padding; masked positions stay at -1e30) --------
    q_key = jnp.pad(question_pad,
                    ((0, Tq_p - Tq), (0, Bp - B), (0, 0))).astype(key_dtype)
    p_key = jnp.pad(passage_pad,
                    ((0, Tp_p - Tp), (0, Bp - B), (0, 0))).astype(key_dtype)
    # Only the tiny masks are transposed to batch-first (lane-dense) layout.
    q_mask = jnp.pad(jnp.transpose(question_mask).astype(f32),
                     ((0, Bp - B), (0, Tq_p - Tq)))
    p_mask = jnp.pad(jnp.transpose(passage_mask).astype(f32),
                     ((0, Bp - B), (0, Tp_p - Tp)))

    def pad_a(w):   # zero-pad the attention dim to A_p
        return jnp.pad(w, ((0, 0), (0, A_p - A)))

    qp_wk = pad_a(params["qp_wk"]).astype(key_dtype)
    pp_wk = pad_a(params["pp_wk"]).astype(key_dtype)
    qp_wq = pad_a(params["qp_wq"]).astype(f32)
    pp_wq = pad_a(params["pp_wq"]).astype(f32)
    qp_v = pad_a(params["qp_v"]).astype(f32)
    pp_v = pad_a(params["pp_v"]).astype(f32)
    vq = params["V_q"].reshape(1, Dq).astype(f32)

    const2 = lambda b: (0, 0)   # weights: same block every grid step
    in_specs = [
        pl.BlockSpec((1, Dq), const2),                         # V_q
        pl.BlockSpec((Tq_p, TB, Dq), lambda b: (0, b, 0)),     # question keys (seq-first)
        pl.BlockSpec((TB, Tq_p), lambda b: (b, 0)),            # question mask (batch-first)
        pl.BlockSpec((Tp_p, TB, Dp), lambda b: (0, b, 0)),     # passage keys (seq-first)
        pl.BlockSpec((TB, Tp_p), lambda b: (b, 0)),            # passage mask
        pl.BlockSpec((Dq, A_p), const2),                       # qp_wk
        pl.BlockSpec((Dq, A_p), const2),                       # qp_wq
        pl.BlockSpec((1, A_p), const2),                        # qp_v
        pl.BlockSpec((Dp, A_p), const2),                       # pp_wk
        pl.BlockSpec((Dq, A_p), const2),                       # pp_wq
        pl.BlockSpec((1, A_p), const2),                        # pp_v
        pl.BlockSpec((Dp, 3 * H), const2),                     # gru_wih (fused gates)
        pl.BlockSpec((H, 3 * H), const2),                      # gru_whh (fused gates)
        pl.BlockSpec((1, 3 * H), const2),                      # gru_bih
        pl.BlockSpec((1, 3 * H), const2),                      # gru_bhh
    ]
    out_specs = (pl.BlockSpec((TB, Tp_p), lambda b: (b, 0)),
                 pl.BlockSpec((TB, Tp_p), lambda b: (b, 0)))

    begin, end = pl.pallas_call(
        _pointer_kernel,
        out_shape=(jax.ShapeDtypeStruct((Bp, Tp_p), f32),
                   jax.ShapeDtypeStruct((Bp, Tp_p), f32)),
        grid=grid,
        in_specs=in_specs,
        out_specs=out_specs,
        compiler_params=pltpu.CompilerParams(
            dimension_semantics=("parallel",),   # v7x: shard batch blocks across 2 TCs
            vmem_limit_bytes=vmem_limit_bytes),
    )(vq, q_key, q_mask, p_key, p_mask,
      qp_wk, qp_wq, qp_v, pp_wk, pp_wq, pp_v,
      params["gru_wih"], params["gru_whh"], params["gru_bih"], params["gru_bhh"])

    return begin[:B, :Tp], end[:B, :Tp]


# -----------------------------------------------------------------------------
# Pure-JAX reference (for correctness check)
# -----------------------------------------------------------------------------
def _ref_attn_pool(key_tbd, query_bd, mask_tb, wk, wq, v):
    kp = jnp.einsum("tbd,da->tba", key_tbd, wk)
    qp = query_bd @ wq                                  # (B, A)
    t = jnp.tanh(kp + qp[None, :, :])                   # (T, B, A)
    s = jnp.einsum("tba,a->tb", t, v[0])                # (T, B)
    s = jnp.where(mask_tb > 0.5, s, -1e30)
    alpha = jax.nn.softmax(s, axis=0)                   # (T, B)
    pooled = jnp.einsum("tb,tbd->bd", alpha, key_tbd)   # (B, D)
    return pooled, s.T                                  # scores (B, T)


def _ref_gru(x, h, wih, whh, bih, bhh):
    H = h.shape[-1]
    gi = x @ wih + bih
    gh = h @ whh + bhh
    r = jax.nn.sigmoid(gi[:, 0:H] + gh[:, 0:H])
    z = jax.nn.sigmoid(gi[:, H:2 * H] + gh[:, H:2 * H])
    n = jnp.tanh(gi[:, 2 * H:3 * H] + r * gh[:, 2 * H:3 * H])
    return (1.0 - z) * n + z * h


def _ref_forward(p, q_pad, q_mask, p_pad, p_mask):
    B = q_pad.shape[1]
    vq = jnp.broadcast_to(p["V_q"][0], (B, p["V_q"].shape[-1]))
    hidden, _ = _ref_attn_pool(q_pad, vq, q_mask, p["qp_wk"], p["qp_wq"], p["qp_v"])
    inputs, ab = _ref_attn_pool(p_pad, hidden, p_mask, p["pp_wk"], p["pp_wq"], p["pp_v"])
    h_new = _ref_gru(inputs, hidden, p["gru_wih"], p["gru_whh"], p["gru_bih"], p["gru_bhh"])
    _, ae = _ref_attn_pool(p_pad, h_new, p_mask, p["pp_wk"], p["pp_wq"], p["pp_v"])
    return ab, ae


if __name__ == "__main__":
    rng = jax.random.PRNGKey(0)
    B, Tq, Tp = 2, 8, 16
    question_size = passage_size = 32   # must match so the GRUCell input fits

    k_params, k_q, k_p = jax.random.split(rng, 3)
    params = init_params(k_params, question_size, passage_size)

    question_pad = jax.random.normal(k_q, (Tq, B, question_size), jnp.float32)
    passage_pad = jax.random.normal(k_p, (Tp, B, passage_size), jnp.float32)

    q_lens = jnp.array([8, 6])
    p_lens = jnp.array([16, 12])
    question_mask = (jnp.arange(Tq)[:, None] < q_lens[None, :]).astype(jnp.float32)  # (Tq, B)
    passage_mask = (jnp.arange(Tp)[:, None] < p_lens[None, :]).astype(jnp.float32)   # (Tp, B)

    # ---- f32 path (primary correctness check) ----
    ans_begin, ans_end = pointer_network_forward(
        params, question_pad, question_mask, passage_pad, passage_mask)
    jax.block_until_ready((ans_begin, ans_end))

    ref_begin, ref_end = _ref_forward(
        params, question_pad, question_mask, passage_pad, passage_mask)
    assert ans_begin.shape == (B, Tp) and ans_end.shape == (B, Tp)
    assert jnp.allclose(ans_begin, ref_begin, atol=1e-2, rtol=1e-2)
    assert jnp.allclose(ans_end, ref_end, atol=1e-2, rtol=1e-2)

    # ---- bf16 MXU-operand path (v6e/v7x fast path; looser tolerance) ----
    bf_begin, bf_end = pointer_network_forward(
        params, question_pad, question_mask, passage_pad, passage_mask,
        use_bf16=True)
    jax.block_until_ready((bf_begin, bf_end))
    assert jnp.allclose(bf_begin, ref_begin, atol=1e-1, rtol=1e-1)
    assert jnp.allclose(bf_end, ref_end, atol=1e-1, rtol=1e-1)

    print("KERNEL_OK")
</pallas_src>

<mosaic_0001>
module attributes {stable_mosaic.version = 11 : i64} {
  func.func @_pointer_kernel(%arg0: i32, %arg1: memref<1x32xf32, #tpu.memory_space<vmem>>, %arg2: memref<8x8x32xf32, #tpu.memory_space<vmem>>, %arg3: memref<8x8xf32, #tpu.memory_space<vmem>>, %arg4: memref<128x8x32xf32, #tpu.memory_space<vmem>>, %arg5: memref<8x128xf32, #tpu.memory_space<vmem>>, %arg6: memref<32x128xf32, #tpu.memory_space<vmem>>, %arg7: memref<32x128xf32, #tpu.memory_space<vmem>>, %arg8: memref<1x128xf32, #tpu.memory_space<vmem>>, %arg9: memref<32x128xf32, #tpu.memory_space<vmem>>, %arg10: memref<32x128xf32, #tpu.memory_space<vmem>>, %arg11: memref<1x128xf32, #tpu.memory_space<vmem>>, %arg12: memref<32x96xf32, #tpu.memory_space<vmem>>, %arg13: memref<32x96xf32, #tpu.memory_space<vmem>>, %arg14: memref<1x96xf32, #tpu.memory_space<vmem>>, %arg15: memref<1x96xf32, #tpu.memory_space<vmem>>, %arg16: memref<8x128xf32, #tpu.memory_space<vmem>>, %arg17: memref<8x128xf32, #tpu.memory_space<vmem>>) attributes {dimension_semantics = [#tpu.dimension_semantics<parallel>], iteration_bounds = array<i64: 1>, scalar_prefetch = 0 : i64, scratch_operands = 0 : i64, tpu.core_type = #tpu.core_type<tc>, window_params = [{pipeline_mode = #tpu.pipeline_mode<synchronous>, transform_indices = @transform_0, window_bounds = array<i64: 1, 32>}, {transform_indices = @transform_1, window_bounds = array<i64: 8, 8, 32>}, {transform_indices = @transform_2, window_bounds = array<i64: 8, 8>}, {transform_indices = @transform_3, window_bounds = array<i64: 128, 8, 32>}, {transform_indices = @transform_4, window_bounds = array<i64: 8, 128>}, {pipeline_mode = #tpu.pipeline_mode<synchronous>, transform_indices = @transform_5, window_bounds = array<i64: 32, 128>}, {pipeline_mode = #tpu.pipeline_mode<synchronous>, transform_indices = @transform_6, window_bounds = array<i64: 32, 128>}, {pipeline_mode = #tpu.pipeline_mode<synchronous>, transform_indices = @transform_7, window_bounds = array<i64: 1, 128>}, {pipeline_mode = #tpu.pipeline_mode<synchronous>, transform_indices = @transform_8, window_bounds = array<i64: 32, 128>}, {pipeline_mode = #tpu.pipeline_mode<synchronous>, transform_indices = @transform_9, window_bounds = array<i64: 32, 128>}, {pipeline_mode = #tpu.pipeline_mode<synchronous>, transform_indices = @transform_10, window_bounds = array<i64: 1, 128>}, {pipeline_mode = #tpu.pipeline_mode<synchronous>, transform_indices = @transform_11, window_bounds = array<i64: 32, 96>}, {pipeline_mode = #tpu.pipeline_mode<synchronous>, transform_indices = @transform_12, window_bounds = array<i64: 32, 96>}, {pipeline_mode = #tpu.pipeline_mode<synchronous>, transform_indices = @transform_13, window_bounds = array<i64: 1, 96>}, {pipeline_mode = #tpu.pipeline_mode<synchronous>, transform_indices = @transform_14, window_bounds = array<i64: 1, 96>}, {transform_indices = @transform_15, window_bounds = array<i64: 8, 128>}, {transform_indices = @transform_16, window_bounds = array<i64: 8, 128>}]} {
    %c0 = arith.constant 0 : index
    %c0_0 = arith.constant 0 : index
    %c0_1 = arith.constant 0 : index
    %0 = vector.load %arg2[%c0, %c0_0, %c0_1] : memref<8x8x32xf32, #tpu.memory_space<vmem>>, vector<8x8x32xf32>
    %c0_2 = arith.constant 0 : index
    %c0_3 = arith.constant 0 : index
    %c0_4 = arith.constant 0 : index
    %1 = vector.load %arg4[%c0_2, %c0_3, %c0_4] : memref<128x8x32xf32, #tpu.memory_space<vmem>>, vector<128x8x32xf32>
    %c0_5 = arith.constant 0 : index
    %c0_6 = arith.constant 0 : index
    %2 = vector.load %arg3[%c0_5, %c0_6] : memref<8x8xf32, #tpu.memory_space<vmem>>, vector<8x8xf32>
    %c0_7 = arith.constant 0 : index
    %c0_8 = arith.constant 0 : index
    %3 = vector.load %arg5[%c0_7, %c0_8] : memref<8x128xf32, #tpu.memory_space<vmem>>, vector<8x128xf32>
    %4 = vector.shape_cast %0 : vector<8x8x32xf32> to vector<64x32xf32>
    %c0_9 = arith.constant 0 : index
    %c0_10 = arith.constant 0 : index
    %5 = vector.load %arg6[%c0_9, %c0_10] : memref<32x128xf32, #tpu.memory_space<vmem>>, vector<32x128xf32>
    %cst = arith.constant dense<0.000000e+00> : vector<64x128xf32>
    %6 = tpu.matmul %4, %5, %cst {dimension_numbers = #tpu.dot_dimension_numbers<[1], [0], [0], [1], [0, 0, 1, 1], [], []>} : vector<64x32xf32>, vector<32x128xf32>, vector<64x128xf32> -> vector<64x128xf32>
    %7 = vector.shape_cast %6 : vector<64x128xf32> to vector<8x8x128xf32>
    %c0_11 = arith.constant 0 : index
    %c0_12 = arith.constant 0 : index
    %8 = vector.load %arg1[%c0_11, %c0_12] : memref<1x32xf32, #tpu.memory_space<vmem>>, vector<1x32xf32>
    %c0_13 = arith.constant 0 : index
    %c0_14 = arith.constant 0 : index
    %9 = vector.load %arg7[%c0_13, %c0_14] : memref<32x128xf32, #tpu.memory_space<vmem>>, vector<32x128xf32>
    %cst_15 = arith.constant dense<0.000000e+00> : vector<1x128xf32>
    %10 = tpu.matmul %8, %9, %cst_15 {dimension_numbers = #tpu.dot_dimension_numbers<[1], [0], [0], [1], [0, 0, 1, 1], [], []>} : vector<1x32xf32>, vector<32x128xf32>, vector<1x128xf32> -> vector<1x128xf32>
    %c0_16 = arith.constant 0 : index
    %c0_17 = arith.constant 0 : index
    %11 = vector.load %arg8[%c0_16, %c0_17] : memref<1x128xf32, #tpu.memory_space<vmem>>, vector<1x128xf32>
    %12 = vector.shape_cast %10 : vector<1x128xf32> to vector<1x1x128xf32>
    %13 = vector.broadcast %12 : vector<1x1x128xf32> to vector<8x8x128xf32>
    %14 = arith.addf %7, %13 : vector<8x8x128xf32>
    %15 = math.tanh %14 : vector<8x8x128xf32>
    %16 = vector.shape_cast %11 : vector<1x128xf32> to vector<1x1x128xf32>
    %17 = vector.broadcast %16 : vector<1x1x128xf32> to vector<8x8x128xf32>
    %18 = arith.mulf %15, %17 : vector<8x8x128xf32>
    %cst_18 = arith.constant dense<0.000000e+00> : vector<8x8xf32>
    %19 = vector.multi_reduction <add>, %18, %cst_18 [2] : vector<8x8x128xf32> to vector<8x8xf32>
    %20 = tpu.transpose %19, [1, 0] : vector<8x8xf32> -> vector<8x8xf32>
    %cst_19 = arith.constant 5.000000e-01 : f32
    %21 = vector.broadcast %cst_19 : f32 to vector<8x8xf32>
    %22 = arith.cmpf ogt, %2, %21 : vector<8x8xf32>
    %cst_20 = arith.constant -1.000000e+30 : f32
    %23 = vector.broadcast %cst_20 : f32 to vector<8x8xf32>
    %24 = arith.select %22, %20, %23 : vector<8x8xi1>, vector<8x8xf32>
    %cst_21 = arith.constant dense<0xFF800000> : vector<8xf32>
    %25 = vector.multi_reduction <maximumf>, %24, %cst_21 [1] : vector<8x8xf32> to vector<8xf32>
    %26 = vector.shape_cast %25 : vector<8xf32> to vector<8x1xf32>
    %27 = vector.broadcast %26 : vector<8x1xf32> to vector<8x8xf32>
    %28 = arith.subf %24, %27 : vector<8x8xf32>
    %29 = math.exp %28 : vector<8x8xf32>
    %cst_22 = arith.constant dense<0.000000e+00> : vector<8xf32>
    %30 = vector.multi_reduction <add>, %29, %cst_22 [1] : vector<8x8xf32> to vector<8xf32>
    %31 = vector.shape_cast %30 : vector<8xf32> to vector<8x1xf32>
    %cst_23 = arith.constant 1.000000e-30 : f32
    %32 = vector.broadcast %cst_23 : f32 to vector<8x1xf32>
    %33 = arith.maximumf %31, %32 : vector<8x1xf32>
    %34 = tpu.reciprocal %33 {approx = true} : vector<8x1xf32> -> vector<8x1xf32>
    %35 = vector.broadcast %34 : vector<8x1xf32> to vector<8x8xf32>
    %36 = arith.mulf %29, %35 : vector<8x8xf32>
    %37 = tpu.transpose %36, [1, 0] : vector<8x8xf32> -> vector<8x8xf32>
    %38 = vector.shape_cast %37 : vector<8x8xf32> to vector<8x8x1xf32>
    %39 = vector.broadcast %38 : vector<8x8x1xf32> to vector<8x8x32xf32>
    %40 = arith.mulf %39, %0 : vector<8x8x32xf32>
    %cst_24 = arith.constant dense<0.000000e+00> : vector<8x32xf32>
    %41 = vector.multi_reduction <add>, %40, %cst_24 [0] : vector<8x8x32xf32> to vector<8x32xf32>
    %42 = vector.shape_cast %1 : vector<128x8x32xf32> to vector<1024x32xf32>
    %c0_25 = arith.constant 0 : index
    %c0_26 = arith.constant 0 : index
    %43 = vector.load %arg9[%c0_25, %c0_26] : memref<32x128xf32, #tpu.memory_space<vmem>>, vector<32x128xf32>
    %cst_27 = arith.constant dense<0.000000e+00> : vector<1024x128xf32>
    %44 = tpu.matmul %42, %43, %cst_27 {dimension_numbers = #tpu.dot_dimension_numbers<[1], [0], [0], [1], [0, 0, 1, 1], [], []>} : vector<1024x32xf32>, vector<32x128xf32>, vector<1024x128xf32> -> vector<1024x128xf32>
    %45 = vector.shape_cast %44 : vector<1024x128xf32> to vector<128x8x128xf32>
    %c0_28 = arith.constant 0 : index
    %c0_29 = arith.constant 0 : index
    %46 = vector.load %arg10[%c0_28, %c0_29] : memref<32x128xf32, #tpu.memory_space<vmem>>, vector<32x128xf32>
    %cst_30 = arith.constant dense<0.000000e+00> : vector<8x128xf32>
    %47 = tpu.matmul %41, %46, %cst_30 {dimension_numbers = #tpu.dot_dimension_numbers<[1], [0], [0], [1], [0, 0, 1, 1], [], []>} : vector<8x32xf32>, vector<32x128xf32>, vector<8x128xf32> -> vector<8x128xf32>
    %c0_31 = arith.constant 0 : index
    %c0_32 = arith.constant 0 : index
    %48 = vector.load %arg11[%c0_31, %c0_32] : memref<1x128xf32, #tpu.memory_space<vmem>>, vector<1x128xf32>
    %49 = vector.shape_cast %47 : vector<8x128xf32> to vector<1x8x128xf32>
    %50 = vector.broadcast %49 : vector<1x8x128xf32> to vector<128x8x128xf32>
    %51 = arith.addf %45, %50 : vector<128x8x128xf32>
    %52 = math.tanh %51 : vector<128x8x128xf32>
    %53 = vector.shape_cast %48 : vector<1x128xf32> to vector<1x1x128xf32>
    %54 = vector.broadcast %53 : vector<1x1x128xf32> to vector<128x8x128xf32>
    %55 = arith.mulf %52, %54 : vector<128x8x128xf32>
    %cst_33 = arith.constant dense<0.000000e+00> : vector<128x8xf32>
    %56 = vector.multi_reduction <add>, %55, %cst_33 [2] : vector<128x8x128xf32> to vector<128x8xf32>
    %57 = tpu.transpose %56, [1, 0] : vector<128x8xf32> -> vector<8x128xf32>
    %cst_34 = arith.constant 5.000000e-01 : f32
    %58 = vector.broadcast %cst_34 : f32 to vector<8x128xf32>
    %59 = arith.cmpf ogt, %3, %58 : vector<8x128xf32>
    %cst_35 = arith.constant -1.000000e+30 : f32
    %60 = vector.broadcast %cst_35 : f32 to vector<8x128xf32>
    %61 = arith.select %59, %57, %60 : vector<8x128xi1>, vector<8x128xf32>
    %c0_36 = arith.constant 0 : index
    %c0_37 = arith.constant 0 : index
    %62 = vector.load %arg16[%c0_36, %c0_37] : memref<8x128xf32, #tpu.memory_space<vmem>>, vector<8x128xf32>
    tpu.vector_store %arg16[%c0_36, %c0_37], %61 {strides = array<i32>} : memref<8x128xf32, #tpu.memory_space<vmem>>, vector<8x128xf32>,
    %cst_38 = arith.constant dense<0xFF800000> : vector<8xf32>
    %63 = vector.multi_reduction <maximumf>, %61, %cst_38 [1] : vector<8x128xf32> to vector<8xf32>
    %64 = vector.shape_cast %63 : vector<8xf32> to vector<8x1xf32>
    %65 = vector.broadcast %64 : vector<8x1xf32> to vector<8x128xf32>
    %66 = arith.subf %61, %65 : vector<8x128xf32>
    %67 = math.exp %66 : vector<8x128xf32>
    %cst_39 = arith.constant dense<0.000000e+00> : vector<8xf32>
    %68 = vector.multi_reduction <add>, %67, %cst_39 [1] : vector<8x128xf32> to vector<8xf32>
    %69 = vector.shape_cast %68 : vector<8xf32> to vector<8x1xf32>
    %cst_40 = arith.constant 1.000000e-30 : f32
    %70 = vector.broadcast %cst_40 : f32 to vector<8x1xf32>
    %71 = arith.maximumf %69, %70 : vector<8x1xf32>
    %72 = tpu.reciprocal %71 {approx = true} : vector<8x1xf32> -> vector<8x1xf32>
    %73 = vector.broadcast %72 : vector<8x1xf32> to vector<8x128xf32>
    %74 = arith.mulf %67, %73 : vector<8x128xf32>
    %75 = tpu.transpose %74, [1, 0] : vector<8x128xf32> -> vector<128x8xf32>
    %76 = vector.shape_cast %75 : vector<128x8xf32> to vector<128x8x1xf32>
    %77 = vector.broadcast %76 : vector<128x8x1xf32> to vector<128x8x32xf32>
    %78 = arith.mulf %77, %1 : vector<128x8x32xf32>
    %cst_41 = arith.constant dense<0.000000e+00> : vector<8x32xf32>
    %79 = vector.multi_reduction <add>, %78, %cst_41 [0] : vector<128x8x32xf32> to vector<8x32xf32>
    %c0_42 = arith.constant 0 : index
    %c0_43 = arith.constant 0 : index
    %80 = vector.load %arg12[%c0_42, %c0_43] : memref<32x96xf32, #tpu.memory_space<vmem>>, vector<32x96xf32>
    %cst_44 = arith.constant dense<0.000000e+00> : vector<8x96xf32>
    %81 = tpu.matmul %79, %80, %cst_44 {dimension_numbers = #tpu.dot_dimension_numbers<[1], [0], [0], [1], [0, 0, 1, 1], [], []>} : vector<8x32xf32>, vector<32x96xf32>, vector<8x96xf32> -> vector<8x96xf32>
    %c0_45 = arith.constant 0 : index
    %c0_46 = arith.constant 0 : index
    %82 = vector.load %arg14[%c0_45, %c0_46] : memref<1x96xf32, #tpu.memory_space<vmem>>, vector<1x96xf32>
    %83 = vector.broadcast %82 : vector<1x96xf32> to vector<8x96xf32>
    %84 = arith.addf %81, %83 : vector<8x96xf32>
    %c0_47 = arith.constant 0 : index
    %c0_48 = arith.constant 0 : index
    %85 = vector.load %arg13[%c0_47, %c0_48] : memref<32x96xf32, #tpu.memory_space<vmem>>, vector<32x96xf32>
    %cst_49 = arith.constant dense<0.000000e+00> : vector<8x96xf32>
    %86 = tpu.matmul %41, %85, %cst_49 {dimension_numbers = #tpu.dot_dimension_numbers<[1], [0], [0], [1], [0, 0, 1, 1], [], []>} : vector<8x32xf32>, vector<32x96xf32>, vector<8x96xf32> -> vector<8x96xf32>
    %c0_50 = arith.constant 0 : index
    %c0_51 = arith.constant 0 : index
    %87 = vector.load %arg15[%c0_50, %c0_51] : memref<1x96xf32, #tpu.memory_space<vmem>>, vector<1x96xf32>
    %88 = vector.broadcast %87 : vector<1x96xf32> to vector<8x96xf32>
    %89 = arith.addf %86, %88 : vector<8x96xf32>
    %90 = vector.extract_strided_slice %84 {offsets = [0, 0], sizes = [8, 32], strides = [1, 1]} : vector<8x96xf32> to vector<8x32xf32>
    %91 = vector.extract_strided_slice %89 {offsets = [0, 0], sizes = [8, 32], strides = [1, 1]} : vector<8x96xf32> to vector<8x32xf32>
    %92 = arith.addf %90, %91 : vector<8x32xf32>
    %93 = arith.negf %92 : vector<8x32xf32>
    %94 = math.exp %93 : vector<8x32xf32>
    %cst_52 = arith.constant 1.000000e+00 : f32
    %95 = vector.broadcast %cst_52 : f32 to vector<8x32xf32>
    %96 = arith.addf %95, %94 : vector<8x32xf32>
    %97 = arith.divf %95, %96 : vector<8x32xf32>
    %98 = vector.extract_strided_slice %84 {offsets = [0, 32], sizes = [8, 32], strides = [1, 1]} : vector<8x96xf32> to vector<8x32xf32>
    %99 = vector.extract_strided_slice %89 {offsets = [0, 32], sizes = [8, 32], strides = [1, 1]} : vector<8x96xf32> to vector<8x32xf32>
    %100 = arith.addf %98, %99 : vector<8x32xf32>
    %101 = arith.negf %100 : vector<8x32xf32>
    %102 = math.exp %101 : vector<8x32xf32>
    %cst_53 = arith.constant 1.000000e+00 : f32
    %103 = vector.broadcast %cst_53 : f32 to vector<8x32xf32>
    %104 = arith.addf %103, %102 : vector<8x32xf32>
    %105 = arith.divf %103, %104 : vector<8x32xf32>
    %106 = vector.extract_strided_slice %84 {offsets = [0, 64], sizes = [8, 32], strides = [1, 1]} : vector<8x96xf32> to vector<8x32xf32>
    %107 = vector.extract_strided_slice %89 {offsets = [0, 64], sizes = [8, 32], strides = [1, 1]} : vector<8x96xf32> to vector<8x32xf32>
    %108 = arith.mulf %97, %107 : vector<8x32xf32>
    %109 = arith.addf %106, %108 : vector<8x32xf32>
    %110 = math.tanh %109 : vector<8x32xf32>
    %cst_54 = arith.constant 1.000000e+00 : f32
    %111 = vector.broadcast %cst_54 : f32 to vector<8x32xf32>
    %112 = arith.subf %111, %105 : vector<8x32xf32>
    %113 = arith.mulf %112, %110 : vector<8x32xf32>
    %114 = arith.mulf %105, %41 : vector<8x32xf32>
    %115 = arith.addf %113, %114 : vector<8x32xf32>
    %c0_55 = arith.constant 0 : index
    %c0_56 = arith.constant 0 : index
    %116 = vector.load %arg10[%c0_55, %c0_56] : memref<32x128xf32, #tpu.memory_space<vmem>>, vector<32x128xf32>
    %cst_57 = arith.constant dense<0.000000e+00> : vector<8x128xf32>
    %117 = tpu.matmul %115, %116, %cst_57 {dimension_numbers = #tpu.dot_dimension_numbers<[1], [0], [0], [1], [0, 0, 1, 1], [], []>} : vector<8x32xf32>, vector<32x128xf32>, vector<8x128xf32> -> vector<8x128xf32>
    %c0_58 = arith.constant 0 : index
    %c0_59 = arith.constant 0 : index
    %118 = vector.load %arg11[%c0_58, %c0_59] : memref<1x128xf32, #tpu.memory_space<vmem>>, vector<1x128xf32>
    %119 = vector.shape_cast %117 : vector<8x128xf32> to vector<1x8x128xf32>
    %120 = vector.broadcast %119 : vector<1x8x128xf32> to vector<128x8x128xf32>
    %121 = arith.addf %45, %120 : vector<128x8x128xf32>
    %122 = math.tanh %121 : vector<128x8x128xf32>
    %123 = vector.shape_cast %118 : vector<1x128xf32> to vector<1x1x128xf32>
    %124 = vector.broadcast %123 : vector<1x1x128xf32> to vector<128x8x128xf32>
    %125 = arith.mulf %122, %124 : vector<128x8x128xf32>
    %cst_60 = arith.constant dense<0.000000e+00> : vector<128x8xf32>
    %126 = vector.multi_reduction <add>, %125, %cst_60 [2] : vector<128x8x128xf32> to vector<128x8xf32>
    %127 = tpu.transpose %126, [1, 0] : vector<128x8xf32> -> vector<8x128xf32>
    %cst_61 = arith.constant 5.000000e-01 : f32
    %128 = vector.broadcast %cst_61 : f32 to vector<8x128xf32>
    %129 = arith.cmpf ogt, %3, %128 : vector<8x128xf32>
    %cst_62 = arith.constant -1.000000e+30 : f32
    %130 = vector.broadcast %cst_62 : f32 to vector<8x128xf32>
    %131 = arith.select %129, %127, %130 : vector<8x128xi1>, vector<8x128xf32>
    %c0_63 = arith.constant 0 : index
    %c0_64 = arith.constant 0 : index
    %132 = vector.load %arg17[%c0_63, %c0_64] : memref<8x128xf32, #tpu.memory_space<vmem>>, vector<8x128xf32>
    tpu.vector_store %arg17[%c0_63, %c0_64], %131 {strides = array<i32>} : memref<8x128xf32, #tpu.memory_space<vmem>>, vector<8x128xf32>,
    return
  }
  func.func @transform_0(%arg0: i32) -> (i32, i32) {
    %c0_i32 = arith.constant 0 : i32
    %c0_i32_0 = arith.constant 0 : i32
    %c0_i32_1 = arith.constant 0 : i32
    return %c0_i32, %c0_i32_0 : i32, i32
  }
  func.func @transform_1(%arg0: i32) -> (i32, i32, i32) {
    %c0_i32 = arith.constant 0 : i32
    %c0_i32_0 = arith.constant 0 : i32
    %c0_i32_1 = arith.constant 0 : i32
    return %c0_i32, %arg0, %c0_i32_0 : i32, i32, i32
  }
  func.func @transform_2(%arg0: i32) -> (i32, i32) {
    %c0_i32 = arith.constant 0 : i32
    %c0_i32_0 = arith.constant 0 : i32
    return %arg0, %c0_i32 : i32, i32
  }
  func.func @transform_3(%arg0: i32) -> (i32, i32, i32) {
    %c0_i32 = arith.constant 0 : i32
    %c0_i32_0 = arith.constant 0 : i32
    %c0_i32_1 = arith.constant 0 : i32
    return %c0_i32, %arg0, %c0_i32_0 : i32, i32, i32
  }
  func.func @transform_4(%arg0: i32) -> (i32, i32) {
    %c0_i32 = arith.constant 0 : i32
    %c0_i32_0 = arith.constant 0 : i32
    return %arg0, %c0_i32 : i32, i32
  }
  func.func @transform_5(%arg0: i32) -> (i32, i32) {
    %c0_i32 = arith.constant 0 : i32
    %c0_i32_0 = arith.constant 0 : i32
    %c0_i32_1 = arith.constant 0 : i32
    return %c0_i32, %c0_i32_0 : i32, i32
  }
  func.func @transform_6(%arg0: i32) -> (i32, i32) {
    %c0_i32 = arith.constant 0 : i32
    %c0_i32_0 = arith.constant 0 : i32
    %c0_i32_1 = arith.constant 0 : i32
    return %c0_i32, %c0_i32_0 : i32, i32
  }
  func.func @transform_7(%arg0: i32) -> (i32, i32) {
    %c0_i32 = arith.constant 0 : i32
    %c0_i32_0 = arith.constant 0 : i32
    %c0_i32_1 = arith.constant 0 : i32
    return %c0_i32, %c0_i32_0 : i32, i32
  }
  func.func @transform_8(%arg0: i32) -> (i32, i32) {
    %c0_i32 = arith.constant 0 : i32
    %c0_i32_0 = arith.constant 0 : i32
    %c0_i32_1 = arith.constant 0 : i32
    return %c0_i32, %c0_i32_0 : i32, i32
  }
  func.func @transform_9(%arg0: i32) -> (i32, i32) {
    %c0_i32 = arith.constant 0 : i32
    %c0_i32_0 = arith.constant 0 : i32
    %c0_i32_1 = arith.constant 0 : i32
    return %c0_i32, %c0_i32_0 : i32, i32
  }
  func.func @transform_10(%arg0: i32) -> (i32, i32) {
    %c0_i32 = arith.constant 0 : i32
    %c0_i32_0 = arith.constant 0 : i32
    %c0_i32_1 = arith.constant 0 : i32
    return %c0_i32, %c0_i32_0 : i32, i32
  }
  func.func @transform_11(%arg0: i32) -> (i32, i32) {
    %c0_i32 = arith.constant 0 : i32
    %c0_i32_0 = arith.constant 0 : i32
    %c0_i32_1 = arith.constant 0 : i32
    return %c0_i32, %c0_i32_0 : i32, i32
  }
  func.func @transform_12(%arg0: i32) -> (i32, i32) {
    %c0_i32 = arith.constant 0 : i32
    %c0_i32_0 = arith.constant 0 : i32
    %c0_i32_1 = arith.constant 0 : i32
    return %c0_i32, %c0_i32_0 : i32, i32
  }
  func.func @transform_13(%arg0: i32) -> (i32, i32) {
    %c0_i32 = arith.constant 0 : i32
    %c0_i32_0 = arith.constant 0 : i32
    %c0_i32_1 = arith.constant 0 : i32
    return %c0_i32, %c0_i32_0 : i32, i32
  }
  func.func @transform_14(%arg0: i32) -> (i32, i32) {
    %c0_i32 = arith.constant 0 : i32
    %c0_i32_0 = arith.constant 0 : i32
    %c0_i32_1 = arith.constant 0 : i32
    return %c0_i32, %c0_i32_0 : i32, i32
  }
  func.func @transform_15(%arg0: i32) -> (i32, i32) {
    %c0_i32 = arith.constant 0 : i32
    %c0_i32_0 = arith.constant 0 : i32
    return %arg0, %c0_i32 : i32, i32
  }
  func.func @transform_16(%arg0: i32) -> (i32, i32) {
    %c0_i32 = arith.constant 0 : i32
    %c0_i32_0 = arith.constant 0 : i32
    return %arg0, %c0_i32 : i32, i32
  }
}

</mosaic_0001>

<bundles_post_ra>
// kernel: tpu_custom_call.1
= control target key start
LH: loop header
LB: loop body
LE: loop exit
PB: predicated region body
PF: predicated region fallthrough
CT: control target
= control target key end

     0   :  { %s11793_s0 = inlined_call_operand.vmem [shape: f32[1,32], index: 0, kind: input, shape index: {}]   ;;  %s11794_s1 = inlined_call_operand.vmem [shape: f32[8,8,32], index: 1, kind: input, shape index: {}]   ;;  %s11795_s2 = inlined_call_operand.vmem [shape: f32[8,8], index: 2, kind: input, shape index: {}]   ;;  %s11796_s3 = inlined_call_operand.vmem [shape: f32[128,8,32], index: 3, kind: input, shape index: {}]   ;;  %s11797_s4 = inlined_call_operand.vmem [shape: f32[8,128], index: 4, kind: input, shape index: {}]   ;;  %s11798_s5 = inlined_call_operand.vmem [shape: f32[32,128], index: 5, kind: input, shape index: {}]   ;;  %s11799_s6 = inlined_call_operand.vmem [shape: f32[32,128], index: 6, kind: input, shape index: {}]   ;;  %s11800_s7 = inlined_call_operand.vmem [shape: f32[1,128], index: 7, kind: input, shape index: {}]   ;;  %s11801_s8 = inlined_call_operand.vmem [shape: f32[32,128], index: 8, kind: input, shape index: {}]   ;;  %s11802_s9 = inlined_call_operand.vmem [shape: f32[32,128], index: 9, kind: input, shape index: {}]   ;;  %s11803_s10 = inlined_call_operand.vmem [shape: f32[1,128], index: 10, kind: input, shape index: {}]   ;;  %s11804_s11 = inlined_call_operand.vmem [shape: f32[32,96], index: 11, kind: input, shape index: {}]   ;;  %s11805_s12 = inlined_call_operand.vmem [shape: f32[32,96], index: 12, kind: input, shape index: {}]   ;;  %s11806_s13 = inlined_call_operand.vmem [shape: f32[1,96], index: 13, kind: input, shape index: {}]   ;;  %s11807_s14 = inlined_call_operand.vmem [shape: f32[1,96], index: 14, kind: input, shape index: {}]   ;;  %s11808_s15 = inlined_call_operand.hbm [shape: f32[8,128], index: 15, kind: output, shape index: {0}]   ;;  %s11809_s16 = inlined_call_operand.hbm [shape: f32[8,128], index: 16, kind: output, shape index: {1}]  }
   0x1   :  { %11964 = sst [smem:[#allocation193_spill]] %s11793_s0 }
   0x2   :  { %22 = vsyncpa [#allocation3], 0  ;;  %v192_v0 = vld [vmem:[%s11798_s5] sm:$0xff]  ;;  %v193_v1 = vld [vmem:[%s11798_s5 + $0x8] sm:$0xff]  ;;  %v11810_v3 = vmov 0.0|0.0   ;;  %vm7731_vm0 = vmmov 0  }
   0x3   :  { %v327_v2 = vld [vmem:[%s11799_s6] sm:$0xff]  ;;  %6960 = vmatprep.subr.bf16.mxu1 %v11810_v3  ;;  %v6952_v4 = vpack.c.bf16 %v193_v1, %v192_v0  ;;  %v328_v5 = vld [vmem:[%s11799_s6 + $0x8] sm:$0xff]  ;;  %v194_v6 = vld [vmem:[%s11798_s5 + $0x10] sm:$0xff]  ;;  %v11812_v8 = vmov 0.0   ;;  %vm196_vm1 = vcmask 261120  }
   0x4   :  { %v195_v7 = vld [vmem:[%s11798_s5 + $0x18] sm:$0xff]  ;;  %6705 = vmatprep.mubr.msk.f32.mxu1 %vm7731_vm0, %v11812_v8  ;;  %v6961_v9 = vpack.c.bf16 %v328_v5, %v327_v2  ;;  %v329_v11 = vld [vmem:[%s11799_s6 + $0x10] sm:$0xff]  ;;  %v7853_v13 = vld [vmem:[%s11794_s1] sm:$0xff] }
   0x5   :  { %v6956_v10 = vpack.c.bf16 %v195_v7, %v194_v6  ;;  %v330_v12 = vld [vmem:[%s11799_s6 + $0x18] sm:$0xff]  ;;  %6953 = vmatprep.subr.bf16.mxu0 %v6952_v4  ;;  %6685 = vmatprep.mubr.msk.f32.mxu0 %vm196_vm1, %v7853_v13 }
   0x6   :  { %6962 = vmatpush3.bf16.msra.mxu1 %v6961_v9  ;;  %6955 = vmatpush3.bf16.msra.mxu0 %v6952_v4  ;;  %v6964_v14 = vpack.c.bf16 %v330_v12, %v329_v11 }
   0x7   :  { %6963 = vmatprep.subr.bf16.mxu1 %v11810_v3  ;;  %6957 = vmatprep.subr.bf16.mxu0 %v6956_v10 }
   0x8   :  { %23 = vsyncpa [#allocation5], 0  ;;  %s11965_s24 = sld [smem:[#allocation193_spill]]  ;;  %v7864_v16 = vld [vmem:[%s11794_s1 + $0x8] sm:$0xff]  ;;  %v7869_v17 = vld [vmem:[%s11794_s1 + $0x10] sm:$0xff]  ;;  %v405_v23 = vlaneseq  ;;  %vm497_vm2 = vcmask 1041409  }
   0x9   :  { %v7879_v18 = vld [vmem:[%s11794_s1 + $0x18] sm:$0xff]  ;;  %v7884_v19 = vld [vmem:[%s11794_s1 + $0x20] sm:$0xff]  ;;  %v7893_v20 = vld [vmem:[%s11794_s1 + $0x28] sm:$0xff]  ;;  %vm499_vm3 = vcmask 1042434   ;;  %vm501_vm4 = vcmask 1043459   ;;  %vm503_vm5 = vcmask 1044484  }
   0xa   :  { %6965 = vmatpush3.bf16.msra.mxu1 %v6964_v14  ;;  %6959 = vmatpush3.bf16.msra.mxu0 %v6956_v10  ;;  %v7898_v21 = vld [vmem:[%s11794_s1 + $0x30] sm:$0xff]  ;;  %v7907_v22 = vld [vmem:[%s11794_s1 + $0x38] sm:$0xff]  ;;  %v7911_v24 = vshrl.u32 %v405_v23, 7  ;;  %v6370_v45 = vld [vmem:[%s11800_s7] ss:$0 sm:$0xff]  ;;  %v464_v62 = vand.u32 127, %v405_v23 }
   0xb   :  { %vm505_vm6 = vcmask 1045509   ;;  %vm507_vm7 = vcmask 1046534   ;;  %vm509_vm8 = vcmask 1047559   ;;  %vm546_vm10 = vcmask 64512   ;;  %s7733_s29 = smov 64   ;;  %s7735_s22 = smov 96  }
   0xc   :  { %v7914_v25 = vsub.s32 0, %v7911_v24  ;;  %v7921_v0 = vsub.s32 %v464_v62, %v7911_v24  ;;  %v124_v62 = vld [vmem:[%s11796_s3 + $0x1f0] sm:$0xff] }
   0xd   :  { %6686 = vmatmul.mubr.msk.f32.vlgmr.msra.gmra.mrb[0].mxu0 %vm196_vm1, %v7864_v16 }
   0xe   :  { %v326_v15 = vld [vmem:[%s11965_s24] sm:$0x1]  ;;  %6688 = vmatprep.mubr.msk.f32.mxu0 %vm196_vm1, %v7869_v17  ;;  %11966 = vst [vmem:[#allocation8_spill] sm:$0xff] %v7914_v25  ;;  %11967 = vst [vmem:[#allocation9_spill] sm:$0xff] %v7921_v0 }
   0xf   :  { %6706 = vmatmul.mubr.msk.f32.vlgmr.msra.gmra.mrb[0].mxu1 %vm196_vm1, %v326_v15 }
  0x11   :  { %6689 = vmatmul.mubr.msk.f32.gmra.mrb[2].mxu0 %vm196_vm1, %v7879_v18 }
  0x12   :  { %6691 = vmatprep.mubr.msk.f32.mxu0 %vm196_vm1, %v7884_v19 }
  0x15   :  { %6692 = vmatmul.mubr.msk.f32.gmra.mrb[4].mxu0 %vm196_vm1, %v7893_v20 }
  0x16   :  { %6694 = vmatprep.mubr.msk.f32.mxu0 %vm196_vm1, %v7898_v21 }
  0x19   :  { %6695 = vmatmul.mubr.msk.f32.gmra.mrb[6].mxu0 %vm196_vm1, %v7907_v22 }
  0xe0   :  { %v6687_v27 = vpop.f32.mrb[0].mxu0 }
  0xe1   :  { %v287_v29 = vpop.f32.mrb[1].mxu0 }
  0xe2   :  { %v400_v26 = vpop.f32.mrb[0].mxu1 }
  0xe3   :  { %v408_v28 = vrot.slane %v400_v26, %v7914_v25  ;;  %v6707_v30 = vpop.f32.mrb[1].mxu1 }
  0xe4   :  { %v6690_v33 = vpop.f32.mrb[2].mxu0 }
  0xe5   :  { %v410_v31 = vadd.f32 %v6687_v27, %v408_v28  ;;  %v409_v32 = vadd.f32 %v408_v28, %v287_v29  ;;  %v412_v34 = vadd.f32 %v6690_v33, %v408_v28  ;;  %v297_v35 = vpop.f32.mrb[3].mxu0 }
  0xe6   :  { %v411_v36 = vadd.f32 %v408_v28, %v297_v35  ;;  %v190_v35 = vld [vmem:[%s11795_s2] sm:$0xff] }
  0xe7   :  { %7010 = vtanh.f32 %v409_v32  ;;  %vm544_vm9 = vcmp.gt.f32.partialorder %v190_v35, 0.5  ;;  %v70_v35 = vld [vmem:[%s11796_s3 + $0x40] sm:$0xff] }
  0xe8   :  { %7012 = vtanh.f32 %v412_v34  ;;  %v6693_v37 = vpop.f32.mrb[4].mxu0 }
  0xe9   :  { %7014 = vtanh.f32 %v410_v31  ;;  %v414_v38 = vadd.f32 %v6693_v37, %v408_v28  ;;  %v307_v39 = vpop.f32.mrb[5].mxu0 }
  0xea   :  { %7016 = vtanh.f32 %v411_v36  ;;  %v413_v40 = vadd.f32 %v408_v28, %v307_v39 }
  0xec   :  { %7018 = vtanh.f32 %v413_v40  ;;  %v6696_v41 = vpop.f32.mrb[6].mxu0 }
  0xed   :  { %7020 = vtanh.f32 %v414_v38  ;;  %v416_v42 = vadd.f32 %v6696_v41, %v408_v28  ;;  %v317_v43 = vpop.f32.mrb[7].mxu0 }
  0xee   :  { %v415_v44 = vadd.f32 %v408_v28, %v317_v43 }
  0xf0   :  { %7022 = vtanh.f32 %v415_v44  ;;  %v670_v44 = vld [vmem:[%s11801_s8] sm:$0xff] }
  0xf1   :  { %v7011_v46 = vpop.eup %7010  ;;  %7024 = vtanh.f32 %v416_v42 }
  0xf2   :  { %v7013_v47 = vpop.eup %7012  ;;  %v431_v48 = vmul.f32 %v7011_v46, %v6370_v45  ;;  %v672_v46 = vld [vmem:[%s11801_s8 + $0x10] sm:$0xff] }
  0xf3   :  { %v7015_v49 = vpop.eup %7014  ;;  %v434_v50 = vmul.f32 %v7013_v47, %v6370_v45 }
  0xf4   :  { %v7017_v51 = vpop.eup %7016  ;;  %439 = vadd.xlane.f32.xlu0 %v431_v48  ;;  %v432_v52 = vmul.f32 %v7015_v49, %v6370_v45  ;;  %v673_v48 = vld [vmem:[%s11801_s8 + $0x18] sm:$0xff]  ;;  %v116_v49 = vld [vmem:[%s11796_s3 + $0x1b0] sm:$0xff] }
  0xf5   :  { %445 = vadd.xlane.f32.xlu1 %v434_v50  ;;  %v433_v54 = vmul.f32 %v7017_v51, %v6370_v45  ;;  %v6970_v50 = vpack.c.bf16 %v673_v48, %v672_v46  ;;  %6797 = vmatprep.mubr.msk.f32.mxu1 %vm196_vm1, %v116_v49  ;;  %v117_v51 = vld [vmem:[%s11796_s3 + $0x1b8] sm:$0xff]  ;;  %v75_v49 = vld [vmem:[%s11796_s3 + $0x68] sm:$0xff] }
  0xf6   :  { %v7019_v53 = vpop.eup %7018  ;;  %v1766_v46 = vld [vmem:[%s11802_s9 + $0x18] sm:$0xff] }
  0xf7   :  { %v7021_v55 = vpop.eup %7020  ;;  %v435_v56 = vmul.f32 %v7019_v53, %v6370_v45  ;;  %v119_v53 = vld [vmem:[%s11796_s3 + $0x1c8] sm:$0xff] }
  0xf8   :  { %441 = vadd.xlane.f32.xlu0 %v432_v52  ;;  %v436_v58 = vmul.f32 %v7021_v55, %v6370_v45  ;;  %v118_v52 = vld [vmem:[%s11796_s3 + $0x1c0] sm:$0xff]  ;;  %v121_v55 = vld [vmem:[%s11796_s3 + $0x1d8] sm:$0xff] }
  0xf9   :  { %443 = vadd.xlane.f32.xlu1 %v433_v54  ;;  %v120_v54 = vld [vmem:[%s11796_s3 + $0x1d0] sm:$0xff] }
  0xfa   :  { %v7023_v57 = vpop.eup %7022 }
  0xfb   :  { %v7025_v59 = vpop.eup %7024  ;;  %v437_v60 = vmul.f32 %v7023_v57, %v6370_v45 }
  0xfc   :  { %447 = vadd.xlane.f32.xlu0 %v435_v56  ;;  %v438_v61 = vmul.f32 %v7025_v59, %v6370_v45  ;;  %v671_v45 = vld [vmem:[%s11801_s8 + $0x8] sm:$0xff] }
  0xfd   :  { %449 = vadd.xlane.f32.xlu1 %v436_v58  ;;  %v6966_v47 = vpack.c.bf16 %v671_v45, %v670_v44  ;;  %v1765_v44 = vld [vmem:[%s11802_s9 + $0x10] sm:$0xff]  ;;  %v141_v45 = vld [vmem:[%s11796_s3 + $0x278] sm:$0xff] }
  0xfe   :  { %v6978_v48 = vpack.c.bf16 %v1766_v46, %v1765_v44  ;;  %v165_v44 = vld [vmem:[%s11796_s3 + $0x338] sm:$0xff]  ;;  %v99_v46 = vld [vmem:[%s11796_s3 + $0x128] sm:$0xff] }
  0xff   :  { %6998 = vmatprep.subr.bf16.mxu1 %v6966_v47  ;;  %6967 = vmatprep.subr.bf16.mxu0 %v6966_v47 }
 0x100   :  { %451 = vadd.xlane.f32.xlu0 %v437_v60  ;;  %7000 = vmatpush3.bf16.msra.mxu1 %v6966_v47  ;;  %v122_v60 = vld [vmem:[%s11796_s3 + $0x1e0] sm:$0xff] }
 0x101   :  { %453 = vadd.xlane.f32.xlu1 %v438_v61  ;;  %6969 = vmatpush3.bf16.msra.mxu0 %v6966_v47  ;;  %v123_v61 = vld [vmem:[%s11796_s3 + $0x1e8] sm:$0xff]  ;;  %v142_v47 = vld [vmem:[%s11796_s3 + $0x280] sm:$0xff] }
 0x102   :  { %6999 = vmatprep.subr.bf16.mxu1 %v6970_v50  ;;  %6971 = vmatprep.subr.bf16.mxu0 %v6970_v50 }
 0x104   :  { %7001 = vmatpush3.bf16.msra.mxu1 %v6970_v50 }
 0x105   :  { %6973 = vmatpush3.bf16.msra.mxu0 %v6970_v50  ;;  %v76_v50 = vld [vmem:[%s11796_s3 + $0x70] sm:$0xff] }
 0x106   :  { %6974 = vmatprep.subr.bf16.mxu0 %v11810_v3 }
 0x107   :  { %6798 = vmatmul.mubr.msk.f32.vlgmr.msra.gmra.mrb[2].mxu1 %vm196_vm1, %v117_v51  ;;  %v143_v51 = vld [vmem:[%s11796_s3 + $0x288] sm:$0xff] }
 0x108   :  { %6800 = vmatprep.mubr.msk.f32.mxu1 %vm196_vm1, %v118_v52  ;;  %v144_v52 = vld [vmem:[%s11796_s3 + $0x290] sm:$0xff] }
 0x10b   :  { %6801 = vmatmul.mubr.msk.f32.gmra.mrb[4].mxu1 %vm196_vm1, %v119_v53  ;;  %v77_v53 = vld [vmem:[%s11796_s3 + $0x78] sm:$0xff] }
 0x10c   :  { %6803 = vmatprep.mubr.msk.f32.mxu1 %vm196_vm1, %v120_v54  ;;  %v78_v54 = vld [vmem:[%s11796_s3 + $0x80] sm:$0xff] }
 0x10f   :  { %6804 = vmatmul.mubr.msk.f32.gmra.mrb[6].mxu1 %vm196_vm1, %v121_v55  ;;  %v145_v55 = vld [vmem:[%s11796_s3 + $0x298] sm:$0xff] }
 0x110   :  { %6806 = vmatprep.mubr.msk.f32.mxu1 %vm196_vm1, %v122_v60  ;;  %v148_v60 = vld [vmem:[%s11796_s3 + $0x2b0] sm:$0xff] }
 0x113   :  { %6807 = vmatmul.mubr.msk.f32.gmra.mrb[8].mxu1 %vm196_vm1, %v123_v61  ;;  %v81_v61 = vld [vmem:[%s11796_s3 + $0x98] sm:$0xff] }
 0x114   :  { %6809 = vmatprep.mubr.msk.f32.mxu1 %vm196_vm1, %v124_v62  ;;  %v82_v62 = vld [vmem:[%s11796_s3 + $0xa0] sm:$0xff] }
 0x181   :  { %v440_v63 = vpop.xlane.xlu0 %439 }
 0x182   :  { %v446_v1 = vpop.xlane.xlu1 %445  ;;  %v468_v4 = vrot.slane %v440_v63, %v7921_v0  ;;  %v125_v63 = vld [vmem:[%s11796_s3 + $0x1f8] sm:$0xff] }
 0x183   :  { %v480_v9 = vrot.slane %v446_v1, %v7921_v0  ;;  %v126_v1 = vld [vmem:[%s11796_s3 + $0x200] sm:$0xff]  ;;  %6810 = vmatmul.mubr.msk.f32.gmra.mrb[10].mxu1 %vm196_vm1, %v125_v63  ;;  %v149_v63 = vld [vmem:[%s11796_s3 + $0x2b8] sm:$0xff] }
 0x184   :  { %6812 = vmatprep.mubr.msk.f32.mxu1 %vm196_vm1, %v126_v1  ;;  %v150_v1 = vld [vmem:[%s11796_s3 + $0x2c0] sm:$0xff] }
 0x185   :  { %v442_v2 = vpop.xlane.xlu0 %441 }
 0x186   :  { %v472_v5 = vrot.slane %v442_v2, %v7921_v0  ;;  %v444_v6 = vpop.xlane.xlu1 %443  ;;  %v127_v2 = vld [vmem:[%s11796_s3 + $0x208] sm:$0xff] }
 0x187   :  { %v476_v7 = vrot.slane %v444_v6, %v7921_v0  ;;  %6813 = vmatmul.mubr.msk.f32.gmra.mrb[12].mxu1 %vm196_vm1, %v127_v2  ;;  %v130_v6 = vld [vmem:[%s11796_s3 + $0x220] sm:$0xff]  ;;  %v83_v2 = vld [vmem:[%s11796_s3 + $0xa8] sm:$0xff] }
 0x188   :  { %v498_v10 = vsel %vm497_vm2, %v472_v5, %v468_v4  ;;  %v128_v4 = vld [vmem:[%s11796_s3 + $0x210] sm:$0xff]  ;;  %v129_v5 = vld [vmem:[%s11796_s3 + $0x218] sm:$0xff] }
 0x189   :  { %v500_v11 = vsel %vm499_vm3, %v476_v7, %v498_v10  ;;  %v448_v12 = vpop.xlane.xlu0 %447  ;;  %6815 = vmatprep.mubr.msk.f32.mxu1 %vm196_vm1, %v128_v4  ;;  %v62_v7 = vld [vmem:[%s11796_s3] sm:$0xff]  ;;  %v132_v10 = vld [vmem:[%s11796_s3 + $0x230] sm:$0xff] }
 0x18a   :  { %v502_v14 = vsel %vm501_vm4, %v480_v9, %v500_v11  ;;  %v484_v15 = vrot.slane %v448_v12, %v7921_v0  ;;  %v450_v23 = vpop.xlane.xlu1 %449  ;;  %v131_v9 = vld [vmem:[%s11796_s3 + $0x228] sm:$0xff]  ;;  %6716 = vmatprep.mubr.msk.f32.mxu0 %vm196_vm1, %v62_v7  ;;  %v1763_v12 = vld [vmem:[%s11802_s9] sm:$0xff]  ;;  %v84_v4 = vld [vmem:[%s11796_s3 + $0xb0] sm:$0xff] }
 0x18b   :  { %v488_v26 = vrot.slane %v450_v23, %v7921_v0  ;;  %6816 = vmatmul.mubr.msk.f32.gmra.mrb[14].mxu1 %vm196_vm1, %v129_v5  ;;  %v63_v11 = vld [vmem:[%s11796_s3 + $0x8] sm:$0xff]  ;;  %v85_v7 = vld [vmem:[%s11796_s3 + $0xb8] sm:$0xff] }
 0x18c   :  { %v504_v27 = vsel %vm503_vm5, %v484_v15, %v502_v14  ;;  %6818 = vmatprep.mubr.msk.f32.mxu1 %vm196_vm1, %v130_v6  ;;  %6717 = vmatmul.mubr.msk.f32.vlgmr.msra.gmra.mrb[8].mxu0 %vm196_vm1, %v63_v11  ;;  %v1764_v14 = vld [vmem:[%s11802_s9 + $0x8] sm:$0xff]  ;;  %v64_v15 = vld [vmem:[%s11796_s3 + $0x10] sm:$0xff]  ;;  %v154_v11 = vld [vmem:[%s11796_s3 + $0x2e0] sm:$0xff] }
 0x18d   :  { %v452_v28 = vpop.xlane.xlu0 %451  ;;  %v506_v29 = vsel %vm505_vm6, %v488_v26, %v504_v27  ;;  %v6975_v23 = vpack.c.bf16 %v1764_v14, %v1763_v12  ;;  %6719 = vmatprep.mubr.msk.f32.mxu0 %vm196_vm1, %v64_v15  ;;  %v65_v26 = vld [vmem:[%s11796_s3 + $0x18] sm:$0xff]  ;;  %v66_v27 = vld [vmem:[%s11796_s3 + $0x20] sm:$0xff]  ;;  %v151_v5 = vld [vmem:[%s11796_s3 + $0x2c8] sm:$0xff] }
 0x18e   :  { %v492_v30 = vrot.slane %v452_v28, %v7921_v0  ;;  %v454_v31 = vpop.xlane.xlu1 %453  ;;  %v133_v28 = vld [vmem:[%s11796_s3 + $0x238] sm:$0xff]  ;;  %v152_v6 = vld [vmem:[%s11796_s3 + $0x2d0] sm:$0xff]  ;;  %v87_v12 = vld [vmem:[%s11796_s3 + $0xc8] sm:$0xff] }
 0x18f   :  { %v496_v32 = vrot.slane %v454_v31, %v7921_v0  ;;  %6819 = vmatmul.mubr.msk.f32.gmra.mrb[16].mxu1 %vm196_vm1, %v131_v9  ;;  %6976 = vmatpush3.bf16.msra.mxu0 %v6975_v23  ;;  %v68_v31 = vld [vmem:[%s11796_s3 + $0x30] sm:$0xff]  ;;  %v86_v9 = vld [vmem:[%s11796_s3 + $0xc0] sm:$0xff]  ;;  %v155_v15 = vld [vmem:[%s11796_s3 + $0x2e8] sm:$0xff] }
 0x190   :  { %v508_v33 = vsel %vm507_vm7, %v492_v30, %v506_v29  ;;  %6821 = vmatprep.mubr.msk.f32.mxu1 %vm196_vm1, %v132_v10  ;;  %v134_v29 = vld [vmem:[%s11796_s3 + $0x240] sm:$0xff]  ;;  %6720 = vmatmul.mubr.msk.f32.gmra.mrb[10].mxu0 %vm196_vm1, %v65_v26  ;;  %v67_v30 = vld [vmem:[%s11796_s3 + $0x28] sm:$0xff]  ;;  %v153_v10 = vld [vmem:[%s11796_s3 + $0x2d8] sm:$0xff] }
 0x191   :  { %v510_v34 = vsel %vm509_vm8, %v496_v32, %v508_v33  ;;  %6977 = vmatprep.subr.bf16.mxu0 %v11810_v3  ;;  %6722 = vmatprep.mubr.msk.f32.mxu0 %vm196_vm1, %v66_v27  ;;  %v135_v32 = vld [vmem:[%s11796_s3 + $0x248] sm:$0xff]  ;;  %v136_v33 = vld [vmem:[%s11796_s3 + $0x250] sm:$0xff]  ;;  %v89_v26 = vld [vmem:[%s11796_s3 + $0xd8] sm:$0xff] }
 0x192   :  { %512 = vxpose.xlu0.b32.start.end [1/1] (short) (narrow) %v510_v34, 8  ;;  %v69_v34 = vld [vmem:[%s11796_s3 + $0x38] sm:$0xff]  ;;  %v88_v14 = vld [vmem:[%s11796_s3 + $0xd0] sm:$0xff]  ;;  %v90_v27 = vld [vmem:[%s11796_s3 + $0xe0] sm:$0xff] }
 0x193   :  { %6822 = vmatmul.mubr.msk.f32.gmra.mrb[18].mxu1 %vm196_vm1, %v133_v28  ;;  %6979 = vmatpush3.bf16.msra.mxu0 %v6978_v48  ;;  %v156_v23 = vld [vmem:[%s11796_s3 + $0x2f0] sm:$0xff]  ;;  %v157_v28 = vld [vmem:[%s11796_s3 + $0x2f8] sm:$0xff]  ;;  %v167_v48 = vld [vmem:[%s11796_s3 + $0x348] sm:$0xff] }
 0x194   :  { %6824 = vmatprep.mubr.msk.f32.mxu1 %vm196_vm1, %v134_v29  ;;  %6723 = vmatmul.mubr.msk.f32.gmra.mrb[12].mxu0 %vm196_vm1, %v67_v30  ;;  %v158_v29 = vld [vmem:[%s11796_s3 + $0x300] sm:$0xff]  ;;  %v91_v30 = vld [vmem:[%s11796_s3 + $0xe8] sm:$0xff] }
 0x195   :  { %6725 = vmatprep.mubr.msk.f32.mxu0 %vm196_vm1, %v68_v31  ;;  %6980 = vmatprep.subr.bf16.mxu0 %v11810_v3  ;;  %v92_v31 = vld [vmem:[%s11796_s3 + $0xf0] sm:$0xff] }
 0x197   :  { %6825 = vmatmul.mubr.msk.f32.gmra.mrb[20].mxu1 %vm196_vm1, %v135_v32  ;;  %v159_v32 = vld [vmem:[%s11796_s3 + $0x308] sm:$0xff] }
 0x198   :  { %6827 = vmatprep.mubr.msk.f32.mxu1 %vm196_vm1, %v136_v33  ;;  %6726 = vmatmul.mubr.msk.f32.gmra.mrb[14].mxu0 %vm196_vm1, %v69_v34  ;;  %v160_v33 = vld [vmem:[%s11796_s3 + $0x310] sm:$0xff]  ;;  %v93_v34 = vld [vmem:[%s11796_s3 + $0xf8] sm:$0xff] }
 0x199   :  { %6728 = vmatprep.mubr.msk.f32.mxu0 %vm196_vm1, %v70_v35  ;;  %v94_v35 = vld [vmem:[%s11796_s3 + $0x100] sm:$0xff] }
 0x212   :  { %v528_v36 = vpop.trf.xlu0 }
 0x213   :  { %v545_v37 = vsel %vm544_vm9, %v528_v36, -1e+30  ;;  %v137_v36 = vld [vmem:[%s11796_s3 + $0x258] sm:$0xff] }
 0x214   :  { %v547_v38 = vsel %vm546_vm10, %v545_v37, -inf  ;;  %6828 = vmatmul.mubr.msk.f32.gmra.mrb[22].mxu1 %vm196_vm1, %v137_v36  ;;  %v161_v36 = vld [vmem:[%s11796_s3 + $0x318] sm:$0xff] }
 0x215   :  { %548 = vmax.xlane.f32.xlu1 %v547_v38  ;;  %v71_v38 = vld [vmem:[%s11796_s3 + $0x48] sm:$0xff] }
 0x216   :  { %6729 = vmatmul.mubr.msk.f32.gmra.mrb[16].mxu0 %vm196_vm1, %v71_v38  ;;  %v95_v38 = vld [vmem:[%s11796_s3 + $0x108] sm:$0xff] }
 0x2a2   :  { %v549_v39 = vpop.xlane.xlu1 %548 }
 0x2a3   :  { %v550_v40 = vsub.f32 %v545_v37, %v549_v39  ;;  %v138_v37 = vld [vmem:[%s11796_s3 + $0x260] sm:$0xff]  ;;  %v72_v39 = vld [vmem:[%s11796_s3 + $0x50] sm:$0xff] }
 0x2a4   :  { %6830 = vmatprep.mubr.msk.f32.mxu1 %vm196_vm1, %v138_v37  ;;  %6731 = vmatprep.mubr.msk.f32.mxu0 %vm196_vm1, %v72_v39  ;;  %v162_v37 = vld [vmem:[%s11796_s3 + $0x320] sm:$0xff]  ;;  %v96_v39 = vld [vmem:[%s11796_s3 + $0x110] sm:$0xff] }
 0x2a5   :  { %v551_v41 = vmul.f32 1.442695, %v550_v40  ;;  %v139_v40 = vld [vmem:[%s11796_s3 + $0x268] sm:$0xff] }
 0x2a6   :  { %6831 = vmatmul.mubr.msk.f32.gmra.mrb[24].mxu1 %vm196_vm1, %v139_v40  ;;  %v163_v40 = vld [vmem:[%s11796_s3 + $0x328] sm:$0xff] }
 0x2a7   :  { %7026 = vpow2.f32 %v551_v41  ;;  %v140_v41 = vld [vmem:[%s11796_s3 + $0x270] sm:$0xff] }
 0x2a8   :  { %6833 = vmatprep.mubr.msk.f32.mxu1 %vm196_vm1, %v140_v41  ;;  %v164_v41 = vld [vmem:[%s11796_s3 + $0x330] sm:$0xff] }
 0x2aa   :  { %6834 = vmatmul.mubr.msk.f32.gmra.mrb[26].mxu1 %vm196_vm1, %v141_v45  ;;  %v166_v45 = vld [vmem:[%s11796_s3 + $0x340] sm:$0xff] }
 0x2ab   :  { %6836 = vmatprep.mubr.msk.f32.mxu1 %vm196_vm1, %v142_v47  ;;  %v100_v47 = vld [vmem:[%s11796_s3 + $0x130] sm:$0xff] }
 0x2ae   :  { %6837 = vmatmul.mubr.msk.f32.gmra.mrb[28].mxu1 %vm196_vm1, %v143_v51  ;;  %v102_v51 = vld [vmem:[%s11796_s3 + $0x140] sm:$0xff] }
 0x2af   :  { %6839 = vmatprep.mubr.msk.f32.mxu1 %vm196_vm1, %v144_v52  ;;  %v169_v52 = vld [vmem:[%s11796_s3 + $0x358] sm:$0xff] }
 0x2b1   :  { %v7027_v42 = vpop.eup %7026 }
 0x2b2   :  { %v553_v43 = vsel %vm546_vm10, %v7027_v42, 0.0  ;;  %6840 = vmatmul.mubr.msk.f32.gmra.mrb[30].mxu1 %vm196_vm1, %v145_v55  ;;  %v104_v55 = vld [vmem:[%s11796_s3 + $0x150] sm:$0xff] }
 0x2b3   :  { %554 = vadd.xlane.f32.xlu1 %v553_v43  ;;  %v74_v43 = vld [vmem:[%s11796_s3 + $0x60] sm:$0xff] }
 0x340   :  { %v555_v56 = vpop.xlane.xlu1 %554 }
 0x341   :  { %v556_v57 = vmax.f32 %v555_v56, 1e-30  ;;  %v146_v56 = vld [vmem:[%s11796_s3 + $0x2a0] sm:$0xff] }
 0x342   :  { %6842 = vmatprep.mubr.msk.f32.mxu1 %vm196_vm1, %v146_v56  ;;  %v171_v56 = vld [vmem:[%s11796_s3 + $0x368] sm:$0xff] }
 0x343   :  { %7028 = vrcp.f32 %v556_v57  ;;  %v79_v57 = vld [vmem:[%s11796_s3 + $0x88] sm:$0xff] }
 0x34d   :  { %v7029_v58 = vpop.eup %7028 }
 0x34e   :  { %v558_v59 = vmul.f32 %v7029_v58, %v7027_v42  ;;  %v73_v42 = vld [vmem:[%s11796_s3 + $0x58] sm:$0xff]  ;;  %v80_v58 = vld [vmem:[%s11796_s3 + $0x90] sm:$0xff] }
 0x34f   :  { %6732 = vmatmul.mubr.msk.f32.gmra.mrb[18].mxu0 %vm196_vm1, %v73_v42  ;;  %v97_v42 = vld [vmem:[%s11796_s3 + $0x118] sm:$0xff] }
 0x350   :  { %559 = vxpose.xlu1.b32.start.end [1/1] (short) (narrow) %v558_v59, 8  ;;  %6734 = vmatprep.mubr.msk.f32.mxu0 %vm196_vm1, %v74_v43  ;;  %v147_v59 = vld [vmem:[%s11796_s3 + $0x2a8] sm:$0xff]  ;;  %v98_v43 = vld [vmem:[%s11796_s3 + $0x120] sm:$0xff] }
 0x351   :  { %6843 = vmatmul.mubr.msk.f32.gmra.mrb[32].mxu1 %vm196_vm1, %v147_v59  ;;  %v106_v59 = vld [vmem:[%s11796_s3 + $0x160] sm:$0xff] }
 0x352   :  { %6845 = vmatprep.mubr.msk.f32.mxu1 %vm196_vm1, %v148_v60  ;;  %v173_v60 = vld [vmem:[%s11796_s3 + $0x378] sm:$0xff] }
 0x353   :  { %6735 = vmatmul.mubr.msk.f32.gmra.mrb[20].mxu0 %vm196_vm1, %v75_v49  ;;  %v168_v49 = vld [vmem:[%s11796_s3 + $0x350] sm:$0xff] }
 0x354   :  { %6737 = vmatprep.mubr.msk.f32.mxu0 %vm196_vm1, %v76_v50  ;;  %v101_v50 = vld [vmem:[%s11796_s3 + $0x138] sm:$0xff] }
 0x355   :  { %6846 = vmatmul.mubr.msk.f32.gmra.mrb[34].mxu1 %vm196_vm1, %v149_v63  ;;  %v175_v63 = vld [vmem:[%s11796_s3 + $0x388] sm:$0xff] }
 0x356   :  { %6848 = vmatprep.mubr.msk.f32.mxu1 %vm196_vm1, %v150_v1  ;;  %v176_v1 = vld [vmem:[%s11796_s3 + $0x390] sm:$0xff] }
 0x357   :  { %6738 = vmatmul.mubr.msk.f32.gmra.mrb[22].mxu0 %vm196_vm1, %v77_v53  ;;  %v170_v53 = vld [vmem:[%s11796_s3 + $0x360] sm:$0xff] }
 0x358   :  { %6740 = vmatprep.mubr.msk.f32.mxu0 %vm196_vm1, %v78_v54  ;;  %v103_v54 = vld [vmem:[%s11796_s3 + $0x148] sm:$0xff] }
 0x359   :  { %6849 = vmatmul.mubr.msk.f32.gmra.mrb[36].mxu1 %vm196_vm1, %v151_v5  ;;  %v179_v5 = vld [vmem:[%s11796_s3 + $0x3a8] sm:$0xff] }
 0x35a   :  { %6851 = vmatprep.mubr.msk.f32.mxu1 %vm196_vm1, %v152_v6  ;;  %v108_v6 = vld [vmem:[%s11796_s3 + $0x170] sm:$0xff] }
 0x35b   :  { %6741 = vmatmul.mubr.msk.f32.gmra.mrb[24].mxu0 %vm196_vm1, %v79_v57  ;;  %v172_v57 = vld [vmem:[%s11796_s3 + $0x370] sm:$0xff] }
 0x35c   :  { %6743 = vmatprep.mubr.msk.f32.mxu0 %vm196_vm1, %v80_v58  ;;  %v105_v58 = vld [vmem:[%s11796_s3 + $0x158] sm:$0xff] }
 0x35d   :  { %6852 = vmatmul.mubr.msk.f32.gmra.mrb[38].mxu1 %vm196_vm1, %v153_v10  ;;  %v181_v10 = vld [vmem:[%s11796_s3 + $0x3b8] sm:$0xff] }
 0x35e   :  { %6854 = vmatprep.mubr.msk.f32.mxu1 %vm196_vm1, %v154_v11  ;;  %v110_v11 = vld [vmem:[%s11796_s3 + $0x180] sm:$0xff] }
 0x35f   :  { %6744 = vmatmul.mubr.msk.f32.gmra.mrb[26].mxu0 %vm196_vm1, %v81_v61  ;;  %v174_v61 = vld [vmem:[%s11796_s3 + $0x380] sm:$0xff] }
 0x360   :  { %6746 = vmatprep.mubr.msk.f32.mxu0 %vm196_vm1, %v82_v62  ;;  %v107_v62 = vld [vmem:[%s11796_s3 + $0x168] sm:$0xff] }
 0x361   :  { %6855 = vmatmul.mubr.msk.f32.gmra.mrb[40].mxu1 %vm196_vm1, %v155_v15  ;;  %v111_v15 = vld [vmem:[%s11796_s3 + $0x188] sm:$0xff] }
 0x362   :  { %6857 = vmatprep.mubr.msk.f32.mxu1 %vm196_vm1, %v156_v23  ;;  %v183_v23 = vld [vmem:[%s11796_s3 + $0x3c8] sm:$0xff] }
 0x363   :  { %6747 = vmatmul.mubr.msk.f32.gmra.mrb[28].mxu0 %vm196_vm1, %v83_v2  ;;  %v177_v2 = vld [vmem:[%s11796_s3 + $0x398] sm:$0xff] }
 0x364   :  { %6749 = vmatprep.mubr.msk.f32.mxu0 %vm196_vm1, %v84_v4  ;;  %v178_v4 = vld [vmem:[%s11796_s3 + $0x3a0] sm:$0xff] }
 0x365   :  { %6858 = vmatmul.mubr.msk.f32.gmra.mrb[42].mxu1 %vm196_vm1, %v157_v28  ;;  %v184_v28 = vld [vmem:[%s11796_s3 + $0x3d0] sm:$0xff] }
 0x366   :  { %6860 = vmatprep.mubr.msk.f32.mxu1 %vm196_vm1, %v158_v29 }
 0x367   :  { %6750 = vmatmul.mubr.msk.f32.gmra.mrb[30].mxu0 %vm196_vm1, %v85_v7  ;;  %v180_v7 = vld [vmem:[%s11796_s3 + $0x3b0] sm:$0xff] }
 0x368   :  { %6752 = vmatprep.mubr.msk.f32.mxu0 %vm196_vm1, %v86_v9  ;;  %v109_v9 = vld [vmem:[%s11796_s3 + $0x178] sm:$0xff] }
 0x369   :  { %6861 = vmatmul.mubr.msk.f32.gmra.mrb[44].mxu1 %vm196_vm1, %v159_v32  ;;  %v8455_v32 = vsub.s32 2, %v7911_v24 }
 0x36a   :  { %6863 = vmatprep.mubr.msk.f32.mxu1 %vm196_vm1, %v160_v33  ;;  %v113_v33 = vld [vmem:[%s11796_s3 + $0x198] sm:$0xff] }
 0x36b   :  { %6753 = vmatmul.mubr.msk.f32.gmra.mrb[32].mxu0 %vm196_vm1, %v87_v12  ;;  %v182_v12 = vld [vmem:[%s11796_s3 + $0x3c0] sm:$0xff]  ;;  %11970 = vst [vmem:[#allocation12_spill] sm:$0xff] %v8455_v32 }
 0x36c   :  { %6755 = vmatprep.mubr.msk.f32.mxu0 %vm196_vm1, %v88_v14  ;;  %v8431_v14 = vsub.s32 1, %v7911_v24 }
 0x36d   :  { %6864 = vmatmul.mubr.msk.f32.gmra.mrb[46].mxu1 %vm196_vm1, %v161_v36  ;;  %v186_v36 = vld [vmem:[%s11796_s3 + $0x3e0] sm:$0xff] }
 0x36e   :  { %6866 = vmatprep.mubr.msk.f32.mxu1 %vm196_vm1, %v162_v37  ;;  %11968 = vst [vmem:[#allocation10_spill] sm:$0xff] %v8431_v14 }
 0x36f   :  { %6756 = vmatmul.mubr.msk.f32.gmra.mrb[34].mxu0 %vm196_vm1, %v89_v26 }
 0x370   :  { %6758 = vmatprep.mubr.msk.f32.mxu0 %vm196_vm1, %v90_v27  ;;  %v112_v27 = vld [vmem:[%s11796_s3 + $0x190] sm:$0xff] }
 0x371   :  { %6867 = vmatmul.mubr.msk.f32.gmra.mrb[48].mxu1 %vm196_vm1, %v163_v40  ;;  %v8479_v40 = vsub.s32 4, %v7911_v24 }
 0x372   :  { %6869 = vmatprep.mubr.msk.f32.mxu1 %vm196_vm1, %v164_v41  ;;  %v115_v41 = vld [vmem:[%s11796_s3 + $0x1a8] sm:$0xff] }
 0x373   :  { %6759 = vmatmul.mubr.msk.f32.gmra.mrb[36].mxu0 %vm196_vm1, %v91_v30  ;;  %11972 = vst [vmem:[#allocation14_spill] sm:$0xff] %v8479_v40 }
 0x374   :  { %6761 = vmatprep.mubr.msk.f32.mxu0 %vm196_vm1, %v92_v31  ;;  %v8452_v31 = vsub.s32 3, %v7911_v24 }
 0x375   :  { %6870 = vmatmul.mubr.msk.f32.gmra.mrb[50].mxu1 %vm196_vm1, %v165_v44 }
 0x376   :  { %6872 = vmatprep.mubr.msk.f32.mxu1 %vm196_vm1, %v166_v45  ;;  %11969 = vst [vmem:[#allocation11_spill] sm:$0xff] %v8452_v31 }
 0x377   :  { %6762 = vmatmul.mubr.msk.f32.gmra.mrb[38].mxu0 %vm196_vm1, %v93_v34  ;;  %v185_v34 = vld [vmem:[%s11796_s3 + $0x3d8] sm:$0xff] }
 0x378   :  { %6764 = vmatprep.mubr.msk.f32.mxu0 %vm196_vm1, %v94_v35  ;;  %v114_v35 = vld [vmem:[%s11796_s3 + $0x1a0] sm:$0xff] }
 0x379   :  { %6873 = vmatmul.mubr.msk.f32.gmra.mrb[52].mxu1 %vm196_vm1, %v167_v48  ;;  %v189_v48 = vld [vmem:[%s11796_s3 + $0x3f8] sm:$0xff] }
 0x37a   :  { %6875 = vmatprep.mubr.msk.f32.mxu1 %vm196_vm1, %v168_v49  ;;  %v8508_v49 = vpop.f32.mrb[2].mxu1 }
 0x37b   :  { %6765 = vmatmul.mubr.msk.f32.gmra.mrb[40].mxu0 %vm196_vm1, %v95_v38  ;;  %11975 = vst [vmem:[#allocation17_spill] sm:$0xff] %v8508_v49 }
 0x37c   :  { %6767 = vmatprep.mubr.msk.f32.mxu0 %vm196_vm1, %v96_v39  ;;  %v8476_v39 = vsub.s32 5, %v7911_v24 }
 0x37d   :  { %6876 = vmatmul.mubr.msk.f32.gmra.mrb[54].mxu1 %vm196_vm1, %v169_v52 }
 0x37e   :  { %6878 = vmatprep.mubr.msk.f32.mxu1 %vm196_vm1, %v170_v53  ;;  %11971 = vst [vmem:[#allocation13_spill] sm:$0xff] %v8476_v39 }
 0x37f   :  { %6768 = vmatmul.mubr.msk.f32.gmra.mrb[42].mxu0 %vm196_vm1, %v97_v42  ;;  %v187_v42 = vld [vmem:[%s11796_s3 + $0x3e8] sm:$0xff] }
 0x380   :  { %6770 = vmatprep.mubr.msk.f32.mxu0 %vm196_vm1, %v98_v43  ;;  %v188_v43 = vld [vmem:[%s11796_s3 + $0x3f0] sm:$0xff] }
 0x381   :  { %6879 = vmatmul.mubr.msk.f32.gmra.mrb[56].mxu1 %vm196_vm1, %v171_v56 }
 0x382   :  { %6881 = vmatprep.mubr.msk.f32.mxu1 %vm196_vm1, %v172_v57 }
 0x383   :  { %6771 = vmatmul.mubr.msk.f32.gmra.mrb[44].mxu0 %vm196_vm1, %v99_v46  ;;  %v8497_v46 = vsub.s32 7, %v7911_v24 }
 0x384   :  { %6773 = vmatprep.mubr.msk.f32.mxu0 %vm196_vm1, %v100_v47  ;;  %v8500_v47 = vsub.s32 6, %v7911_v24 }
 0x385   :  { %6882 = vmatmul.mubr.msk.f32.gmra.mrb[58].mxu1 %vm196_vm1, %v173_v60  ;;  %11973 = vst [vmem:[#allocation15_spill] sm:$0xff] %v8497_v46 }
 0x386   :  { %6884 = vmatprep.mubr.msk.f32.mxu1 %vm196_vm1, %v174_v61  ;;  %11974 = vst [vmem:[#allocation16_spill] sm:$0xff] %v8500_v47 }
 0x387   :  { %6774 = vmatmul.mubr.msk.f32.gmra.mrb[46].mxu0 %vm196_vm1, %v101_v50  ;;  %v8510_v50 = vpop.f32.mrb[3].mxu1 }
 0x388   :  { %6776 = vmatprep.mubr.msk.f32.mxu0 %vm196_vm1, %v102_v51  ;;  %11976 = vst [vmem:[#allocation18_spill] sm:$0xff] %v8510_v50  ;;  %v8512_v51 = vpop.f32.mrb[4].mxu1 }
 0x389   :  { %6885 = vmatmul.mubr.msk.f32.gmra.mrb[60].mxu1 %vm196_vm1, %v175_v63  ;;  %11977 = vst [vmem:[#allocation19_spill] sm:$0xff] %v8512_v51  ;;  %v8515_v24 = vpop.f32.mrb[5].mxu1 }
 0x38a   :  { %6887 = vmatprep.mubr.msk.f32.mxu1 %vm196_vm1, %v176_v1  ;;  %11978 = vst [vmem:[#allocation20_spill] sm:$0xff] %v8515_v24  ;;  %v8539_v1 = vpop.f32.mrb[8].mxu0 }
 0x38b   :  { %6777 = vmatmul.mubr.msk.f32.gmra.mrb[48].mxu0 %vm196_vm1, %v103_v54  ;;  %v8519_v54 = vpop.f32.mrb[6].mxu1  ;;  %11989 = vst [vmem:[#allocation31_spill] sm:$0xff] %v8539_v1 }
 0x38c   :  { %6779 = vmatprep.mubr.msk.f32.mxu0 %vm196_vm1, %v104_v55  ;;  %11979 = vst [vmem:[#allocation21_spill] sm:$0xff] %v8519_v54  ;;  %v8521_v55 = vpop.f32.mrb[7].mxu1 }
 0x38d   :  { %6888 = vmatmul.mubr.msk.f32.gmra.mrb[62].mxu1 %vm196_vm1, %v177_v2  ;;  %11980 = vst [vmem:[#allocation22_spill] sm:$0xff] %v8521_v55  ;;  %v8523_v56 = vpop.f32.mrb[8].mxu1  ;;  %v8541_v2 = vpop.f32.mrb[9].mxu0 }
 0x38e   :  { %6890 = vmatprep.mubr.msk.f32.mxu1 %vm196_vm1, %v178_v4  ;;  %11981 = vst [vmem:[#allocation23_spill] sm:$0xff] %v8523_v56  ;;  %v8525_v57 = vpop.f32.mrb[9].mxu1  ;;  %11990 = vst [vmem:[#allocation32_spill] sm:$0xff] %v8541_v2 }
 0x38f   :  { %6780 = vmatmul.mubr.msk.f32.gmra.mrb[50].mxu0 %vm196_vm1, %v105_v58  ;;  %11982 = vst [vmem:[#allocation24_spill] sm:$0xff] %v8525_v57  ;;  %v8527_v58 = vpop.f32.mrb[10].mxu1 }
 0x390   :  { %6782 = vmatprep.mubr.msk.f32.mxu0 %vm196_vm1, %v106_v59  ;;  %11983 = vst [vmem:[#allocation25_spill] sm:$0xff] %v8527_v58  ;;  %v8529_v59 = vpop.f32.mrb[11].mxu1 }
 0x391   :  { %6891 = vmatmul.mubr.msk.f32.gmra.mrb[64].mxu1 %vm196_vm1, %v179_v5  ;;  %11984 = vst [vmem:[#allocation26_spill] sm:$0xff] %v8529_v59  ;;  %v8531_v60 = vpop.f32.mrb[12].mxu1 }
 0x392   :  { %6893 = vmatprep.mubr.msk.f32.mxu1 %vm196_vm1, %v180_v7  ;;  %11985 = vst [vmem:[#allocation27_spill] sm:$0xff] %v8531_v60  ;;  %v8533_v61 = vpop.f32.mrb[13].mxu1 }
 0x393   :  { %6783 = vmatmul.mubr.msk.f32.gmra.mrb[52].mxu0 %vm196_vm1, %v107_v62  ;;  %11986 = vst [vmem:[#allocation28_spill] sm:$0xff] %v8533_v61  ;;  %v8535_v62 = vpop.f32.mrb[14].mxu1 }
 0x394   :  { %6785 = vmatprep.mubr.msk.f32.mxu0 %vm196_vm1, %v108_v6  ;;  %11987 = vst [vmem:[#allocation29_spill] sm:$0xff] %v8535_v62  ;;  %v8537_v63 = vpop.f32.mrb[15].mxu1  ;;  %v8547_v6 = vpop.f32.mrb[10].mxu0 }
 0x395   :  { %6894 = vmatmul.mubr.msk.f32.gmra.mrb[66].mxu1 %vm196_vm1, %v181_v10  ;;  %11988 = vst [vmem:[#allocation30_spill] sm:$0xff] %v8537_v63  ;;  %v8543_v4 = vpop.f32.mrb[16].mxu1  ;;  %11993 = vst [vmem:[#allocation35_spill] sm:$0xff] %v8547_v6  ;;  %v8549_v7 = vpop.f32.mrb[11].mxu0 }
 0x396   :  { %6896 = vmatprep.mubr.msk.f32.mxu1 %vm196_vm1, %v182_v12  ;;  %11991 = vst [vmem:[#allocation33_spill] sm:$0xff] %v8543_v4  ;;  %v8545_v5 = vpop.f32.mrb[17].mxu1  ;;  %11994 = vst [vmem:[#allocation36_spill] sm:$0xff] %v8549_v7 }
 0x397   :  { %6786 = vmatmul.mubr.msk.f32.gmra.mrb[54].mxu0 %vm196_vm1, %v109_v9  ;;  %11992 = vst [vmem:[#allocation34_spill] sm:$0xff] %v8545_v5  ;;  %v8551_v9 = vpop.f32.mrb[18].mxu1 }
 0x398   :  { %6788 = vmatprep.mubr.msk.f32.mxu0 %vm196_vm1, %v110_v11  ;;  %11995 = vst [vmem:[#allocation37_spill] sm:$0xff] %v8551_v9  ;;  %v8553_v10 = vpop.f32.mrb[19].mxu1  ;;  %v8555_v11 = vpop.f32.mrb[12].mxu0 }
 0x399   :  { %6897 = vmatmul.mubr.msk.f32.gmra.mrb[68].mxu1 %vm196_vm1, %v183_v23  ;;  %11996 = vst [vmem:[#allocation38_spill] sm:$0xff] %v8553_v10  ;;  %11997 = vst [vmem:[#allocation39_spill] sm:$0xff] %v8555_v11  ;;  %v8557_v12 = vpop.f32.mrb[13].mxu0 }
 0x39a   :  { %6899 = vmatprep.mubr.msk.f32.mxu1 %vm196_vm1, %v184_v28  ;;  %11998 = vst [vmem:[#allocation40_spill] sm:$0xff] %v8557_v12 }
 0x39b   :  { %6789 = vmatmul.mubr.msk.f32.gmra.mrb[56].mxu0 %vm196_vm1, %v111_v15  ;;  %v8559_v15 = vpop.f32.mrb[20].mxu1 }
 0x39c   :  { %6791 = vmatprep.mubr.msk.f32.mxu0 %vm196_vm1, %v112_v27  ;;  %11999 = vst [vmem:[#allocation41_spill] sm:$0xff] %v8559_v15  ;;  %v8561_v23 = vpop.f32.mrb[21].mxu1 }
 0x39d   :  { %6900 = vmatmul.mubr.msk.f32.gmra.mrb[70].mxu1 %vm196_vm1, %v185_v34  ;;  %12000 = vst [vmem:[#allocation42_spill] sm:$0xff] %v8561_v23  ;;  %v8567_v28 = vpop.f32.mrb[22].mxu1 }
 0x39e   :  { %6902 = vmatprep.mubr.msk.f32.mxu1 %vm196_vm1, %v186_v36  ;;  %12003 = vst [vmem:[#allocation45_spill] sm:$0xff] %v8567_v28 }
 0x39f   :  { %6792 = vmatmul.mubr.msk.f32.gmra.mrb[58].mxu0 %vm196_vm1, %v113_v33 }
 0x3a0   :  { %6794 = vmatprep.mubr.msk.f32.mxu0 %vm196_vm1, %v114_v35 }
 0x3a1   :  { %6903 = vmatmul.mubr.msk.f32.gmra.mrb[72].mxu1 %vm196_vm1, %v187_v42 }
 0x3a2   :  { %6905 = vmatprep.mubr.msk.f32.mxu1 %vm196_vm1, %v188_v43 }
 0x3a3   :  { %6795 = vmatmul.mubr.msk.f32.gmra.mrb[60].mxu0 %vm196_vm1, %v115_v41 }
 0x3a4   :  { %6916 = vmatprep.mubr.msk.f32.mxu0 %vm7731_vm0, %v11812_v8 }
 0x3a5   :  { %6906 = vmatmul.mubr.msk.f32.gmra.mrb[74].mxu1 %vm196_vm1, %v189_v48 }
 0x3d0   :  { %v575_v26 = vpop.trf.xlu1 }
 0x3d1   :  { %v601_v29 = vrot.slane %v575_v26, %v8431_v14  ;;  %v594_v30 = vrot.slane %v575_v26, %v7914_v25  ;;  %v615_v37 = vrot.slane %v575_v26, %v8452_v31  ;;  %v608_v38 = vrot.slane %v575_v26, %v8455_v32 }
 0x3d2   :  { %v629_v44 = vrot.slane %v575_v26, %v8476_v39  ;;  %v622_v45 = vrot.slane %v575_v26, %v8479_v40  ;;  %v643_v52 = vrot.slane %v575_v26, %v8497_v46  ;;  %v636_v53 = vrot.slane %v575_v26, %v8500_v47  ;;  %v8563_v26 = vpop.f32.mrb[14].mxu0 }
 0x3d3   :  { %603 = vbcast.lane.b32.xlu1 %v601_v29, 256  ;;  %596 = vbcast.lane.b32.xlu0 %v594_v30, 256  ;;  %12001 = vst [vmem:[#allocation43_spill] sm:$0xff] %v8563_v26  ;;  %v8565_v27 = vpop.f32.mrb[15].mxu0  ;;  %v8569_v29 = vpop.f32.mrb[23].mxu1 }
 0x3d4   :  { %12002 = vst [vmem:[#allocation44_spill] sm:$0xff] %v8565_v27  ;;  %12004 = vst [vmem:[#allocation46_spill] sm:$0xff] %v8569_v29  ;;  %v8573_v36 = vpop.f32.mrb[16].mxu0 }
 0x3d5   :  { %12005 = vst [vmem:[#allocation47_spill] sm:$0xff] %v8573_v36 }
 0x3d7   :  { %617 = vbcast.lane.b32.xlu1 %v615_v37, 256  ;;  %610 = vbcast.lane.b32.xlu0 %v608_v38, 256  ;;  %v8575_v37 = vpop.f32.mrb[17].mxu0  ;;  %v8577_v38 = vpop.f32.mrb[24].mxu1 }
 0x3d8   :  { %12006 = vst [vmem:[#allocation48_spill] sm:$0xff] %v8575_v37  ;;  %12007 = vst [vmem:[#allocation49_spill] sm:$0xff] %v8577_v38  ;;  %v8581_v43 = vpop.f32.mrb[25].mxu1 }
 0x3d9   :  { %12008 = vst [vmem:[#allocation50_spill] sm:$0xff] %v8581_v43 }
 0x3db   :  { %631 = vbcast.lane.b32.xlu1 %v629_v44, 256  ;;  %624 = vbcast.lane.b32.xlu0 %v622_v45, 256 }
 0x3df   :  { %645 = vbcast.lane.b32.xlu1 %v643_v52, 256  ;;  %638 = vbcast.lane.b32.xlu0 %v636_v53, 256 }
 0x422   :  { %v8585_v52 = vpop.f32.mrb[18].mxu0 }
 0x423   :  { %12009 = vst [vmem:[#allocation51_spill] sm:$0xff] %v8585_v52  ;;  %v8587_v53 = vpop.f32.mrb[19].mxu0 }
 0x424   :  { %12010 = vst [vmem:[#allocation52_spill] sm:$0xff] %v8587_v53 }
 0x445   :  { %v604_v30 = vpop.permute.xlu1 %603  ;;  %v597_v33 = vpop.permute.xlu0 %596 }
 0x446   :  { %v648_v34 = vmul.f32 %v604_v30, %v7864_v16  ;;  %v647_v35 = vmul.f32 %v597_v33, %v7853_v13  ;;  %v8589_v30 = vpop.f32.mrb[26].mxu1 }
 0x447   :  { %12011 = vst [vmem:[#allocation53_spill] sm:$0xff] %v8589_v30 }
 0x448   :  { %v656_v41 = vsel %vm196_vm1, %v648_v34, 0.0  ;;  %v655_v42 = vsel %vm196_vm1, %v647_v35, 0.0  ;;  %v8592_v34 = vpop.f32.mrb[27].mxu1 }
 0x449   :  { %v618_v44 = vpop.permute.xlu1 %617  ;;  %v611_v45 = vpop.permute.xlu0 %610  ;;  %v657_v13 = vadd.f32 %v656_v41, %v655_v42  ;;  %12012 = vst [vmem:[#allocation54_spill] sm:$0xff] %v8592_v34 }
 0x44a   :  { %v650_v48 = vmul.f32 %v618_v44, %v7879_v18  ;;  %v649_v16 = vmul.f32 %v611_v45, %v7869_v17  ;;  %v8597_v44 = vpop.f32.mrb[20].mxu0  ;;  %v8601_v45 = vpop.f32.mrb[28].mxu1 }
 0x44b   :  { %12013 = vst [vmem:[#allocation55_spill] sm:$0xff] %v8597_v44  ;;  %v8599_v42 = vpop.f32.mrb[21].mxu0  ;;  %12015 = vst [vmem:[#allocation57_spill] sm:$0xff] %v8601_v45  ;;  %v8604_v47 = vpop.f32.mrb[29].mxu1 }
 0x44c   :  { %v658_v33 = vsel %vm196_vm1, %v649_v16, 0.0  ;;  %v660_v46 = vsel %vm196_vm1, %v650_v48, 0.0  ;;  %12014 = vst [vmem:[#allocation56_spill] sm:$0xff] %v8599_v42  ;;  %12016 = vst [vmem:[#allocation58_spill] sm:$0xff] %v8604_v47 }
 0x44d   :  { %v659_v35 = vadd.f32 %v658_v33, %v657_v13  ;;  %v632_v3 = vpop.permute.xlu1 %631  ;;  %v625_v8 = vpop.permute.xlu0 %624 }
 0x44e   :  { %v652_v18 = vmul.f32 %v632_v3, %v7893_v20  ;;  %v651_v17 = vmul.f32 %v625_v8, %v7884_v19  ;;  %v8609_v19 = vpop.f32.mrb[22].mxu0 }
 0x44f   :  { %v661_v41 = vadd.f32 %v660_v46, %v659_v35  ;;  %12017 = vst [vmem:[#allocation59_spill] sm:$0xff] %v8609_v19  ;;  %v8611_v46 = vpop.f32.mrb[23].mxu0  ;;  %v8613_v35 = vpop.f32.mrb[30].mxu1 }
 0x450   :  { %v662_v16 = vsel %vm196_vm1, %v651_v17, 0.0  ;;  %v664_v48 = vsel %vm196_vm1, %v652_v18, 0.0  ;;  %12018 = vst [vmem:[#allocation60_spill] sm:$0xff] %v8611_v46  ;;  %12019 = vst [vmem:[#allocation61_spill] sm:$0xff] %v8613_v35  ;;  %v8616_v40 = vpop.f32.mrb[31].mxu1 }
 0x451   :  { %v663_v13 = vadd.f32 %v662_v16, %v661_v41  ;;  %v646_v33 = vpop.permute.xlu1 %645  ;;  %v639_v39 = vpop.permute.xlu0 %638  ;;  %12020 = vst [vmem:[#allocation62_spill] sm:$0xff] %v8616_v40 }
 0x452   :  { %v654_v3 = vmul.f32 %v646_v33, %v7907_v22  ;;  %v653_v8 = vmul.f32 %v639_v39, %v7898_v21  ;;  %v8618_v16 = vpop.f32.mrb[24].mxu0  ;;  %v8625_v21 = vpop.f32.mrb[32].mxu1 }
 0x453   :  { %v665_v20 = vadd.f32 %v664_v48, %v663_v13  ;;  %12021 = vst [vmem:[#allocation63_spill] sm:$0xff] %v8618_v16  ;;  %v8621_v31 = vpop.f32.mrb[25].mxu0  ;;  %12024 = vst [vmem:[#allocation66_spill] sm:$0xff] %v8625_v21  ;;  %v8627_v39 = vpop.f32.mrb[33].mxu1  ;;  %v12028_v48 = vmov 0.0  }
 0x454   :  { %v666_v17 = vsel %vm196_vm1, %v653_v8, 0.0  ;;  %v668_v18 = vsel %vm196_vm1, %v654_v3, 0.0  ;;  %12022 = vst [vmem:[#allocation64_spill] sm:$0xff] %v8621_v31  ;;  %12025 = vst [vmem:[#allocation67_spill] sm:$0xff] %v8627_v39  ;;  %v8631_v13 = vpop.f32.mrb[26].mxu0  ;;  %v8637_v8 = vpop.f32.mrb[34].mxu1 }
 0x455   :  { %v667_v41 = vadd.f32 %v666_v17, %v665_v20  ;;  %12026 = vst [vmem:[#allocation68_spill] sm:$0xff] %v8631_v13  ;;  %v8633_v33 = vpop.f32.mrb[27].mxu0  ;;  %12029 = vst [vmem:[#allocation70_spill] sm:$0xff] %v8637_v8  ;;  %v8639_v3 = vpop.f32.mrb[35].mxu1 }
 0x456   :  { %12027 = vst [vmem:[#allocation69_spill] sm:$0xff] %v8633_v33  ;;  %12030 = vst [vmem:[#allocation71_spill] sm:$0xff] %v8639_v3  ;;  %v8641_v20 = vpop.f32.mrb[28].mxu0 }
 0x457   :  { %v8623_v22 = vadd.f32 %v668_v18, %v667_v41  ;;  %12031 = vst [vmem:[#allocation72_spill] sm:$0xff] %v8641_v20  ;;  %v8643_v17 = vpop.f32.mrb[29].mxu0  ;;  %v8645_v41 = vpop.f32.mrb[36].mxu1 }
 0x458   :  { %12032 = vst [vmem:[#allocation73_spill] sm:$0xff] %v8643_v17  ;;  %12033 = vst [vmem:[#allocation74_spill] sm:$0xff] %v8645_v41  ;;  %v8647_v18 = vpop.f32.mrb[37].mxu1 }
 0x459   :  { %12023 = vst [vmem:[#allocation65_spill] sm:$0xff] %v8623_v22  ;;  %6917 = vmatmul.mubr.msk.f32.vlgmr.msra.gmra.mrb[62].mxu0 %vm196_vm1, %v8623_v22  ;;  %12034 = vst [vmem:[#allocation75_spill] sm:$0xff] %v8647_v18  ;;  %v8649_v22 = vpop.f32.mrb[30].mxu0  ;;  %v8653_v25 = vpop.f32.mrb[38].mxu1 }
 0x45a   :  { %6927 = vmatprep.mubr.msk.f32.mxu0 %vm7731_vm0, %v12028_v48  ;;  %12035 = vst [vmem:[#allocation76_spill] sm:$0xff] %v8649_v22  ;;  %v8651_v32 = vpop.f32.mrb[31].mxu0  ;;  %12037 = vst [vmem:[#allocation78_spill] sm:$0xff] %v8653_v25  ;;  %v8655_v14 = vpop.f32.mrb[39].mxu1 }
 0x45b   :  { %12036 = vst [vmem:[#allocation77_spill] sm:$0xff] %v8651_v32  ;;  %12038 = vst [vmem:[#allocation79_spill] sm:$0xff] %v8655_v14  ;;  %v8657_v48 = vpop.f32.mrb[32].mxu0  ;;  %v8661_v3 = vpop.f32.mrb[40].mxu1 }
 0x45c   :  { %12039 = vst [vmem:[#allocation80_spill] sm:$0xff] %v8657_v48  ;;  %v8659_v0 = vpop.f32.mrb[33].mxu0  ;;  %12041 = vst [vmem:[#allocation82_spill] sm:$0xff] %v8661_v3  ;;  %v8663_v8 = vpop.f32.mrb[41].mxu1 }
 0x45d   :  { %12040 = vst [vmem:[#allocation81_spill] sm:$0xff] %v8659_v0  ;;  %12042 = vst [vmem:[#allocation83_spill] sm:$0xff] %v8663_v8  ;;  %v8665_v21 = vpop.f32.mrb[34].mxu0  ;;  %v8669_v18 = vpop.f32.mrb[42].mxu1 }
 0x45e   :  { %12043 = vst [vmem:[#allocation84_spill] sm:$0xff] %v8665_v21  ;;  %v8667_v34 = vpop.f32.mrb[35].mxu0  ;;  %12045 = vst [vmem:[#allocation86_spill] sm:$0xff] %v8669_v18  ;;  %v8671_v30 = vpop.f32.mrb[43].mxu1 }
 0x45f   :  { %12044 = vst [vmem:[#allocation85_spill] sm:$0xff] %v8667_v34  ;;  %12046 = vst [vmem:[#allocation87_spill] sm:$0xff] %v8671_v30  ;;  %v8673_v38 = vpop.f32.mrb[36].mxu0  ;;  %v8677_v14 = vpop.f32.mrb[44].mxu1 }
 0x460   :  { %12047 = vst [vmem:[#allocation88_spill] sm:$0xff] %v8673_v38  ;;  %v8675_v25 = vpop.f32.mrb[37].mxu0  ;;  %12049 = vst [vmem:[#allocation90_spill] sm:$0xff] %v8677_v14  ;;  %v8679_v39 = vpop.f32.mrb[45].mxu1 }
 0x461   :  { %12048 = vst [vmem:[#allocation89_spill] sm:$0xff] %v8675_v25  ;;  %12050 = vst [vmem:[#allocation91_spill] sm:$0xff] %v8679_v39  ;;  %v8681_v40 = vpop.f32.mrb[38].mxu0  ;;  %v8685_v8 = vpop.f32.mrb[46].mxu1 }
 0x462   :  { %12051 = vst [vmem:[#allocation92_spill] sm:$0xff] %v8681_v40  ;;  %v8683_v3 = vpop.f32.mrb[39].mxu0  ;;  %12053 = vst [vmem:[#allocation94_spill] sm:$0xff] %v8685_v8  ;;  %v8687_v41 = vpop.f32.mrb[47].mxu1 }
 0x463   :  { %12052 = vst [vmem:[#allocation93_spill] sm:$0xff] %v8683_v3  ;;  %12054 = vst [vmem:[#allocation95_spill] sm:$0xff] %v8687_v41  ;;  %v8689_v10 = vpop.f32.mrb[40].mxu0  ;;  %v8693_v30 = vpop.f32.mrb[48].mxu1 }
 0x464   :  { %12055 = vst [vmem:[#allocation96_spill] sm:$0xff] %v8689_v10  ;;  %v8691_v18 = vpop.f32.mrb[41].mxu0  ;;  %12057 = vst [vmem:[#allocation98_spill] sm:$0xff] %v8693_v30  ;;  %v8695_v35 = vpop.f32.mrb[49].mxu1 }
 0x465   :  { %12056 = vst [vmem:[#allocation97_spill] sm:$0xff] %v8691_v18  ;;  %12058 = vst [vmem:[#allocation99_spill] sm:$0xff] %v8695_v35  ;;  %v8697_v47 = vpop.f32.mrb[42].mxu0  ;;  %v8701_v39 = vpop.f32.mrb[50].mxu1 }
 0x466   :  { %12059 = vst [vmem:[#allocation100_spill] sm:$0xff] %v8697_v47  ;;  %v8699_v14 = vpop.f32.mrb[43].mxu0  ;;  %12061 = vst [vmem:[#allocation102_spill] sm:$0xff] %v8701_v39  ;;  %v8703_v9 = vpop.f32.mrb[51].mxu1 }
 0x467   :  { %12060 = vst [vmem:[#allocation101_spill] sm:$0xff] %v8699_v14  ;;  %12062 = vst [vmem:[#allocation103_spill] sm:$0xff] %v8703_v9  ;;  %v8705_v4 = vpop.f32.mrb[44].mxu0  ;;  %v8709_v41 = vpop.f32.mrb[52].mxu1 }
 0x468   :  { %12063 = vst [vmem:[#allocation104_spill] sm:$0xff] %v8705_v4  ;;  %v8707_v8 = vpop.f32.mrb[45].mxu0  ;;  %12065 = vst [vmem:[#allocation106_spill] sm:$0xff] %v8709_v41  ;;  %v8711_v43 = vpop.f32.mrb[53].mxu1 }
 0x469   :  { %12064 = vst [vmem:[#allocation105_spill] sm:$0xff] %v8707_v8  ;;  %12066 = vst [vmem:[#allocation107_spill] sm:$0xff] %v8711_v43  ;;  %v8713_v29 = vpop.f32.mrb[46].mxu0  ;;  %v8717_v35 = vpop.f32.mrb[54].mxu1 }
 0x46a   :  { %12067 = vst [vmem:[#allocation108_spill] sm:$0xff] %v8713_v29  ;;  %v8715_v30 = vpop.f32.mrb[47].mxu0  ;;  %12069 = vst [vmem:[#allocation110_spill] sm:$0xff] %v8717_v35  ;;  %v8719_v45 = vpop.f32.mrb[55].mxu1 }
 0x46b   :  { %12068 = vst [vmem:[#allocation109_spill] sm:$0xff] %v8715_v30  ;;  %12070 = vst [vmem:[#allocation111_spill] sm:$0xff] %v8719_v45  ;;  %v8721_v59 = vpop.f32.mrb[48].mxu0  ;;  %v8725_v9 = vpop.f32.mrb[56].mxu1 }
 0x46c   :  { %12071 = vst [vmem:[#allocation112_spill] sm:$0xff] %v8721_v59  ;;  %v8723_v39 = vpop.f32.mrb[49].mxu0  ;;  %12073 = vst [vmem:[#allocation114_spill] sm:$0xff] %v8725_v9  ;;  %v8727_v28 = vpop.f32.mrb[57].mxu1 }
 0x46d   :  { %12072 = vst [vmem:[#allocation113_spill] sm:$0xff] %v8723_v39  ;;  %12074 = vst [vmem:[#allocation115_spill] sm:$0xff] %v8727_v28  ;;  %v8729_v23 = vpop.f32.mrb[50].mxu0  ;;  %v8733_v43 = vpop.f32.mrb[58].mxu1 }
 0x46e   :  { %12075 = vst [vmem:[#allocation116_spill] sm:$0xff] %v8729_v23  ;;  %v8731_v41 = vpop.f32.mrb[51].mxu0  ;;  %12077 = vst [vmem:[#allocation118_spill] sm:$0xff] %v8733_v43  ;;  %v8735_v58 = vpop.f32.mrb[59].mxu1 }
 0x46f   :  { %12076 = vst [vmem:[#allocation117_spill] sm:$0xff] %v8731_v41  ;;  %12078 = vst [vmem:[#allocation119_spill] sm:$0xff] %v8735_v58  ;;  %v8737_v56 = vpop.f32.mrb[52].mxu0  ;;  %v8741_v45 = vpop.f32.mrb[60].mxu1 }
 0x470   :  { %12079 = vst [vmem:[#allocation120_spill] sm:$0xff] %v8737_v56  ;;  %v8739_v35 = vpop.f32.mrb[53].mxu0  ;;  %12081 = vst [vmem:[#allocation122_spill] sm:$0xff] %v8741_v45  ;;  %v8743_v5 = vpop.f32.mrb[61].mxu1 }
 0x471   :  { %12080 = vst [vmem:[#allocation121_spill] sm:$0xff] %v8739_v35  ;;  %12082 = vst [vmem:[#allocation123_spill] sm:$0xff] %v8743_v5  ;;  %v8745_v63 = vpop.f32.mrb[62].mxu1  ;;  %v8753_v50 = vpop.f32.mrb[54].mxu0 }
 0x472   :  { %12083 = vst [vmem:[#allocation124_spill] sm:$0xff] %v8745_v63  ;;  %v8747_v9 = vpop.f32.mrb[63].mxu1  ;;  %12087 = vst [vmem:[#allocation128_spill] sm:$0xff] %v8753_v50  ;;  %v8757_v58 = vpop.f32.mrb[55].mxu0 }
 0x473   :  { %12084 = vst [vmem:[#allocation125_spill] sm:$0xff] %v8747_v9  ;;  %v8749_v28 = vpop.f32.mrb[64].mxu1  ;;  %12089 = vst [vmem:[#allocation130_spill] sm:$0xff] %v8757_v58  ;;  %v8761_v61 = vpop.f32.mrb[56].mxu0 }
 0x474   :  { %12085 = vst [vmem:[#allocation126_spill] sm:$0xff] %v8749_v28  ;;  %v8751_v15 = vpop.f32.mrb[65].mxu1  ;;  %12091 = vst [vmem:[#allocation132_spill] sm:$0xff] %v8761_v61  ;;  %v8765_v5 = vpop.f32.mrb[57].mxu0 }
 0x475   :  { %12086 = vst [vmem:[#allocation127_spill] sm:$0xff] %v8751_v15  ;;  %v8755_v43 = vpop.f32.mrb[66].mxu1  ;;  %12093 = vst [vmem:[#allocation134_spill] sm:$0xff] %v8765_v5  ;;  %v8769_v9 = vpop.f32.mrb[58].mxu0 }
 0x476   :  { %12088 = vst [vmem:[#allocation129_spill] sm:$0xff] %v8755_v43  ;;  %v8759_v62 = vpop.f32.mrb[67].mxu1  ;;  %12095 = vst [vmem:[#allocation136_spill] sm:$0xff] %v8769_v9  ;;  %v8773_v15 = vpop.f32.mrb[59].mxu0 }
 0x477   :  { %12090 = vst [vmem:[#allocation131_spill] sm:$0xff] %v8759_v62  ;;  %v8763_v45 = vpop.f32.mrb[68].mxu1  ;;  %12097 = vst [vmem:[#allocation138_spill] sm:$0xff] %v8773_v15  ;;  %v8777_v43 = vpop.f32.mrb[60].mxu0 }
 0x478   :  { %12092 = vst [vmem:[#allocation133_spill] sm:$0xff] %v8763_v45  ;;  %v8767_v63 = vpop.f32.mrb[69].mxu1  ;;  %12099 = vst [vmem:[#allocation140_spill] sm:$0xff] %v8777_v43  ;;  %v8781_v62 = vpop.f32.mrb[61].mxu0 }
 0x479   :  { %12094 = vst [vmem:[#allocation135_spill] sm:$0xff] %v8767_v63  ;;  %v8771_v28 = vpop.f32.mrb[70].mxu1  ;;  %12101 = vst [vmem:[#allocation142_spill] sm:$0xff] %v8781_v62 }
 0x47a   :  { %12096 = vst [vmem:[#allocation137_spill] sm:$0xff] %v8771_v28  ;;  %v8775_v49 = vpop.f32.mrb[71].mxu1 }
 0x47b   :  { %12098 = vst [vmem:[#allocation139_spill] sm:$0xff] %v8775_v49  ;;  %v8779_v57 = vpop.f32.mrb[72].mxu1 }
 0x47c   :  { %12100 = vst [vmem:[#allocation141_spill] sm:$0xff] %v8779_v57  ;;  %v8783_v55 = vpop.f32.mrb[73].mxu1 }
 0x47d   :  { %12102 = vst [vmem:[#allocation143_spill] sm:$0xff] %v8783_v55  ;;  %v8785_v45 = vpop.f32.mrb[74].mxu1 }
 0x47e   :  { %12103 = vst [vmem:[#allocation144_spill] sm:$0xff] %v8785_v45  ;;  %v8787_v60 = vpop.f32.mrb[75].mxu1 }
 0x47f   :  { %12104 = vst [vmem:[#allocation145_spill] sm:$0xff] %v8787_v60 }
 0x52c   :  { %v8789_v63 = vpop.f32.mrb[62].mxu0 }
 0x52d   :  { %v6918_v58 = vpop.f32.mrb[63].mxu0  ;;  %v1842_v28 = vadd.f32 %v8539_v1, %v8789_v63  ;;  %v1841_v49 = vadd.f32 %v8789_v63, %v8541_v2  ;;  %v1850_v57 = vadd.f32 %v8573_v36, %v8789_v63  ;;  %v1843_v43 = vadd.f32 %v8789_v63, %v8549_v7 }
 0x52e   :  { %v1851_v45 = vadd.f32 %v8789_v63, %v8587_v53  ;;  %v1844_v60 = vadd.f32 %v8547_v6, %v8789_v63  ;;  %v1852_v58 = vadd.f32 %v8585_v52, %v8789_v63  ;;  %v1849_v1 = vadd.f32 %v8789_v63, %v8575_v37 }
 0x52f   :  { %7030 = vtanh.f32 %v1842_v28  ;;  %v1858_v2 = vadd.f32 %v8618_v16, %v8789_v63  ;;  %v1845_v36 = vadd.f32 %v8789_v63, %v8557_v12  ;;  %v8813_v7 = vadd.f32 %v8789_v63, %v8599_v42 }
 0x530   :  { %7032 = vtanh.f32 %v1841_v49  ;;  %v8817_v53 = vadd.f32 %v8555_v11, %v8789_v63  ;;  %v8821_v52 = vadd.f32 %v8563_v26, %v8789_v63  ;;  %v8825_v28 = vadd.f32 %v8789_v63, %v8621_v31 }
 0x531   :  { %7034 = vtanh.f32 %v1850_v57  ;;  %v8829_v16 = vadd.f32 %v8631_v13, %v8789_v63  ;;  %v8833_v49 = vadd.f32 %v8789_v63, %v8565_v27  ;;  %v8837_v42 = vadd.f32 %v8657_v48, %v8789_v63  ;;  %v12111_v27 = vld [vmem:[#allocation28_spill] sm:$0xff] }
 0x532   :  { %7036 = vtanh.f32 %v1843_v43  ;;  %v8841_v26 = vadd.f32 %v8789_v63, %v8633_v33  ;;  %v8845_v57 = vadd.f32 %v8789_v63, %v8643_v17  ;;  %v8849_v13 = vadd.f32 %v8597_v44, %v8789_v63 }
 0x533   :  { %v8853_v31 = vadd.f32 %v8609_v19, %v8789_v63  ;;  %v8857_v48 = vadd.f32 %v8789_v63, %v8659_v0  ;;  %v8861_v43 = vadd.f32 %v8665_v21, %v8789_v63  ;;  %v8865_v17 = vadd.f32 %v8789_v63, %v8611_v46 }
 0x534   :  { %v8869_v33 = vadd.f32 %v8689_v10, %v8789_v63  ;;  %v8873_v19 = vadd.f32 %v8789_v63, %v8667_v34  ;;  %7038 = vtanh.f32 %v1851_v45  ;;  %v8877_v0 = vadd.f32 %v8789_v63, %v8675_v25  ;;  %v8902_v34 = vld [vmem:[%s11803_s10] ss:$0 sm:$0xff] }
 0x535   :  { %v8881_v21 = vadd.f32 %v8641_v20, %v8789_v63  ;;  %v8885_v44 = vadd.f32 %v8649_v22, %v8789_v63  ;;  %7040 = vtanh.f32 %v1844_v60  ;;  %v8889_v10 = vadd.f32 %v8789_v63, %v8691_v18 }
 0x536   :  { %v8893_v45 = vadd.f32 %v8697_v47, %v8789_v63  ;;  %v8897_v25 = vadd.f32 %v8789_v63, %v8651_v32  ;;  %v8906_v60 = vadd.f32 %v8721_v59, %v8789_v63  ;;  %v8910_v18 = vadd.f32 %v8789_v63, %v8699_v14 }
 0x537   :  { %v8914_v47 = vadd.f32 %v8789_v63, %v8707_v8  ;;  %v8918_v22 = vadd.f32 %v8673_v38, %v8789_v63  ;;  %v8922_v20 = vadd.f32 %v8681_v40, %v8789_v63  ;;  %v8926_v59 = vadd.f32 %v8789_v63, %v8723_v39 }
 0x538   :  { %7042 = vtanh.f32 %v1852_v58  ;;  %v8930_v14 = vadd.f32 %v8729_v23, %v8789_v63  ;;  %v8934_v8 = vadd.f32 %v8789_v63, %v8683_v3  ;;  %v8938_v38 = vadd.f32 %v8761_v61, %v8789_v63 }
 0x539   :  { %v7031_v32 = vpop.eup %7030  ;;  %7044 = vtanh.f32 %v1849_v1  ;;  %v8943_v39 = vadd.f32 %v8789_v63, %v8731_v41  ;;  %v8947_v58 = vadd.f32 %v8789_v63, %v8739_v35  ;;  %v8952_v37 = vadd.f32 %v8705_v4, %v8789_v63 }
 0x53a   :  { %v7033_v40 = vpop.eup %7032  ;;  %v2104_v46 = vmul.f32 %v7031_v32, %v8902_v34  ;;  %v8956_v61 = vadd.f32 %v8713_v29, %v8789_v63  ;;  %v8960_v1 = vadd.f32 %v8789_v63, %v8765_v5  ;;  %v8964_v35 = vadd.f32 %v8769_v9, %v8789_v63 }
 0x53b   :  { %v7035_v23 = vpop.eup %7034  ;;  %v2103_v3 = vmul.f32 %v7033_v40, %v8902_v34  ;;  %7046 = vtanh.f32 %v1858_v2  ;;  %v8968_v40 = vadd.f32 %v8789_v63, %v8715_v30  ;;  %v8972_v41 = vadd.f32 %v8512_v51, %v8789_v63  ;;  %v12109_v30 = vld [vmem:[#allocation140_spill] sm:$0xff] }
 0x53c   :  { %v7037_v32 = vpop.eup %7036  ;;  %2233 = vadd.xlane.f32.xlu1 %v2104_v46  ;;  %v2112_v46 = vmul.f32 %v7035_v23, %v8902_v34  ;;  %7048 = vtanh.f32 %v1845_v36  ;;  %v8977_v5 = vadd.f32 %v8789_v63, %v8773_v15  ;;  %v8981_v9 = vadd.f32 %v8789_v63, %v8781_v62 }
 0x53d   :  { %2231 = vadd.xlane.f32.xlu0 %v2103_v3  ;;  %v2105_v3 = vmul.f32 %v7037_v32, %v8902_v34  ;;  %v8986_v29 = vadd.f32 %v8737_v56, %v8789_v63  ;;  %v8990_v51 = vadd.f32 %v8753_v50, %v8789_v63  ;;  %v8994_v36 = vadd.f32 %v8789_v63, %v8515_v24  ;;  %v12105_v32 = vld [vmem:[#allocation130_spill] sm:$0xff]  ;;  %v12106_v50 = vld [vmem:[#allocation27_spill] sm:$0xff] }
 0x53e   :  { %v7039_v2 = vpop.eup %7038  ;;  %v8998_v62 = vadd.f32 %v8519_v54, %v8789_v63  ;;  %7050 = vtanh.f32 %v8813_v7  ;;  %v9003_v15 = vadd.f32 %v8789_v63, %v12105_v32  ;;  %v9007_v56 = vadd.f32 %v12106_v50, %v8789_v63  ;;  %v12107_v24 = vld [vmem:[#allocation22_spill] sm:$0xff]  ;;  %v12108_v54 = vld [vmem:[#allocation24_spill] sm:$0xff]  ;;  %v12110_v50 = vld [vmem:[#allocation17_spill] sm:$0xff] }
 0x53f   :  { %v7041_v23 = vpop.eup %7040  ;;  %7052 = vtanh.f32 %v8817_v53  ;;  %v9013_v4 = vadd.f32 %v8789_v63, %v12107_v24  ;;  %v9022_v11 = vadd.f32 %v12109_v30, %v8789_v63  ;;  %v9030_v24 = vadd.f32 %v8789_v63, %v12111_v27  ;;  %v12119_v27 = vld [vmem:[#allocation30_spill] sm:$0xff] }
 0x540   :  { %2249 = vadd.xlane.f32.xlu1 %v2112_v46  ;;  %v2113_v46 = vmul.f32 %v7039_v2, %v8902_v34  ;;  %v2106_v32 = vmul.f32 %v7041_v23, %v8902_v34  ;;  %v9026_v2 = vadd.f32 %v12110_v50, %v8789_v63  ;;  %7054 = vtanh.f32 %v8821_v52  ;;  %v12115_v23 = vld [vmem:[#allocation18_spill] sm:$0xff]  ;;  %v12117_v50 = vld [vmem:[#allocation41_spill] sm:$0xff] }
 0x541   :  { %2235 = vadd.xlane.f32.xlu0 %v2105_v3  ;;  %v9017_v3 = vadd.f32 %v8789_v63, %v12108_v54  ;;  %12112 = vst [vmem:[#allocation146_spill] sm:$0xff] %v9030_v24  ;;  %v12113_v54 = vld [vmem:[#allocation29_spill] sm:$0xff]  ;;  %v9039_v30 = vadd.f32 %v8789_v63, %v12115_v23  ;;  %v9043_v12 = vadd.f32 %v12117_v50, %v8789_v63  ;;  %7056 = vtanh.f32 %v8825_v28 }
 0x542   :  { %v7043_v7 = vpop.eup %7042  ;;  %v9034_v6 = vadd.f32 %v12113_v54, %v8789_v63  ;;  %v9049_v24 = vadd.f32 %v8789_v63, %v12119_v27  ;;  %v12120_v54 = vld [vmem:[#allocation34_spill] sm:$0xff]  ;;  %v12123_v50 = vld [vmem:[#allocation25_spill] sm:$0xff]  ;;  %7058 = vtanh.f32 %v8829_v16 }
 0x543   :  { %v7045_v53 = vpop.eup %7044  ;;  %12116 = vst [vmem:[#allocation148_spill] sm:$0xff] %v9039_v30  ;;  %12118 = vst [vmem:[#allocation149_spill] sm:$0xff] %v9043_v12  ;;  %v12122_v30 = vld [vmem:[#allocation23_spill] sm:$0xff]  ;;  %v12125_v12 = vld [vmem:[#allocation42_spill] sm:$0xff]  ;;  %7060 = vtanh.f32 %v8833_v49 }
 0x544   :  { %2251 = vadd.xlane.f32.xlu1 %v2113_v46  ;;  %12114 = vst [vmem:[#allocation147_spill] sm:$0xff] %v9034_v6  ;;  %v2114_v46 = vmul.f32 %v7043_v7, %v8902_v34  ;;  %v2111_v23 = vmul.f32 %v7045_v53, %v8902_v34  ;;  %v9058_v6 = vadd.f32 %v12122_v30, %v8789_v63  ;;  %v12129_v53 = vld [vmem:[#allocation26_spill] sm:$0xff]  ;;  %7062 = vtanh.f32 %v8837_v42 }
 0x545   :  { %2237 = vadd.xlane.f32.xlu0 %v2106_v32  ;;  %v9053_v32 = vadd.f32 %v8789_v63, %v12120_v54  ;;  %v7047_v52 = vpop.eup %7046  ;;  %v9062_v7 = vadd.f32 %v12123_v50, %v8789_v63  ;;  %v9066_v27 = vadd.f32 %v8789_v63, %v12125_v12  ;;  %v12127_v54 = vld [vmem:[#allocation45_spill] sm:$0xff]  ;;  %v9075_v30 = vadd.f32 %v8789_v63, %v12129_v53  ;;  %v12133_v12 = vld [vmem:[#allocation46_spill] sm:$0xff] }
 0x546   :  { %v7049_v28 = vpop.eup %7048  ;;  %v12131_v50 = vld [vmem:[#allocation57_spill] sm:$0xff]  ;;  %7064 = vtanh.f32 %v8841_v26 }
 0x547   :  { %12121 = vst [vmem:[#allocation150_spill] sm:$0xff] %v9053_v32  ;;  %12124 = vst [vmem:[#allocation151_spill] sm:$0xff] %v9062_v7  ;;  %v9070_v32 = vadd.f32 %v12127_v54, %v8789_v63  ;;  %v9079_v7 = vadd.f32 %v12131_v50, %v8789_v63  ;;  %v12134_v54 = vld [vmem:[#allocation50_spill] sm:$0xff]  ;;  %v2107_v53 = vmul.f32 %v7049_v28, %v8902_v34  ;;  %v12137_v50 = vld [vmem:[#allocation37_spill] sm:$0xff]  ;;  %7066 = vtanh.f32 %v8845_v57 }
 0x548   :  { %2253 = vadd.xlane.f32.xlu1 %v2114_v46  ;;  %12126 = vst [vmem:[#allocation152_spill] sm:$0xff] %v9066_v27  ;;  %12130 = vst [vmem:[#allocation154_spill] sm:$0xff] %v9075_v30  ;;  %v2120_v46 = vmul.f32 %v7047_v52, %v8902_v34  ;;  %v9085_v27 = vadd.f32 %v8789_v63, %v12133_v12  ;;  %v7051_v16 = vpop.eup %7050  ;;  %v12136_v30 = vld [vmem:[#allocation33_spill] sm:$0xff]  ;;  %v9098_v52 = vadd.f32 %v12137_v50, %v8789_v63  ;;  %v12143_v28 = vld [vmem:[#allocation38_spill] sm:$0xff] }
 0x549   :  { %12128 = vst [vmem:[#allocation153_spill] sm:$0xff] %v9070_v32  ;;  %2247 = vadd.xlane.f32.xlu0 %v2111_v23  ;;  %12132 = vst [vmem:[#allocation155_spill] sm:$0xff] %v9079_v7  ;;  %v9089_v23 = vadd.f32 %v8789_v63, %v12134_v54  ;;  %v9094_v32 = vadd.f32 %v12136_v30, %v8789_v63  ;;  %v7053_v49 = vpop.eup %7052  ;;  %v12139_v7 = vld [vmem:[#allocation58_spill] sm:$0xff]  ;;  %v12141_v54 = vld [vmem:[#allocation61_spill] sm:$0xff]  ;;  %v9111_v30 = vadd.f32 %v8789_v63, %v12143_v28 }
 0x54a   :  { %12138 = vst [vmem:[#allocation157_spill] sm:$0xff] %v9098_v52  ;;  %v9102_v12 = vadd.f32 %v8789_v63, %v12139_v7  ;;  %v12145_v50 = vld [vmem:[#allocation74_spill] sm:$0xff]  ;;  %v7055_v42 = vpop.eup %7054  ;;  %v2108_v28 = vmul.f32 %v7053_v49, %v8902_v34  ;;  %7068 = vtanh.f32 %v8849_v13 }
 0x54b   :  { %12135 = vst [vmem:[#allocation156_spill] sm:$0xff] %v9089_v23  ;;  %v9106_v23 = vadd.f32 %v12141_v54, %v8789_v63  ;;  %12144 = vst [vmem:[#allocation160_spill] sm:$0xff] %v9111_v30  ;;  %v9115_v52 = vadd.f32 %v12145_v50, %v8789_v63  ;;  %v12147_v7 = vld [vmem:[#allocation62_spill] sm:$0xff]  ;;  %v12148_v54 = vld [vmem:[#allocation67_spill] sm:$0xff]  ;;  %v7057_v26 = vpop.eup %7056  ;;  %7070 = vtanh.f32 %v8853_v31 }
 0x54c   :  { %2265 = vadd.xlane.f32.xlu1 %v2120_v46  ;;  %12140 = vst [vmem:[#allocation158_spill] sm:$0xff] %v9102_v12  ;;  %v2115_v46 = vmul.f32 %v7051_v16, %v8902_v34  ;;  %v9121_v12 = vadd.f32 %v8789_v63, %v12147_v7  ;;  %v12150_v30 = vld [vmem:[#allocation49_spill] sm:$0xff]  ;;  %v12157_v49 = vld [vmem:[#allocation54_spill] sm:$0xff]  ;;  %v7059_v57 = vpop.eup %7058  ;;  %7072 = vtanh.f32 %v8857_v48 }
 0x54d   :  { %12142 = vst [vmem:[#allocation159_spill] sm:$0xff] %v9106_v23  ;;  %2239 = vadd.xlane.f32.xlu0 %v2107_v53  ;;  %12146 = vst [vmem:[#allocation161_spill] sm:$0xff] %v9115_v52  ;;  %v9125_v53 = vadd.f32 %v8789_v63, %v12148_v54  ;;  %v9130_v23 = vadd.f32 %v12150_v30, %v8789_v63  ;;  %v12151_v50 = vld [vmem:[#allocation53_spill] sm:$0xff]  ;;  %v12153_v52 = vld [vmem:[#allocation75_spill] sm:$0xff]  ;;  %v9147_v30 = vadd.f32 %v8789_v63, %v12157_v49  ;;  %v7061_v13 = vpop.eup %7060 }
 0x54e   :  { %v9134_v16 = vadd.f32 %v12151_v50, %v8789_v63  ;;  %v9138_v7 = vadd.f32 %v8789_v63, %v12153_v52  ;;  %v12155_v54 = vld [vmem:[#allocation78_spill] sm:$0xff]  ;;  %v12161_v52 = vld [vmem:[#allocation79_spill] sm:$0xff]  ;;  %v2119_v49 = vmul.f32 %v7057_v26, %v8902_v34  ;;  %v7063_v31 = vpop.eup %7062  ;;  %7074 = vtanh.f32 %v8861_v43 }
 0x54f   :  { %12149 = vst [vmem:[#allocation162_spill] sm:$0xff] %v9125_v53  ;;  %v9142_v53 = vadd.f32 %v12155_v54, %v8789_v63  ;;  %12158 = vst [vmem:[#allocation166_spill] sm:$0xff] %v9147_v30  ;;  %v12159_v50 = vld [vmem:[#allocation90_spill] sm:$0xff]  ;;  %v12162_v54 = vld [vmem:[#allocation83_spill] sm:$0xff]  ;;  %7076 = vtanh.f32 %v8865_v17 }
 0x550   :  { %12152 = vst [vmem:[#allocation163_spill] sm:$0xff] %v9134_v16  ;;  %2255 = vadd.xlane.f32.xlu1 %v2115_v46  ;;  %12154 = vst [vmem:[#allocation164_spill] sm:$0xff] %v9138_v7  ;;  %v9151_v16 = vadd.f32 %v12159_v50, %v8789_v63  ;;  %v2110_v46 = vmul.f32 %v7055_v42, %v8902_v34  ;;  %v9157_v7 = vadd.f32 %v8789_v63, %v12161_v52  ;;  %v12164_v30 = vld [vmem:[#allocation66_spill] sm:$0xff]  ;;  %v12171_v26 = vld [vmem:[#allocation71_spill] sm:$0xff]  ;;  %v7065_v48 = vpop.eup %7064 }
 0x551   :  { %12156 = vst [vmem:[#allocation165_spill] sm:$0xff] %v9142_v53  ;;  %2241 = vadd.xlane.f32.xlu0 %v2108_v28  ;;  %v9161_v28 = vadd.f32 %v8789_v63, %v12162_v54  ;;  %v9166_v53 = vadd.f32 %v12164_v30, %v8789_v63  ;;  %v12165_v50 = vld [vmem:[#allocation70_spill] sm:$0xff]  ;;  %v9183_v30 = vadd.f32 %v8789_v63, %v12171_v26  ;;  %v7067_v43 = vpop.eup %7066  ;;  %7078 = vtanh.f32 %v8869_v33 }
 0x552   :  { %12160 = vst [vmem:[#allocation167_spill] sm:$0xff] %v9151_v16  ;;  %v9170_v42 = vadd.f32 %v12165_v50, %v8789_v63  ;;  %v12167_v16 = vld [vmem:[#allocation91_spill] sm:$0xff]  ;;  %v12169_v54 = vld [vmem:[#allocation94_spill] sm:$0xff]  ;;  %v2109_v26 = vmul.f32 %v7061_v13, %v8902_v34  ;;  %7080 = vtanh.f32 %v8873_v19 }
 0x553   :  { %12163 = vst [vmem:[#allocation168_spill] sm:$0xff] %v9161_v28  ;;  %v9174_v52 = vadd.f32 %v8789_v63, %v12167_v16  ;;  %v9178_v28 = vadd.f32 %v12169_v54, %v8789_v63  ;;  %12172 = vst [vmem:[#allocation172_spill] sm:$0xff] %v9183_v30  ;;  %v12173_v50 = vld [vmem:[#allocation106_spill] sm:$0xff]  ;;  %v12175_v16 = vld [vmem:[#allocation95_spill] sm:$0xff]  ;;  %7082 = vtanh.f32 %v8877_v0 }
 0x554   :  { %12166 = vst [vmem:[#allocation169_spill] sm:$0xff] %v9170_v42  ;;  %2245 = vadd.xlane.f32.xlu1 %v2110_v46  ;;  %v9187_v42 = vadd.f32 %v12173_v50, %v8789_v63  ;;  %v2122_v46 = vmul.f32 %v7059_v57, %v8902_v34  ;;  %v12176_v54 = vld [vmem:[#allocation99_spill] sm:$0xff]  ;;  %v12178_v30 = vld [vmem:[#allocation82_spill] sm:$0xff]  ;;  %v7069_v17 = vpop.eup %7068  ;;  %7084 = vtanh.f32 %v8881_v21 }
 0x555   :  { %12168 = vst [vmem:[#allocation170_spill] sm:$0xff] %v9174_v52  ;;  %12170 = vst [vmem:[#allocation171_spill] sm:$0xff] %v9178_v28  ;;  %2263 = vadd.xlane.f32.xlu0 %v2119_v49  ;;  %v9193_v52 = vadd.f32 %v8789_v63, %v12175_v16  ;;  %v9197_v49 = vadd.f32 %v8789_v63, %v12176_v54  ;;  %v9202_v28 = vadd.f32 %v12178_v30, %v8789_v63  ;;  %v12179_v50 = vld [vmem:[#allocation86_spill] sm:$0xff]  ;;  %v12185_v13 = vld [vmem:[#allocation87_spill] sm:$0xff]  ;;  %v7071_v33 = vpop.eup %7070 }
 0x556   :  { %12174 = vst [vmem:[#allocation173_spill] sm:$0xff] %v9187_v42  ;;  %v9206_v57 = vadd.f32 %v12179_v50, %v8789_v63  ;;  %v12181_v42 = vld [vmem:[#allocation107_spill] sm:$0xff]  ;;  %v12183_v54 = vld [vmem:[#allocation110_spill] sm:$0xff]  ;;  %v9219_v30 = vadd.f32 %v8789_v63, %v12185_v13  ;;  %v2121_v13 = vmul.f32 %v7065_v48, %v8902_v34  ;;  %v7073_v19 = vpop.eup %7072  ;;  %7086 = vtanh.f32 %v8885_v44 }
 0x557   :  { %12177 = vst [vmem:[#allocation174_spill] sm:$0xff] %v9197_v49  ;;  %v9210_v16 = vadd.f32 %v8789_v63, %v12181_v42  ;;  %v9214_v49 = vadd.f32 %v12183_v54, %v8789_v63  ;;  %v12187_v50 = vld [vmem:[#allocation122_spill] sm:$0xff]  ;;  %v12189_v42 = vld [vmem:[#allocation111_spill] sm:$0xff]  ;;  %7088 = vtanh.f32 %v8889_v10 }
 0x558   :  { %12180 = vst [vmem:[#allocation175_spill] sm:$0xff] %v9206_v57  ;;  %2269 = vadd.xlane.f32.xlu1 %v2122_v46  ;;  %12186 = vst [vmem:[#allocation178_spill] sm:$0xff] %v9219_v30  ;;  %v9223_v57 = vadd.f32 %v12187_v50, %v8789_v63  ;;  %v2128_v46 = vmul.f32 %v7063_v31, %v8902_v34  ;;  %v12190_v54 = vld [vmem:[#allocation115_spill] sm:$0xff]  ;;  %v12192_v30 = vld [vmem:[#allocation98_spill] sm:$0xff]  ;;  %v7075_v0 = vpop.eup %7074  ;;  %7090 = vtanh.f32 %v8893_v45 }
 0x559   :  { %12182 = vst [vmem:[#allocation176_spill] sm:$0xff] %v9210_v16  ;;  %12184 = vst [vmem:[#allocation177_spill] sm:$0xff] %v9214_v49  ;;  %2243 = vadd.xlane.f32.xlu0 %v2109_v26  ;;  %v9229_v16 = vadd.f32 %v8789_v63, %v12189_v42  ;;  %v9233_v26 = vadd.f32 %v8789_v63, %v12190_v54  ;;  %v9238_v49 = vadd.f32 %v12192_v30, %v8789_v63  ;;  %v12193_v50 = vld [vmem:[#allocation102_spill] sm:$0xff]  ;;  %v12197_v54 = vld [vmem:[#allocation124_spill] sm:$0xff]  ;;  %v7077_v21 = vpop.eup %7076 }
 0x55a   :  { %12188 = vst [vmem:[#allocation179_spill] sm:$0xff] %v9223_v57  ;;  %v9242_v31 = vadd.f32 %v12193_v50, %v8789_v63  ;;  %v12195_v57 = vld [vmem:[#allocation123_spill] sm:$0xff]  ;;  %v12201_v50 = vld [vmem:[#allocation133_spill] sm:$0xff]  ;;  %7092 = vtanh.f32 %v8897_v25 }
 0x55b   :  { %12191 = vst [vmem:[#allocation180_spill] sm:$0xff] %v9233_v26  ;;  %v9246_v42 = vadd.f32 %v8789_v63, %v12195_v57  ;;  %v9250_v26 = vadd.f32 %v12197_v54, %v8789_v63  ;;  %v12199_v48 = vld [vmem:[#allocation103_spill] sm:$0xff]  ;;  %v12203_v57 = vld [vmem:[#allocation125_spill] sm:$0xff]  ;;  %7094 = vtanh.f32 %v8906_v60 }
 0x55c   :  { %12194 = vst [vmem:[#allocation181_spill] sm:$0xff] %v9242_v31  ;;  %2281 = vadd.xlane.f32.xlu1 %v2128_v46  ;;  %v9255_v30 = vadd.f32 %v8789_v63, %v12199_v48  ;;  %v9259_v31 = vadd.f32 %v12201_v50, %v8789_v63  ;;  %v2123_v46 = vmul.f32 %v7067_v43, %v8902_v34  ;;  %v12204_v54 = vld [vmem:[#allocation127_spill] sm:$0xff]  ;;  %v12207_v50 = vld [vmem:[#allocation118_spill] sm:$0xff]  ;;  %7096 = vtanh.f32 %v8910_v18 }
 0x55d   :  { %12196 = vst [vmem:[#allocation182_spill] sm:$0xff] %v9246_v42  ;;  %12198 = vst [vmem:[#allocation183_spill] sm:$0xff] %v9250_v26  ;;  %2267 = vadd.xlane.f32.xlu0 %v2121_v13  ;;  %v9265_v42 = vadd.f32 %v8789_v63, %v12203_v57  ;;  %v9269_v13 = vadd.f32 %v8789_v63, %v12204_v54  ;;  %v2116_v48 = vmul.f32 %v7069_v17, %v8902_v34  ;;  %v12210_v54 = vld [vmem:[#allocation137_spill] sm:$0xff]  ;;  %v12212_v17 = vld [vmem:[#allocation119_spill] sm:$0xff] }
 0x55e   :  { %12200 = vst [vmem:[#allocation184_spill] sm:$0xff] %v9255_v30  ;;  %12202 = vst [vmem:[#allocation185_spill] sm:$0xff] %v9259_v31  ;;  %v12206_v30 = vld [vmem:[#allocation114_spill] sm:$0xff]  ;;  %v9278_v43 = vadd.f32 %v12207_v50, %v8789_v63  ;;  %v12208_v31 = vld [vmem:[#allocation135_spill] sm:$0xff]  ;;  %v9295_v50 = vadd.f32 %v8789_v63, %v8783_v55  ;;  %7098 = vtanh.f32 %v8914_v47 }
 0x55f   :  { %12205 = vst [vmem:[#allocation186_spill] sm:$0xff] %v9269_v13  ;;  %v9274_v26 = vadd.f32 %v12206_v30, %v8789_v63  ;;  %v9282_v57 = vadd.f32 %v8789_v63, %v12208_v31  ;;  %v9286_v13 = vadd.f32 %v12210_v54, %v8789_v63  ;;  %v9291_v30 = vadd.f32 %v8789_v63, %v12212_v17  ;;  %v12215_v31 = vld [vmem:[#allocation139_spill] sm:$0xff]  ;;  %v12219_v55 = vld [vmem:[#allocation144_spill] sm:$0xff] }
 0x560   :  { %2271 = vadd.xlane.f32.xlu1 %v2123_v46  ;;  %12214 = vst [vmem:[#allocation190_spill] sm:$0xff] %v9295_v50  ;;  %v2118_v46 = vmul.f32 %v7071_v33, %v8902_v34  ;;  %v2127_v17 = vmul.f32 %v7073_v19, %v8902_v34  ;;  %v9314_v33 = vadd.f32 %v12219_v55, %v8789_v63  ;;  %v12221_v50 = vld [vmem:[#allocation131_spill] sm:$0xff]  ;;  %v12223_v19 = vld [vmem:[#allocation145_spill] sm:$0xff]  ;;  %7100 = vtanh.f32 %v8918_v22 }
 0x561   :  { %12209 = vst [vmem:[#allocation187_spill] sm:$0xff] %v9282_v57  ;;  %12211 = vst [vmem:[#allocation188_spill] sm:$0xff] %v9286_v13  ;;  %2257 = vadd.xlane.f32.xlu0 %v2116_v48  ;;  %v9301_v57 = vadd.f32 %v8789_v63, %v12215_v31  ;;  %v12216_v48 = vld [vmem:[#allocation141_spill] sm:$0xff]  ;;  %v9318_v31 = vadd.f32 %v8789_v63, %v12221_v50  ;;  %v2130_v55 = vmul.f32 %v7075_v0, %v8902_v34 }
 0x562   :  { %12213 = vst [vmem:[#allocation189_spill] sm:$0xff] %v9291_v30  ;;  %v9305_v54 = vadd.f32 %v12216_v48, %v8789_v63  ;;  %v12218_v30 = vld [vmem:[#allocation126_spill] sm:$0xff]  ;;  %12220 = vst [vmem:[#allocation192_spill] sm:$0xff] %v9314_v33  ;;  %v12222_v48 = vld [vmem:[#allocation129_spill] sm:$0xff]  ;;  %v2117_v33 = vmul.f32 %v7077_v21, %v8902_v34  ;;  %7102 = vtanh.f32 %v8922_v20 }
 0x563   :  { %v9310_v13 = vadd.f32 %v12218_v30, %v8789_v63  ;;  %v9327_v30 = vadd.f32 %v8789_v63, %v12223_v19  ;;  %7104 = vtanh.f32 %v8926_v59 }
 0x564   :  { %12217 = vst [vmem:[#allocation191_spill] sm:$0xff] %v9305_v54  ;;  %2261 = vadd.xlane.f32.xlu1 %v2118_v46  ;;  %v9322_v54 = vadd.f32 %v12222_v48, %v8789_v63  ;;  %v7079_v46 = vpop.eup %7078  ;;  %7106 = vtanh.f32 %v8930_v14 }
 0x565   :  { %2279 = vadd.xlane.f32.xlu0 %v2127_v17  ;;  %v7081_v50 = vpop.eup %7080  ;;  %v2136_v17 = vmul.f32 %v7079_v46, %v8902_v34  ;;  %7108 = vtanh.f32 %v8934_v8 }
 0x566   :  { %v7083_v44 = vpop.eup %7082  ;;  %v2129_v63 = vmul.f32 %v7081_v50, %v8902_v34  ;;  %7110 = vtanh.f32 %v8938_v38 }
 0x567   :  { %v7085_v19 = vpop.eup %7084  ;;  %v2131_v10 = vmul.f32 %v7083_v44, %v8902_v34  ;;  %7112 = vtanh.f32 %v8943_v39 }
 0x568   :  { %2285 = vadd.xlane.f32.xlu1 %v2130_v55  ;;  %v7087_v55 = vpop.eup %7086  ;;  %v2124_v0 = vmul.f32 %v7085_v19, %v8902_v34  ;;  %7114 = vtanh.f32 %v8947_v58 }
 0x569   :  { %2259 = vadd.xlane.f32.xlu0 %v2117_v33  ;;  %v7089_v45 = vpop.eup %7088  ;;  %v2126_v25 = vmul.f32 %v7087_v55, %v8902_v34  ;;  %7116 = vtanh.f32 %v8952_v37 }
 0x56a   :  { %v7091_v50 = vpop.eup %7090  ;;  %v2135_v33 = vmul.f32 %v7089_v45, %v8902_v34  ;;  %7118 = vtanh.f32 %v8956_v61 }
 0x56b   :  { %v7093_v60 = vpop.eup %7092  ;;  %v2138_v18 = vmul.f32 %v7091_v50, %v8902_v34  ;;  %7120 = vtanh.f32 %v8960_v1 }
 0x56c   :  { %2297 = vadd.xlane.f32.xlu1 %v2136_v17  ;;  %v7095_v21 = vpop.eup %7094  ;;  %v2125_v19 = vmul.f32 %v7093_v60, %v8902_v34  ;;  %7122 = vtanh.f32 %v8964_v35 }
 0x56d   :  { %2283 = vadd.xlane.f32.xlu0 %v2129_v63  ;;  %v7097_v47 = vpop.eup %7096  ;;  %v2144_v22 = vmul.f32 %v7095_v21, %v8902_v34  ;;  %7124 = vtanh.f32 %v8968_v40 }
 0x56e   :  { %v7099_v46 = vpop.eup %7098  ;;  %v2137_v17 = vmul.f32 %v7097_v47, %v8902_v34  ;;  %7126 = vtanh.f32 %v8972_v41 }
 0x56f   :  { %v7101_v20 = vpop.eup %7100  ;;  %v2139_v59 = vmul.f32 %v7099_v46, %v8902_v34  ;;  %7128 = vtanh.f32 %v8977_v5 }
 0x570   :  { %2287 = vadd.xlane.f32.xlu1 %v2131_v10  ;;  %v7103_v44 = vpop.eup %7102  ;;  %v2132_v63 = vmul.f32 %v7101_v20, %v8902_v34  ;;  %7130 = vtanh.f32 %v8981_v9 }
 0x571   :  { %2273 = vadd.xlane.f32.xlu0 %v2124_v0  ;;  %v7105_v14 = vpop.eup %7104  ;;  %v2134_v8 = vmul.f32 %v7103_v44, %v8902_v34  ;;  %7132 = vtanh.f32 %v8986_v29 }
 0x572   :  { %v7107_v10 = vpop.eup %7106  ;;  %v2143_v55 = vmul.f32 %v7105_v14, %v8902_v34  ;;  %7134 = vtanh.f32 %v8990_v51 }
 0x573   :  { %v7109_v38 = vpop.eup %7108  ;;  %v2146_v39 = vmul.f32 %v7107_v10, %v8902_v34  ;;  %7136 = vtanh.f32 %v8994_v36  ;;  %v12225_v10 = vld [vmem:[#allocation147_spill] sm:$0xff] }
 0x574   :  { %2277 = vadd.xlane.f32.xlu1 %v2126_v25  ;;  %v7111_v0 = vpop.eup %7110  ;;  %v2133_v45 = vmul.f32 %v7109_v38, %v8902_v34  ;;  %7138 = vtanh.f32 %v8998_v62 }
 0x575   :  { %2295 = vadd.xlane.f32.xlu0 %v2135_v33  ;;  %v7113_v58 = vpop.eup %7112  ;;  %v2152_v37 = vmul.f32 %v7111_v0, %v8902_v34  ;;  %7140 = vtanh.f32 %v9003_v15  ;;  %v12227_v0 = vld [vmem:[#allocation149_spill] sm:$0xff] }
 0x576   :  { %v7115_v25 = vpop.eup %7114  ;;  %v2145_v50 = vmul.f32 %v7113_v58, %v8902_v34  ;;  %7142 = vtanh.f32 %v9007_v56 }
 0x577   :  { %v7117_v61 = vpop.eup %7116  ;;  %v2147_v1 = vmul.f32 %v7115_v25, %v8902_v34  ;;  %7144 = vtanh.f32 %v9013_v4 }
 0x578   :  { %2301 = vadd.xlane.f32.xlu1 %v2138_v18  ;;  %v7119_v33 = vpop.eup %7118  ;;  %v2140_v60 = vmul.f32 %v7117_v61, %v8902_v34  ;;  %7146 = vtanh.f32 %v9017_v3 }
 0x579   :  { %2275 = vadd.xlane.f32.xlu0 %v2125_v19  ;;  %v7121_v35 = vpop.eup %7120  ;;  %v2142_v40 = vmul.f32 %v7119_v33, %v8902_v34  ;;  %7148 = vtanh.f32 %v9022_v11 }
 0x57a   :  { %v7123_v18 = vpop.eup %7122  ;;  %v2151_v21 = vmul.f32 %v7121_v35, %v8902_v34  ;;  %7150 = vtanh.f32 %v9026_v2  ;;  %v12229_v35 = vld [vmem:[#allocation151_spill] sm:$0xff] }
 0x57b   :  { %v7125_v41 = vpop.eup %7124  ;;  %v2154_v5 = vmul.f32 %v7123_v18, %v8902_v34 }
 0x57c   :  { %2313 = vadd.xlane.f32.xlu1 %v2144_v22  ;;  %v7127_v19 = vpop.eup %7126  ;;  %v2141_v47 = vmul.f32 %v7125_v41, %v8902_v34 }
 0x57d   :  { %2299 = vadd.xlane.f32.xlu0 %v2137_v17  ;;  %v7129_v9 = vpop.eup %7128  ;;  %v2160_v29 = vmul.f32 %v7127_v19, %v8902_v34  ;;  %v12232_v19 = vld [vmem:[#allocation154_spill] sm:$0xff] }
 0x57e   :  { %v7131_v22 = vpop.eup %7130  ;;  %v2153_v46 = vmul.f32 %v7129_v9, %v8902_v34 }
 0x57f   :  { %v7133_v51 = vpop.eup %7132  ;;  %v2155_v36 = vmul.f32 %v7131_v22, %v8902_v34  ;;  %v12233_v22 = vld [vmem:[#allocation155_spill] sm:$0xff] }
 0x580   :  { %2303 = vadd.xlane.f32.xlu1 %v2139_v59  ;;  %v7135_v17 = vpop.eup %7134  ;;  %v2148_v20 = vmul.f32 %v7133_v51, %v8902_v34 }
 0x581   :  { %2289 = vadd.xlane.f32.xlu0 %v2132_v63  ;;  %v7137_v62 = vpop.eup %7136  ;;  %v2150_v15 = vmul.f32 %v7135_v17, %v8902_v34  ;;  %v12224_v63 = vld [vmem:[#allocation146_spill] sm:$0xff] }
 0x582   :  { %v7139_v59 = vpop.eup %7138  ;;  %v2159_v44 = vmul.f32 %v7137_v62, %v8902_v34  ;;  %7152 = vtanh.f32 %v12224_v63 }
 0x583   :  { %v7141_v56 = vpop.eup %7140  ;;  %v2162_v4 = vmul.f32 %v7139_v59, %v8902_v34  ;;  %7154 = vtanh.f32 %v12225_v10  ;;  %v12238_v10 = vld [vmem:[#allocation9_spill] sm:$0xff] }
 0x584   :  { %2293 = vadd.xlane.f32.xlu1 %v2134_v8  ;;  %v7143_v14 = vpop.eup %7142  ;;  %v2149_v8 = vmul.f32 %v7141_v56, %v8902_v34  ;;  %v12235_v56 = vld [vmem:[#allocation157_spill] sm:$0xff] }
 0x585   :  { %2311 = vadd.xlane.f32.xlu0 %v2143_v55  ;;  %v7145_v3 = vpop.eup %7144  ;;  %v2168_v11 = vmul.f32 %v7143_v14, %v8902_v34  ;;  %v12226_v55 = vld [vmem:[#allocation148_spill] sm:$0xff] }
 0x586   :  { %7156 = vtanh.f32 %v12226_v55  ;;  %v7147_v38 = vpop.eup %7146 }
 0x587   :  { %v7149_v2 = vpop.eup %7148  ;;  %7158 = vtanh.f32 %v12227_v0 }
 0x588   :  { %2317 = vadd.xlane.f32.xlu1 %v2146_v39  ;;  %v2161_v39 = vmul.f32 %v7145_v3, %v8902_v34  ;;  %7160 = vtanh.f32 %v9049_v24  ;;  %v7151_v58 = vpop.eup %7150 }
 0x589   :  { %2291 = vadd.xlane.f32.xlu0 %v2133_v45  ;;  %v2163_v45 = vmul.f32 %v7147_v38, %v8902_v34  ;;  %v2158_v61 = vmul.f32 %v7151_v58, %v8902_v34 }
 0x58c   :  { %2329 = vadd.xlane.f32.xlu1 %v2152_v37  ;;  %v2156_v37 = vmul.f32 %v7149_v2, %v8902_v34  ;;  %v7153_v25 = vpop.eup %7152 }
 0x58d   :  { %2315 = vadd.xlane.f32.xlu0 %v2145_v50  ;;  %v12228_v50 = vld [vmem:[#allocation150_spill] sm:$0xff]  ;;  %v2167_v33 = vmul.f32 %v7153_v25, %v8902_v34 }
 0x58e   :  { %7162 = vtanh.f32 %v12228_v50  ;;  %v12240_v50 = vld [vmem:[#allocation161_spill] sm:$0xff] }
 0x58f   :  { %7164 = vtanh.f32 %v9058_v6 }
 0x590   :  { %2319 = vadd.xlane.f32.xlu1 %v2147_v1  ;;  %v7155_v1 = vpop.eup %7154  ;;  %7166 = vtanh.f32 %v12229_v35 }
 0x591   :  { %2305 = vadd.xlane.f32.xlu0 %v2140_v60  ;;  %v7157_v60 = vpop.eup %7156  ;;  %v2170_v24 = vmul.f32 %v7155_v1, %v8902_v34 }
 0x592   :  { %v7159_v18 = vpop.eup %7158 }
 0x593   :  { %v7161_v41 = vpop.eup %7160  ;;  %v2176_v6 = vmul.f32 %v7159_v18, %v8902_v34 }
 0x594   :  { %2309 = vadd.xlane.f32.xlu1 %v2142_v40  ;;  %v12230_v40 = vld [vmem:[#allocation152_spill] sm:$0xff]  ;;  %v2169_v9 = vmul.f32 %v7161_v41, %v8902_v34 }
 0x595   :  { %2327 = vadd.xlane.f32.xlu0 %v2151_v21  ;;  %7168 = vtanh.f32 %v12230_v40  ;;  %v2157_v21 = vmul.f32 %v7157_v60, %v8902_v34 }
 0x598   :  { %2333 = vadd.xlane.f32.xlu1 %v2154_v5  ;;  %v12231_v5 = vld [vmem:[#allocation153_spill] sm:$0xff] }
 0x599   :  { %2307 = vadd.xlane.f32.xlu0 %v2141_v47  ;;  %7170 = vtanh.f32 %v12231_v5  ;;  %v7163_v47 = vpop.eup %7162 }
 0x59a   :  { %7172 = vtanh.f32 %v12232_v19 }
 0x59b   :  { %7174 = vtanh.f32 %v12233_v22  ;;  %v12242_v22 = vld [vmem:[#allocation163_spill] sm:$0xff] }
 0x59c   :  { %2345 = vadd.xlane.f32.xlu1 %v2160_v29  ;;  %v7165_v29 = vpop.eup %7164  ;;  %7176 = vtanh.f32 %v9085_v27 }
 0x59d   :  { %2331 = vadd.xlane.f32.xlu0 %v2153_v46  ;;  %v2171_v46 = vmul.f32 %v7163_v47, %v8902_v34  ;;  %v7167_v51 = vpop.eup %7166 }
 0x59e   :  { %v2166_v62 = vmul.f32 %v7167_v51, %v8902_v34 }
 0x59f   :  { %v7169_v17 = vpop.eup %7168 }
 0x5a0   :  { %2335 = vadd.xlane.f32.xlu1 %v2155_v36  ;;  %v2164_v36 = vmul.f32 %v7165_v29, %v8902_v34  ;;  %v2175_v59 = vmul.f32 %v7169_v17, %v8902_v34 }
 0x5a1   :  { %2321 = vadd.xlane.f32.xlu0 %v2148_v20  ;;  %v12234_v20 = vld [vmem:[#allocation156_spill] sm:$0xff] }
 0x5a2   :  { %7178 = vtanh.f32 %v12234_v20 }
 0x5a3   :  { %7180 = vtanh.f32 %v9094_v32  ;;  %v12237_v32 = vld [vmem:[#allocation159_spill] sm:$0xff] }
 0x5a4   :  { %2325 = vadd.xlane.f32.xlu1 %v2150_v15  ;;  %v7171_v15 = vpop.eup %7170  ;;  %7182 = vtanh.f32 %v12235_v56 }
 0x5a5   :  { %2343 = vadd.xlane.f32.xlu0 %v2159_v44  ;;  %v7173_v44 = vpop.eup %7172  ;;  %v2178_v27 = vmul.f32 %v7171_v15, %v8902_v34 }
 0x5a6   :  { %v7175_v63 = vpop.eup %7174  ;;  %v2165_v14 = vmul.f32 %v7173_v44, %v8902_v34 }
 0x5a7   :  { %v2184_v38 = vmul.f32 %v7175_v63, %v8902_v34 }
 0x5a8   :  { %2349 = vadd.xlane.f32.xlu1 %v2162_v4  ;;  %v12236_v4 = vld [vmem:[#allocation158_spill] sm:$0xff] }
 0x5a9   :  { %2323 = vadd.xlane.f32.xlu0 %v2149_v8  ;;  %7184 = vtanh.f32 %v12236_v4  ;;  %v7177_v8 = vpop.eup %7176  ;;  %v12244_v4 = vld [vmem:[#allocation165_spill] sm:$0xff] }
 0x5aa   :  { %7186 = vtanh.f32 %v12237_v32 }
 0x5ac   :  { %2361 = vadd.xlane.f32.xlu1 %v2168_v11  ;;  %v7179_v2 = vpop.eup %7178 }
 0x5ad   :  { %2347 = vadd.xlane.f32.xlu0 %v2161_v39  ;;  %v12239_v39 = vld [vmem:[#allocation160_spill] sm:$0xff]  ;;  %v7181_v58 = vpop.eup %7180  ;;  %v2179_v1 = vmul.f32 %v7179_v2, %v8902_v34 }
 0x5ae   :  { %7188 = vtanh.f32 %v12239_v39  ;;  %v2172_v35 = vmul.f32 %v7181_v58, %v8902_v34 }
 0x5af   :  { %7190 = vtanh.f32 %v12240_v50 }
 0x5b0   :  { %2351 = vadd.xlane.f32.xlu1 %v2163_v45  ;;  %v2177_v45 = vmul.f32 %v7177_v8, %v8902_v34  ;;  %7192 = vtanh.f32 %v9121_v12 }
 0x5b1   :  { %2337 = vadd.xlane.f32.xlu0 %v2156_v37 }
 0x5b4   :  { %2341 = vadd.xlane.f32.xlu1 %v2158_v61 }
 0x5b5   :  { %2359 = vadd.xlane.f32.xlu0 %v2167_v33  ;;  %v7183_v33 = vpop.eup %7182 }
 0x5b6   :  { %v2174_v5 = vmul.f32 %v7183_v33, %v8902_v34 }
 0x5b8   :  { %2365 = vadd.xlane.f32.xlu1 %v2170_v24  ;;  %v7185_v24 = vpop.eup %7184 }
 0x5b9   :  { %2339 = vadd.xlane.f32.xlu0 %v2157_v21  ;;  %v12241_v21 = vld [vmem:[#allocation162_spill] sm:$0xff]  ;;  %v2183_v19 = vmul.f32 %v7185_v24, %v8902_v34 }
 0x5ba   :  { %7194 = vtanh.f32 %v12241_v21 }
 0x5bb   :  { %7196 = vtanh.f32 %v9130_v23 }
 0x5bc   :  { %2377 = vadd.xlane.f32.xlu1 %v2176_v6  ;;  %v7187_v6 = vpop.eup %7186  ;;  %7198 = vtanh.f32 %v12242_v22 }
 0x5bd   :  { %2363 = vadd.xlane.f32.xlu0 %v2169_v9  ;;  %v7189_v47 = vpop.eup %7188  ;;  %v2186_v51 = vmul.f32 %v7187_v6, %v8902_v34 }
 0x5be   :  { %v7191_v17 = vpop.eup %7190 }
 0x5bf   :  { %v7193_v15 = vpop.eup %7192  ;;  %v2192_v8 = vmul.f32 %v7191_v17, %v8902_v34 }
 0x5c0   :  { %2367 = vadd.xlane.f32.xlu1 %v2171_v46 }
 0x5c1   :  { %2353 = vadd.xlane.f32.xlu0 %v2164_v36  ;;  %v12243_v36 = vld [vmem:[#allocation164_spill] sm:$0xff] }
 0x5c2   :  { %7200 = vtanh.f32 %v12243_v36 }
 0x5c3   :  { %7202 = vtanh.f32 %v12244_v4 }
 0x5c4   :  { %2357 = vadd.xlane.f32.xlu1 %v2166_v62  ;;  %v2173_v62 = vmul.f32 %v7189_v47, %v8902_v34  ;;  %v7195_v32 = vpop.eup %7194 }
 0x5c5   :  { %2375 = vadd.xlane.f32.xlu0 %v2175_v59  ;;  %v7197_v39 = vpop.eup %7196 }
 0x5c6   :  { %v7199_v50 = vpop.eup %7198 }
 0x5c7   :  { %v2182_v21 = vmul.f32 %v7199_v50, %v8902_v34 }
 0x5c8   :  { %2381 = vadd.xlane.f32.xlu1 %v2178_v27 }
 0x5c9   :  { %2355 = vadd.xlane.f32.xlu0 %v2165_v14  ;;  %v2234_v3 = vpop.xlane.xlu1 %2233 }
 0x5ca   :  { %v2622_v11 = vrot.slane %v2234_v3, %v12238_v10  ;;  %v2232_v55 = vpop.xlane.xlu0 %2231  ;;  %v12245_v3 = vld [vmem:[#allocation166_spill] sm:$0xff] }
 0x5cb   :  { %v2618_v0 = vrot.slane %v2232_v55, %v12238_v10  ;;  %7204 = vtanh.f32 %v12245_v3  ;;  %v2185_v55 = vmul.f32 %v7193_v15, %v8902_v34 }
 0x5cc   :  { %2393 = vadd.xlane.f32.xlu1 %v2184_v38  ;;  %v7201_v33 = vpop.eup %7200 }
 0x5cd   :  { %v3127_v37 = vsel %vm497_vm2, %v2622_v11, %v2618_v0  ;;  %2379 = vadd.xlane.f32.xlu0 %v2177_v45  ;;  %v2250_v25 = vpop.xlane.xlu1 %2249  ;;  %v12246_v45 = vld [vmem:[#allocation167_spill] sm:$0xff]  ;;  %v2191_v6 = vmul.f32 %v7201_v33, %v8902_v34  ;;  %v12253_v33 = vld [vmem:[#allocation174_spill] sm:$0xff] }
 0x5ce   :  { %v2236_v61 = vpop.xlane.xlu0 %2235  ;;  %v2654_v23 = vrot.slane %v2250_v25, %v12238_v10  ;;  %7206 = vtanh.f32 %v12246_v45  ;;  %v2187_v25 = vmul.f32 %v7195_v32, %v8902_v34 }
 0x5cf   :  { %v2626_v60 = vrot.slane %v2236_v61, %v12238_v10  ;;  %7208 = vtanh.f32 %v9157_v7  ;;  %v7203_v7 = vpop.eup %7202 }
 0x5d0   :  { %2383 = vadd.xlane.f32.xlu1 %v2179_v1  ;;  %v2180_v1 = vmul.f32 %v7197_v39, %v8902_v34  ;;  %v2194_v22 = vmul.f32 %v7203_v7, %v8902_v34 }
 0x5d1   :  { %v3128_v40 = vsel %vm499_vm3, %v2626_v60, %v3127_v37  ;;  %2369 = vadd.xlane.f32.xlu0 %v2172_v35  ;;  %v2252_v18 = vpop.xlane.xlu1 %2251 }
 0x5d2   :  { %v2238_v41 = vpop.xlane.xlu0 %2237  ;;  %v2658_v59 = vrot.slane %v2252_v18, %v12238_v10 }
 0x5d3   :  { %v2630_v12 = vrot.slane %v2238_v41, %v12238_v10 }
 0x5d4   :  { %2373 = vadd.xlane.f32.xlu1 %v2174_v5 }
 0x5d5   :  { %v3129_v9 = vsel %vm501_vm4, %v2630_v12, %v3128_v40  ;;  %2391 = vadd.xlane.f32.xlu0 %v2183_v19  ;;  %v2254_v29 = vpop.xlane.xlu1 %2253  ;;  %v12247_v40 = vld [vmem:[#allocation168_spill] sm:$0xff]  ;;  %v7205_v12 = vpop.eup %7204 }
 0x5d6   :  { %v2248_v46 = vpop.xlane.xlu0 %2247  ;;  %v2662_v44 = vrot.slane %v2254_v29, %v12238_v10  ;;  %7210 = vtanh.f32 %v12247_v40  ;;  %v2181_v36 = vmul.f32 %v7205_v12, %v8902_v34 }
 0x5d7   :  { %v2650_v20 = vrot.slane %v2248_v46, %v12238_v10  ;;  %7212 = vtanh.f32 %v9166_v53  ;;  %v12249_v46 = vld [vmem:[#allocation170_spill] sm:$0xff] }
 0x5d8   :  { %2397 = vadd.xlane.f32.xlu1 %v2186_v51  ;;  %v7207_v53 = vpop.eup %7206 }
 0x5d9   :  { %v3134_v56 = vsel %vm497_vm2, %v2654_v23, %v2650_v20  ;;  %2371 = vadd.xlane.f32.xlu0 %v2173_v62  ;;  %v2266_v27 = vpop.xlane.xlu1 %2265  ;;  %v7209_v17 = vpop.eup %7208  ;;  %v12250_v62 = vld [vmem:[#allocation171_spill] sm:$0xff] }
 0x5da   :  { %v3135_v63 = vsel %vm499_vm3, %v2658_v59, %v3134_v56  ;;  %v2240_v14 = vpop.xlane.xlu0 %2239  ;;  %v2686_v41 = vrot.slane %v2266_v27, %v12238_v10  ;;  %v12251_v56 = vld [vmem:[#allocation172_spill] sm:$0xff] }
 0x5db   :  { %v2634_v11 = vrot.slane %v2240_v14, %v12238_v10  ;;  %v3136_v38 = vsel %vm501_vm4, %v2662_v44, %v3135_v63  ;;  %v2200_v44 = vmul.f32 %v7207_v53, %v8902_v34  ;;  %v2193_v14 = vmul.f32 %v7209_v17, %v8902_v34  ;;  %v12256_v53 = vld [vmem:[#allocation177_spill] sm:$0xff] }
 0x5dc   :  { %2409 = vadd.xlane.f32.xlu1 %v2192_v8 }
 0x5dd   :  { %v3130_v2 = vsel %vm503_vm5, %v2634_v11, %v3129_v9  ;;  %2395 = vadd.xlane.f32.xlu0 %v2185_v55  ;;  %v2256_v0 = vpop.xlane.xlu1 %2255  ;;  %v12248_v9 = vld [vmem:[#allocation169_spill] sm:$0xff] }
 0x5de   :  { %v2666_v58 = vrot.slane %v2256_v0, %v12238_v10  ;;  %v2242_v37 = vpop.xlane.xlu0 %2241  ;;  %7214 = vtanh.f32 %v12248_v9  ;;  %v12252_v55 = vld [vmem:[#allocation173_spill] sm:$0xff]  ;;  %v9502_v0 = vld [vmem:[%s11803_s10] ss:$0 sm:$0xff] }
 0x5df   :  { %v2638_v61 = vrot.slane %v2242_v37, %v12238_v10  ;;  %7216 = vtanh.f32 %v12249_v46 }
 0x5e0   :  { %v3137_v60 = vsel %vm503_vm5, %v2666_v58, %v3136_v38  ;;  %2399 = vadd.xlane.f32.xlu1 %v2187_v25  ;;  %7218 = vtanh.f32 %v12250_v62  ;;  %v7211_v4 = vpop.eup %7210 }
 0x5e1   :  { %v3131_v35 = vsel %vm505_vm6, %v2638_v61, %v3130_v2  ;;  %2385 = vadd.xlane.f32.xlu0 %v2180_v1  ;;  %v2246_v24 = vpop.xlane.xlu1 %2245  ;;  %7220 = vtanh.f32 %v12251_v56  ;;  %v7213_v8 = vpop.eup %7212  ;;  %v2195_v34 = vmul.f32 %v9502_v0, %v7211_v4 }
 0x5e2   :  { %v2264_v18 = vpop.xlane.xlu0 %2263  ;;  %v2646_v23 = vrot.slane %v2246_v24, %v12238_v10  ;;  %7222 = vtanh.f32 %v12252_v55  ;;  %v2188_v37 = vmul.f32 %v9502_v0, %v7213_v8 }
 0x5e3   :  { %v2682_v5 = vrot.slane %v2264_v18, %v12238_v10  ;;  %7224 = vtanh.f32 %v9193_v52 }
 0x5e4   :  { %2389 = vadd.xlane.f32.xlu1 %v2182_v21  ;;  %7226 = vtanh.f32 %v12253_v33 }
 0x5e5   :  { %v3141_v19 = vsel %vm497_vm2, %v2686_v41, %v2682_v5  ;;  %2407 = vadd.xlane.f32.xlu0 %v2191_v6  ;;  %v2270_v47 = vpop.xlane.xlu1 %2269  ;;  %7228 = vtanh.f32 %v9202_v28  ;;  %v12254_v5 = vld [vmem:[#allocation175_spill] sm:$0xff] }
 0x5e6   :  { %v2244_v29 = vpop.xlane.xlu0 %2243  ;;  %v2694_v3 = vrot.slane %v2270_v47, %v12238_v10  ;;  %7230 = vtanh.f32 %v12254_v5 }
 0x5e7   :  { %v2642_v51 = vrot.slane %v2244_v29, %v12238_v10 }
 0x5e8   :  { %2413 = vadd.xlane.f32.xlu1 %v2194_v22  ;;  %v7215_v45 = vpop.eup %7214 }
 0x5e9   :  { %2387 = vadd.xlane.f32.xlu0 %v2181_v36  ;;  %v2282_v20 = vpop.xlane.xlu1 %2281  ;;  %v3132_v15 = vsel %vm507_vm7, %v2642_v51, %v3131_v35  ;;  %v7217_v25 = vpop.eup %7216  ;;  %v2190_v24 = vmul.f32 %v9502_v0, %v7215_v45 }
 0x5ea   :  { %v2268_v59 = vpop.xlane.xlu0 %2267  ;;  %v9490_v27 = vsel %vm509_vm8, %v2646_v23, %v3132_v15  ;;  %v7219_v52 = vpop.eup %7218  ;;  %v2718_v40 = vrot.slane %v2282_v20, %v12238_v10  ;;  %v2199_v21 = vmul.f32 %v9502_v0, %v7217_v25  ;;  %v12257_v23 = vld [vmem:[#allocation178_spill] sm:$0xff] }
 0x5eb   :  { %v2690_v63 = vrot.slane %v2268_v59, %v12238_v10  ;;  %v7221_v7 = vpop.eup %7220  ;;  %v2202_v12 = vmul.f32 %v9502_v0, %v7219_v52 }
 0x5ec   :  { %2425 = vadd.xlane.f32.xlu1 %v2200_v44  ;;  %v7223_v28 = vpop.eup %7222  ;;  %v2189_v9 = vmul.f32 %v9502_v0, %v7221_v7  ;;  %v12261_v7 = vld [vmem:[#allocation182_spill] sm:$0xff] }
 0x5ed   :  { %v3142_v32 = vsel %vm499_vm3, %v2690_v63, %v3141_v19  ;;  %2411 = vadd.xlane.f32.xlu0 %v2193_v14  ;;  %v2272_v11 = vpop.xlane.xlu1 %2271  ;;  %v12255_v19 = vld [vmem:[#allocation176_spill] sm:$0xff]  ;;  %v7225_v29 = vpop.eup %7224  ;;  %v2208_v17 = vmul.f32 %v9502_v0, %v7223_v28  ;;  %v12258_v14 = vld [vmem:[#allocation179_spill] sm:$0xff] }
 0x5ee   :  { %v2698_v38 = vrot.slane %v2272_v11, %v12238_v10  ;;  %v3143_v39 = vsel %vm501_vm4, %v2694_v3, %v3142_v32  ;;  %v2258_v2 = vpop.xlane.xlu0 %2257  ;;  %7232 = vtanh.f32 %v12255_v19  ;;  %v7227_v62 = vpop.eup %7226  ;;  %v2201_v59 = vmul.f32 %v9502_v0, %v7225_v29 }
 0x5ef   :  { %v2670_v58 = vrot.slane %v2258_v2, %v12238_v10  ;;  %7234 = vtanh.f32 %v12256_v53  ;;  %v7229_v44 = vpop.eup %7228  ;;  %v2203_v11 = vmul.f32 %v9502_v0, %v7227_v62 }
 0x5f0   :  { %v3144_v50 = vsel %vm503_vm5, %v2698_v38, %v3143_v39  ;;  %2415 = vadd.xlane.f32.xlu1 %v2195_v34  ;;  %7236 = vtanh.f32 %v12257_v23  ;;  %v7231_v55 = vpop.eup %7230  ;;  %v2196_v39 = vmul.f32 %v9502_v0, %v7229_v44  ;;  %v12264_v23 = vld [vmem:[#allocation185_spill] sm:$0xff] }
 0x5f1   :  { %v3138_v61 = vsel %vm505_vm6, %v2670_v58, %v3137_v60  ;;  %2401 = vadd.xlane.f32.xlu0 %v2188_v37  ;;  %v2262_v1 = vpop.xlane.xlu1 %2261  ;;  %7238 = vtanh.f32 %v12258_v14  ;;  %v12259_v37 = vld [vmem:[#allocation180_spill] sm:$0xff] }
 0x5f2   :  { %v2280_v35 = vpop.xlane.xlu0 %2279  ;;  %v2678_v22 = vrot.slane %v2262_v1, %v12238_v10  ;;  %7240 = vtanh.f32 %v9229_v16  ;;  %v2198_v16 = vmul.f32 %v9502_v0, %v7231_v55 }
 0x5f3   :  { %v2714_v18 = vrot.slane %v2280_v35, %v12238_v10  ;;  %7242 = vtanh.f32 %v12259_v37 }
 0x5f4   :  { %2405 = vadd.xlane.f32.xlu1 %v2190_v24  ;;  %7244 = vtanh.f32 %v9238_v49 }
 0x5f5   :  { %v3148_v60 = vsel %vm497_vm2, %v2718_v40, %v2714_v18  ;;  %2423 = vadd.xlane.f32.xlu0 %v2199_v21  ;;  %v2286_v41 = vpop.xlane.xlu1 %2285  ;;  %v12260_v40 = vld [vmem:[#allocation181_spill] sm:$0xff] }
 0x5f6   :  { %v2260_v6 = vpop.xlane.xlu0 %2259  ;;  %v2726_v56 = vrot.slane %v2286_v41, %v12238_v10  ;;  %7246 = vtanh.f32 %v12260_v40 }
 0x5f7   :  { %v2674_v47 = vrot.slane %v2260_v6, %v12238_v10  ;;  %7248 = vtanh.f32 %v12261_v7  ;;  %v12268_v7 = vld [vmem:[#allocation189_spill] sm:$0xff] }
 0x5f8   :  { %2429 = vadd.xlane.f32.xlu1 %v2202_v12  ;;  %v7233_v2 = vpop.eup %7232  ;;  %v12262_v12 = vld [vmem:[#allocation183_spill] sm:$0xff] }
 0x5f9   :  { %2403 = vadd.xlane.f32.xlu0 %v2189_v9  ;;  %v2298_v46 = vpop.xlane.xlu1 %2297  ;;  %v3139_v51 = vsel %vm507_vm7, %v2674_v47, %v3138_v61  ;;  %v7235_v61 = vpop.eup %7234  ;;  %v2207_v35 = vmul.f32 %v9502_v0, %v7233_v2  ;;  %7250 = vtanh.f32 %v12262_v12  ;;  %v12263_v9 = vld [vmem:[#allocation184_spill] sm:$0xff] }
 0x5fa   :  { %v2284_v36 = vpop.xlane.xlu0 %2283  ;;  %v9528_v20 = vsel %vm509_vm8, %v2678_v22, %v3139_v51  ;;  %v2750_v1 = vrot.slane %v2298_v46, %v12238_v10  ;;  %v7237_v24 = vpop.eup %7236  ;;  %v2210_v21 = vmul.f32 %v9502_v0, %v7235_v61  ;;  %7252 = vtanh.f32 %v12263_v9  ;;  %v12269_v9 = vld [vmem:[#allocation190_spill] sm:$0xff] }
 0x5fb   :  { %v2722_v15 = vrot.slane %v2284_v36, %v12238_v10  ;;  %v7239_v49 = vpop.eup %7238  ;;  %v2197_v41 = vmul.f32 %v9502_v0, %v7237_v24  ;;  %7254 = vtanh.f32 %v12264_v23 }
 0x5fc   :  { %2441 = vadd.xlane.f32.xlu1 %v2208_v17  ;;  %v7241_v5 = vpop.eup %7240  ;;  %v2216_v47 = vmul.f32 %v9502_v0, %v7239_v49  ;;  %7256 = vtanh.f32 %v9265_v42 }
 0x5fd   :  { %v3149_v4 = vsel %vm499_vm3, %v2722_v15, %v3148_v60  ;;  %2427 = vadd.xlane.f32.xlu0 %v2201_v59  ;;  %v2288_v63 = vpop.xlane.xlu1 %2287  ;;  %v7243_v29 = vpop.eup %7242  ;;  %v2209_v46 = vmul.f32 %v9502_v0, %v7241_v5 }
 0x5fe   :  { %v2730_v8 = vrot.slane %v2288_v63, %v12238_v10  ;;  %v3150_v3 = vsel %vm501_vm4, %v2726_v56, %v3149_v4  ;;  %v2274_v32 = vpop.xlane.xlu0 %2273  ;;  %v7245_v53 = vpop.eup %7244  ;;  %v2211_v59 = vmul.f32 %v9502_v0, %v7243_v29 }
 0x5ff   :  { %v2702_v38 = vrot.slane %v2274_v32, %v12238_v10  ;;  %v2204_v4 = vmul.f32 %v9502_v0, %v7245_v53 }
 0x600   :  { %v9542_v34 = vsel %vm503_vm5, %v2730_v8, %v3150_v3  ;;  %2431 = vadd.xlane.f32.xlu1 %v2203_v11  ;;  %v7247_v44 = vpop.eup %7246  ;;  %v12265_v3 = vld [vmem:[#allocation186_spill] sm:$0xff] }
 0x601   :  { %v3145_v45 = vsel %vm505_vm6, %v2702_v38, %v3144_v50  ;;  %2417 = vadd.xlane.f32.xlu0 %v2196_v39  ;;  %v9545_v58 = vpop.xlane.xlu1 %2277  ;;  %v7249_v63 = vpop.eup %7248  ;;  %7258 = vtanh.f32 %v12265_v3  ;;  %v2206_v11 = vmul.f32 %v9502_v0, %v7247_v44  ;;  %v12271_v3 = vld [vmem:[#allocation192_spill] sm:$0xff] }
 0x602   :  { %v2296_v25 = vpop.xlane.xlu0 %2295  ;;  %7260 = vtanh.f32 %v9274_v26  ;;  %v2215_v55 = vmul.f32 %v9502_v0, %v7249_v63 }
 0x603   :  { %v2746_v33 = vrot.slane %v2296_v25, %v12238_v10  ;;  %v7251_v42 = vpop.eup %7250  ;;  %7262 = vtanh.f32 %v9278_v43  ;;  %v12266_v25 = vld [vmem:[#allocation187_spill] sm:$0xff] }
 0x604   :  { %2421 = vadd.xlane.f32.xlu1 %v2198_v16  ;;  %v7253_v38 = vpop.eup %7252  ;;  %v2218_v37 = vmul.f32 %v9502_v0, %v7251_v42  ;;  %7264 = vtanh.f32 %v12266_v25 }
 0x605   :  { %v3155_v50 = vsel %vm497_vm2, %v2750_v1, %v2746_v33  ;;  %2439 = vadd.xlane.f32.xlu0 %v2207_v35  ;;  %v2302_v52 = vpop.xlane.xlu1 %2301  ;;  %v7255_v16 = vpop.eup %7254  ;;  %v2205_v26 = vmul.f32 %v9502_v0, %v7253_v38 }
 0x606   :  { %v2276_v18 = vpop.xlane.xlu0 %2275  ;;  %v2758_v51 = vrot.slane %v2302_v52, %v12238_v10  ;;  %v7257_v1 = vpop.eup %7256 }
 0x607   :  { %v2706_v60 = vrot.slane %v2276_v18, %v12238_v10 }
 0x608   :  { %2445 = vadd.xlane.f32.xlu1 %v2210_v21  ;;  %v2224_v21 = vmul.f32 %v9502_v0, %v7255_v16 }
 0x609   :  { %2419 = vadd.xlane.f32.xlu0 %v2197_v41  ;;  %v9559_v6 = vpop.xlane.xlu1 %2313  ;;  %v9563_v19 = vsel %vm507_vm7, %v2706_v60, %v3145_v45  ;;  %v2217_v41 = vmul.f32 %v9502_v0, %v7257_v1 }
 0x60a   :  { %v2300_v28 = vpop.xlane.xlu0 %2299  ;;  %v2782_v40 = vrot.slane %v9559_v6, %v12238_v10 }
 0x60b   :  { %v2754_v22 = vrot.slane %v2300_v28, %v12238_v10  ;;  %v7259_v49 = vpop.eup %7258 }
 0x60c   :  { %2457 = vadd.xlane.f32.xlu1 %v2216_v47  ;;  %v7261_v5 = vpop.eup %7260  ;;  %v2219_v53 = vmul.f32 %v9502_v0, %v7259_v49 }
 0x60d   :  { %v3156_v36 = vsel %vm499_vm3, %v2754_v22, %v3155_v50  ;;  %2443 = vadd.xlane.f32.xlu0 %v2209_v46  ;;  %v2304_v17 = vpop.xlane.xlu1 %2303  ;;  %v12267_v50 = vld [vmem:[#allocation188_spill] sm:$0xff] }
 0x60e   :  { %v2762_v62 = vrot.slane %v2304_v17, %v12238_v10  ;;  %v2290_v15 = vpop.xlane.xlu0 %2289  ;;  %v3157_v56 = vsel %vm501_vm4, %v2758_v51, %v3156_v36  ;;  %7266 = vtanh.f32 %v12267_v50  ;;  %v7263_v51 = vpop.eup %7262  ;;  %v2212_v36 = vmul.f32 %v9502_v0, %v7261_v5 }
 0x60f   :  { %v2734_v39 = vrot.slane %v2290_v15, %v12238_v10  ;;  %7268 = vtanh.f32 %v12268_v7  ;;  %v7265_v17 = vpop.eup %7264  ;;  %v12270_v15 = vld [vmem:[#allocation191_spill] sm:$0xff]  ;;  %v2214_v44 = vmul.f32 %v9502_v0, %v7263_v51 }
 0x610   :  { %v9578_v14 = vsel %vm503_vm5, %v2762_v62, %v3157_v56  ;;  %2447 = vadd.xlane.f32.xlu1 %v2211_v59  ;;  %7270 = vtanh.f32 %v12269_v9 }
 0x611   :  { %2433 = vadd.xlane.f32.xlu0 %v2204_v4  ;;  %v2294_v8 = vpop.xlane.xlu1 %2293  ;;  %v3152_v33 = vsel %vm505_vm6, %v2734_v39, %v9542_v34  ;;  %7272 = vtanh.f32 %v9301_v57  ;;  %v2223_v57 = vmul.f32 %v9502_v0, %v7265_v17 }
 0x612   :  { %v2312_v32 = vpop.xlane.xlu0 %2311  ;;  %v2742_v35 = vrot.slane %v2294_v8, %v12238_v10  ;;  %7274 = vtanh.f32 %v12270_v15 }
 0x613   :  { %v2778_v24 = vrot.slane %v2312_v32, %v12238_v10  ;;  %7276 = vtanh.f32 %v9310_v13 }
 0x614   :  { %2437 = vadd.xlane.f32.xlu1 %v2206_v11  ;;  %7278 = vtanh.f32 %v12271_v3 }
 0x615   :  { %2455 = vadd.xlane.f32.xlu0 %v2215_v55  ;;  %v2318_v2 = vpop.xlane.xlu1 %2317  ;;  %v3162_v12 = vsel %vm497_vm2, %v2782_v40, %v2778_v24  ;;  %7280 = vtanh.f32 %v9318_v31 }
 0x616   :  { %v2292_v45 = vpop.xlane.xlu0 %2291  ;;  %v2790_v28 = vrot.slane %v2318_v2, %v12238_v10  ;;  %7282 = vtanh.f32 %v9322_v54 }
 0x617   :  { %v2738_v61 = vrot.slane %v2292_v45, %v12238_v10  ;;  %7284 = vtanh.f32 %v9327_v30 }
 0x618   :  { %2461 = vadd.xlane.f32.xlu1 %v2218_v37  ;;  %v7267_v56 = vpop.eup %7266 }
 0x619   :  { %2435 = vadd.xlane.f32.xlu0 %v2205_v26  ;;  %v9594_v43 = vpop.xlane.xlu1 %2329  ;;  %v3153_v52 = vsel %vm507_vm7, %v2738_v61, %v3152_v33  ;;  %v7269_v4 = vpop.eup %7268  ;;  %v2226_v11 = vmul.f32 %v9502_v0, %v7267_v56 }
 0x61a   :  { %v2316_v18 = vpop.xlane.xlu0 %2315  ;;  %v9603_v34 = vsel %vm509_vm8, %v2742_v35, %v3153_v52  ;;  %v7271_v42 = vpop.eup %7270  ;;  %v2213_v13 = vmul.f32 %v9502_v0, %v7269_v4  ;;  %v2814_v31 = vrot.slane %v9594_v43, %v12238_v10 }
 0x61b   :  { %v2786_v60 = vrot.slane %v2316_v18, %v12238_v10  ;;  %v7273_v38 = vpop.eup %7272  ;;  %v2227_v61 = vmul.f32 %v9502_v0, %v7271_v42 }
 0x61c   :  { %2473 = vadd.xlane.f32.xlu1 %v2224_v21  ;;  %v2225_v33 = vmul.f32 %v9502_v0, %v7273_v38 }
 0x61d   :  { %v3163_v6 = vsel %vm499_vm3, %v2786_v60, %v3162_v12  ;;  %2459 = vadd.xlane.f32.xlu0 %v2217_v41  ;;  %v2320_v47 = vpop.xlane.xlu1 %2319 }
 0x61e   :  { %v2794_v29 = vrot.slane %v2320_v47, %v12238_v10  ;;  %v3164_v22 = vsel %vm501_vm4, %v2790_v28, %v3163_v6  ;;  %v2306_v46 = vpop.xlane.xlu0 %2305 }
 0x61f   :  { %v2766_v63 = vrot.slane %v2306_v46, %v12238_v10 }
 0x620   :  { %v9617_v23 = vsel %vm503_vm5, %v2794_v29, %v3164_v22  ;;  %2463 = vadd.xlane.f32.xlu1 %v2219_v53 }
 0x621   :  { %2449 = vadd.xlane.f32.xlu0 %v2212_v36  ;;  %v2310_v62 = vpop.xlane.xlu1 %2309  ;;  %v3159_v39 = vsel %vm505_vm6, %v2766_v63, %v9578_v14  ;;  %v7275_v14 = vpop.eup %7274 }
 0x622   :  { %v2328_v59 = vpop.xlane.xlu0 %2327  ;;  %v2774_v2 = vrot.slane %v2310_v62, %v12238_v10  ;;  %v7277_v35 = vpop.eup %7276  ;;  %v2228_v21 = vmul.f32 %v9502_v0, %v7275_v14 }
 0x623   :  { %v2810_v45 = vrot.slane %v2328_v59, %v12238_v10  ;;  %v7279_v7 = vpop.eup %7278  ;;  %v2220_v49 = vmul.f32 %v9502_v0, %v7277_v35 }
 0x624   :  { %2453 = vadd.xlane.f32.xlu1 %v2214_v44  ;;  %v7281_v60 = vpop.eup %7280  ;;  %v2230_v28 = vmul.f32 %v9502_v0, %v7279_v7 }
 0x625   :  { %2471 = vadd.xlane.f32.xlu0 %v2223_v57  ;;  %v2334_v8 = vpop.xlane.xlu1 %2333  ;;  %v3169_v24 = vsel %vm497_vm2, %v2814_v31, %v2810_v45  ;;  %v2221_v6 = vmul.f32 %v9502_v0, %v7281_v60  ;;  %v7283_v47 = vpop.eup %7282 }
 0x626   :  { %v2308_v32 = vpop.xlane.xlu0 %2307  ;;  %v2822_v50 = vrot.slane %v2334_v8, %v12238_v10  ;;  %v2222_v46 = vmul.f32 %v9502_v0, %v7283_v47  ;;  %v7285_v53 = vpop.eup %7284 }
 0x627   :  { %v2770_v55 = vrot.slane %v2308_v32, %v12238_v10  ;;  %v2229_v4 = vmul.f32 %v9502_v0, %v7285_v53 }
 0x628   :  { %2477 = vadd.xlane.f32.xlu1 %v2226_v11 }
 0x629   :  { %2451 = vadd.xlane.f32.xlu0 %v2213_v13  ;;  %v2346_v37 = vpop.xlane.xlu1 %2345  ;;  %v3160_v25 = vsel %vm507_vm7, %v2770_v55, %v3159_v39 }
 0x62a   :  { %v2332_v16 = vpop.xlane.xlu0 %2331  ;;  %v9639_v26 = vsel %vm509_vm8, %v2774_v2, %v3160_v25  ;;  %v2846_v59 = vrot.slane %v2346_v37, %v12238_v10 }
 0x62b   :  { %v2818_v1 = vrot.slane %v2332_v16, %v12238_v10 }
 0x62c   :  { %2479 = vadd.xlane.f32.xlu1 %v2227_v61 }
 0x62d   :  { %v3170_v43 = vsel %vm499_vm3, %v2818_v1, %v3169_v24  ;;  %2475 = vadd.xlane.f32.xlu0 %v2225_v33  ;;  %v2336_v52 = vpop.xlane.xlu1 %2335 }
 0x62e   :  { %v2826_v54 = vrot.slane %v2336_v52, %v12238_v10  ;;  %v3171_v40 = vsel %vm501_vm4, %v2822_v50, %v3170_v43  ;;  %v2322_v18 = vpop.xlane.xlu0 %2321 }
 0x62f   :  { %v2798_v9 = vrot.slane %v2322_v18, %v12238_v10 }
 0x630   :  { %v9652_v41 = vsel %vm503_vm5, %v2826_v54, %v3171_v40  ;;  %2481 = vadd.xlane.f32.xlu1 %v2228_v21  ;;  %v2710_v21 = vrot.slane %v9545_v58, %v12238_v10 }
 0x631   :  { %2465 = vadd.xlane.f32.xlu0 %v2220_v49  ;;  %v2326_v5 = vpop.xlane.xlu1 %2325  ;;  %v3166_v51 = vsel %vm505_vm6, %v2798_v9, %v9617_v23 }
 0x632   :  { %v2344_v12 = vpop.xlane.xlu0 %2343  ;;  %v2806_v36 = vrot.slane %v2326_v5, %v12238_v10  ;;  %v3147_v49 = vsel %vm509_vm8, %v2710_v21, %v9563_v19 }
 0x633   :  { %v2842_v17 = vrot.slane %v2344_v12, %v12238_v10 }
 0x634   :  { %2485 = vadd.xlane.f32.xlu1 %v2230_v28 }
 0x635   :  { %2467 = vadd.xlane.f32.xlu0 %v2221_v6  ;;  %v2350_v30 = vpop.xlane.xlu1 %2349  ;;  %v3176_v63 = vsel %vm497_vm2, %v2846_v59, %v2842_v17 }
 0x636   :  { %v2324_v29 = vpop.xlane.xlu0 %2323  ;;  %v2854_v23 = vrot.slane %v2350_v30, %v12238_v10 }
 0x637   :  { %v2802_v22 = vrot.slane %v2324_v29, %v12238_v10 }
 0x639   :  { %2469 = vadd.xlane.f32.xlu0 %v2222_v46  ;;  %v2362_v62 = vpop.xlane.xlu1 %2361  ;;  %v3167_v15 = vsel %vm507_vm7, %v2802_v22, %v3166_v51 }
 0x63a   :  { %v2348_v44 = vpop.xlane.xlu0 %2347  ;;  %v3168_v56 = vsel %vm509_vm8, %v2806_v36, %v3167_v15  ;;  %v2878_v47 = vrot.slane %v2362_v62, %v12238_v10 }
 0x63b   :  { %v2850_v57 = vrot.slane %v2348_v44, %v12238_v10 }
 0x63d   :  { %v3177_v8 = vsel %vm499_vm3, %v2850_v57, %v3176_v63  ;;  %2483 = vadd.xlane.f32.xlu0 %v2229_v4  ;;  %v2352_v3 = vpop.xlane.xlu1 %2351 }
 0x63e   :  { %v3178_v32 = vsel %vm501_vm4, %v2854_v23, %v3177_v8  ;;  %v2338_v11 = vpop.xlane.xlu0 %2337 }
 0x641   :  { %v9672_v42 = vpop.xlane.xlu1 %2341 }
 0x642   :  { %v2360_v55 = vpop.xlane.xlu0 %2359  ;;  %v2838_v51 = vrot.slane %v9672_v42, %v12238_v10 }
 0x643   :  { %v2874_v58 = vrot.slane %v2360_v55, %v12238_v10 }
 0x645   :  { %v9674_v13 = vpop.xlane.xlu1 %2365  ;;  %v3183_v22 = vsel %vm497_vm2, %v2878_v47, %v2874_v58 }
 0x646   :  { %v2340_v38 = vpop.xlane.xlu0 %2339  ;;  %v2886_v15 = vrot.slane %v9674_v13, %v12238_v10 }
 0x647   :  { %v2834_v28 = vrot.slane %v2340_v38, %v12238_v10 }
 0x649   :  { %v9676_v39 = vpop.xlane.xlu1 %2377 }
 0x64a   :  { %v2364_v0 = vpop.xlane.xlu0 %2363  ;;  %v2910_v44 = vrot.slane %v9676_v39, %v12238_v10 }
 0x64b   :  { %v2882_v6 = vrot.slane %v2364_v0, %v12238_v10 }
 0x64d   :  { %v9678_v2 = vpop.xlane.xlu1 %2367  ;;  %v3184_v36 = vsel %vm499_vm3, %v2882_v6, %v3183_v22 }
 0x64e   :  { %v2354_v45 = vpop.xlane.xlu0 %2353  ;;  %v3185_v23 = vsel %vm501_vm4, %v2886_v15, %v3184_v36 }
 0x64f   :  { %v2862_v30 = vrot.slane %v2354_v45, %v12238_v10 }
 0x651   :  { %v9680_v37 = vpop.xlane.xlu1 %2357 }
 0x652   :  { %v9682_v25 = vpop.xlane.xlu0 %2375  ;;  %v2870_v42 = vrot.slane %v9680_v37, %v12238_v10 }
 0x653   :  { %v2906_v17 = vrot.slane %v9682_v25, %v12238_v10 }
 0x655   :  { %v9684_v31 = vpop.xlane.xlu1 %2381  ;;  %v3190_v55 = vsel %vm497_vm2, %v2910_v44, %v2906_v17 }
 0x656   :  { %v2356_v16 = vpop.xlane.xlu0 %2355  ;;  %v2918_v38 = vrot.slane %v9684_v31, %v12238_v10 }
 0x657   :  { %v2866_v46 = vrot.slane %v2356_v16, %v12238_v10 }
 0x659   :  { %v9686_v61 = vpop.xlane.xlu1 %2393 }
 0x65a   :  { %v2380_v14 = vpop.xlane.xlu0 %2379  ;;  %v2942_v45 = vrot.slane %v9686_v61, %v12238_v10 }
 0x65b   :  { %v2914_v59 = vrot.slane %v2380_v14, %v12238_v10 }
 0x65d   :  { %v9688_v1 = vpop.xlane.xlu1 %2383  ;;  %v3191_v39 = vsel %vm499_vm3, %v2914_v59, %v3190_v55 }
 0x65e   :  { %v9690_v33 = vpop.xlane.xlu0 %2369  ;;  %v2922_v0 = vrot.slane %v9688_v1, %v12238_v10 }
 0x65f   :  { %v2894_v57 = vrot.slane %v9690_v33, %v12238_v10 }
 0x661   :  { %v9692_v35 = vpop.xlane.xlu1 %2373 }
 0x662   :  { %v9694_v24 = vpop.xlane.xlu0 %2391  ;;  %v2902_v61 = vrot.slane %v9692_v35, %v12238_v10 }
 0x663   :  { %v2938_v13 = vrot.slane %v9694_v24, %v12238_v10  ;;  %v3192_v24 = vsel %vm501_vm4, %v2918_v38, %v3191_v39 }
 0x665   :  { %v9696_v50 = vpop.xlane.xlu1 %2397 }
 0x666   :  { %v9698_v43 = vpop.xlane.xlu0 %2371 }
 0x667   :  { %v2898_v8 = vrot.slane %v9698_v43, %v12238_v10  ;;  %v3197_v43 = vsel %vm497_vm2, %v2942_v45, %v2938_v13 }
 0x669   :  { %v9700_v52 = vpop.xlane.xlu1 %2409 }
 0x66a   :  { %3255 = vxpose.xlu0.b32.start [1/16] (narrow) %v9490_v27, 8  ;;  %v9703_v54 = vpop.xlane.xlu0 %2395 }
 0x66d   :  { %v9705_v40 = vpop.xlane.xlu1 %2399 }
 0x66e   :  { %3256 = vxpose.xlu0.b32.cont [2/16] (narrow) %v9528_v20, 8  ;;  %v9708_v18 = vpop.xlane.xlu0 %2385  ;;  %v2830_v20 = vrot.slane %v2338_v11, %v12238_v10  ;;  %v2954_v21 = vrot.slane %v9705_v40, %v12238_v10 }
 0x66f   :  { %v2926_v25 = vrot.slane %v9708_v18, %v12238_v10 }
 0x670   :  { %v3173_v9 = vsel %vm505_vm6, %v2830_v20, %v9652_v41  ;;  %v2890_v41 = vrot.slane %v9678_v2, %v12238_v10  ;;  %v2946_v2 = vrot.slane %v9703_v54, %v12238_v10  ;;  %v3193_v54 = vsel %vm503_vm5, %v2922_v0, %v3192_v24 }
 0x671   :  { %v9712_v7 = vpop.xlane.xlu1 %2389  ;;  %v3174_v53 = vsel %vm507_vm7, %v2834_v28, %v3173_v9 }
 0x672   :  { %3257 = vxpose.xlu0.b32.cont [3/16] (narrow) %v3147_v49, 8  ;;  %v9716_v60 = vpop.xlane.xlu0 %2407  ;;  %v3175_v63 = vsel %vm509_vm8, %v2838_v51, %v3174_v53  ;;  %v3186_v11 = vsel %vm503_vm5, %v2890_v41, %v3185_v23  ;;  %v3198_v18 = vsel %vm499_vm3, %v2946_v2, %v3197_v43  ;;  %v2950_v49 = vrot.slane %v9696_v50, %v12238_v10 }
 0x673   :  { %v3187_v37 = vsel %vm505_vm6, %v2894_v57, %v3186_v11  ;;  %v2934_v40 = vrot.slane %v9712_v7, %v12238_v10  ;;  %v2974_v7 = vrot.slane %v9700_v52, %v12238_v10 }
 0x674   :  { %v3188_v33 = vsel %vm507_vm7, %v2898_v8, %v3187_v37 }
 0x675   :  { %v9718_v27 = vpop.xlane.xlu1 %2413  ;;  %v3189_v35 = vsel %vm509_vm8, %v2902_v61, %v3188_v33 }
 0x676   :  { %3258 = vxpose.xlu0.b32.cont [4/16] (narrow) %v9603_v34, 8  ;;  %v9721_v5 = vpop.xlane.xlu0 %2387  ;;  %v2858_v34 = vrot.slane %v2352_v3, %v12238_v10 }
 0x677   :  { %v2930_v14 = vrot.slane %v9721_v5, %v12238_v10  ;;  %v3194_v5 = vsel %vm505_vm6, %v2926_v25, %v3193_v54 }
 0x678   :  { %v3179_v62 = vsel %vm503_vm5, %v2858_v34, %v3178_v32  ;;  %v3199_v34 = vsel %vm501_vm4, %v2950_v49, %v3198_v18 }
 0x679   :  { %v9724_v12 = vpop.xlane.xlu1 %2425  ;;  %v3195_v47 = vsel %vm507_vm7, %v2930_v14, %v3194_v5  ;;  %v3200_v50 = vsel %vm503_vm5, %v2954_v21, %v3199_v34 }
 0x67a   :  { %3259 = vxpose.xlu0.b32.cont [5/16] (narrow) %v9639_v26, 8  ;;  %v9729_v19 = vpop.xlane.xlu0 %2411  ;;  %v3196_v22 = vsel %vm509_vm8, %v2934_v40, %v3195_v47  ;;  %v3006_v39 = vrot.slane %v9724_v12, %v12238_v10 }
 0x67b   :  { %v2978_v51 = vrot.slane %v9729_v19, %v12238_v10  ;;  %v2982_v19 = vrot.slane %v9718_v27, %v12238_v10 }
 0x67d   :  { %v9737_v29 = vpop.xlane.xlu1 %2415 }
 0x67e   :  { %3260 = vxpose.xlu0.b32.cont [6/16] (narrow) %v3168_v56, 8  ;;  %v2402_v26 = vpop.xlane.xlu0 %2401  ;;  %v3180_v56 = vsel %vm505_vm6, %v2862_v30, %v3179_v62  ;;  %v2986_v59 = vrot.slane %v9737_v29, %v12238_v10 }
 0x67f   :  { %v3181_v32 = vsel %vm507_vm7, %v2866_v46, %v3180_v56  ;;  %v2958_v20 = vrot.slane %v2402_v26, %v12238_v10  ;;  %v2970_v46 = vrot.slane %v9716_v60, %v12238_v10 }
 0x680   :  { %v3182_v31 = vsel %vm509_vm8, %v2870_v42, %v3181_v32 }
 0x681   :  { %v2406_v4 = vpop.xlane.xlu1 %2405  ;;  %v3201_v9 = vsel %vm505_vm6, %v2958_v20, %v3200_v50  ;;  %v3204_v62 = vsel %vm497_vm2, %v2974_v7, %v2970_v46 }
 0x682   :  { %3261 = vxpose.xlu0.b32.cont [7/16] (narrow) %v3175_v63, 8  ;;  %v9762_v3 = vpop.xlane.xlu0 %2423  ;;  %v2966_v36 = vrot.slane %v2406_v4, %v12238_v10  ;;  %v3205_v60 = vsel %vm499_vm3, %v2978_v51, %v3204_v62 }
 0x683   :  { %v3206_v52 = vsel %vm501_vm4, %v2982_v19, %v3205_v60  ;;  %v3002_v55 = vrot.slane %v9762_v3, %v12238_v10 }
 0x684   :  { %v3207_v4 = vsel %vm503_vm5, %v2986_v59, %v3206_v52 }
 0x685   :  { %v9783_v16 = vpop.xlane.xlu1 %2429  ;;  %v3211_v2 = vsel %vm497_vm2, %v3006_v39, %v3002_v55 }
 0x686   :  { %3262 = vxpose.xlu0.b32.cont [8/16] (narrow) %v3182_v31, 8  ;;  %v2404_v1 = vpop.xlane.xlu0 %2403  ;;  %v3014_v31 = vrot.slane %v9783_v16, %v12238_v10 }
 0x687   :  { %v2962_v28 = vrot.slane %v2404_v1, %v12238_v10 }
 0x689   :  { %v9801_v58 = vpop.xlane.xlu1 %2441  ;;  %v3202_v53 = vsel %vm507_vm7, %v2962_v28, %v3201_v9 }
 0x68a   :  { %3263 = vxpose.xlu0.b32.cont [9/16] (narrow) %v3189_v35, 8  ;;  %v2428_v6 = vpop.xlane.xlu0 %2427  ;;  %v3203_v17 = vsel %vm509_vm8, %v2966_v36, %v3202_v53  ;;  %v3038_v28 = vrot.slane %v9801_v58, %v12238_v10 }
 0x68b   :  { %v3010_v38 = vrot.slane %v2428_v6, %v12238_v10 }
 0x68d   :  { %v2432_v30 = vpop.xlane.xlu1 %2431  ;;  %v3212_v37 = vsel %vm499_vm3, %v3010_v38, %v3211_v2 }
 0x68e   :  { %3264 = vxpose.xlu0.b32.cont [10/16] (narrow) %v3196_v22, 8  ;;  %v2418_v26 = vpop.xlane.xlu0 %2417  ;;  %v3018_v25 = vrot.slane %v2432_v30, %v12238_v10  ;;  %v3213_v1 = vsel %vm501_vm4, %v3014_v31, %v3212_v37 }
 0x68f   :  { %v2990_v44 = vrot.slane %v2418_v26, %v12238_v10 }
 0x690   :  { %v3214_v24 = vsel %vm503_vm5, %v3018_v25, %v3213_v1 }
 0x691   :  { %v2422_v41 = vpop.xlane.xlu1 %2421  ;;  %v3208_v23 = vsel %vm505_vm6, %v2990_v44, %v3207_v4 }
 0x692   :  { %3265 = vxpose.xlu0.b32.cont [11/16] (narrow) %v3203_v17, 8  ;;  %v2440_v15 = vpop.xlane.xlu0 %2439  ;;  %v2998_v8 = vrot.slane %v2422_v41, %v12238_v10 }
 0x693   :  { %v3034_v5 = vrot.slane %v2440_v15, %v12238_v10 }
 0x695   :  { %v2446_v56 = vpop.xlane.xlu1 %2445  ;;  %v3218_v47 = vsel %vm497_vm2, %v3038_v28, %v3034_v5 }
 0x696   :  { %v2420_v57 = vpop.xlane.xlu0 %2419  ;;  %v3046_v9 = vrot.slane %v2446_v56, %v12238_v10 }
 0x697   :  { %v2994_v63 = vrot.slane %v2420_v57, %v12238_v10 }
 0x699   :  { %v2458_v32 = vpop.xlane.xlu1 %2457  ;;  %v3209_v29 = vsel %vm507_vm7, %v2994_v63, %v3208_v23 }
 0x69a   :  { %v2444_v11 = vpop.xlane.xlu0 %2443  ;;  %v3210_v27 = vsel %vm509_vm8, %v2998_v8, %v3209_v29  ;;  %v3070_v44 = vrot.slane %v2458_v32, %v12238_v10 }
 0x69b   :  { %3266 = vxpose.xlu0.b32.cont [12/16] (narrow) %v3210_v27, 8  ;;  %v3042_v35 = vrot.slane %v2444_v11, %v12238_v10 }
 0x69d   :  { %v2448_v42 = vpop.xlane.xlu1 %2447  ;;  %v3219_v40 = vsel %vm499_vm3, %v3042_v35, %v3218_v47 }
 0x69e   :  { %v2434_v13 = vpop.xlane.xlu0 %2433  ;;  %v3050_v50 = vrot.slane %v2448_v42, %v12238_v10  ;;  %v3220_v22 = vsel %vm501_vm4, %v3046_v9, %v3219_v40 }
 0x69f   :  { %v3022_v14 = vrot.slane %v2434_v13, %v12238_v10 }
 0x6a0   :  { %v3221_v26 = vsel %vm503_vm5, %v3050_v50, %v3220_v22  ;;  %v12273_v50 = vld [vmem:[#allocation10_spill] sm:$0xff] }
 0x6a1   :  { %v2438_v0 = vpop.xlane.xlu1 %2437  ;;  %v3215_v61 = vsel %vm505_vm6, %v3022_v14, %v3214_v24 }
 0x6a2   :  { %v2456_v45 = vpop.xlane.xlu0 %2455  ;;  %v3030_v43 = vrot.slane %v2438_v0, %v12238_v10 }
 0x6a3   :  { %v3066_v62 = vrot.slane %v2456_v45, %v12238_v10 }
 0x6a5   :  { %v2462_v3 = vpop.xlane.xlu1 %2461  ;;  %v3225_v57 = vsel %vm497_vm2, %v3070_v44, %v3066_v62  ;;  %v12279_v62 = vld [vmem:[#allocation16_spill] sm:$0xff] }
 0x6a6   :  { %v2436_v33 = vpop.xlane.xlu0 %2435  ;;  %v3078_v29 = vrot.slane %v2462_v3, %v12238_v10 }
 0x6a7   :  { %v3026_v12 = vrot.slane %v2436_v33, %v12238_v10 }
 0x6a9   :  { %v2474_v54 = vpop.xlane.xlu1 %2473  ;;  %v3216_v18 = vsel %vm507_vm7, %v3026_v12, %v3215_v61 }
 0x6aa   :  { %v2460_v21 = vpop.xlane.xlu0 %2459  ;;  %v3217_v16 = vsel %vm509_vm8, %v3030_v43, %v3216_v18  ;;  %v3102_v52 = vrot.slane %v2474_v54, %v12238_v10  ;;  %v9902_v18 = vld [vmem:[%s11797_s4] sm:$0xff] }
 0x6ab   :  { %3267 = vxpose.xlu0.b32.cont [13/16] (narrow) %v3217_v16, 8  ;;  %v3074_v60 = vrot.slane %v2460_v21, %v12238_v10  ;;  %12272 = vst [vmem:[#allocation129_spill] sm:$0xff] %v9902_v18  ;;  %vm3287_vm11 = vcmp.gt.f32.partialorder %v9902_v18, 0.5 }
 0x6ad   :  { %v2464_v49 = vpop.xlane.xlu1 %2463  ;;  %v3226_v4 = vsel %vm499_vm3, %v3074_v60, %v3225_v57  ;;  %v12280_v60 = vld [vmem:[#allocation15_spill] sm:$0xff] }
 0x6ae   :  { %v2450_v20 = vpop.xlane.xlu0 %2449  ;;  %v3082_v63 = vrot.slane %v2464_v49, %v12238_v10  ;;  %v3227_v13 = vsel %vm501_vm4, %v3078_v29, %v3226_v4 }
 0x6af   :  { %v3054_v30 = vrot.slane %v2450_v20, %v12238_v10 }
 0x6b0   :  { %v3228_v38 = vsel %vm503_vm5, %v3082_v63, %v3227_v13 }
 0x6b1   :  { %v2454_v6 = vpop.xlane.xlu1 %2453  ;;  %v3222_v51 = vsel %vm505_vm6, %v3054_v30, %v3221_v26  ;;  %v12274_v30 = vld [vmem:[#allocation8_spill] sm:$0xff] }
 0x6b2   :  { %v2472_v34 = vpop.xlane.xlu0 %2471  ;;  %v3062_v36 = vrot.slane %v2454_v6, %v12238_v10 }
 0x6b3   :  { %v3098_v59 = vrot.slane %v2472_v34, %v12238_v10 }
 0x6b5   :  { %v2478_v53 = vpop.xlane.xlu1 %2477  ;;  %v3232_v23 = vsel %vm497_vm2, %v3102_v52, %v3098_v59 }
 0x6b6   :  { %v2452_v46 = vpop.xlane.xlu0 %2451  ;;  %v3110_v42 = vrot.slane %v2478_v53, %v12238_v10  ;;  %v12276_v53 = vld [vmem:[#allocation11_spill] sm:$0xff] }
 0x6b7   :  { %v3058_v58 = vrot.slane %v2452_v46, %v12238_v10  ;;  %v12275_v46 = vld [vmem:[#allocation12_spill] sm:$0xff] }
 0x6b9   :  { %v3223_v7 = vsel %vm507_vm7, %v3058_v58, %v3222_v51  ;;  %v2480_v15 = vpop.xlane.xlu1 %2479  ;;  %v12277_v51 = vld [vmem:[#allocation14_spill] sm:$0xff] }
 0x6ba   :  { %v2476_v41 = vpop.xlane.xlu0 %2475  ;;  %v3224_v17 = vsel %vm509_vm8, %v3062_v36, %v3223_v7  ;;  %v3114_v2 = vrot.slane %v2480_v15, %v12238_v10  ;;  %v12278_v7 = vld [vmem:[#allocation13_spill] sm:$0xff] }
 0x6bb   :  { %3268 = vxpose.xlu0.b32.cont [14/16] (narrow) %v3224_v17, 8  ;;  %v3106_v56 = vrot.slane %v2476_v41, %v12238_v10 }
 0x6bd   :  { %v3233_v11 = vsel %vm499_vm3, %v3106_v56, %v3232_v23  ;;  %v2482_v27 = vpop.xlane.xlu1 %2481 }
 0x6be   :  { %v2466_v19 = vpop.xlane.xlu0 %2465  ;;  %v3234_v39 = vsel %vm501_vm4, %v3110_v42, %v3233_v11  ;;  %v3118_v25 = vrot.slane %v2482_v27, %v12238_v10 }
 0x6bf   :  { %v3086_v32 = vrot.slane %v2466_v19, %v12238_v10  ;;  %v3235_v14 = vsel %vm503_vm5, %v3114_v2, %v3234_v39 }
 0x6c0   :  { %v3236_v12 = vsel %vm505_vm6, %v3118_v25, %v3235_v14 }
 0x6c1   :  { %v3229_v45 = vsel %vm505_vm6, %v3086_v32, %v3228_v38  ;;  %v2486_v3 = vpop.xlane.xlu1 %2485 }
 0x6c2   :  { %v2468_v8 = vpop.xlane.xlu0 %2467  ;;  %v3126_v61 = vrot.slane %v2486_v3, %v12238_v10 }
 0x6c3   :  { %v3090_v55 = vrot.slane %v2468_v8, %v12238_v10 }
 0x6c5   :  { %v3230_v31 = vsel %vm507_vm7, %v3090_v55, %v3229_v45 }
 0x6c6   :  { %v2470_v0 = vpop.xlane.xlu0 %2469 }
 0x6c7   :  { %v3094_v37 = vrot.slane %v2470_v0, %v12238_v10 }
 0x6c9   :  { %v3231_v1 = vsel %vm509_vm8, %v3094_v37, %v3230_v31 }
 0x6ca   :  { %3269 = vxpose.xlu0.b32.cont [15/16] (narrow) %v3231_v1, 8  ;;  %v2484_v33 = vpop.xlane.xlu0 %2483 }
 0x6cb   :  { %v3122_v24 = vrot.slane %v2484_v33, %v12238_v10 }
 0x6cd   :  { %v3237_v43 = vsel %vm507_vm7, %v3122_v24, %v3236_v12 }
 0x6ce   :  { %v3238_v54 = vsel %vm509_vm8, %v3126_v61, %v3237_v43 }
 0x6cf   :  { %3270 = vxpose.xlu0.b32.end [16/16] (narrow) %v3238_v54, 8 }
 0x713   :  { %v3271_v21 = vpop.trf.xlu0 }
 0x714   :  { %v3288_v16 = vsel %vm3287_vm11, %v3271_v21, -1e+30 }
 0x715   :  { %3290 = vmax.xlane.f32.xlu1 %v3288_v16  ;;  %3289 = vst [vmem:[#allocation2] sm:$0xff] %v3288_v16 }
 0x7a2   :  { %v3291_v49 = vpop.xlane.xlu1 %3290 }
 0x7a3   :  { %v3292_v5 = vsub.f32 %v3288_v16, %v3291_v49 }
 0x7a5   :  { %v3293_v20 = vmul.f32 1.442695, %v3292_v5 }
 0x7a7   :  { %7286 = vpow2.f32 %v3293_v20 }
 0x7b1   :  { %v7287_v35 = vpop.eup %7286 }
 0x7b2   :  { %3295 = vadd.xlane.f32.xlu1 %v7287_v35 }
 0x83f   :  { %v3296_v28 = vpop.xlane.xlu1 %3295 }
 0x840   :  { %v3297_v6 = vmax.f32 %v3296_v28, 1e-30 }
 0x842   :  { %7288 = vrcp.f32 %v3297_v6 }
 0x84c   :  { %v7289_v47 = vpop.eup %7288 }
 0x84d   :  { %v3299_v34 = vmul.f32 %v7289_v47, %v7287_v35 }
 0x84f   :  { %3300 = vxpose.xlu1.b32.start.end [1/1] (short) %v3299_v34, 128 }
 0x8cf   :  { %v3316_v40 = vpop.trf.xlu1 }
 0x8d0   :  { %v3342_v9 = vrot.slane %v3316_v40, %v12273_v50  ;;  %v3335_v22 = vrot.slane %v3316_v40, %v12274_v30  ;;  %v3349_v26 = vrot.slane %v3316_v40, %v12275_v46  ;;  %v3356_v58 = vrot.slane %v3316_v40, %v12276_v53 }
 0x8d1   :  { %v3363_v36 = vrot.slane %v3316_v40, %v12277_v51  ;;  %v3370_v41 = vrot.slane %v3316_v40, %v12278_v7  ;;  %v3377_v15 = vrot.slane %v3316_v40, %v12279_v62  ;;  %v3384_v59 = vrot.slane %v3316_v40, %v12280_v60 }
 0x8d2   :  { %3344 = vbcast.lane.b32.xlu0 %v3342_v9, 256  ;;  %3337 = vbcast.lane.b32.xlu1 %v3335_v22, 256 }
 0x8d3   :  { %v3317_v17 = vpop.trf.xlu1 }
 0x8d4   :  { %v3398_v19 = vrot.slane %v3317_v17, %v12273_v50  ;;  %v3391_v44 = vrot.slane %v3317_v17, %v12274_v30  ;;  %v3412_v56 = vrot.slane %v3317_v17, %v12276_v53  ;;  %v3405_v52 = vrot.slane %v3317_v17, %v12275_v46 }
 0x8d5   :  { %v3426_v57 = vrot.slane %v3317_v17, %v12278_v7  ;;  %v3419_v4 = vrot.slane %v3317_v17, %v12277_v51  ;;  %v3440_v23 = vrot.slane %v3317_v17, %v12280_v60  ;;  %v3433_v8 = vrot.slane %v3317_v17, %v12279_v62 }
 0x8d6   :  { %3351 = vbcast.lane.b32.xlu0 %v3349_v26, 256  ;;  %3358 = vbcast.lane.b32.xlu1 %v3356_v58, 256 }
 0x8d7   :  { %v3318_v63 = vpop.trf.xlu1 }
 0x8d8   :  { %v3454_v29 = vrot.slane %v3318_v63, %v12273_v50  ;;  %v3447_v11 = vrot.slane %v3318_v63, %v12274_v30  ;;  %v3468_v27 = vrot.slane %v3318_v63, %v12276_v53  ;;  %v3461_v32 = vrot.slane %v3318_v63, %v12275_v46 }
 0x8d9   :  { %v3482_v42 = vrot.slane %v3318_v63, %v12278_v7  ;;  %v3475_v55 = vrot.slane %v3318_v63, %v12277_v51  ;;  %v3496_v38 = vrot.slane %v3318_v63, %v12280_v60  ;;  %v3489_v39 = vrot.slane %v3318_v63, %v12279_v62 }
 0x8da   :  { %3365 = vbcast.lane.b32.xlu0 %v3363_v36, 256  ;;  %3372 = vbcast.lane.b32.xlu1 %v3370_v41, 256 }
 0x8db   :  { %v3319_v13 = vpop.trf.xlu1 }
 0x8dc   :  { %v3510_v0 = vrot.slane %v3319_v13, %v12273_v50  ;;  %v3503_v2 = vrot.slane %v3319_v13, %v12274_v30  ;;  %v3524_v25 = vrot.slane %v3319_v13, %v12276_v53  ;;  %v3517_v31 = vrot.slane %v3319_v13, %v12275_v46 }
 0x8dd   :  { %v3538_v14 = vrot.slane %v3319_v13, %v12278_v7  ;;  %v3531_v3 = vrot.slane %v3319_v13, %v12277_v51  ;;  %v3552_v33 = vrot.slane %v3319_v13, %v12280_v60  ;;  %v3545_v24 = vrot.slane %v3319_v13, %v12279_v62  ;;  %v7553_v13 = vld [vmem:[%s11796_s3 + $0x8] sm:$0xff] }
 0x8de   :  { %3379 = vbcast.lane.b32.xlu0 %v3377_v15, 256  ;;  %3386 = vbcast.lane.b32.xlu1 %v3384_v59, 256 }
 0x8df   :  { %v3320_v45 = vpop.trf.xlu1 }
 0x8e0   :  { %v3566_v12 = vrot.slane %v3320_v45, %v12273_v50  ;;  %v3559_v61 = vrot.slane %v3320_v45, %v12274_v30  ;;  %v3580_v54 = vrot.slane %v3320_v45, %v12276_v53  ;;  %v3573_v21 = vrot.slane %v3320_v45, %v12275_v46 }
 0x8e1   :  { %v3594_v49 = vrot.slane %v3320_v45, %v12278_v7  ;;  %v3587_v5 = vrot.slane %v3320_v45, %v12277_v51  ;;  %v3608_v35 = vrot.slane %v3320_v45, %v12280_v60  ;;  %v3601_v28 = vrot.slane %v3320_v45, %v12279_v62 }
 0x8e2   :  { %3400 = vbcast.lane.b32.xlu1 %v3398_v19, 256  ;;  %3393 = vbcast.lane.b32.xlu0 %v3391_v44, 256 }
 0x8e3   :  { %v3321_v37 = vpop.trf.xlu1 }
 0x8e4   :  { %v3622_v6 = vrot.slane %v3321_v37, %v12273_v50  ;;  %v3615_v47 = vrot.slane %v3321_v37, %v12274_v30  ;;  %v3636_v40 = vrot.slane %v3321_v37, %v12276_v53  ;;  %v3629_v9 = vrot.slane %v3321_v37, %v12275_v46 }
 0x8e5   :  { %v3650_v26 = vrot.slane %v3321_v37, %v12278_v7  ;;  %v3643_v58 = vrot.slane %v3321_v37, %v12277_v51  ;;  %v3664_v36 = vrot.slane %v3321_v37, %v12280_v60  ;;  %v3657_v41 = vrot.slane %v3321_v37, %v12279_v62 }
 0x8e6   :  { %3414 = vbcast.lane.b32.xlu1 %v3412_v56, 256  ;;  %3407 = vbcast.lane.b32.xlu0 %v3405_v52, 256 }
 0x8e7   :  { %v3322_v1 = vpop.trf.xlu1 }
 0x8e8   :  { %v3678_v15 = vrot.slane %v3322_v1, %v12273_v50  ;;  %v3671_v59 = vrot.slane %v3322_v1, %v12274_v30  ;;  %v3692_v44 = vrot.slane %v3322_v1, %v12276_v53  ;;  %v3685_v56 = vrot.slane %v3322_v1, %v12275_v46 }
 0x8e9   :  { %v3706_v52 = vrot.slane %v3322_v1, %v12278_v7  ;;  %v3720_v63 = vrot.slane %v3322_v1, %v12280_v60 }
 0x8ea   :  { %3428 = vbcast.lane.b32.xlu1 %v3426_v57, 256  ;;  %3421 = vbcast.lane.b32.xlu0 %v3419_v4, 256  ;;  %v3699_v57 = vrot.slane %v3322_v1, %v12277_v51 }
 0x8eb   :  { %v9941_v43 = vpop.trf.xlu1 }
 0x8ee   :  { %3442 = vbcast.lane.b32.xlu1 %v3440_v23, 256  ;;  %3435 = vbcast.lane.b32.xlu0 %v3433_v8, 256  ;;  %v3713_v23 = vrot.slane %v3322_v1, %v12279_v62 }
 0x8ef   :  { %v9945_v16 = vpop.trf.xlu1 }
 0x8f2   :  { %3456 = vbcast.lane.b32.xlu1 %v3454_v29, 256  ;;  %3449 = vbcast.lane.b32.xlu0 %v3447_v11, 256  ;;  %v3734_v29 = vrot.slane %v9941_v43, %v12273_v50  ;;  %v3727_v11 = vrot.slane %v9941_v43, %v12274_v30 }
 0x8f3   :  { %v9949_v20 = vpop.trf.xlu1 }
 0x8f6   :  { %3470 = vbcast.lane.b32.xlu1 %v3468_v27, 256  ;;  %3463 = vbcast.lane.b32.xlu0 %v3461_v32, 256 }
 0x8f7   :  { %v9955_v34 = vpop.trf.xlu1 }
 0x8fa   :  { %3484 = vbcast.lane.b32.xlu1 %v3482_v42, 256  ;;  %3477 = vbcast.lane.b32.xlu0 %v3475_v55, 256  ;;  %v3748_v42 = vrot.slane %v9941_v43, %v12276_v53  ;;  %v3741_v55 = vrot.slane %v9941_v43, %v12275_v46 }
 0x8fb   :  { %v9959_v22 = vpop.trf.xlu1 }
 0x8fe   :  { %3498 = vbcast.lane.b32.xlu1 %v3496_v38, 256  ;;  %3491 = vbcast.lane.b32.xlu0 %v3489_v39, 256  ;;  %v7554_v39 = vld [vmem:[%s11796_s3] sm:$0xff] }
 0x8ff   :  { %v9965_v17 = vpop.trf.xlu1 }
 0x902   :  { %3512 = vbcast.lane.b32.xlu1 %v3510_v0, 256  ;;  %3505 = vbcast.lane.b32.xlu0 %v3503_v2, 256 }
 0x903   :  { %v9969_v19 = vpop.trf.xlu1 }
 0x906   :  { %3526 = vbcast.lane.b32.xlu1 %v3524_v25, 256  ;;  %3519 = vbcast.lane.b32.xlu0 %v3517_v31, 256  ;;  %v3762_v31 = vrot.slane %v9941_v43, %v12278_v7 }
 0x907   :  { %v9975_v4 = vpop.trf.xlu1 }
 0x90a   :  { %3540 = vbcast.lane.b32.xlu1 %v3538_v14, 256  ;;  %3533 = vbcast.lane.b32.xlu0 %v3531_v3, 256  ;;  %v3755_v14 = vrot.slane %v9941_v43, %v12277_v51  ;;  %v7555_v3 = vld [vmem:[%s11796_s3 + $0x10] sm:$0xff] }
 0x90b   :  { %v9979_v8 = vpop.trf.xlu1 }
 0x90e   :  { %3554 = vbcast.lane.b32.xlu1 %v3552_v33, 256  ;;  %3547 = vbcast.lane.b32.xlu0 %v3545_v24, 256  ;;  %v7556_v33 = vld [vmem:[%s11796_s3 + $0x18] sm:$0xff] }
 0x912   :  { %3568 = vbcast.lane.b32.xlu1 %v3566_v12, 256  ;;  %3561 = vbcast.lane.b32.xlu0 %v3559_v61, 256 }
 0x916   :  { %3582 = vbcast.lane.b32.xlu1 %v3580_v54, 256  ;;  %3575 = vbcast.lane.b32.xlu0 %v3573_v21, 256 }
 0x91a   :  { %3596 = vbcast.lane.b32.xlu1 %v3594_v49, 256  ;;  %3589 = vbcast.lane.b32.xlu0 %v3587_v5, 256  ;;  %v3776_v5 = vrot.slane %v9941_v43, %v12280_v60 }
 0x91e   :  { %3610 = vbcast.lane.b32.xlu1 %v3608_v35, 256  ;;  %3603 = vbcast.lane.b32.xlu0 %v3601_v28, 256  ;;  %v3769_v35 = vrot.slane %v9941_v43, %v12279_v62 }
 0x922   :  { %3624 = vbcast.lane.b32.xlu1 %v3622_v6, 256  ;;  %3617 = vbcast.lane.b32.xlu0 %v3615_v47, 256  ;;  %v7557_v6 = vld [vmem:[%s11796_s3 + $0x20] sm:$0xff] }
 0x926   :  { %3638 = vbcast.lane.b32.xlu1 %v3636_v40, 256  ;;  %3631 = vbcast.lane.b32.xlu0 %v3629_v9, 256  ;;  %v7558_v40 = vld [vmem:[%s11796_s3 + $0x28] sm:$0xff] }
 0x92a   :  { %3652 = vbcast.lane.b32.xlu1 %v3650_v26, 256  ;;  %3645 = vbcast.lane.b32.xlu0 %v3643_v58, 256 }
 0x92e   :  { %3666 = vbcast.lane.b32.xlu1 %v3664_v36, 256  ;;  %3659 = vbcast.lane.b32.xlu0 %v3657_v41, 256 }
 0x932   :  { %3680 = vbcast.lane.b32.xlu1 %v3678_v15, 256  ;;  %3673 = vbcast.lane.b32.xlu0 %v3671_v59, 256  ;;  %v3790_v15 = vrot.slane %v9945_v16, %v12273_v50  ;;  %v3783_v59 = vrot.slane %v9945_v16, %v12274_v30 }
 0x936   :  { %3694 = vbcast.lane.b32.xlu1 %v3692_v44, 256  ;;  %3687 = vbcast.lane.b32.xlu0 %v3685_v56, 256  ;;  %v7559_v56 = vld [vmem:[%s11796_s3 + $0x30] sm:$0xff] }
 0x93a   :  { %3708 = vbcast.lane.b32.xlu1 %v3706_v52, 256  ;;  %3701 = vbcast.lane.b32.xlu0 %v3699_v57, 256  ;;  %v7560_v57 = vld [vmem:[%s11796_s3 + $0x38] sm:$0xff] }
 0x93e   :  { %3722 = vbcast.lane.b32.xlu1 %v3720_v63, 256  ;;  %3715 = vbcast.lane.b32.xlu0 %v3713_v23, 256 }
 0x942   :  { %3736 = vbcast.lane.b32.xlu1 %v3734_v29, 256  ;;  %3729 = vbcast.lane.b32.xlu0 %v3727_v11, 256 }
 0x944   :  { %v3345_v27 = vpop.permute.xlu0 %3344  ;;  %v3338_v32 = vpop.permute.xlu1 %3337 }
 0x945   :  { %v4229_v38 = vmul.f32 %v7553_v13, %v3345_v27  ;;  %v4228_v0 = vmul.f32 %v7554_v39, %v3338_v32 }
 0x946   :  { %3750 = vbcast.lane.b32.xlu1 %v3748_v42, 256  ;;  %3743 = vbcast.lane.b32.xlu0 %v3741_v55, 256  ;;  %v3804_v42 = vrot.slane %v9945_v16, %v12276_v53  ;;  %v3797_v55 = vrot.slane %v9945_v16, %v12275_v46 }
 0x947   :  { %v4357_v2 = vsel %vm196_vm1, %v4229_v38, 0.0  ;;  %v4356_v45 = vsel %vm196_vm1, %v4228_v0, 0.0  ;;  %v7561_v38 = vld [vmem:[%s11796_s3 + $0x40] sm:$0xff]  ;;  %v7562_v0 = vld [vmem:[%s11796_s3 + $0x48] sm:$0xff] }
 0x948   :  { %v3352_v37 = vpop.permute.xlu0 %3351  ;;  %v3359_v25 = vpop.permute.xlu1 %3358  ;;  %v4358_v12 = vadd.f32 %v4357_v2, %v4356_v45 }
 0x949   :  { %v4230_v1 = vmul.f32 %v7555_v3, %v3352_v37  ;;  %v4231_v24 = vmul.f32 %v7556_v33, %v3359_v25  ;;  %v3818_v3 = vrot.slane %v9945_v16, %v12278_v7 }
 0x94a   :  { %3764 = vbcast.lane.b32.xlu1 %v3762_v31, 256  ;;  %3757 = vbcast.lane.b32.xlu0 %v3755_v14, 256 }
 0x94b   :  { %v4359_v61 = vsel %vm196_vm1, %v4230_v1, 0.0  ;;  %v4361_v28 = vsel %vm196_vm1, %v4231_v24, 0.0  ;;  %v3811_v1 = vrot.slane %v9945_v16, %v12277_v51  ;;  %v7563_v24 = vld [vmem:[%s11796_s3 + $0x50] sm:$0xff] }
 0x94c   :  { %v4360_v54 = vadd.f32 %v4359_v61, %v4358_v12  ;;  %v3366_v21 = vpop.permute.xlu0 %3365  ;;  %v3373_v49 = vpop.permute.xlu1 %3372  ;;  %v7564_v61 = vld [vmem:[%s11796_s3 + $0x58] sm:$0xff] }
 0x94d   :  { %v4232_v47 = vmul.f32 %v7557_v6, %v3366_v21  ;;  %v4233_v9 = vmul.f32 %v7558_v40, %v3373_v49  ;;  %v3832_v6 = vrot.slane %v9945_v16, %v12280_v60 }
 0x94e   :  { %v4362_v26 = vadd.f32 %v4361_v28, %v4360_v54  ;;  %3778 = vbcast.lane.b32.xlu1 %v3776_v5, 256  ;;  %3771 = vbcast.lane.b32.xlu0 %v3769_v35, 256 }
 0x94f   :  { %v4363_v58 = vsel %vm196_vm1, %v4232_v47, 0.0  ;;  %v4365_v44 = vsel %vm196_vm1, %v4233_v9, 0.0  ;;  %v3825_v47 = vrot.slane %v9945_v16, %v12279_v62  ;;  %v7565_v9 = vld [vmem:[%s11796_s3 + $0x60] sm:$0xff] }
 0x950   :  { %v4364_v36 = vadd.f32 %v4363_v58, %v4362_v26  ;;  %v3380_v41 = vpop.permute.xlu0 %3379  ;;  %v3387_v43 = vpop.permute.xlu1 %3386  ;;  %v7566_v58 = vld [vmem:[%s11796_s3 + $0x68] sm:$0xff] }
 0x951   :  { %v4234_v52 = vmul.f32 %v7559_v56, %v3380_v41  ;;  %v4235_v63 = vmul.f32 %v7560_v57, %v3387_v43  ;;  %v3839_v56 = vrot.slane %v9949_v20, %v12274_v30  ;;  %v7567_v57 = vld [vmem:[%s11796_s3 + $0x70] sm:$0xff] }
 0x952   :  { %v4366_v23 = vadd.f32 %v4365_v44, %v4364_v36  ;;  %3792 = vbcast.lane.b32.xlu1 %v3790_v15, 256  ;;  %3785 = vbcast.lane.b32.xlu0 %v3783_v59, 256  ;;  %v3846_v44 = vrot.slane %v9949_v20, %v12273_v50 }
 0x953   :  { %v4367_v29 = vsel %vm196_vm1, %v4234_v52, 0.0  ;;  %v4369_v13 = vsel %vm196_vm1, %v4235_v63, 0.0 }
 0x954   :  { %v4368_v11 = vadd.f32 %v4367_v29, %v4366_v23  ;;  %v3394_v27 = vpop.permute.xlu0 %3393  ;;  %v3401_v32 = vpop.permute.xlu1 %3400  ;;  %v7568_v23 = vld [vmem:[%s11796_s3 + $0x78] sm:$0xff] }
 0x955   :  { %v4236_v39 = vmul.f32 %v7561_v38, %v3394_v27  ;;  %v4237_v2 = vmul.f32 %v7562_v0, %v3401_v32  ;;  %v3853_v38 = vrot.slane %v9949_v20, %v12275_v46  ;;  %v7569_v0 = vld [vmem:[%s11796_s3 + $0x80] sm:$0xff] }
 0x956   :  { %v4370_v45 = vadd.f32 %v4369_v13, %v4368_v11  ;;  %3806 = vbcast.lane.b32.xlu1 %v3804_v42, 256  ;;  %3799 = vbcast.lane.b32.xlu0 %v3797_v55, 256  ;;  %v3860_v13 = vrot.slane %v9949_v20, %v12276_v53 }
 0x957   :  { %v4371_v37 = vsel %vm196_vm1, %v4236_v39, 0.0  ;;  %v4373_v33 = vsel %vm196_vm1, %v4237_v2, 0.0 }
 0x958   :  { %v4372_v25 = vadd.f32 %v4371_v37, %v4370_v45  ;;  %v3408_v31 = vpop.permute.xlu0 %3407  ;;  %v3415_v14 = vpop.permute.xlu1 %3414  ;;  %v7570_v45 = vld [vmem:[%s11796_s3 + $0x88] sm:$0xff] }
 0x959   :  { %v4238_v12 = vmul.f32 %v7563_v24, %v3408_v31  ;;  %v4239_v54 = vmul.f32 %v7564_v61, %v3415_v14  ;;  %v3867_v24 = vrot.slane %v9949_v20, %v12277_v51  ;;  %v7571_v61 = vld [vmem:[%s11796_s3 + $0x90] sm:$0xff] }
 0x95a   :  { %v4374_v21 = vadd.f32 %v4373_v33, %v4372_v25  ;;  %3820 = vbcast.lane.b32.xlu1 %v3818_v3, 256  ;;  %3813 = vbcast.lane.b32.xlu0 %v3811_v1, 256  ;;  %v3874_v33 = vrot.slane %v9949_v20, %v12278_v7 }
 0x95b   :  { %v4375_v49 = vsel %vm196_vm1, %v4238_v12, 0.0  ;;  %v4377_v40 = vsel %vm196_vm1, %v4239_v54, 0.0 }
 0x95c   :  { %v4376_v5 = vadd.f32 %v4375_v49, %v4374_v21  ;;  %v3422_v35 = vpop.permute.xlu0 %3421  ;;  %v3429_v28 = vpop.permute.xlu1 %3428  ;;  %v7572_v21 = vld [vmem:[%s11796_s3 + $0x98] sm:$0xff] }
 0x95d   :  { %v4240_v26 = vmul.f32 %v7565_v9, %v3422_v35  ;;  %v4241_v36 = vmul.f32 %v7566_v58, %v3429_v28  ;;  %v3881_v9 = vrot.slane %v9949_v20, %v12279_v62  ;;  %v7573_v58 = vld [vmem:[%s11796_s3 + $0xa0] sm:$0xff] }
 0x95e   :  { %v4378_v41 = vadd.f32 %v4377_v40, %v4376_v5  ;;  %3834 = vbcast.lane.b32.xlu1 %v3832_v6, 256  ;;  %3827 = vbcast.lane.b32.xlu0 %v3825_v47, 256  ;;  %v3888_v40 = vrot.slane %v9949_v20, %v12280_v60 }
 0x95f   :  { %v4379_v43 = vsel %vm196_vm1, %v4240_v26, 0.0  ;;  %v4381_v52 = vsel %vm196_vm1, %v4241_v36, 0.0 }
 0x960   :  { %v4380_v15 = vadd.f32 %v4379_v43, %v4378_v41  ;;  %v3436_v59 = vpop.permute.xlu0 %3435  ;;  %v3443_v16 = vpop.permute.xlu1 %3442  ;;  %v7574_v41 = vld [vmem:[%s11796_s3 + $0xa8] sm:$0xff] }
 0x961   :  { %v4242_v63 = vmul.f32 %v7567_v57, %v3436_v59  ;;  %v4243_v29 = vmul.f32 %v7568_v23, %v3443_v16 }
 0x962   :  { %v4382_v11 = vadd.f32 %v4381_v52, %v4380_v15  ;;  %3848 = vbcast.lane.b32.xlu1 %v3846_v44, 256  ;;  %3841 = vbcast.lane.b32.xlu0 %v3839_v56, 256  ;;  %v3902_v56 = vrot.slane %v9955_v34, %v12273_v50  ;;  %v3895_v52 = vrot.slane %v9955_v34, %v12274_v30 }
 0x963   :  { %v4383_v27 = vsel %vm196_vm1, %v4242_v63, 0.0  ;;  %v4385_v39 = vsel %vm196_vm1, %v4243_v29, 0.0  ;;  %v7575_v63 = vld [vmem:[%s11796_s3 + $0xb0] sm:$0xff]  ;;  %v7576_v29 = vld [vmem:[%s11796_s3 + $0xb8] sm:$0xff] }
 0x964   :  { %v4384_v32 = vadd.f32 %v4383_v27, %v4382_v11  ;;  %v3450_v42 = vpop.permute.xlu0 %3449  ;;  %v3457_v55 = vpop.permute.xlu1 %3456 }
 0x965   :  { %v4244_v2 = vmul.f32 %v7569_v0, %v3450_v42  ;;  %v4245_v37 = vmul.f32 %v7570_v45, %v3457_v55 }
 0x966   :  { %v4386_v25 = vadd.f32 %v4385_v39, %v4384_v32  ;;  %3862 = vbcast.lane.b32.xlu1 %v3860_v13, 256  ;;  %3855 = vbcast.lane.b32.xlu0 %v3853_v38, 256  ;;  %v3916_v38 = vrot.slane %v9955_v34, %v12276_v53  ;;  %v3909_v39 = vrot.slane %v9955_v34, %v12275_v46 }
 0x967   :  { %v4387_v31 = vsel %vm196_vm1, %v4244_v2, 0.0  ;;  %v4389_v12 = vsel %vm196_vm1, %v4245_v37, 0.0  ;;  %v7577_v2 = vld [vmem:[%s11796_s3 + $0xc0] sm:$0xff]  ;;  %v7578_v37 = vld [vmem:[%s11796_s3 + $0xc8] sm:$0xff] }
 0x968   :  { %v4388_v14 = vadd.f32 %v4387_v31, %v4386_v25  ;;  %v3464_v3 = vpop.permute.xlu0 %3463  ;;  %v3471_v1 = vpop.permute.xlu1 %3470 }
 0x969   :  { %v4246_v54 = vmul.f32 %v7571_v61, %v3464_v3  ;;  %v4247_v49 = vmul.f32 %v7572_v21, %v3471_v1 }
 0x96a   :  { %v4390_v5 = vadd.f32 %v4389_v12, %v4388_v14  ;;  %3876 = vbcast.lane.b32.xlu1 %v3874_v33, 256  ;;  %3869 = vbcast.lane.b32.xlu0 %v3867_v24, 256  ;;  %v3930_v24 = vrot.slane %v9955_v34, %v12278_v7  ;;  %v3923_v12 = vrot.slane %v9955_v34, %v12277_v51 }
 0x96b   :  { %v4391_v35 = vsel %vm196_vm1, %v4246_v54, 0.0  ;;  %v4393_v26 = vsel %vm196_vm1, %v4247_v49, 0.0  ;;  %v7579_v54 = vld [vmem:[%s11796_s3 + $0xd0] sm:$0xff]  ;;  %v7580_v49 = vld [vmem:[%s11796_s3 + $0xd8] sm:$0xff] }
 0x96c   :  { %v4392_v28 = vadd.f32 %v4391_v35, %v4390_v5  ;;  %v3478_v6 = vpop.permute.xlu0 %3477  ;;  %v3485_v47 = vpop.permute.xlu1 %3484 }
 0x96d   :  { %v4248_v36 = vmul.f32 %v7573_v58, %v3478_v6  ;;  %v4249_v43 = vmul.f32 %v7574_v41, %v3485_v47 }
 0x96e   :  { %v4394_v15 = vadd.f32 %v4393_v26, %v4392_v28  ;;  %3890 = vbcast.lane.b32.xlu1 %v3888_v40, 256  ;;  %3883 = vbcast.lane.b32.xlu0 %v3881_v9, 256  ;;  %v3944_v9 = vrot.slane %v9955_v34, %v12280_v60  ;;  %v3937_v26 = vrot.slane %v9955_v34, %v12279_v62 }
 0x96f   :  { %v4395_v59 = vsel %vm196_vm1, %v4248_v36, 0.0  ;;  %v4397_v57 = vsel %vm196_vm1, %v4249_v43, 0.0  ;;  %v7581_v36 = vld [vmem:[%s11796_s3 + $0xe0] sm:$0xff]  ;;  %v7582_v43 = vld [vmem:[%s11796_s3 + $0xe8] sm:$0xff] }
 0x970   :  { %v4396_v16 = vadd.f32 %v4395_v59, %v4394_v15  ;;  %v3492_v44 = vpop.permute.xlu0 %3491  ;;  %v3499_v20 = vpop.permute.xlu1 %3498 }
 0x971   :  { %v4250_v23 = vmul.f32 %v7575_v63, %v3492_v44  ;;  %v4251_v11 = vmul.f32 %v7576_v29, %v3499_v20  ;;  %v7583_v63 = vld [vmem:[%s11796_s3 + $0xf0] sm:$0xff]  ;;  %v7584_v29 = vld [vmem:[%s11796_s3 + $0xf8] sm:$0xff] }
 0x972   :  { %v4398_v27 = vadd.f32 %v4397_v57, %v4396_v16  ;;  %3904 = vbcast.lane.b32.xlu1 %v3902_v56, 256  ;;  %3897 = vbcast.lane.b32.xlu0 %v3895_v52, 256  ;;  %v3958_v56 = vrot.slane %v9959_v22, %v12273_v50  ;;  %v3951_v52 = vrot.slane %v9959_v22, %v12274_v30 }
 0x973   :  { %v4399_v32 = vsel %vm196_vm1, %v4250_v23, 0.0  ;;  %v4401_v0 = vsel %vm196_vm1, %v4251_v11, 0.0 }
 0x974   :  { %v4400_v42 = vadd.f32 %v4399_v32, %v4398_v27  ;;  %v3506_v55 = vpop.permute.xlu0 %3505  ;;  %v3513_v13 = vpop.permute.xlu1 %3512 }
 0x975   :  { %v4252_v45 = vmul.f32 %v7577_v2, %v3506_v55  ;;  %v4253_v25 = vmul.f32 %v7578_v37, %v3513_v13  ;;  %v7585_v2 = vld [vmem:[%s11796_s3 + $0x100] sm:$0xff]  ;;  %v7586_v37 = vld [vmem:[%s11796_s3 + $0x108] sm:$0xff] }
 0x976   :  { %v4402_v31 = vadd.f32 %v4401_v0, %v4400_v42  ;;  %3918 = vbcast.lane.b32.xlu1 %v3916_v38, 256  ;;  %3911 = vbcast.lane.b32.xlu0 %v3909_v39, 256  ;;  %v3965_v38 = vrot.slane %v9959_v22, %v12275_v46  ;;  %v3972_v39 = vrot.slane %v9959_v22, %v12276_v53 }
 0x977   :  { %v4403_v14 = vsel %vm196_vm1, %v4252_v45, 0.0  ;;  %v4405_v61 = vsel %vm196_vm1, %v4253_v25, 0.0 }
 0x978   :  { %v4404_v3 = vadd.f32 %v4403_v14, %v4402_v31  ;;  %v3520_v1 = vpop.permute.xlu0 %3519  ;;  %v3527_v33 = vpop.permute.xlu1 %3526 }
 0x979   :  { %v4254_v21 = vmul.f32 %v7579_v54, %v3520_v1  ;;  %v4255_v5 = vmul.f32 %v7580_v49, %v3527_v33  ;;  %v7587_v54 = vld [vmem:[%s11796_s3 + $0x110] sm:$0xff]  ;;  %v7588_v49 = vld [vmem:[%s11796_s3 + $0x118] sm:$0xff] }
 0x97a   :  { %v4406_v35 = vadd.f32 %v4405_v61, %v4404_v3  ;;  %3932 = vbcast.lane.b32.xlu1 %v3930_v24, 256  ;;  %3925 = vbcast.lane.b32.xlu0 %v3923_v12, 256  ;;  %v3979_v24 = vrot.slane %v9959_v22, %v12277_v51  ;;  %v3986_v12 = vrot.slane %v9959_v22, %v12278_v7 }
 0x97b   :  { %v4407_v28 = vsel %vm196_vm1, %v4254_v21, 0.0  ;;  %v4409_v58 = vsel %vm196_vm1, %v4255_v5, 0.0 }
 0x97c   :  { %v4408_v6 = vadd.f32 %v4407_v28, %v4406_v35  ;;  %v3534_v47 = vpop.permute.xlu0 %3533  ;;  %v3541_v40 = vpop.permute.xlu1 %3540 }
 0x97d   :  { %v4256_v41 = vmul.f32 %v7581_v36, %v3534_v47  ;;  %v4257_v15 = vmul.f32 %v7582_v43, %v3541_v40  ;;  %v7589_v36 = vld [vmem:[%s11796_s3 + $0x120] sm:$0xff]  ;;  %v7590_v43 = vld [vmem:[%s11796_s3 + $0x128] sm:$0xff] }
 0x97e   :  { %v4410_v59 = vadd.f32 %v4409_v58, %v4408_v6  ;;  %3946 = vbcast.lane.b32.xlu1 %v3944_v9, 256  ;;  %3939 = vbcast.lane.b32.xlu0 %v3937_v26, 256  ;;  %v3993_v9 = vrot.slane %v9959_v22, %v12279_v62  ;;  %v4000_v26 = vrot.slane %v9959_v22, %v12280_v60 }
 0x97f   :  { %v4411_v16 = vsel %vm196_vm1, %v4256_v41, 0.0  ;;  %v4413_v57 = vsel %vm196_vm1, %v4257_v15, 0.0 }
 0x980   :  { %v4412_v44 = vadd.f32 %v4411_v16, %v4410_v59  ;;  %v3548_v20 = vpop.permute.xlu0 %3547  ;;  %v3555_v34 = vpop.permute.xlu1 %3554 }
 0x981   :  { %v4258_v23 = vmul.f32 %v7583_v63, %v3548_v20  ;;  %v4259_v11 = vmul.f32 %v7584_v29, %v3555_v34  ;;  %v4007_v34 = vrot.slane %v9965_v17, %v12274_v30 }
 0x982   :  { %v4414_v27 = vadd.f32 %v4413_v57, %v4412_v44  ;;  %3960 = vbcast.lane.b32.xlu1 %v3958_v56, 256  ;;  %3953 = vbcast.lane.b32.xlu0 %v3951_v52, 256  ;;  %v4014_v56 = vrot.slane %v9965_v17, %v12273_v50  ;;  %v7591_v57 = vld [vmem:[%s11796_s3 + $0x130] sm:$0xff] }
 0x983   :  { %v4415_v32 = vsel %vm196_vm1, %v4258_v23, 0.0  ;;  %v4417_v0 = vsel %vm196_vm1, %v4259_v11, 0.0  ;;  %v7592_v23 = vld [vmem:[%s11796_s3 + $0x138] sm:$0xff] }
 0x984   :  { %v4416_v42 = vadd.f32 %v4415_v32, %v4414_v27  ;;  %v3562_v55 = vpop.permute.xlu0 %3561  ;;  %v3569_v13 = vpop.permute.xlu1 %3568 }
 0x985   :  { %v4260_v45 = vmul.f32 %v7585_v2, %v3562_v55  ;;  %v4261_v25 = vmul.f32 %v7586_v37, %v3569_v13  ;;  %v4021_v13 = vrot.slane %v9965_v17, %v12275_v46 }
 0x986   :  { %v4418_v31 = vadd.f32 %v4417_v0, %v4416_v42  ;;  %3967 = vbcast.lane.b32.xlu0 %v3965_v38, 256  ;;  %3974 = vbcast.lane.b32.xlu1 %v3972_v39, 256  ;;  %v4028_v38 = vrot.slane %v9965_v17, %v12276_v53  ;;  %v7593_v0 = vld [vmem:[%s11796_s3 + $0x140] sm:$0xff] }
 0x987   :  { %v4419_v14 = vsel %vm196_vm1, %v4260_v45, 0.0  ;;  %v4421_v61 = vsel %vm196_vm1, %v4261_v25, 0.0  ;;  %v7594_v45 = vld [vmem:[%s11796_s3 + $0x148] sm:$0xff] }
 0x988   :  { %v4420_v3 = vadd.f32 %v4419_v14, %v4418_v31  ;;  %v3576_v1 = vpop.permute.xlu0 %3575  ;;  %v3583_v33 = vpop.permute.xlu1 %3582 }
 0x989   :  { %v4262_v21 = vmul.f32 %v7587_v54, %v3576_v1  ;;  %v4263_v5 = vmul.f32 %v7588_v49, %v3583_v33  ;;  %v4035_v33 = vrot.slane %v9965_v17, %v12277_v51 }
 0x98a   :  { %v4422_v35 = vadd.f32 %v4421_v61, %v4420_v3  ;;  %3981 = vbcast.lane.b32.xlu0 %v3979_v24, 256  ;;  %3988 = vbcast.lane.b32.xlu1 %v3986_v12, 256  ;;  %v4042_v24 = vrot.slane %v9965_v17, %v12278_v7  ;;  %v7595_v61 = vld [vmem:[%s11796_s3 + $0x150] sm:$0xff] }
 0x98b   :  { %v4423_v28 = vsel %vm196_vm1, %v4262_v21, 0.0  ;;  %v4425_v58 = vsel %vm196_vm1, %v4263_v5, 0.0  ;;  %v7596_v21 = vld [vmem:[%s11796_s3 + $0x158] sm:$0xff] }
 0x98c   :  { %v4424_v6 = vadd.f32 %v4423_v28, %v4422_v35  ;;  %v3590_v47 = vpop.permute.xlu0 %3589  ;;  %v3597_v40 = vpop.permute.xlu1 %3596 }
 0x98d   :  { %v4264_v41 = vmul.f32 %v7589_v36, %v3590_v47  ;;  %v4265_v15 = vmul.f32 %v7590_v43, %v3597_v40  ;;  %v4049_v40 = vrot.slane %v9965_v17, %v12279_v62 }
 0x98e   :  { %v4426_v59 = vadd.f32 %v4425_v58, %v4424_v6  ;;  %3995 = vbcast.lane.b32.xlu0 %v3993_v9, 256  ;;  %4002 = vbcast.lane.b32.xlu1 %v4000_v26, 256  ;;  %v4056_v9 = vrot.slane %v9965_v17, %v12280_v60  ;;  %v7597_v58 = vld [vmem:[%s11796_s3 + $0x160] sm:$0xff] }
 0x98f   :  { %v4427_v16 = vsel %vm196_vm1, %v4264_v41, 0.0  ;;  %v4429_v52 = vsel %vm196_vm1, %v4265_v15, 0.0  ;;  %v7598_v41 = vld [vmem:[%s11796_s3 + $0x168] sm:$0xff] }
 0x990   :  { %v4428_v44 = vadd.f32 %v4427_v16, %v4426_v59  ;;  %v3604_v20 = vpop.permute.xlu0 %3603  ;;  %v3611_v22 = vpop.permute.xlu1 %3610 }
 0x991   :  { %v4266_v63 = vmul.f32 %v7591_v57, %v3604_v20  ;;  %v4267_v29 = vmul.f32 %v7592_v23, %v3611_v22  ;;  %v4063_v20 = vrot.slane %v9969_v19, %v12274_v30  ;;  %v4070_v22 = vrot.slane %v9969_v19, %v12273_v50  ;;  %v7600_v57 = vld [vmem:[%s11796_s3 + $0x178] sm:$0xff] }
 0x992   :  { %v4430_v11 = vadd.f32 %v4429_v52, %v4428_v44  ;;  %4009 = vbcast.lane.b32.xlu0 %v4007_v34, 256  ;;  %4016 = vbcast.lane.b32.xlu1 %v4014_v56, 256  ;;  %v7599_v56 = vld [vmem:[%s11796_s3 + $0x170] sm:$0xff] }
 0x993   :  { %v4431_v27 = vsel %vm196_vm1, %v4266_v63, 0.0  ;;  %v4433_v39 = vsel %vm196_vm1, %v4267_v29, 0.0 }
 0x994   :  { %v4432_v32 = vadd.f32 %v4431_v27, %v4430_v11  ;;  %v3618_v42 = vpop.permute.xlu0 %3617  ;;  %v3625_v55 = vpop.permute.xlu1 %3624 }
 0x995   :  { %v4268_v2 = vmul.f32 %v7593_v0, %v3618_v42  ;;  %v4269_v37 = vmul.f32 %v7594_v45, %v3625_v55  ;;  %v4077_v42 = vrot.slane %v9969_v19, %v12275_v46  ;;  %v4084_v55 = vrot.slane %v9969_v19, %v12276_v53  ;;  %v7602_v0 = vld [vmem:[%s11796_s3 + $0x188] sm:$0xff] }
 0x996   :  { %v4434_v25 = vadd.f32 %v4433_v39, %v4432_v32  ;;  %4023 = vbcast.lane.b32.xlu0 %v4021_v13, 256  ;;  %4030 = vbcast.lane.b32.xlu1 %v4028_v38, 256  ;;  %v7601_v38 = vld [vmem:[%s11796_s3 + $0x180] sm:$0xff] }
 0x997   :  { %v4435_v31 = vsel %vm196_vm1, %v4268_v2, 0.0  ;;  %v4437_v12 = vsel %vm196_vm1, %v4269_v37, 0.0 }
 0x998   :  { %v4436_v14 = vadd.f32 %v4435_v31, %v4434_v25  ;;  %v3632_v3 = vpop.permute.xlu0 %3631  ;;  %v3639_v1 = vpop.permute.xlu1 %3638 }
 0x999   :  { %v4270_v54 = vmul.f32 %v7595_v61, %v3632_v3  ;;  %v4271_v49 = vmul.f32 %v7596_v21, %v3639_v1  ;;  %v4091_v3 = vrot.slane %v9969_v19, %v12277_v51  ;;  %v4098_v1 = vrot.slane %v9969_v19, %v12278_v7  ;;  %v7604_v61 = vld [vmem:[%s11796_s3 + $0x198] sm:$0xff] }
 0x99a   :  { %v4438_v5 = vadd.f32 %v4437_v12, %v4436_v14  ;;  %4037 = vbcast.lane.b32.xlu0 %v4035_v33, 256  ;;  %4044 = vbcast.lane.b32.xlu1 %v4042_v24, 256  ;;  %v7603_v24 = vld [vmem:[%s11796_s3 + $0x190] sm:$0xff] }
 0x99b   :  { %v4439_v35 = vsel %vm196_vm1, %v4270_v54, 0.0  ;;  %v4441_v26 = vsel %vm196_vm1, %v4271_v49, 0.0 }
 0x99c   :  { %v4440_v28 = vadd.f32 %v4439_v35, %v4438_v5  ;;  %v3646_v6 = vpop.permute.xlu0 %3645  ;;  %v3653_v47 = vpop.permute.xlu1 %3652 }
 0x99d   :  { %v4272_v36 = vmul.f32 %v7597_v58, %v3646_v6  ;;  %v4273_v43 = vmul.f32 %v7598_v41, %v3653_v47  ;;  %v4105_v6 = vrot.slane %v9969_v19, %v12279_v62  ;;  %v4112_v47 = vrot.slane %v9969_v19, %v12280_v60  ;;  %v7606_v58 = vld [vmem:[%s11796_s3 + $0x1a8] sm:$0xff] }
 0x99e   :  { %v4442_v15 = vadd.f32 %v4441_v26, %v4440_v28  ;;  %4051 = vbcast.lane.b32.xlu0 %v4049_v40, 256  ;;  %4058 = vbcast.lane.b32.xlu1 %v4056_v9, 256  ;;  %v7605_v9 = vld [vmem:[%s11796_s3 + $0x1a0] sm:$0xff] }
 0x99f   :  { %v4443_v59 = vsel %vm196_vm1, %v4272_v36, 0.0  ;;  %v4445_v34 = vsel %vm196_vm1, %v4273_v43, 0.0 }
 0x9a0   :  { %v4444_v16 = vadd.f32 %v4443_v59, %v4442_v15  ;;  %v3660_v44 = vpop.permute.xlu0 %3659  ;;  %v3667_v17 = vpop.permute.xlu1 %3666 }
 0x9a1   :  { %v4274_v52 = vmul.f32 %v7599_v56, %v3660_v44  ;;  %v4275_v63 = vmul.f32 %v7600_v57, %v3667_v17  ;;  %v4126_v44 = vrot.slane %v9975_v4, %v12273_v50 }
 0x9a2   :  { %v4446_v23 = vadd.f32 %v4445_v34, %v4444_v16  ;;  %4065 = vbcast.lane.b32.xlu0 %v4063_v20, 256  ;;  %4072 = vbcast.lane.b32.xlu1 %v4070_v22, 256  ;;  %v4119_v16 = vrot.slane %v9975_v4, %v12274_v30  ;;  %v7607_v20 = vld [vmem:[%s11796_s3 + $0x1b0] sm:$0xff]  ;;  %v7608_v34 = vld [vmem:[%s11796_s3 + $0x1b8] sm:$0xff] }
 0x9a3   :  { %v4447_v29 = vsel %vm196_vm1, %v4274_v52, 0.0  ;;  %v4449_v13 = vsel %vm196_vm1, %v4275_v63, 0.0 }
 0x9a4   :  { %v4448_v11 = vadd.f32 %v4447_v29, %v4446_v23  ;;  %v3674_v27 = vpop.permute.xlu0 %3673  ;;  %v3681_v32 = vpop.permute.xlu1 %3680 }
 0x9a5   :  { %v4276_v39 = vmul.f32 %v7601_v38, %v3674_v27  ;;  %v4277_v2 = vmul.f32 %v7602_v0, %v3681_v32  ;;  %v4140_v27 = vrot.slane %v9975_v4, %v12276_v53 }
 0x9a6   :  { %v4450_v45 = vadd.f32 %v4449_v13, %v4448_v11  ;;  %4079 = vbcast.lane.b32.xlu0 %v4077_v42, 256  ;;  %4086 = vbcast.lane.b32.xlu1 %v4084_v55, 256  ;;  %v4133_v11 = vrot.slane %v9975_v4, %v12275_v46  ;;  %v7609_v42 = vld [vmem:[%s11796_s3 + $0x1c0] sm:$0xff]  ;;  %v7610_v13 = vld [vmem:[%s11796_s3 + $0x1c8] sm:$0xff] }
 0x9a7   :  { %v4451_v37 = vsel %vm196_vm1, %v4276_v39, 0.0  ;;  %v4453_v33 = vsel %vm196_vm1, %v4277_v2, 0.0 }
 0x9a8   :  { %v4452_v25 = vadd.f32 %v4451_v37, %v4450_v45  ;;  %v3688_v31 = vpop.permute.xlu0 %3687  ;;  %v3695_v14 = vpop.permute.xlu1 %3694 }
 0x9a9   :  { %v4278_v12 = vmul.f32 %v7603_v24, %v3688_v31  ;;  %v4279_v54 = vmul.f32 %v7604_v61, %v3695_v14  ;;  %v4154_v31 = vrot.slane %v9975_v4, %v12278_v7 }
 0x9aa   :  { %v4454_v21 = vadd.f32 %v4453_v33, %v4452_v25  ;;  %4093 = vbcast.lane.b32.xlu0 %v4091_v3, 256  ;;  %4100 = vbcast.lane.b32.xlu1 %v4098_v1, 256  ;;  %v4147_v25 = vrot.slane %v9975_v4, %v12277_v51  ;;  %v7611_v3 = vld [vmem:[%s11796_s3 + $0x1d0] sm:$0xff]  ;;  %v7612_v33 = vld [vmem:[%s11796_s3 + $0x1d8] sm:$0xff] }
 0x9ab   :  { %v4455_v49 = vsel %vm196_vm1, %v4278_v12, 0.0  ;;  %v4457_v40 = vsel %vm196_vm1, %v4279_v54, 0.0 }
 0x9ac   :  { %v4456_v5 = vadd.f32 %v4455_v49, %v4454_v21  ;;  %v3702_v35 = vpop.permute.xlu0 %3701  ;;  %v3709_v28 = vpop.permute.xlu1 %3708 }
 0x9ad   :  { %v4280_v26 = vmul.f32 %v7605_v9, %v3702_v35  ;;  %v4281_v36 = vmul.f32 %v7606_v58, %v3709_v28  ;;  %v4168_v35 = vrot.slane %v9975_v4, %v12280_v60 }
 0x9ae   :  { %v4458_v41 = vadd.f32 %v4457_v40, %v4456_v5  ;;  %4107 = vbcast.lane.b32.xlu0 %v4105_v6, 256  ;;  %4114 = vbcast.lane.b32.xlu1 %v4112_v47, 256  ;;  %v4161_v5 = vrot.slane %v9975_v4, %v12279_v62  ;;  %v7613_v6 = vld [vmem:[%s11796_s3 + $0x1e0] sm:$0xff]  ;;  %v7614_v40 = vld [vmem:[%s11796_s3 + $0x1e8] sm:$0xff] }
 0x9af   :  { %v4459_v43 = vsel %vm196_vm1, %v4280_v26, 0.0  ;;  %v4461_v17 = vsel %vm196_vm1, %v4281_v36, 0.0 }
 0x9b0   :  { %v4460_v15 = vadd.f32 %v4459_v43, %v4458_v41  ;;  %v3716_v59 = vpop.permute.xlu0 %3715  ;;  %v3723_v19 = vpop.permute.xlu1 %3722  ;;  %v4175_v43 = vrot.slane %v9979_v8, %v12274_v30  ;;  %v4611_v30 = vld [vmem:[%s11804_s11] sm:$0xff] }
 0x9b1   :  { %v4282_v22 = vmul.f32 %v7607_v20, %v3716_v59  ;;  %v4283_v56 = vmul.f32 %v7608_v34, %v3723_v19  ;;  %v7615_v19 = vld [vmem:[%s11796_s3 + $0x1f0] sm:$0xff] }
 0x9b2   :  { %v4462_v52 = vadd.f32 %v4461_v17, %v4460_v15  ;;  %4121 = vbcast.lane.b32.xlu0 %v4119_v16, 256  ;;  %4128 = vbcast.lane.b32.xlu1 %v4126_v44, 256  ;;  %v4182_v15 = vrot.slane %v9979_v8, %v12273_v50  ;;  %v7616_v44 = vld [vmem:[%s11796_s3 + $0x1f8] sm:$0xff]  ;;  %v4612_v50 = vld [vmem:[%s11804_s11 + $0x8] sm:$0xff] }
 0x9b3   :  { %v4463_v57 = vsel %vm196_vm1, %v4282_v22, 0.0  ;;  %v4465_v32 = vsel %vm196_vm1, %v4283_v56, 0.0  ;;  %v6981_v34 = vpack.c.bf16 %v4612_v50, %v4611_v30 }
 0x9b4   :  { %v4464_v63 = vadd.f32 %v4463_v57, %v4462_v52  ;;  %v3730_v23 = vpop.permute.xlu0 %3729  ;;  %v3737_v29 = vpop.permute.xlu1 %3736 }
 0x9b5   :  { %v4284_v55 = vmul.f32 %v7609_v42, %v3730_v23  ;;  %v4285_v38 = vmul.f32 %v7610_v13, %v3737_v29  ;;  %v4196_v23 = vrot.slane %v9979_v8, %v12276_v53  ;;  %6982 = vmatpush3.bf16.msra.mxu0 %v6981_v34  ;;  %v4614_v53 = vld [vmem:[%s11804_s11 + $0x18] sm:$0xff] }
 0x9b6   :  { %v4466_v39 = vadd.f32 %v4465_v32, %v4464_v63  ;;  %4135 = vbcast.lane.b32.xlu0 %v4133_v11, 256  ;;  %4142 = vbcast.lane.b32.xlu1 %v4140_v27, 256  ;;  %v4189_v63 = vrot.slane %v9979_v8, %v12275_v46  ;;  %v7617_v11 = vld [vmem:[%s11796_s3 + $0x200] sm:$0xff]  ;;  %v7618_v32 = vld [vmem:[%s11796_s3 + $0x208] sm:$0xff]  ;;  %v4613_v46 = vld [vmem:[%s11804_s11 + $0x10] sm:$0xff] }
 0x9b7   :  { %v4467_v0 = vsel %vm196_vm1, %v4284_v55, 0.0  ;;  %v4469_v14 = vsel %vm196_vm1, %v4285_v38, 0.0  ;;  %v12281_v38 = vmov 0.0|0.0  }
 0x9b8   :  { %v4468_v2 = vadd.f32 %v4467_v0, %v4466_v39  ;;  %v3744_v45 = vpop.permute.xlu0 %3743  ;;  %v3751_v37 = vpop.permute.xlu1 %3750  ;;  %6983 = vmatprep.subr.bf16.mxu0 %v12281_v38  ;;  %v6984_v39 = vpack.c.bf16 %v4614_v53, %v4613_v46 }
 0x9b9   :  { %v4286_v1 = vmul.f32 %v7611_v3, %v3744_v45  ;;  %v4287_v24 = vmul.f32 %v7612_v33, %v3751_v37  ;;  %v4203_v37 = vrot.slane %v9979_v8, %v12277_v51 }
 0x9ba   :  { %v4470_v12 = vadd.f32 %v4469_v14, %v4468_v2  ;;  %4149 = vbcast.lane.b32.xlu0 %v4147_v25, 256  ;;  %4156 = vbcast.lane.b32.xlu1 %v4154_v31, 256  ;;  %v4210_v25 = vrot.slane %v9979_v8, %v12278_v7  ;;  %v7619_v14 = vld [vmem:[%s11796_s3 + $0x210] sm:$0xff] }
 0x9bb   :  { %v4471_v61 = vsel %vm196_vm1, %v4286_v1, 0.0  ;;  %v4473_v28 = vsel %vm196_vm1, %v4287_v24, 0.0  ;;  %v7620_v1 = vld [vmem:[%s11796_s3 + $0x218] sm:$0xff]  ;;  %6985 = vmatpush3.bf16.msra.mxu0 %v6984_v39 }
 0x9bc   :  { %v4472_v54 = vadd.f32 %v4471_v61, %v4470_v12  ;;  %v3758_v21 = vpop.permute.xlu0 %3757  ;;  %v3765_v49 = vpop.permute.xlu1 %3764  ;;  %6986 = vmatprep.subr.bf16.mxu0 %v12281_v38 }
 0x9bd   :  { %v4288_v47 = vmul.f32 %v7613_v6, %v3758_v21  ;;  %v4289_v9 = vmul.f32 %v7614_v40, %v3765_v49  ;;  %v4224_v21 = vrot.slane %v9979_v8, %v12280_v60 }
 0x9be   :  { %v4474_v26 = vadd.f32 %v4473_v28, %v4472_v54  ;;  %4163 = vbcast.lane.b32.xlu0 %v4161_v5, 256  ;;  %4170 = vbcast.lane.b32.xlu1 %v4168_v35, 256  ;;  %v4217_v54 = vrot.slane %v9979_v8, %v12279_v62  ;;  %v7621_v5 = vld [vmem:[%s11796_s3 + $0x220] sm:$0xff]  ;;  %v7622_v28 = vld [vmem:[%s11796_s3 + $0x228] sm:$0xff] }
 0x9bf   :  { %v4475_v58 = vsel %vm196_vm1, %v4288_v47, 0.0  ;;  %v4477_v59 = vsel %vm196_vm1, %v4289_v9, 0.0 }
 0x9c0   :  { %v4476_v36 = vadd.f32 %v4475_v58, %v4474_v26  ;;  %v3772_v41 = vpop.permute.xlu0 %3771  ;;  %v3779_v4 = vpop.permute.xlu1 %3778  ;;  %v7623_v26 = vld [vmem:[%s11796_s3 + $0x230] sm:$0xff] }
 0x9c1   :  { %v4290_v16 = vmul.f32 %v7615_v19, %v3772_v41  ;;  %v4291_v17 = vmul.f32 %v7616_v44, %v3779_v4  ;;  %v7625_v44 = vld [vmem:[%s11796_s3 + $0x240] sm:$0xff] }
 0x9c2   :  { %v4478_v20 = vadd.f32 %v4477_v59, %v4476_v36  ;;  %4177 = vbcast.lane.b32.xlu0 %v4175_v43, 256  ;;  %4184 = vbcast.lane.b32.xlu1 %v4182_v15, 256  ;;  %v7624_v36 = vld [vmem:[%s11796_s3 + $0x238] sm:$0xff] }
 0x9c3   :  { %v4479_v22 = vsel %vm196_vm1, %v4290_v16, 0.0  ;;  %v4481_v29 = vsel %vm196_vm1, %v4291_v17, 0.0 }
 0x9c4   :  { %v4480_v56 = vadd.f32 %v4479_v22, %v4478_v20  ;;  %v3786_v52 = vpop.permute.xlu0 %3785  ;;  %v3793_v57 = vpop.permute.xlu1 %3792  ;;  %v7626_v20 = vld [vmem:[%s11796_s3 + $0x248] sm:$0xff] }
 0x9c5   :  { %v4292_v27 = vmul.f32 %v7617_v11, %v3786_v52  ;;  %v4293_v42 = vmul.f32 %v7618_v32, %v3793_v57 }
 0x9c6   :  { %v4482_v55 = vadd.f32 %v4481_v29, %v4480_v56  ;;  %4191 = vbcast.lane.b32.xlu0 %v4189_v63, 256  ;;  %4198 = vbcast.lane.b32.xlu1 %v4196_v23, 256  ;;  %v7627_v63 = vld [vmem:[%s11796_s3 + $0x250] sm:$0xff]  ;;  %v7628_v29 = vld [vmem:[%s11796_s3 + $0x258] sm:$0xff] }
 0x9c7   :  { %v4483_v13 = vsel %vm196_vm1, %v4292_v27, 0.0  ;;  %v4485_v31 = vsel %vm196_vm1, %v4293_v42, 0.0 }
 0x9c8   :  { %v4484_v0 = vadd.f32 %v4483_v13, %v4482_v55  ;;  %v3800_v2 = vpop.permute.xlu0 %3799  ;;  %v3807_v45 = vpop.permute.xlu1 %3806  ;;  %v7629_v13 = vld [vmem:[%s11796_s3 + $0x260] sm:$0xff] }
 0x9c9   :  { %v4294_v3 = vmul.f32 %v7619_v14, %v3800_v2  ;;  %v4295_v33 = vmul.f32 %v7620_v1, %v3807_v45  ;;  %v7631_v1 = vld [vmem:[%s11796_s3 + $0x270] sm:$0xff] }
 0x9ca   :  { %v4486_v24 = vadd.f32 %v4485_v31, %v4484_v0  ;;  %4205 = vbcast.lane.b32.xlu0 %v4203_v37, 256  ;;  %4212 = vbcast.lane.b32.xlu1 %v4210_v25, 256  ;;  %v7630_v0 = vld [vmem:[%s11796_s3 + $0x268] sm:$0xff] }
 0x9cb   :  { %v4487_v51 = vsel %vm196_vm1, %v4294_v3, 0.0  ;;  %v4489_v49 = vsel %vm196_vm1, %v4295_v33, 0.0 }
 0x9cc   :  { %v4488_v7 = vadd.f32 %v4487_v51, %v4486_v24  ;;  %v3814_v12 = vpop.permute.xlu0 %3813  ;;  %v3821_v61 = vpop.permute.xlu1 %3820  ;;  %v7632_v24 = vld [vmem:[%s11796_s3 + $0x278] sm:$0xff] }
 0x9cd   :  { %v4296_v35 = vmul.f32 %v7621_v5, %v3814_v12  ;;  %v4297_v6 = vmul.f32 %v7622_v28, %v3821_v61  ;;  %v7633_v5 = vld [vmem:[%s11796_s3 + $0x280] sm:$0xff]  ;;  %v7634_v28 = vld [vmem:[%s11796_s3 + $0x288] sm:$0xff] }
 0x9ce   :  { %v4490_v47 = vadd.f32 %v4489_v49, %v4488_v7  ;;  %4219 = vbcast.lane.b32.xlu0 %v4217_v54, 256  ;;  %4226 = vbcast.lane.b32.xlu1 %v4224_v21, 256 }
 0x9cf   :  { %v4491_v62 = vsel %vm196_vm1, %v4296_v35, 0.0  ;;  %v4493_v8 = vsel %vm196_vm1, %v4297_v6, 0.0 }
 0x9d0   :  { %v4492_v40 = vadd.f32 %v4491_v62, %v4490_v47  ;;  %v3828_v9 = vpop.permute.xlu0 %3827  ;;  %v3835_v60 = vpop.permute.xlu1 %3834 }
 0x9d1   :  { %v4298_v58 = vmul.f32 %v7623_v26, %v3828_v9  ;;  %v4299_v41 = vmul.f32 %v7624_v36, %v3835_v60  ;;  %v7635_v26 = vld [vmem:[%s11796_s3 + $0x290] sm:$0xff]  ;;  %v7636_v36 = vld [vmem:[%s11796_s3 + $0x298] sm:$0xff] }
 0x9d2   :  { %v4494_v4 = vadd.f32 %v4493_v8, %v4492_v40 }
 0x9d3   :  { %v4495_v43 = vsel %vm196_vm1, %v4298_v58, 0.0  ;;  %v4497_v16 = vsel %vm196_vm1, %v4299_v41, 0.0 }
 0x9d4   :  { %v4496_v15 = vadd.f32 %v4495_v43, %v4494_v4  ;;  %v3842_v59 = vpop.permute.xlu0 %3841  ;;  %v3849_v19 = vpop.permute.xlu1 %3848 }
 0x9d5   :  { %v4300_v17 = vmul.f32 %v7625_v44, %v3842_v59  ;;  %v4301_v30 = vmul.f32 %v7626_v20, %v3849_v19  ;;  %v7637_v44 = vld [vmem:[%s11796_s3 + $0x2a0] sm:$0xff]  ;;  %v7638_v20 = vld [vmem:[%s11796_s3 + $0x2a8] sm:$0xff] }
 0x9d6   :  { %v4498_v50 = vadd.f32 %v4497_v16, %v4496_v15 }
 0x9d7   :  { %v4499_v22 = vsel %vm196_vm1, %v4300_v17, 0.0  ;;  %v4501_v57 = vsel %vm196_vm1, %v4301_v30, 0.0 }
 0x9d8   :  { %v4500_v34 = vadd.f32 %v4499_v22, %v4498_v50  ;;  %v3856_v56 = vpop.permute.xlu0 %3855  ;;  %v3863_v52 = vpop.permute.xlu1 %3862 }
 0x9d9   :  { %v4302_v23 = vmul.f32 %v7627_v63, %v3856_v56  ;;  %v4303_v11 = vmul.f32 %v7628_v29, %v3863_v52  ;;  %v7639_v63 = vld [vmem:[%s11796_s3 + $0x2b0] sm:$0xff]  ;;  %v7640_v29 = vld [vmem:[%s11796_s3 + $0x2b8] sm:$0xff] }
 0x9da   :  { %v4502_v27 = vadd.f32 %v4501_v57, %v4500_v34 }
 0x9db   :  { %v4503_v32 = vsel %vm196_vm1, %v4302_v23, 0.0  ;;  %v4505_v53 = vsel %vm196_vm1, %v4303_v11, 0.0 }
 0x9dc   :  { %v4504_v42 = vadd.f32 %v4503_v32, %v4502_v27  ;;  %v3870_v55 = vpop.permute.xlu0 %3869  ;;  %v3877_v46 = vpop.permute.xlu1 %3876 }
 0x9dd   :  { %v4304_v39 = vmul.f32 %v7629_v13, %v3870_v55  ;;  %v4305_v2 = vmul.f32 %v7630_v0, %v3877_v46  ;;  %v7641_v13 = vld [vmem:[%s11796_s3 + $0x2c0] sm:$0xff]  ;;  %v7642_v0 = vld [vmem:[%s11796_s3 + $0x2c8] sm:$0xff] }
 0x9de   :  { %v4506_v45 = vadd.f32 %v4505_v53, %v4504_v42 }
 0x9df   :  { %v4507_v37 = vsel %vm196_vm1, %v4304_v39, 0.0  ;;  %v4509_v3 = vsel %vm196_vm1, %v4305_v2, 0.0 }
 0x9e0   :  { %v4508_v25 = vadd.f32 %v4507_v37, %v4506_v45  ;;  %v3884_v31 = vpop.permute.xlu0 %3883  ;;  %v3891_v14 = vpop.permute.xlu1 %3890 }
 0x9e1   :  { %v4306_v33 = vmul.f32 %v7631_v1, %v3884_v31  ;;  %v4307_v51 = vmul.f32 %v7632_v24, %v3891_v14  ;;  %v7643_v1 = vld [vmem:[%s11796_s3 + $0x2d0] sm:$0xff]  ;;  %v7644_v24 = vld [vmem:[%s11796_s3 + $0x2d8] sm:$0xff] }
 0x9e2   :  { %v4510_v7 = vadd.f32 %v4509_v3, %v4508_v25 }
 0x9e3   :  { %v4511_v12 = vsel %vm196_vm1, %v4306_v33, 0.0  ;;  %v4513_v49 = vsel %vm196_vm1, %v4307_v51, 0.0 }
 0x9e4   :  { %v4512_v61 = vadd.f32 %v4511_v12, %v4510_v7  ;;  %v3898_v54 = vpop.permute.xlu0 %3897  ;;  %v3905_v21 = vpop.permute.xlu1 %3904 }
 0x9e5   :  { %v4308_v35 = vmul.f32 %v7633_v5, %v3898_v54  ;;  %v4309_v6 = vmul.f32 %v7634_v28, %v3905_v21  ;;  %v7645_v5 = vld [vmem:[%s11796_s3 + $0x2e0] sm:$0xff]  ;;  %v7646_v28 = vld [vmem:[%s11796_s3 + $0x2e8] sm:$0xff] }
 0x9e6   :  { %v4514_v47 = vadd.f32 %v4513_v49, %v4512_v61 }
 0x9e7   :  { %v4515_v62 = vsel %vm196_vm1, %v4308_v35, 0.0  ;;  %v4517_v8 = vsel %vm196_vm1, %v4309_v6, 0.0 }
 0x9e8   :  { %v4516_v40 = vadd.f32 %v4515_v62, %v4514_v47  ;;  %v3912_v9 = vpop.permute.xlu0 %3911  ;;  %v3919_v60 = vpop.permute.xlu1 %3918 }
 0x9e9   :  { %v4310_v58 = vmul.f32 %v7635_v26, %v3912_v9  ;;  %v4311_v41 = vmul.f32 %v7636_v36, %v3919_v60  ;;  %v7647_v26 = vld [vmem:[%s11796_s3 + $0x2f0] sm:$0xff]  ;;  %v7648_v36 = vld [vmem:[%s11796_s3 + $0x2f8] sm:$0xff] }
 0x9ea   :  { %v4518_v4 = vadd.f32 %v4517_v8, %v4516_v40 }
 0x9eb   :  { %v4519_v43 = vsel %vm196_vm1, %v4310_v58, 0.0  ;;  %v4521_v16 = vsel %vm196_vm1, %v4311_v41, 0.0 }
 0x9ec   :  { %v4520_v15 = vadd.f32 %v4519_v43, %v4518_v4  ;;  %v3926_v59 = vpop.permute.xlu0 %3925  ;;  %v3933_v19 = vpop.permute.xlu1 %3932 }
 0x9ed   :  { %v4312_v17 = vmul.f32 %v7637_v44, %v3926_v59  ;;  %v4313_v30 = vmul.f32 %v7638_v20, %v3933_v19  ;;  %v7649_v44 = vld [vmem:[%s11796_s3 + $0x300] sm:$0xff]  ;;  %v7650_v20 = vld [vmem:[%s11796_s3 + $0x308] sm:$0xff] }
 0x9ee   :  { %v4522_v50 = vadd.f32 %v4521_v16, %v4520_v15 }
 0x9ef   :  { %v4523_v22 = vsel %vm196_vm1, %v4312_v17, 0.0  ;;  %v4525_v57 = vsel %vm196_vm1, %v4313_v30, 0.0 }
 0x9f0   :  { %v4524_v34 = vadd.f32 %v4523_v22, %v4522_v50  ;;  %v3940_v56 = vpop.permute.xlu0 %3939  ;;  %v3947_v52 = vpop.permute.xlu1 %3946 }
 0x9f1   :  { %v4314_v23 = vmul.f32 %v7639_v63, %v3940_v56  ;;  %v4315_v11 = vmul.f32 %v7640_v29, %v3947_v52  ;;  %v7651_v63 = vld [vmem:[%s11796_s3 + $0x310] sm:$0xff]  ;;  %v7652_v29 = vld [vmem:[%s11796_s3 + $0x318] sm:$0xff] }
 0x9f2   :  { %v4526_v27 = vadd.f32 %v4525_v57, %v4524_v34 }
 0x9f3   :  { %v4527_v32 = vsel %vm196_vm1, %v4314_v23, 0.0  ;;  %v4529_v53 = vsel %vm196_vm1, %v4315_v11, 0.0 }
 0x9f4   :  { %v4528_v42 = vadd.f32 %v4527_v32, %v4526_v27  ;;  %v3954_v55 = vpop.permute.xlu0 %3953  ;;  %v3961_v46 = vpop.permute.xlu1 %3960 }
 0x9f5   :  { %v4316_v39 = vmul.f32 %v7641_v13, %v3954_v55  ;;  %v4317_v2 = vmul.f32 %v7642_v0, %v3961_v46  ;;  %v7653_v13 = vld [vmem:[%s11796_s3 + $0x320] sm:$0xff]  ;;  %v7654_v0 = vld [vmem:[%s11796_s3 + $0x328] sm:$0xff] }
 0x9f6   :  { %v4530_v45 = vadd.f32 %v4529_v53, %v4528_v42 }
 0x9f7   :  { %v4531_v37 = vsel %vm196_vm1, %v4316_v39, 0.0  ;;  %v4533_v3 = vsel %vm196_vm1, %v4317_v2, 0.0 }
 0x9f8   :  { %v4532_v25 = vadd.f32 %v4531_v37, %v4530_v45  ;;  %v3968_v31 = vpop.permute.xlu0 %3967  ;;  %v3975_v14 = vpop.permute.xlu1 %3974 }
 0x9f9   :  { %v4318_v33 = vmul.f32 %v7643_v1, %v3968_v31  ;;  %v4319_v51 = vmul.f32 %v7644_v24, %v3975_v14  ;;  %v7655_v1 = vld [vmem:[%s11796_s3 + $0x330] sm:$0xff]  ;;  %v7656_v24 = vld [vmem:[%s11796_s3 + $0x338] sm:$0xff] }
 0x9fa   :  { %v4534_v7 = vadd.f32 %v4533_v3, %v4532_v25 }
 0x9fb   :  { %v4535_v12 = vsel %vm196_vm1, %v4318_v33, 0.0  ;;  %v4537_v49 = vsel %vm196_vm1, %v4319_v51, 0.0 }
 0x9fc   :  { %v4536_v61 = vadd.f32 %v4535_v12, %v4534_v7  ;;  %v3982_v54 = vpop.permute.xlu0 %3981  ;;  %v3989_v21 = vpop.permute.xlu1 %3988 }
 0x9fd   :  { %v4320_v35 = vmul.f32 %v7645_v5, %v3982_v54  ;;  %v4321_v6 = vmul.f32 %v7646_v28, %v3989_v21  ;;  %v7657_v5 = vld [vmem:[%s11796_s3 + $0x340] sm:$0xff]  ;;  %v7658_v28 = vld [vmem:[%s11796_s3 + $0x348] sm:$0xff] }
 0x9fe   :  { %v4538_v47 = vadd.f32 %v4537_v49, %v4536_v61 }
 0x9ff   :  { %v4539_v62 = vsel %vm196_vm1, %v4320_v35, 0.0  ;;  %v4541_v8 = vsel %vm196_vm1, %v4321_v6, 0.0 }
 0xa00   :  { %v4540_v40 = vadd.f32 %v4539_v62, %v4538_v47  ;;  %v3996_v9 = vpop.permute.xlu0 %3995  ;;  %v4003_v60 = vpop.permute.xlu1 %4002 }
 0xa01   :  { %v4322_v58 = vmul.f32 %v7647_v26, %v3996_v9  ;;  %v4323_v41 = vmul.f32 %v7648_v36, %v4003_v60  ;;  %v7659_v26 = vld [vmem:[%s11796_s3 + $0x350] sm:$0xff]  ;;  %v7660_v36 = vld [vmem:[%s11796_s3 + $0x358] sm:$0xff] }
 0xa02   :  { %v4542_v4 = vadd.f32 %v4541_v8, %v4540_v40 }
 0xa03   :  { %v4543_v43 = vsel %vm196_vm1, %v4322_v58, 0.0  ;;  %v4545_v16 = vsel %vm196_vm1, %v4323_v41, 0.0 }
 0xa04   :  { %v4544_v15 = vadd.f32 %v4543_v43, %v4542_v4  ;;  %v4010_v59 = vpop.permute.xlu0 %4009  ;;  %v4017_v19 = vpop.permute.xlu1 %4016 }
 0xa05   :  { %v4324_v17 = vmul.f32 %v7649_v44, %v4010_v59  ;;  %v4325_v30 = vmul.f32 %v7650_v20, %v4017_v19  ;;  %v7661_v44 = vld [vmem:[%s11796_s3 + $0x360] sm:$0xff]  ;;  %v7662_v20 = vld [vmem:[%s11796_s3 + $0x368] sm:$0xff] }
 0xa06   :  { %v4546_v50 = vadd.f32 %v4545_v16, %v4544_v15 }
 0xa07   :  { %v4547_v22 = vsel %vm196_vm1, %v4324_v17, 0.0  ;;  %v4549_v57 = vsel %vm196_vm1, %v4325_v30, 0.0 }
 0xa08   :  { %v4548_v34 = vadd.f32 %v4547_v22, %v4546_v50  ;;  %v4024_v56 = vpop.permute.xlu0 %4023  ;;  %v4031_v52 = vpop.permute.xlu1 %4030 }
 0xa09   :  { %v4326_v23 = vmul.f32 %v7651_v63, %v4024_v56  ;;  %v4327_v11 = vmul.f32 %v7652_v29, %v4031_v52  ;;  %v7663_v63 = vld [vmem:[%s11796_s3 + $0x370] sm:$0xff]  ;;  %v7664_v29 = vld [vmem:[%s11796_s3 + $0x378] sm:$0xff] }
 0xa0a   :  { %v4550_v27 = vadd.f32 %v4549_v57, %v4548_v34 }
 0xa0b   :  { %v4551_v32 = vsel %vm196_vm1, %v4326_v23, 0.0  ;;  %v4553_v53 = vsel %vm196_vm1, %v4327_v11, 0.0 }
 0xa0c   :  { %v4552_v42 = vadd.f32 %v4551_v32, %v4550_v27  ;;  %v4038_v55 = vpop.permute.xlu0 %4037  ;;  %v4045_v46 = vpop.permute.xlu1 %4044 }
 0xa0d   :  { %v4328_v39 = vmul.f32 %v7653_v13, %v4038_v55  ;;  %v4329_v2 = vmul.f32 %v7654_v0, %v4045_v46  ;;  %v7665_v13 = vld [vmem:[%s11796_s3 + $0x380] sm:$0xff]  ;;  %v7666_v0 = vld [vmem:[%s11796_s3 + $0x388] sm:$0xff] }
 0xa0e   :  { %v4554_v45 = vadd.f32 %v4553_v53, %v4552_v42 }
 0xa0f   :  { %v4555_v37 = vsel %vm196_vm1, %v4328_v39, 0.0  ;;  %v4557_v3 = vsel %vm196_vm1, %v4329_v2, 0.0 }
 0xa10   :  { %v4556_v25 = vadd.f32 %v4555_v37, %v4554_v45  ;;  %v4052_v31 = vpop.permute.xlu0 %4051  ;;  %v4059_v14 = vpop.permute.xlu1 %4058 }
 0xa11   :  { %v4330_v33 = vmul.f32 %v7655_v1, %v4052_v31  ;;  %v4331_v51 = vmul.f32 %v7656_v24, %v4059_v14  ;;  %v7667_v1 = vld [vmem:[%s11796_s3 + $0x390] sm:$0xff]  ;;  %v7668_v24 = vld [vmem:[%s11796_s3 + $0x398] sm:$0xff] }
 0xa12   :  { %v4558_v7 = vadd.f32 %v4557_v3, %v4556_v25 }
 0xa13   :  { %v4559_v12 = vsel %vm196_vm1, %v4330_v33, 0.0  ;;  %v4561_v49 = vsel %vm196_vm1, %v4331_v51, 0.0 }
 0xa14   :  { %v4560_v61 = vadd.f32 %v4559_v12, %v4558_v7  ;;  %v4066_v54 = vpop.permute.xlu0 %4065  ;;  %v4073_v21 = vpop.permute.xlu1 %4072 }
 0xa15   :  { %v4332_v35 = vmul.f32 %v7657_v5, %v4066_v54  ;;  %v4333_v6 = vmul.f32 %v7658_v28, %v4073_v21  ;;  %v7669_v5 = vld [vmem:[%s11796_s3 + $0x3a0] sm:$0xff]  ;;  %v7670_v28 = vld [vmem:[%s11796_s3 + $0x3a8] sm:$0xff] }
 0xa16   :  { %v4562_v47 = vadd.f32 %v4561_v49, %v4560_v61 }
 0xa17   :  { %v4563_v62 = vsel %vm196_vm1, %v4332_v35, 0.0  ;;  %v4565_v8 = vsel %vm196_vm1, %v4333_v6, 0.0 }
 0xa18   :  { %v4564_v40 = vadd.f32 %v4563_v62, %v4562_v47  ;;  %v4080_v9 = vpop.permute.xlu0 %4079  ;;  %v4087_v60 = vpop.permute.xlu1 %4086 }
 0xa19   :  { %v4334_v58 = vmul.f32 %v7659_v26, %v4080_v9  ;;  %v4335_v41 = vmul.f32 %v7660_v36, %v4087_v60  ;;  %v7671_v26 = vld [vmem:[%s11796_s3 + $0x3b0] sm:$0xff]  ;;  %v7672_v36 = vld [vmem:[%s11796_s3 + $0x3b8] sm:$0xff] }
 0xa1a   :  { %v4566_v4 = vadd.f32 %v4565_v8, %v4564_v40 }
 0xa1b   :  { %v4567_v43 = vsel %vm196_vm1, %v4334_v58, 0.0  ;;  %v4569_v16 = vsel %vm196_vm1, %v4335_v41, 0.0 }
 0xa1c   :  { %v4568_v15 = vadd.f32 %v4567_v43, %v4566_v4  ;;  %v4094_v59 = vpop.permute.xlu0 %4093  ;;  %v4101_v19 = vpop.permute.xlu1 %4100 }
 0xa1d   :  { %v4336_v17 = vmul.f32 %v7661_v44, %v4094_v59  ;;  %v4337_v30 = vmul.f32 %v7662_v20, %v4101_v19  ;;  %v7673_v44 = vld [vmem:[%s11796_s3 + $0x3c0] sm:$0xff]  ;;  %v7674_v20 = vld [vmem:[%s11796_s3 + $0x3c8] sm:$0xff] }
 0xa1e   :  { %v4570_v50 = vadd.f32 %v4569_v16, %v4568_v15 }
 0xa1f   :  { %v4571_v22 = vsel %vm196_vm1, %v4336_v17, 0.0  ;;  %v4573_v57 = vsel %vm196_vm1, %v4337_v30, 0.0 }
 0xa20   :  { %v4572_v34 = vadd.f32 %v4571_v22, %v4570_v50  ;;  %v4108_v56 = vpop.permute.xlu0 %4107  ;;  %v4115_v52 = vpop.permute.xlu1 %4114 }
 0xa21   :  { %v4338_v23 = vmul.f32 %v7663_v63, %v4108_v56  ;;  %v4339_v11 = vmul.f32 %v7664_v29, %v4115_v52  ;;  %v7675_v63 = vld [vmem:[%s11796_s3 + $0x3d0] sm:$0xff]  ;;  %v7676_v29 = vld [vmem:[%s11796_s3 + $0x3d8] sm:$0xff] }
 0xa22   :  { %v4574_v27 = vadd.f32 %v4573_v57, %v4572_v34 }
 0xa23   :  { %v4575_v32 = vsel %vm196_vm1, %v4338_v23, 0.0  ;;  %v4577_v53 = vsel %vm196_vm1, %v4339_v11, 0.0 }
 0xa24   :  { %v4576_v42 = vadd.f32 %v4575_v32, %v4574_v27  ;;  %v4122_v55 = vpop.permute.xlu0 %4121  ;;  %v4129_v46 = vpop.permute.xlu1 %4128 }
 0xa25   :  { %v4340_v39 = vmul.f32 %v7665_v13, %v4122_v55  ;;  %v4341_v2 = vmul.f32 %v7666_v0, %v4129_v46  ;;  %v7677_v13 = vld [vmem:[%s11796_s3 + $0x3e0] sm:$0xff]  ;;  %v7678_v0 = vld [vmem:[%s11796_s3 + $0x3e8] sm:$0xff] }
 0xa26   :  { %v4578_v45 = vadd.f32 %v4577_v53, %v4576_v42 }
 0xa27   :  { %v4579_v37 = vsel %vm196_vm1, %v4340_v39, 0.0  ;;  %v4581_v3 = vsel %vm196_vm1, %v4341_v2, 0.0 }
 0xa28   :  { %v4580_v25 = vadd.f32 %v4579_v37, %v4578_v45  ;;  %v4136_v31 = vpop.permute.xlu0 %4135  ;;  %v4143_v14 = vpop.permute.xlu1 %4142 }
 0xa29   :  { %v4342_v33 = vmul.f32 %v7667_v1, %v4136_v31  ;;  %v4343_v51 = vmul.f32 %v7668_v24, %v4143_v14  ;;  %v7679_v1 = vld [vmem:[%s11796_s3 + $0x3f0] sm:$0xff]  ;;  %v7680_v24 = vld [vmem:[%s11796_s3 + $0x3f8] sm:$0xff] }
 0xa2a   :  { %v4582_v7 = vadd.f32 %v4581_v3, %v4580_v25 }
 0xa2b   :  { %v4583_v12 = vsel %vm196_vm1, %v4342_v33, 0.0  ;;  %v4585_v49 = vsel %vm196_vm1, %v4343_v51, 0.0 }
 0xa2c   :  { %v4584_v61 = vadd.f32 %v4583_v12, %v4582_v7  ;;  %v4150_v54 = vpop.permute.xlu0 %4149  ;;  %v4157_v21 = vpop.permute.xlu1 %4156  ;;  %v4695_v12 = vld [vmem:[%s11805_s12] sm:$0xff] }
 0xa2d   :  { %v4344_v35 = vmul.f32 %v7669_v5, %v4150_v54  ;;  %v4345_v6 = vmul.f32 %v7670_v28, %v4157_v21  ;;  %v4697_v28 = vld [vmem:[%s11805_s12 + $0x10] sm:$0xff] }
 0xa2e   :  { %v4586_v47 = vadd.f32 %v4585_v49, %v4584_v61  ;;  %v4696_v61 = vld [vmem:[%s11805_s12 + $0x8] sm:$0xff] }
 0xa2f   :  { %v4587_v62 = vsel %vm196_vm1, %v4344_v35, 0.0  ;;  %v4589_v8 = vsel %vm196_vm1, %v4345_v6, 0.0  ;;  %v6987_v5 = vpack.c.bf16 %v4696_v61, %v4695_v12  ;;  %v4698_v6 = vld [vmem:[%s11805_s12 + $0x18] sm:$0xff]  ;;  %v12292_v12 = vld [vmem:[#allocation43_spill] sm:$0xff] }
 0xa30   :  { %v4588_v40 = vadd.f32 %v4587_v62, %v4586_v47  ;;  %v4164_v9 = vpop.permute.xlu0 %4163  ;;  %v4171_v60 = vpop.permute.xlu1 %4170  ;;  %v6990_v47 = vpack.c.bf16 %v4698_v6, %v4697_v28  ;;  %v12282_v62 = vmov 0.0   ;;  %v12296_v6 = vld [vmem:[#allocation51_spill] sm:$0xff] }
 0xa31   :  { %v4346_v58 = vmul.f32 %v7671_v26, %v4164_v9  ;;  %v4347_v41 = vmul.f32 %v7672_v36, %v4171_v60 }
 0xa32   :  { %v4590_v4 = vadd.f32 %v4589_v8, %v4588_v40  ;;  %v12283_v40 = vld [vmem:[#allocation65_spill] sm:$0xff]  ;;  %v6503_v8 = vld [vmem:[%s11807_s14] ss:$0 sm:$0xff]  ;;  %s7734_s14 = smov 32  }
 0xa33   :  { %v4591_v43 = vsel %vm196_vm1, %v4346_v58, 0.0  ;;  %v4593_v16 = vsel %vm196_vm1, %v4347_v41, 0.0  ;;  %v6501_v41 = vld [vmem:[%s11806_s13] ss:$0 sm:$0xff] }
 0xa34   :  { %v4592_v15 = vadd.f32 %v4591_v43, %v4590_v4  ;;  %v4178_v59 = vpop.permute.xlu0 %4177  ;;  %v4185_v19 = vpop.permute.xlu1 %4184 }
 0xa35   :  { %v4348_v17 = vmul.f32 %v7673_v44, %v4178_v59  ;;  %v4349_v30 = vmul.f32 %v7674_v20, %v4185_v19 }
 0xa36   :  { %v4594_v50 = vadd.f32 %v4593_v16, %v4592_v15 }
 0xa37   :  { %v4595_v22 = vsel %vm196_vm1, %v4348_v17, 0.0  ;;  %v4597_v57 = vsel %vm196_vm1, %v4349_v30, 0.0 }
 0xa38   :  { %v4596_v34 = vadd.f32 %v4595_v22, %v4594_v50  ;;  %v4192_v56 = vpop.permute.xlu0 %4191  ;;  %v4199_v52 = vpop.permute.xlu1 %4198  ;;  %v4805_v50 = vld [vmem:[%s11802_s9] sm:$0xff]  ;;  %v4806_v22 = vld [vmem:[%s11802_s9 + $0x8] sm:$0xff] }
 0xa39   :  { %v4350_v23 = vmul.f32 %v7675_v63, %v4192_v56  ;;  %v4351_v11 = vmul.f32 %v7676_v29, %v4199_v52  ;;  %v6993_v56 = vpack.c.bf16 %v4806_v22, %v4805_v50  ;;  %v4808_v52 = vld [vmem:[%s11802_s9 + $0x18] sm:$0xff] }
 0xa3a   :  { %v4598_v27 = vadd.f32 %v4597_v57, %v4596_v34  ;;  %v4807_v34 = vld [vmem:[%s11802_s9 + $0x10] sm:$0xff]  ;;  %v12307_v22 = vld [vmem:[#allocation81_spill] sm:$0xff] }
 0xa3b   :  { %v4599_v32 = vsel %vm196_vm1, %v4350_v23, 0.0  ;;  %v4601_v53 = vsel %vm196_vm1, %v4351_v11, 0.0  ;;  %v6996_v57 = vpack.c.bf16 %v4808_v52, %v4807_v34 }
 0xa3c   :  { %v4600_v42 = vadd.f32 %v4599_v32, %v4598_v27  ;;  %v4206_v55 = vpop.permute.xlu0 %4205  ;;  %v4213_v46 = vpop.permute.xlu1 %4212 }
 0xa3d   :  { %v4352_v39 = vmul.f32 %v7677_v13, %v4206_v55  ;;  %v4353_v2 = vmul.f32 %v7678_v0, %v4213_v46  ;;  %v12284_v13 = vld [vmem:[#allocation31_spill] sm:$0xff] }
 0xa3e   :  { %v4602_v45 = vadd.f32 %v4601_v53, %v4600_v42 }
 0xa3f   :  { %v4603_v37 = vsel %vm196_vm1, %v4352_v39, 0.0  ;;  %v4605_v3 = vsel %vm196_vm1, %v4353_v2, 0.0  ;;  %v12285_v39 = vld [vmem:[#allocation32_spill] sm:$0xff] }
 0xa40   :  { %v4604_v25 = vadd.f32 %v4603_v37, %v4602_v45  ;;  %v4220_v31 = vpop.permute.xlu0 %4219  ;;  %v4227_v14 = vpop.permute.xlu1 %4226  ;;  %v12286_v2 = vld [vmem:[#allocation36_spill] sm:$0xff] }
 0xa41   :  { %v4354_v33 = vmul.f32 %v7679_v1, %v4220_v31  ;;  %v4355_v51 = vmul.f32 %v7680_v24, %v4227_v14  ;;  %v12287_v37 = vld [vmem:[#allocation40_spill] sm:$0xff]  ;;  %v12288_v31 = vld [vmem:[#allocation35_spill] sm:$0xff] }
 0xa42   :  { %v4606_v7 = vadd.f32 %v4605_v3, %v4604_v25  ;;  %v12289_v3 = vld [vmem:[#allocation44_spill] sm:$0xff] }
 0xa43   :  { %v4607_v54 = vsel %vm196_vm1, %v4354_v33, 0.0  ;;  %v4609_v49 = vsel %vm196_vm1, %v4355_v51, 0.0  ;;  %v12290_v33 = vld [vmem:[#allocation39_spill] sm:$0xff]  ;;  %v12291_v51 = vld [vmem:[#allocation48_spill] sm:$0xff] }
 0xa44   :  { %v4608_v21 = vadd.f32 %v4607_v54, %v4606_v7  ;;  %v12293_v54 = vld [vmem:[#allocation52_spill] sm:$0xff] }
 0xa46   :  { %v4610_v35 = vadd.f32 %v4609_v49, %v4608_v21  ;;  %v12294_v49 = vld [vmem:[#allocation47_spill] sm:$0xff] }
 0xa48   :  { %6928 = vmatmul.mubr.msk.f32.vlgmr.msra.gmra.mrb[64].mxu0 %vm196_vm1, %v4610_v35  ;;  %v12295_v35 = vld [vmem:[#allocation56_spill] sm:$0xff] }
 0xa49   :  { %6988 = vmatpush3.bf16.msra.mxu0 %v6987_v5  ;;  %6938 = vmatprep.mubr.msk.f32.mxu0 %vm7731_vm0, %v12282_v62 }
 0xa4a   :  { %6989 = vmatprep.subr.bf16.mxu0 %v12281_v38 }
 0xa4d   :  { %6991 = vmatpush3.bf16.msra.mxu0 %v6990_v47 }
 0xa4e   :  { %6992 = vmatprep.subr.bf16.mxu0 %v12281_v38 }
 0xa50   :  { %6939 = vmatmul.mubr.msk.f32.vlgmr.msra.gmra.mrb[66].mxu0 %vm196_vm1, %v12283_v40 }
 0xa51   :  { %6949 = vmatprep.mubr.msk.f32.mxu0 %vm7731_vm0, %v12282_v62  ;;  %6994 = vmatpush3.bf16.msra.mxu0 %v6993_v56  ;;  %v12297_v62 = vld [vmem:[#allocation60_spill] sm:$0xff] }
 0xa52   :  { %6995 = vmatprep.subr.bf16.mxu0 %v12281_v38  ;;  %v12308_v56 = vld [vmem:[#allocation76_spill] sm:$0xff] }
 0xa55   :  { %6997 = vmatpush3.bf16.msra.mxu0 %v6996_v57  ;;  %v12309_v57 = vld [vmem:[#allocation85_spill] sm:$0xff] }
 0xb1b   :  { %v4691_v9 = vpop.f32.mrb[64].mxu0 }
 0xb1c   :  { %v6929_v60 = vpop.f32.mrb[65].mxu0  ;;  %v4692_v4 = vadd.f32 %v6501_v41, %v4691_v9  ;;  %v12298_v9 = vld [vmem:[#allocation55_spill] sm:$0xff]  ;;  %v12301_v41 = vld [vmem:[#allocation69_spill] sm:$0xff] }
 0xb23   :  { %v4772_v26 = vpop.f32.mrb[66].mxu0 }
 0xb24   :  { %v4773_v58 = vadd.f32 %v6503_v8, %v4772_v26  ;;  %v6940_v36 = vpop.f32.mrb[67].mxu0  ;;  %v12299_v8 = vld [vmem:[#allocation64_spill] sm:$0xff] }
 0xb26   :  { %4784 = vrot.lane.b32.xlu0 %v4773_v58, %s7733_s29  ;;  %v4776_v43 = vadd.f32 %v4773_v58, %v4692_v4  ;;  %v12300_v58 = vld [vmem:[#allocation59_spill] sm:$0xff] }
 0xb28   :  { %v6505_v15 = vmul.f32 -1.442695, %v4776_v43  ;;  %v12302_v43 = vld [vmem:[#allocation63_spill] sm:$0xff] }
 0xb2a   :  { %7290 = vpow2.f32 %v6505_v15 }
 0xb34   :  { %v7291_v59 = vpop.eup %7290 }
 0xb35   :  { %v4780_v19 = vadd.f32 1.0, %v7291_v59  ;;  %v12303_v59 = vld [vmem:[#allocation73_spill] sm:$0xff] }
 0xb37   :  { %7292 = vrcp.f32 %v4780_v19 }
 0xb41   :  { %v7293_v16 = vpop.eup %7292 }
 0xb42   :  { %v4794_v29 = vsub.f32 1.0, %v7293_v16 }
 0xb98   :  { %v4785_v44 = vpop.permute.xlu0 %4784 }
 0xb99   :  { %v4787_v17 = vmul.f32 %v7293_v16, %v4785_v44 }
 0xb9b   :  { %4789 = vrot.lane.b32.xlu1 %v4787_v17, %s7733_s29  ;;  %v12305_v17 = vld [vmem:[#allocation77_spill] sm:$0xff] }
 0xb9f   :  { %4800 = vrot.lane.b32.xlu1 %v12283_v40, %s7734_s14 }
 0xc0d   :  { %v4790_v20 = vpop.permute.xlu1 %4789 }
 0xc0e   :  { %v4792_v30 = vadd.f32 %v4790_v20, %v4692_v4 }
 0xc10   :  { %7294 = vtanh.f32 %v4792_v30  ;;  %v12306_v30 = vld [vmem:[#allocation72_spill] sm:$0xff] }
 0xc11   :  { %v4801_v23 = vpop.permute.xlu1 %4800 }
 0xc12   :  { %v4803_v27 = vmul.f32 %v7293_v16, %v4801_v23  ;;  %v12304_v16 = vld [vmem:[#allocation68_spill] sm:$0xff] }
 0xc13   :  { %v12310_v23 = vld [vmem:[#allocation80_spill] sm:$0xff] }
 0xc1a   :  { %v7295_v63 = vpop.eup %7294 }
 0xc1b   :  { %4796 = vrot.lane.b32.xlu0 %v7295_v63, %s7735_s22 }
 0xc8d   :  { %v4797_v11 = vpop.permute.xlu0 %4796 }
 0xc8e   :  { %v4799_v32 = vmul.f32 %v4797_v11, %v4794_v29  ;;  %v12311_v11 = vld [vmem:[#allocation89_spill] sm:$0xff] }
 0xc90   :  { %v4804_v42 = vadd.f32 %v4803_v27, %v4799_v32  ;;  %v12312_v32 = vld [vmem:[#allocation84_spill] sm:$0xff] }
 0xc92   :  { %4810 = vrot.lane.b32.xlu0 %v4804_v42, %s7735_s22 }
 0xd04   :  { %v4811_v55 = vpop.permute.xlu0 %4810 }
 0xd05   :  { %6950 = vmatmul.mubr.msk.f32.vlgmr.msra.gmra.mrb[68].mxu0 %vm196_vm1, %v4811_v55  ;;  %v12313_v55 = vld [vmem:[#allocation93_spill] sm:$0xff] }
 0xdd8   :  { %v10693_v46 = vpop.f32.mrb[68].mxu0 }
 0xdd9   :  { %v6951_v53 = vpop.f32.mrb[69].mxu0  ;;  %v4886_v38 = vadd.f32 %v12284_v13, %v10693_v46  ;;  %v4885_v0 = vadd.f32 %v10693_v46, %v12285_v39  ;;  %v4887_v45 = vadd.f32 %v10693_v46, %v12286_v2  ;;  %v4889_v25 = vadd.f32 %v10693_v46, %v12287_v37  ;;  %v12314_v13 = vld [vmem:[#allocation88_spill] sm:$0xff]  ;;  %v12315_v39 = vld [vmem:[#allocation97_spill] sm:$0xff]  ;;  %v10806_v2 = vld [vmem:[%s11803_s10] ss:$0 sm:$0xff] }
 0xdda   :  { %v4888_v14 = vadd.f32 %v12288_v31, %v10693_v46  ;;  %v4891_v1 = vadd.f32 %v10693_v46, %v12289_v3  ;;  %v4890_v24 = vadd.f32 %v12290_v33, %v10693_v46  ;;  %v4893_v7 = vadd.f32 %v10693_v46, %v12291_v51  ;;  %v12320_v51 = vld [vmem:[#allocation100_spill] sm:$0xff] }
 0xddb   :  { %7296 = vtanh.f32 %v4886_v38  ;;  %v4892_v61 = vadd.f32 %v12292_v12, %v10693_v46  ;;  %v4895_v21 = vadd.f32 %v10693_v46, %v12293_v54  ;;  %v10717_v5 = vadd.f32 %v12294_v49, %v10693_v46  ;;  %v12321_v54 = vld [vmem:[#allocation109_spill] sm:$0xff] }
 0xddc   :  { %7298 = vtanh.f32 %v4885_v0  ;;  %v10721_v28 = vadd.f32 %v10693_v46, %v12295_v35  ;;  %v10725_v47 = vadd.f32 %v12296_v6, %v10693_v46  ;;  %v10729_v40 = vadd.f32 %v10693_v46, %v12297_v62  ;;  %v12322_v6 = vld [vmem:[#allocation104_spill] sm:$0xff] }
 0xddd   :  { %7300 = vtanh.f32 %v4887_v45  ;;  %v10733_v60 = vadd.f32 %v12298_v9, %v10693_v46  ;;  %v10737_v26 = vadd.f32 %v10693_v46, %v12299_v8  ;;  %v10741_v36 = vadd.f32 %v12300_v58, %v10693_v46  ;;  %v12316_v45 = vld [vmem:[#allocation92_spill] sm:$0xff]  ;;  %v12323_v9 = vld [vmem:[#allocation113_spill] sm:$0xff] }
 0xdde   :  { %7302 = vtanh.f32 %v4889_v25  ;;  %v10745_v4 = vadd.f32 %v10693_v46, %v12301_v41  ;;  %v10749_v15 = vadd.f32 %v12302_v43, %v10693_v46  ;;  %v10753_v19 = vadd.f32 %v10693_v46, %v12303_v59  ;;  %v12317_v25 = vld [vmem:[#allocation101_spill] sm:$0xff]  ;;  %v12324_v58 = vld [vmem:[#allocation108_spill] sm:$0xff] }
 0xddf   :  { %v10757_v44 = vadd.f32 %v12304_v16, %v10693_v46  ;;  %v10761_v20 = vadd.f32 %v10693_v46, %v12305_v17  ;;  %v10765_v50 = vadd.f32 %v12306_v30, %v10693_v46  ;;  %v10769_v34 = vadd.f32 %v10693_v46, %v12307_v22  ;;  %v12325_v16 = vld [vmem:[#allocation117_spill] sm:$0xff] }
 0xde0   :  { %v10773_v52 = vadd.f32 %v12308_v56, %v10693_v46  ;;  %v10777_v63 = vadd.f32 %v10693_v46, %v12309_v57  ;;  %7304 = vtanh.f32 %v4888_v14  ;;  %v10781_v29 = vadd.f32 %v12310_v23, %v10693_v46  ;;  %v12318_v14 = vld [vmem:[#allocation96_spill] sm:$0xff]  ;;  %v12327_v57 = vld [vmem:[#allocation121_spill] sm:$0xff] }
 0xde1   :  { %v10785_v27 = vadd.f32 %v10693_v46, %v12311_v11  ;;  %v10789_v42 = vadd.f32 %v12312_v32, %v10693_v46  ;;  %7306 = vtanh.f32 %v4891_v1  ;;  %v10793_v53 = vadd.f32 %v10693_v46, %v12313_v55  ;;  %v12319_v1 = vld [vmem:[#allocation105_spill] sm:$0xff]  ;;  %v12328_v11 = vld [vmem:[#allocation116_spill] sm:$0xff]  ;;  %v12329_v55 = vld [vmem:[#allocation130_spill] sm:$0xff] }
 0xde2   :  { %v10797_v38 = vadd.f32 %v12314_v13, %v10693_v46  ;;  %v10801_v0 = vadd.f32 %v10693_v46, %v12315_v39  ;;  %v10810_v37 = vadd.f32 %v12316_v45, %v10693_v46  ;;  %v10814_v31 = vadd.f32 %v10693_v46, %v12317_v25  ;;  %v12330_v39 = vld [vmem:[#allocation120_spill] sm:$0xff]  ;;  %v12331_v25 = vld [vmem:[#allocation134_spill] sm:$0xff] }
 0xde3   :  { %v10818_v3 = vadd.f32 %v12318_v14, %v10693_v46  ;;  %v10822_v33 = vadd.f32 %v10693_v46, %v12319_v1  ;;  %v10826_v12 = vadd.f32 %v12320_v51, %v10693_v46  ;;  %v10830_v49 = vadd.f32 %v10693_v46, %v12321_v54  ;;  %v12332_v1 = vld [vmem:[#allocation128_spill] sm:$0xff] }
 0xde4   :  { %7308 = vtanh.f32 %v4890_v24  ;;  %v10834_v62 = vadd.f32 %v12322_v6, %v10693_v46  ;;  %v10838_v8 = vadd.f32 %v10693_v46, %v12323_v9  ;;  %v10842_v41 = vadd.f32 %v12324_v58, %v10693_v46  ;;  %v12326_v24 = vld [vmem:[#allocation112_spill] sm:$0xff] }
 0xde5   :  { %v7297_v35 = vpop.eup %7296  ;;  %7310 = vtanh.f32 %v4893_v7  ;;  %v10847_v17 = vadd.f32 %v10693_v46, %v12325_v16  ;;  %v10851_v30 = vadd.f32 %v12326_v24, %v10693_v46  ;;  %v10856_v23 = vadd.f32 %v10693_v46, %v12327_v57  ;;  %v12334_v9 = vld [vmem:[#allocation132_spill] sm:$0xff] }
 0xde6   :  { %v7299_v43 = vpop.eup %7298  ;;  %v5148_v59 = vmul.f32 %v7297_v35, %v10806_v2  ;;  %v10860_v32 = vadd.f32 %v12328_v11, %v10693_v46  ;;  %v10864_v13 = vadd.f32 %v10693_v46, %v12329_v55  ;;  %v10868_v45 = vadd.f32 %v12330_v39, %v10693_v46  ;;  %v12333_v35 = vld [vmem:[#allocation138_spill] sm:$0xff]  ;;  %v12336_v24 = vld [vmem:[#allocation136_spill] sm:$0xff] }
 0xde7   :  { %v7301_v22 = vpop.eup %7300  ;;  %v5147_v56 = vmul.f32 %v7299_v43, %v10806_v2  ;;  %7312 = vtanh.f32 %v4892_v61  ;;  %v10872_v14 = vadd.f32 %v10693_v46, %v12331_v25  ;;  %v10876_v51 = vadd.f32 %v12332_v1, %v10693_v46  ;;  %v12338_v11 = vld [vmem:[#allocation140_spill] sm:$0xff]  ;;  %v12340_v25 = vld [vmem:[#allocation17_spill] sm:$0xff] }
 0xde8   :  { %v7303_v7 = vpop.eup %7302  ;;  %5277 = vadd.xlane.f32.xlu0 %v5148_v59  ;;  %v5149_v54 = vmul.f32 %v7301_v22, %v10806_v2  ;;  %7314 = vtanh.f32 %v4895_v21  ;;  %v10881_v6 = vadd.f32 %v10693_v46, %v12333_v35  ;;  %v10885_v58 = vadd.f32 %v12334_v9, %v10693_v46  ;;  %v12335_v59 = vld [vmem:[#allocation142_spill] sm:$0xff] }
 0xde9   :  { %5275 = vadd.xlane.f32.xlu1 %v5147_v56  ;;  %v5151_v43 = vmul.f32 %v7303_v7, %v10806_v2  ;;  %v10890_v16 = vadd.f32 %v10693_v46, %v12335_v59  ;;  %v10894_v56 = vadd.f32 %v12336_v24, %v10693_v46  ;;  %v12337_v22 = vld [vmem:[#allocation18_spill] sm:$0xff]  ;;  %v10902_v55 = vadd.f32 %v12338_v11, %v10693_v46  ;;  %v12339_v7 = vld [vmem:[#allocation20_spill] sm:$0xff] }
 0xdea   :  { %v7305_v61 = vpop.eup %7304  ;;  %v10898_v57 = vadd.f32 %v10693_v46, %v12337_v22  ;;  %7316 = vtanh.f32 %v10717_v5  ;;  %v10907_v39 = vadd.f32 %v10693_v46, %v12339_v7  ;;  %v10911_v1 = vadd.f32 %v12340_v25, %v10693_v46  ;;  %v12341_v35 = vld [vmem:[#allocation22_spill] sm:$0xff]  ;;  %v12343_v22 = vld [vmem:[#allocation24_spill] sm:$0xff]  ;;  %v12344_v7 = vld [vmem:[#allocation21_spill] sm:$0xff] }
 0xdeb   :  { %v7307_v21 = vpop.eup %7306  ;;  %7318 = vtanh.f32 %v10721_v28  ;;  %v10917_v9 = vadd.f32 %v10693_v46, %v12341_v35  ;;  %v10926_v11 = vadd.f32 %v10693_v46, %v12343_v22  ;;  %v12345_v25 = vld [vmem:[#allocation26_spill] sm:$0xff] }
 0xdec   :  { %5279 = vadd.xlane.f32.xlu0 %v5149_v54  ;;  %v5150_v54 = vmul.f32 %v7305_v61, %v10806_v2  ;;  %v5153_v24 = vmul.f32 %v7307_v21, %v10806_v2  ;;  %v10930_v61 = vadd.f32 %v12344_v7, %v10693_v46  ;;  %v10934_v35 = vadd.f32 %v10693_v46, %v12345_v25  ;;  %v12349_v21 = vld [vmem:[#allocation28_spill] sm:$0xff]  ;;  %v12351_v7 = vld [vmem:[#allocation25_spill] sm:$0xff]  ;;  %v12353_v25 = vld [vmem:[#allocation30_spill] sm:$0xff] }
 0xded   :  { %5283 = vadd.xlane.f32.xlu1 %v5151_v43  ;;  %v12342_v43 = vld [vmem:[#allocation19_spill] sm:$0xff]  ;;  %7320 = vtanh.f32 %v10725_v47  ;;  %v10943_v22 = vadd.f32 %v10693_v46, %v12349_v21  ;;  %v10947_v10 = vadd.f32 %v12351_v7, %v10693_v46  ;;  %v12357_v7 = vld [vmem:[#allocation29_spill] sm:$0xff] }
 0xdee   :  { %v10921_v59 = vadd.f32 %v12342_v43, %v10693_v46  ;;  %v7309_v5 = vpop.eup %7308  ;;  %12346 = vst [vmem:[#allocation146_spill] sm:$0xff] %v10934_v35  ;;  %v12347_v43 = vld [vmem:[#allocation23_spill] sm:$0xff]  ;;  %7322 = vtanh.f32 %v10729_v40  ;;  %v10953_v35 = vadd.f32 %v10693_v46, %v12353_v25 }
 0xdef   :  { %v7311_v28 = vpop.eup %7310  ;;  %v10938_v18 = vadd.f32 %v12347_v43, %v10693_v46  ;;  %12350 = vst [vmem:[#allocation148_spill] sm:$0xff] %v10943_v22  ;;  %12352 = vst [vmem:[#allocation149_spill] sm:$0xff] %v10947_v10  ;;  %v12356_v22 = vld [vmem:[#allocation34_spill] sm:$0xff]  ;;  %7324 = vtanh.f32 %v10733_v60 }
 0xdf0   :  { %5281 = vadd.xlane.f32.xlu0 %v5150_v54  ;;  %v5152_v54 = vmul.f32 %v7309_v5, %v10806_v2  ;;  %v5155_v21 = vmul.f32 %v7311_v28, %v10806_v2  ;;  %v10966_v5 = vadd.f32 %v12357_v7, %v10693_v46  ;;  %v12359_v10 = vld [vmem:[#allocation38_spill] sm:$0xff]  ;;  %v12365_v7 = vld [vmem:[#allocation37_spill] sm:$0xff]  ;;  %7326 = vtanh.f32 %v10737_v26 }
 0xdf1   :  { %12348 = vst [vmem:[#allocation147_spill] sm:$0xff] %v10938_v18  ;;  %5287 = vadd.xlane.f32.xlu1 %v5153_v24  ;;  %v12354_v24 = vld [vmem:[#allocation27_spill] sm:$0xff]  ;;  %v7313_v47 = vpop.eup %7312  ;;  %v10962_v18 = vadd.f32 %v10693_v46, %v12356_v22  ;;  %v10970_v25 = vadd.f32 %v10693_v46, %v12359_v10  ;;  %v12363_v28 = vld [vmem:[#allocation42_spill] sm:$0xff]  ;;  %7328 = vtanh.f32 %v10741_v36 }
 0xdf2   :  { %v10957_v43 = vadd.f32 %v12354_v24, %v10693_v46  ;;  %12358 = vst [vmem:[#allocation151_spill] sm:$0xff] %v10966_v5  ;;  %v7315_v40 = vpop.eup %7314  ;;  %v12361_v24 = vld [vmem:[#allocation33_spill] sm:$0xff]  ;;  %v10979_v22 = vadd.f32 %v10693_v46, %v12363_v28  ;;  %v10983_v5 = vadd.f32 %v12365_v7, %v10693_v46  ;;  %v12367_v10 = vld [vmem:[#allocation46_spill] sm:$0xff]  ;;  %7330 = vtanh.f32 %v10745_v4 }
 0xdf3   :  { %12360 = vst [vmem:[#allocation152_spill] sm:$0xff] %v10970_v25  ;;  %v10989_v25 = vadd.f32 %v10693_v46, %v12367_v10  ;;  %v5157_v28 = vmul.f32 %v7315_v40, %v10806_v2  ;;  %v12371_v7 = vld [vmem:[#allocation45_spill] sm:$0xff]  ;;  %v12377_v40 = vld [vmem:[#allocation58_spill] sm:$0xff]  ;;  %7332 = vtanh.f32 %v10749_v15 }
 0xdf4   :  { %12355 = vst [vmem:[#allocation150_spill] sm:$0xff] %v10957_v43  ;;  %5285 = vadd.xlane.f32.xlu0 %v5152_v54  ;;  %v10974_v43 = vadd.f32 %v12361_v24, %v10693_v46  ;;  %12364 = vst [vmem:[#allocation154_spill] sm:$0xff] %v10979_v22  ;;  %v5154_v54 = vmul.f32 %v7313_v47, %v10806_v2  ;;  %v7317_v60 = vpop.eup %7316  ;;  %v12370_v22 = vld [vmem:[#allocation50_spill] sm:$0xff]  ;;  %v11002_v47 = vadd.f32 %v12371_v7, %v10693_v46  ;;  %v12379_v7 = vld [vmem:[#allocation53_spill] sm:$0xff] }
 0xdf5   :  { %5291 = vadd.xlane.f32.xlu1 %v5155_v21  ;;  %12366 = vst [vmem:[#allocation155_spill] sm:$0xff] %v10983_v5  ;;  %v12368_v21 = vld [vmem:[#allocation41_spill] sm:$0xff]  ;;  %v7319_v26 = vpop.eup %7318  ;;  %v12373_v5 = vld [vmem:[#allocation54_spill] sm:$0xff]  ;;  %7334 = vtanh.f32 %v10753_v19 }
 0xdf6   :  { %12362 = vst [vmem:[#allocation153_spill] sm:$0xff] %v10974_v43  ;;  %v10993_v24 = vadd.f32 %v12368_v21, %v10693_v46  ;;  %v10998_v43 = vadd.f32 %v10693_v46, %v12370_v22  ;;  %12372 = vst [vmem:[#allocation157_spill] sm:$0xff] %v11002_v47  ;;  %v11006_v10 = vadd.f32 %v10693_v46, %v12373_v5  ;;  %v12375_v21 = vld [vmem:[#allocation49_spill] sm:$0xff]  ;;  %v12381_v5 = vld [vmem:[#allocation62_spill] sm:$0xff]  ;;  %7336 = vtanh.f32 %v10757_v44 }
 0xdf7   :  { %v11015_v22 = vadd.f32 %v10693_v46, %v12377_v40  ;;  %v11019_v47 = vadd.f32 %v12379_v7, %v10693_v46  ;;  %v7321_v36 = vpop.eup %7320  ;;  %v5159_v40 = vmul.f32 %v7319_v26, %v10806_v2  ;;  %v12385_v7 = vld [vmem:[#allocation61_spill] sm:$0xff]  ;;  %v12391_v26 = vld [vmem:[#allocation75_spill] sm:$0xff]  ;;  %7338 = vtanh.f32 %v10761_v20 }
 0xdf8   :  { %12369 = vst [vmem:[#allocation156_spill] sm:$0xff] %v10993_v24  ;;  %5289 = vadd.xlane.f32.xlu0 %v5154_v54  ;;  %12374 = vst [vmem:[#allocation158_spill] sm:$0xff] %v11006_v10  ;;  %v11010_v24 = vadd.f32 %v12375_v21, %v10693_v46  ;;  %v5156_v54 = vmul.f32 %v7317_v60, %v10806_v2  ;;  %v11025_v10 = vadd.f32 %v10693_v46, %v12381_v5  ;;  %v7323_v4 = vpop.eup %7322 }
 0xdf9   :  { %5295 = vadd.xlane.f32.xlu1 %v5157_v28  ;;  %12378 = vst [vmem:[#allocation160_spill] sm:$0xff] %v11015_v22  ;;  %12380 = vst [vmem:[#allocation161_spill] sm:$0xff] %v11019_v47  ;;  %v12382_v28 = vld [vmem:[#allocation57_spill] sm:$0xff]  ;;  %v12384_v22 = vld [vmem:[#allocation67_spill] sm:$0xff]  ;;  %v11038_v60 = vadd.f32 %v12385_v7, %v10693_v46  ;;  %v7325_v15 = vpop.eup %7324  ;;  %7340 = vtanh.f32 %v10765_v50 }
 0xdfa   :  { %12376 = vst [vmem:[#allocation159_spill] sm:$0xff] %v11010_v24  ;;  %v11029_v21 = vadd.f32 %v12382_v28, %v10693_v46  ;;  %v11034_v24 = vadd.f32 %v10693_v46, %v12384_v22  ;;  %v12387_v47 = vld [vmem:[#allocation71_spill] sm:$0xff]  ;;  %v12389_v28 = vld [vmem:[#allocation66_spill] sm:$0xff]  ;;  %v11051_v22 = vadd.f32 %v10693_v46, %v12391_v26  ;;  %v5161_v26 = vmul.f32 %v7323_v4, %v10806_v2  ;;  %v7327_v19 = vpop.eup %7326 }
 0xdfb   :  { %12386 = vst [vmem:[#allocation163_spill] sm:$0xff] %v11038_v60  ;;  %v11042_v5 = vadd.f32 %v10693_v46, %v12387_v47  ;;  %v12393_v7 = vld [vmem:[#allocation70_spill] sm:$0xff]  ;;  %v12395_v47 = vld [vmem:[#allocation79_spill] sm:$0xff]  ;;  %v7329_v44 = vpop.eup %7328  ;;  %7342 = vtanh.f32 %v10769_v34 }
 0xdfc   :  { %12383 = vst [vmem:[#allocation162_spill] sm:$0xff] %v11029_v21  ;;  %5293 = vadd.xlane.f32.xlu0 %v5156_v54  ;;  %v11046_v21 = vadd.f32 %v12389_v28, %v10693_v46  ;;  %12392 = vst [vmem:[#allocation166_spill] sm:$0xff] %v11051_v22  ;;  %v11055_v60 = vadd.f32 %v12393_v7, %v10693_v46  ;;  %v5158_v54 = vmul.f32 %v7321_v36, %v10806_v2  ;;  %v12398_v22 = vld [vmem:[#allocation83_spill] sm:$0xff]  ;;  %v12400_v7 = vld [vmem:[#allocation78_spill] sm:$0xff]  ;;  %v7331_v20 = vpop.eup %7330 }
 0xdfd   :  { %12388 = vst [vmem:[#allocation164_spill] sm:$0xff] %v11042_v5  ;;  %5299 = vadd.xlane.f32.xlu1 %v5159_v40  ;;  %v11061_v5 = vadd.f32 %v10693_v46, %v12395_v47  ;;  %v12397_v40 = vld [vmem:[#allocation74_spill] sm:$0xff]  ;;  %v11074_v36 = vadd.f32 %v12400_v7, %v10693_v46  ;;  %v7333_v50 = vpop.eup %7332  ;;  %7344 = vtanh.f32 %v10773_v52 }
 0xdfe   :  { %12390 = vst [vmem:[#allocation165_spill] sm:$0xff] %v11046_v21  ;;  %12394 = vst [vmem:[#allocation167_spill] sm:$0xff] %v11055_v60  ;;  %v11065_v28 = vadd.f32 %v12397_v40, %v10693_v46  ;;  %v11070_v21 = vadd.f32 %v10693_v46, %v12398_v22  ;;  %v12401_v47 = vld [vmem:[#allocation90_spill] sm:$0xff]  ;;  %v12403_v60 = vld [vmem:[#allocation91_spill] sm:$0xff]  ;;  %7346 = vtanh.f32 %v10777_v63 }
 0xdff   :  { %12396 = vst [vmem:[#allocation168_spill] sm:$0xff] %v11061_v5  ;;  %v11078_v5 = vadd.f32 %v12401_v47, %v10693_v46  ;;  %v11082_v40 = vadd.f32 %v10693_v46, %v12403_v60  ;;  %v12405_v4 = vld [vmem:[#allocation82_spill] sm:$0xff]  ;;  %v12409_v47 = vld [vmem:[#allocation107_spill] sm:$0xff]  ;;  %v7335_v34 = vpop.eup %7334  ;;  %7348 = vtanh.f32 %v10781_v29 }
 0xe00   :  { %12399 = vst [vmem:[#allocation169_spill] sm:$0xff] %v11070_v21  ;;  %5297 = vadd.xlane.f32.xlu0 %v5158_v54  ;;  %v11087_v22 = vadd.f32 %v12405_v4, %v10693_v46  ;;  %v12407_v21 = vld [vmem:[#allocation95_spill] sm:$0xff]  ;;  %v5160_v54 = vmul.f32 %v7325_v15, %v10806_v2  ;;  %v12411_v60 = vld [vmem:[#allocation94_spill] sm:$0xff]  ;;  %v5163_v4 = vmul.f32 %v7327_v19, %v10806_v2  ;;  %v7337_v52 = vpop.eup %7336  ;;  %7350 = vtanh.f32 %v10785_v27 }
 0xe01   :  { %12402 = vst [vmem:[#allocation170_spill] sm:$0xff] %v11078_v5  ;;  %12404 = vst [vmem:[#allocation171_spill] sm:$0xff] %v11082_v40  ;;  %5303 = vadd.xlane.f32.xlu1 %v5161_v26  ;;  %v11091_v7 = vadd.f32 %v10693_v46, %v12407_v21  ;;  %v11097_v5 = vadd.f32 %v10693_v46, %v12409_v47  ;;  %v11101_v26 = vadd.f32 %v12411_v60, %v10693_v46  ;;  %v12413_v21 = vld [vmem:[#allocation106_spill] sm:$0xff]  ;;  %v7339_v63 = vpop.eup %7338 }
 0xe02   :  { %12406 = vst [vmem:[#allocation172_spill] sm:$0xff] %v11087_v22  ;;  %v12412_v22 = vld [vmem:[#allocation87_spill] sm:$0xff]  ;;  %v11110_v15 = vadd.f32 %v12413_v21, %v10693_v46  ;;  %v12419_v19 = vld [vmem:[#allocation98_spill] sm:$0xff]  ;;  %7352 = vtanh.f32 %v10789_v42 }
 0xe03   :  { %12408 = vst [vmem:[#allocation173_spill] sm:$0xff] %v11091_v7  ;;  %12410 = vst [vmem:[#allocation174_spill] sm:$0xff] %v11097_v5  ;;  %v11106_v40 = vadd.f32 %v10693_v46, %v12412_v22  ;;  %v12415_v7 = vld [vmem:[#allocation111_spill] sm:$0xff]  ;;  %v11123_v22 = vadd.f32 %v12419_v19, %v10693_v46  ;;  %v12421_v21 = vld [vmem:[#allocation86_spill] sm:$0xff]  ;;  %v5165_v19 = vmul.f32 %v7331_v20, %v10806_v2  ;;  %v7341_v29 = vpop.eup %7340  ;;  %7354 = vtanh.f32 %v10793_v53 }
 0xe04   :  { %12414 = vst [vmem:[#allocation175_spill] sm:$0xff] %v11110_v15  ;;  %5301 = vadd.xlane.f32.xlu0 %v5160_v54  ;;  %v11114_v47 = vadd.f32 %v10693_v46, %v12415_v7  ;;  %v12417_v5 = vld [vmem:[#allocation99_spill] sm:$0xff]  ;;  %v11127_v15 = vadd.f32 %v12421_v21, %v10693_v46  ;;  %v5162_v54 = vmul.f32 %v7329_v44, %v10806_v2  ;;  %v12427_v21 = vld [vmem:[#allocation122_spill] sm:$0xff]  ;;  %7356 = vtanh.f32 %v10797_v38 }
 0xe05   :  { %v11118_v60 = vadd.f32 %v10693_v46, %v12417_v5  ;;  %5307 = vadd.xlane.f32.xlu1 %v5163_v4  ;;  %12420 = vst [vmem:[#allocation178_spill] sm:$0xff] %v11123_v22  ;;  %v12423_v7 = vld [vmem:[#allocation123_spill] sm:$0xff]  ;;  %v12425_v5 = vld [vmem:[#allocation110_spill] sm:$0xff]  ;;  %v11146_v44 = vadd.f32 %v12427_v21, %v10693_v46  ;;  %v7343_v27 = vpop.eup %7342  ;;  %7358 = vtanh.f32 %v10801_v0 }
 0xe06   :  { %12416 = vst [vmem:[#allocation176_spill] sm:$0xff] %v11114_v47  ;;  %12422 = vst [vmem:[#allocation179_spill] sm:$0xff] %v11127_v15  ;;  %v11133_v47 = vadd.f32 %v10693_v46, %v12423_v7  ;;  %v11137_v4 = vadd.f32 %v12425_v5, %v10693_v46  ;;  %v12426_v22 = vld [vmem:[#allocation103_spill] sm:$0xff]  ;;  %v12429_v15 = vld [vmem:[#allocation125_spill] sm:$0xff]  ;;  %7360 = vtanh.f32 %v10810_v37 }
 0xe07   :  { %12418 = vst [vmem:[#allocation177_spill] sm:$0xff] %v11118_v60  ;;  %v11142_v60 = vadd.f32 %v10693_v46, %v12426_v22  ;;  %12428 = vst [vmem:[#allocation181_spill] sm:$0xff] %v11146_v44  ;;  %v11150_v7 = vadd.f32 %v10693_v46, %v12429_v15  ;;  %v12433_v20 = vld [vmem:[#allocation114_spill] sm:$0xff]  ;;  %v12437_v15 = vld [vmem:[#allocation135_spill] sm:$0xff]  ;;  %7362 = vtanh.f32 %v10814_v31 }
 0xe08   :  { %12424 = vst [vmem:[#allocation180_spill] sm:$0xff] %v11133_v47  ;;  %5305 = vadd.xlane.f32.xlu0 %v5162_v54  ;;  %v12431_v47 = vld [vmem:[#allocation115_spill] sm:$0xff]  ;;  %v11159_v22 = vadd.f32 %v12433_v20, %v10693_v46  ;;  %v12435_v21 = vld [vmem:[#allocation102_spill] sm:$0xff]  ;;  %v5164_v54 = vmul.f32 %v7333_v50, %v10806_v2  ;;  %v5167_v20 = vmul.f32 %v7335_v34, %v10806_v2  ;;  %7364 = vtanh.f32 %v10818_v3 }
 0xe09   :  { %12430 = vst [vmem:[#allocation182_spill] sm:$0xff] %v11150_v7  ;;  %v11154_v5 = vadd.f32 %v10693_v46, %v12431_v47  ;;  %5311 = vadd.xlane.f32.xlu1 %v5165_v19  ;;  %v11163_v44 = vadd.f32 %v12435_v21, %v10693_v46  ;;  %v11169_v7 = vadd.f32 %v10693_v46, %v12437_v15  ;;  %v12439_v47 = vld [vmem:[#allocation124_spill] sm:$0xff]  ;;  %v12441_v21 = vld [vmem:[#allocation133_spill] sm:$0xff]  ;;  %v12446_v34 = vld [vmem:[#allocation126_spill] sm:$0xff]  ;;  %7366 = vtanh.f32 %v10822_v33 }
 0xe0a   :  { %12434 = vst [vmem:[#allocation184_spill] sm:$0xff] %v11159_v22  ;;  %v11173_v19 = vadd.f32 %v12439_v47, %v10693_v46  ;;  %v12440_v22 = vld [vmem:[#allocation119_spill] sm:$0xff]  ;;  %v11182_v50 = vadd.f32 %v12441_v21, %v10693_v46  ;;  %v12448_v21 = vld [vmem:[#allocation118_spill] sm:$0xff]  ;;  %7368 = vtanh.f32 %v10826_v12 }
 0xe0b   :  { %12432 = vst [vmem:[#allocation183_spill] sm:$0xff] %v11154_v5  ;;  %12436 = vst [vmem:[#allocation185_spill] sm:$0xff] %v11163_v44  ;;  %v11178_v5 = vadd.f32 %v10693_v46, %v12440_v22  ;;  %v12443_v44 = vld [vmem:[#allocation139_spill] sm:$0xff]  ;;  %v11195_v22 = vadd.f32 %v12446_v34, %v10693_v46  ;;  %v5169_v34 = vmul.f32 %v7339_v63, %v10806_v2  ;;  %7370 = vtanh.f32 %v10830_v49 }
 0xe0c   :  { %12438 = vst [vmem:[#allocation186_spill] sm:$0xff] %v11169_v7  ;;  %12442 = vst [vmem:[#allocation187_spill] sm:$0xff] %v11182_v50  ;;  %5309 = vadd.xlane.f32.xlu0 %v5164_v54  ;;  %v11186_v15 = vadd.f32 %v10693_v46, %v12443_v44  ;;  %v12445_v7 = vld [vmem:[#allocation127_spill] sm:$0xff]  ;;  %v11199_v50 = vadd.f32 %v12448_v21, %v10693_v46  ;;  %v5166_v54 = vmul.f32 %v7337_v52, %v10806_v2 }
 0xe0d   :  { %v11190_v47 = vadd.f32 %v10693_v46, %v12445_v7  ;;  %5315 = vadd.xlane.f32.xlu1 %v5167_v20  ;;  %12447 = vst [vmem:[#allocation189_spill] sm:$0xff] %v11195_v22  ;;  %v12450_v44 = vld [vmem:[#allocation131_spill] sm:$0xff]  ;;  %v12451_v7 = vld [vmem:[#allocation137_spill] sm:$0xff]  ;;  %v11214_v22 = vadd.f32 %v12222_v48, %v10693_v46  ;;  %v12457_v48 = vld [vmem:[#allocation144_spill] sm:$0xff]  ;;  %7372 = vtanh.f32 %v10834_v62 }
 0xe0e   :  { %12444 = vst [vmem:[#allocation188_spill] sm:$0xff] %v11186_v15  ;;  %12449 = vst [vmem:[#allocation190_spill] sm:$0xff] %v11199_v50  ;;  %v11205_v15 = vadd.f32 %v10693_v46, %v12450_v44  ;;  %v11209_v20 = vadd.f32 %v12451_v7, %v10693_v46  ;;  %v12453_v21 = vld [vmem:[#allocation143_spill] sm:$0xff]  ;;  %v12455_v50 = vld [vmem:[#allocation145_spill] sm:$0xff]  ;;  %v11231_v63 = vadd.f32 %v12457_v48, %v10693_v46  ;;  %7374 = vtanh.f32 %v10838_v8 }
 0xe0f   :  { %v11218_v52 = vadd.f32 %v10693_v46, %v12453_v21  ;;  %v11222_v44 = vadd.f32 %v10693_v46, %v12455_v50  ;;  %v12456_v7 = vld [vmem:[#allocation141_spill] sm:$0xff]  ;;  %v5168_v21 = vmul.f32 %v7341_v29, %v10806_v2 }
 0xe10   :  { %12452 = vst [vmem:[#allocation191_spill] sm:$0xff] %v11209_v20  ;;  %5313 = vadd.xlane.f32.xlu0 %v5166_v54  ;;  %v11226_v20 = vadd.f32 %v12456_v7, %v10693_v46  ;;  %v7345_v54 = vpop.eup %7344  ;;  %7376 = vtanh.f32 %v10842_v41 }
 0xe11   :  { %12454 = vst [vmem:[#allocation192_spill] sm:$0xff] %v11218_v52  ;;  %5319 = vadd.xlane.f32.xlu1 %v5169_v34  ;;  %v5171_v52 = vmul.f32 %v7343_v27, %v10806_v2  ;;  %v7347_v50 = vpop.eup %7346  ;;  %v5170_v34 = vmul.f32 %v7345_v54, %v10806_v2  ;;  %7378 = vtanh.f32 %v10847_v17 }
 0xe12   :  { %v7349_v42 = vpop.eup %7348  ;;  %v5173_v46 = vmul.f32 %v7347_v50, %v10806_v2  ;;  %7380 = vtanh.f32 %v10851_v30 }
 0xe13   :  { %v7351_v7 = vpop.eup %7350  ;;  %v5172_v53 = vmul.f32 %v7349_v42, %v10806_v2  ;;  %7382 = vtanh.f32 %v10856_v23 }
 0xe14   :  { %5317 = vadd.xlane.f32.xlu0 %v5168_v21  ;;  %v7353_v29 = vpop.eup %7352  ;;  %7384 = vtanh.f32 %v10860_v32 }
 0xe15   :  { %5323 = vadd.xlane.f32.xlu1 %v5171_v52  ;;  %v5175_v52 = vmul.f32 %v7351_v7, %v10806_v2  ;;  %v7355_v38 = vpop.eup %7354  ;;  %v5174_v0 = vmul.f32 %v7353_v29, %v10806_v2  ;;  %7386 = vtanh.f32 %v10864_v13 }
 0xe16   :  { %v7357_v27 = vpop.eup %7356  ;;  %v5177_v48 = vmul.f32 %v7355_v38, %v10806_v2  ;;  %7388 = vtanh.f32 %v10868_v45 }
 0xe17   :  { %v7359_v37 = vpop.eup %7358  ;;  %v5176_v31 = vmul.f32 %v7357_v27, %v10806_v2  ;;  %7390 = vtanh.f32 %v10872_v14 }
 0xe18   :  { %5321 = vadd.xlane.f32.xlu0 %v5170_v34  ;;  %v7361_v21 = vpop.eup %7360  ;;  %v5179_v54 = vmul.f32 %v7359_v37, %v10806_v2  ;;  %7392 = vtanh.f32 %v10876_v51 }
 0xe19   :  { %5327 = vadd.xlane.f32.xlu1 %v5173_v46  ;;  %v7363_v3 = vpop.eup %7362  ;;  %v5178_v33 = vmul.f32 %v7361_v21, %v10806_v2  ;;  %7394 = vtanh.f32 %v10881_v6 }
 0xe1a   :  { %v7365_v50 = vpop.eup %7364  ;;  %v5181_v34 = vmul.f32 %v7363_v3, %v10806_v2  ;;  %7396 = vtanh.f32 %v10885_v58 }
 0xe1b   :  { %v7367_v12 = vpop.eup %7366  ;;  %v5180_v49 = vmul.f32 %v7365_v50, %v10806_v2  ;;  %7398 = vtanh.f32 %v10890_v16 }
 0xe1c   :  { %5325 = vadd.xlane.f32.xlu0 %v5172_v53  ;;  %v7369_v42 = vpop.eup %7368  ;;  %v5183_v46 = vmul.f32 %v7367_v12, %v10806_v2  ;;  %7400 = vtanh.f32 %v10894_v56 }
 0xe1d   :  { %5331 = vadd.xlane.f32.xlu1 %v5175_v52  ;;  %v7371_v62 = vpop.eup %7370  ;;  %v5182_v8 = vmul.f32 %v7369_v42, %v10806_v2  ;;  %7402 = vtanh.f32 %v10898_v57  ;;  %v12458_v42 = vld [vmem:[#allocation146_spill] sm:$0xff] }
 0xe1e   :  { %v7373_v7 = vpop.eup %7372  ;;  %v5185_v53 = vmul.f32 %v7371_v62, %v10806_v2  ;;  %7404 = vtanh.f32 %v10902_v55 }
 0xe1f   :  { %v7375_v41 = vpop.eup %7374  ;;  %v5184_v17 = vmul.f32 %v7373_v7, %v10806_v2  ;;  %7406 = vtanh.f32 %v10907_v39  ;;  %v12460_v7 = vld [vmem:[#allocation148_spill] sm:$0xff] }
 0xe20   :  { %5329 = vadd.xlane.f32.xlu0 %v5174_v0  ;;  %v7377_v29 = vpop.eup %7376  ;;  %v5187_v52 = vmul.f32 %v7375_v41, %v10806_v2  ;;  %7408 = vtanh.f32 %v10911_v1 }
 0xe21   :  { %5335 = vadd.xlane.f32.xlu1 %v5177_v48  ;;  %v7379_v30 = vpop.eup %7378  ;;  %v5186_v23 = vmul.f32 %v7377_v29, %v10806_v2  ;;  %7410 = vtanh.f32 %v10917_v9 }
 0xe22   :  { %v7381_v38 = vpop.eup %7380  ;;  %v5189_v0 = vmul.f32 %v7379_v30, %v10806_v2  ;;  %7412 = vtanh.f32 %v10921_v59 }
 0xe23   :  { %v7383_v32 = vpop.eup %7382  ;;  %v5188_v13 = vmul.f32 %v7381_v38, %v10806_v2  ;;  %7414 = vtanh.f32 %v10926_v11  ;;  %v12462_v38 = vld [vmem:[#allocation150_spill] sm:$0xff] }
 0xe24   :  { %5333 = vadd.xlane.f32.xlu0 %v5176_v31  ;;  %v7385_v27 = vpop.eup %7384  ;;  %v5191_v48 = vmul.f32 %v7383_v32, %v10806_v2  ;;  %7416 = vtanh.f32 %v10930_v61 }
 0xe25   :  { %5339 = vadd.xlane.f32.xlu1 %v5179_v54  ;;  %v7387_v45 = vpop.eup %7386  ;;  %v5190_v14 = vmul.f32 %v7385_v27, %v10806_v2  ;;  %7418 = vtanh.f32 %v12458_v42 }
 0xe26   :  { %v7389_v37 = vpop.eup %7388  ;;  %v5193_v31 = vmul.f32 %v7387_v45, %v10806_v2  ;;  %v12464_v45 = vld [vmem:[#allocation152_spill] sm:$0xff] }
 0xe27   :  { %v7391_v51 = vpop.eup %7390  ;;  %v5192_v6 = vmul.f32 %v7389_v37, %v10806_v2 }
 0xe28   :  { %5337 = vadd.xlane.f32.xlu0 %v5178_v33  ;;  %v7393_v21 = vpop.eup %7392  ;;  %v5195_v54 = vmul.f32 %v7391_v51, %v10806_v2  ;;  %v12465_v51 = vld [vmem:[#allocation153_spill] sm:$0xff] }
 0xe29   :  { %5343 = vadd.xlane.f32.xlu1 %v5181_v34  ;;  %v7395_v58 = vpop.eup %7394  ;;  %v5194_v16 = vmul.f32 %v7393_v21, %v10806_v2 }
 0xe2a   :  { %v7397_v3 = vpop.eup %7396  ;;  %v5197_v33 = vmul.f32 %v7395_v58, %v10806_v2 }
 0xe2b   :  { %v7399_v56 = vpop.eup %7398  ;;  %v5196_v57 = vmul.f32 %v7397_v3, %v10806_v2 }
 0xe2c   :  { %5341 = vadd.xlane.f32.xlu0 %v5180_v49  ;;  %v7401_v50 = vpop.eup %7400  ;;  %v5199_v34 = vmul.f32 %v7399_v56, %v10806_v2 }
 0xe2d   :  { %5347 = vadd.xlane.f32.xlu1 %v5183_v46  ;;  %v7403_v55 = vpop.eup %7402  ;;  %v5198_v39 = vmul.f32 %v7401_v50, %v10806_v2  ;;  %v12468_v50 = vld [vmem:[#allocation156_spill] sm:$0xff] }
 0xe2e   :  { %v7405_v12 = vpop.eup %7404  ;;  %v5201_v49 = vmul.f32 %v7403_v55, %v10806_v2 }
 0xe2f   :  { %v7407_v1 = vpop.eup %7406  ;;  %v5200_v9 = vmul.f32 %v7405_v12, %v10806_v2 }
 0xe30   :  { %5345 = vadd.xlane.f32.xlu0 %v5182_v8  ;;  %v7409_v46 = vpop.eup %7408  ;;  %v5203_v62 = vmul.f32 %v7407_v1, %v10806_v2  ;;  %v12459_v8 = vld [vmem:[#allocation147_spill] sm:$0xff]  ;;  %v12470_v1 = vld [vmem:[#allocation158_spill] sm:$0xff] }
 0xe31   :  { %5351 = vadd.xlane.f32.xlu1 %v5185_v53  ;;  %v7411_v59 = vpop.eup %7410  ;;  %7420 = vtanh.f32 %v12459_v8  ;;  %v5202_v11 = vmul.f32 %v7409_v46, %v10806_v2 }
 0xe32   :  { %7422 = vtanh.f32 %v12460_v7  ;;  %v7413_v53 = vpop.eup %7412  ;;  %v5205_v41 = vmul.f32 %v7411_v59, %v10806_v2  ;;  %v12472_v59 = vld [vmem:[#allocation9_spill] sm:$0xff] }
 0xe33   :  { %v7415_v61 = vpop.eup %7414  ;;  %v5204_v29 = vmul.f32 %v7413_v53, %v10806_v2  ;;  %v12473_v53 = vld [vmem:[#allocation160_spill] sm:$0xff] }
 0xe34   :  { %5349 = vadd.xlane.f32.xlu0 %v5184_v17  ;;  %v12461_v17 = vld [vmem:[#allocation149_spill] sm:$0xff]  ;;  %v5207_v30 = vmul.f32 %v7415_v61, %v10806_v2 }
 0xe35   :  { %5355 = vadd.xlane.f32.xlu1 %v5187_v52  ;;  %7424 = vtanh.f32 %v12461_v17  ;;  %v7417_v52 = vpop.eup %7416 }
 0xe36   :  { %7426 = vtanh.f32 %v10953_v35 }
 0xe37   :  { %7428 = vtanh.f32 %v12462_v38 }
 0xe38   :  { %5353 = vadd.xlane.f32.xlu0 %v5186_v23  ;;  %v7419_v23 = vpop.eup %7418  ;;  %7430 = vtanh.f32 %v10962_v18 }
 0xe39   :  { %5359 = vadd.xlane.f32.xlu1 %v5189_v0  ;;  %v5206_v0 = vmul.f32 %v7417_v52, %v10806_v2 }
 0xe3b   :  { %v7421_v32 = vpop.eup %7420 }
 0xe3c   :  { %5357 = vadd.xlane.f32.xlu0 %v5188_v13  ;;  %v5209_v13 = vmul.f32 %v7419_v23, %v10806_v2  ;;  %v7423_v27 = vpop.eup %7422  ;;  %v5208_v35 = vmul.f32 %v7421_v32, %v10806_v2  ;;  %v12474_v23 = vld [vmem:[#allocation161_spill] sm:$0xff] }
 0xe3d   :  { %5363 = vadd.xlane.f32.xlu1 %v5191_v48  ;;  %v12463_v48 = vld [vmem:[#allocation151_spill] sm:$0xff]  ;;  %v5211_v37 = vmul.f32 %v7423_v27, %v10806_v2 }
 0xe3e   :  { %7432 = vtanh.f32 %v12463_v48 }
 0xe3f   :  { %7434 = vtanh.f32 %v12464_v45 }
 0xe40   :  { %5361 = vadd.xlane.f32.xlu0 %v5190_v14  ;;  %v7425_v14 = vpop.eup %7424  ;;  %7436 = vtanh.f32 %v12465_v51 }
 0xe41   :  { %5367 = vadd.xlane.f32.xlu1 %v5193_v31  ;;  %v7427_v31 = vpop.eup %7426  ;;  %v5210_v18 = vmul.f32 %v7425_v14, %v10806_v2  ;;  %v12475_v14 = vld [vmem:[#allocation162_spill] sm:$0xff] }
 0xe42   :  { %v7429_v21 = vpop.eup %7428 }
 0xe43   :  { %v7431_v58 = vpop.eup %7430  ;;  %v5212_v3 = vmul.f32 %v7429_v21, %v10806_v2 }
 0xe44   :  { %5365 = vadd.xlane.f32.xlu0 %v5192_v6  ;;  %v12466_v6 = vld [vmem:[#allocation154_spill] sm:$0xff]  ;;  %v5215_v56 = vmul.f32 %v7431_v58, %v10806_v2 }
 0xe45   :  { %5371 = vadd.xlane.f32.xlu1 %v5195_v54  ;;  %7438 = vtanh.f32 %v12466_v6  ;;  %v5213_v54 = vmul.f32 %v7427_v31, %v10806_v2 }
 0xe48   :  { %5369 = vadd.xlane.f32.xlu0 %v5194_v16  ;;  %v12467_v16 = vld [vmem:[#allocation155_spill] sm:$0xff] }
 0xe49   :  { %5375 = vadd.xlane.f32.xlu1 %v5197_v33  ;;  %7440 = vtanh.f32 %v12467_v16  ;;  %v7433_v33 = vpop.eup %7432 }
 0xe4a   :  { %7442 = vtanh.f32 %v10989_v25 }
 0xe4b   :  { %7444 = vtanh.f32 %v12468_v50 }
 0xe4c   :  { %5373 = vadd.xlane.f32.xlu0 %v5196_v57  ;;  %v7435_v57 = vpop.eup %7434  ;;  %7446 = vtanh.f32 %v10998_v43  ;;  %v12471_v43 = vld [vmem:[#allocation159_spill] sm:$0xff] }
 0xe4d   :  { %5379 = vadd.xlane.f32.xlu1 %v5199_v34  ;;  %v5214_v34 = vmul.f32 %v7433_v33, %v10806_v2  ;;  %v7437_v55 = vpop.eup %7436 }
 0xe4e   :  { %v5216_v25 = vmul.f32 %v7437_v55, %v10806_v2 }
 0xe4f   :  { %v7439_v12 = vpop.eup %7438 }
 0xe50   :  { %5377 = vadd.xlane.f32.xlu0 %v5198_v39  ;;  %v5217_v39 = vmul.f32 %v7435_v57, %v10806_v2  ;;  %v5219_v42 = vmul.f32 %v7439_v12, %v10806_v2  ;;  %v12477_v57 = vld [vmem:[#allocation164_spill] sm:$0xff] }
 0xe51   :  { %5383 = vadd.xlane.f32.xlu1 %v5201_v49  ;;  %v12469_v49 = vld [vmem:[#allocation157_spill] sm:$0xff] }
 0xe52   :  { %7448 = vtanh.f32 %v12469_v49 }
 0xe53   :  { %7450 = vtanh.f32 %v12470_v1 }
 0xe54   :  { %5381 = vadd.xlane.f32.xlu0 %v5200_v9  ;;  %v7441_v9 = vpop.eup %7440  ;;  %7452 = vtanh.f32 %v12471_v43 }
 0xe55   :  { %5387 = vadd.xlane.f32.xlu1 %v5203_v62  ;;  %v7443_v46 = vpop.eup %7442  ;;  %v5218_v7 = vmul.f32 %v7441_v9, %v10806_v2  ;;  %7454 = vtanh.f32 %v12473_v53 }
 0xe56   :  { %v5221_v17 = vmul.f32 %v7443_v46, %v10806_v2  ;;  %7456 = vtanh.f32 %v12474_v23 }
 0xe57   :  { %7458 = vtanh.f32 %v11025_v10 }
 0xe58   :  { %5385 = vadd.xlane.f32.xlu0 %v5202_v11  ;;  %7460 = vtanh.f32 %v12475_v14 }
 0xe59   :  { %5391 = vadd.xlane.f32.xlu1 %v5205_v41  ;;  %v7445_v41 = vpop.eup %7444  ;;  %7462 = vtanh.f32 %v11034_v24 }
 0xe5a   :  { %v5220_v32 = vmul.f32 %v7445_v41, %v10806_v2  ;;  %v12480_v41 = vld [vmem:[#allocation167_spill] sm:$0xff] }
 0xe5c   :  { %5389 = vadd.xlane.f32.xlu0 %v5204_v29  ;;  %v7447_v29 = vpop.eup %7446 }
 0xe5d   :  { %5395 = vadd.xlane.f32.xlu1 %v5207_v30  ;;  %v5223_v27 = vmul.f32 %v7447_v29, %v10806_v2 }
 0xe60   :  { %5393 = vadd.xlane.f32.xlu0 %v5206_v0 }
 0xe61   :  { %5399 = vadd.xlane.f32.xlu1 %v5209_v13  ;;  %v7449_v13 = vpop.eup %7448 }
 0xe62   :  { %v7451_v48 = vpop.eup %7450  ;;  %v5222_v51 = vmul.f32 %v7449_v13, %v10806_v2 }
 0xe63   :  { %v5225_v6 = vmul.f32 %v7451_v48, %v10806_v2 }
 0xe64   :  { %5397 = vadd.xlane.f32.xlu0 %v5208_v35 }
 0xe65   :  { %5403 = vadd.xlane.f32.xlu1 %v5211_v37 }
 0xe68   :  { %5401 = vadd.xlane.f32.xlu0 %v5210_v18  ;;  %v7453_v18 = vpop.eup %7452 }
 0xe69   :  { %5407 = vadd.xlane.f32.xlu1 %v5213_v54  ;;  %v7455_v21 = vpop.eup %7454  ;;  %v5224_v24 = vmul.f32 %v7453_v18, %v10806_v2 }
 0xe6a   :  { %v7457_v50 = vpop.eup %7456  ;;  %v5227_v55 = vmul.f32 %v7455_v21, %v10806_v2 }
 0xe6b   :  { %v5226_v46 = vmul.f32 %v7457_v50, %v10806_v2 }
 0xe6c   :  { %5405 = vadd.xlane.f32.xlu0 %v5212_v3  ;;  %v12476_v3 = vld [vmem:[#allocation163_spill] sm:$0xff] }
 0xe6d   :  { %5411 = vadd.xlane.f32.xlu1 %v5215_v56  ;;  %7464 = vtanh.f32 %v12476_v3  ;;  %v12483_v3 = vld [vmem:[#allocation170_spill] sm:$0xff] }
 0xe6e   :  { %7466 = vtanh.f32 %v12477_v57 }
 0xe70   :  { %5409 = vadd.xlane.f32.xlu0 %v5214_v34 }
 0xe71   :  { %5415 = vadd.xlane.f32.xlu1 %v5217_v39  ;;  %v7459_v39 = vpop.eup %7458 }
 0xe72   :  { %v7461_v43 = vpop.eup %7460 }
 0xe74   :  { %5413 = vadd.xlane.f32.xlu0 %v5216_v25  ;;  %v12478_v25 = vld [vmem:[#allocation165_spill] sm:$0xff] }
 0xe75   :  { %5419 = vadd.xlane.f32.xlu1 %v5219_v42  ;;  %v5278_v62 = vpop.xlane.xlu0 %5277  ;;  %7468 = vtanh.f32 %v12478_v25  ;;  %v12485_v25 = vld [vmem:[#allocation172_spill] sm:$0xff] }
 0xe76   :  { %v5666_v8 = vrot.slane %v5278_v62, %v12472_v59  ;;  %v5276_v11 = vpop.xlane.xlu1 %5275  ;;  %v12479_v62 = vld [vmem:[#allocation166_spill] sm:$0xff] }
 0xe77   :  { %v5662_v61 = vrot.slane %v5276_v11, %v12472_v59  ;;  %7470 = vtanh.f32 %v12479_v62  ;;  %v7463_v11 = vpop.eup %7462 }
 0xe78   :  { %5417 = vadd.xlane.f32.xlu0 %v5218_v7  ;;  %7472 = vtanh.f32 %v12480_v41  ;;  %v7465_v23 = vpop.eup %7464  ;;  %v11408_v41 = vld [vmem:[%s11803_s10] ss:$0 sm:$0xff]  ;;  %s7736_s10 = smov [#allocation2]  }
 0xe79   :  { %v6171_v52 = vsel %vm497_vm2, %v5666_v8, %v5662_v61  ;;  %5423 = vadd.xlane.f32.xlu1 %v5221_v17  ;;  %v5280_v30 = vpop.xlane.xlu0 %5279  ;;  %v5229_v8 = vmul.f32 %v7459_v39, %v10806_v2  ;;  %v5230_v14 = vmul.f32 %v7465_v23, %v10806_v2  ;;  %s6339_s7 = sshll.u32 %s7736_s10, 4  ;;  %s6340_s7 = int_to_ptr.vmem [resolvable:$true] %s6339_s7 }
 0xe7a   :  { %v5670_v38 = vrot.slane %v5280_v30, %v12472_v59  ;;  %v5284_v0 = vpop.xlane.xlu1 %5283  ;;  %v12481_v30 = vld [vmem:[#allocation168_spill] sm:$0xff]  ;;  %s7682_s6 = scalar_lea.vmem %s6340_s7, 128  ;;  %p7687_p1 = scmp.lt.s32.totalorder %s6340_s7, %s6340_s7 }
 0xe7b   :  { %v5678_v10 = vrot.slane %v5284_v0, %v12472_v59  ;;  %7474 = vtanh.f32 %v12481_v30  ;;  %v5231_v0 = vmul.f32 %v7463_v11, %v10806_v2  ;;  %p7683_p0 = scmp.ne.s32.totalorder %s6340_s7, %s7682_s6  ;;  %p7688_p2 = scmp.lt.s32.totalorder %s7682_s6, %s7682_s6 }
 0xe7c   :  { %v6172_v35 = vsel %vm499_vm3, %v5670_v38, %v6171_v52  ;;  %5421 = vadd.xlane.f32.xlu0 %v5220_v32  ;;  %v5228_v52 = vmul.f32 %v7461_v43, %v10806_v2  ;;  %v7467_v32 = vpop.eup %7466  ;;  %7476 = vtanh.f32 %v11065_v28  ;;  %v12486_v43 = vld [vmem:[#allocation173_spill] sm:$0xff] }
 0xe7d   :  { %5427 = vadd.xlane.f32.xlu1 %v5223_v27  ;;  %v5282_v45 = vpop.xlane.xlu0 %5281  ;;  %v5233_v18 = vmul.f32 %v7467_v32, %v10806_v2  ;;  %p7689_p3 = por %p7688_p2, %p7687_p1 }
 0xe7e   :  { %v5674_v37 = vrot.slane %v5282_v45, %v12472_v59  ;;  %v5288_v31 = vpop.xlane.xlu1 %5287 }
 0xe7f   :  { %v5686_v34 = vrot.slane %v5288_v31, %v12472_v59  ;;  %v7469_v31 = vpop.eup %7468  ;;  %p7690_p4 = pnand %p7689_p3, %p7683_p0 }
 0xe80   :  { %v6173_v54 = vsel %vm501_vm4, %v5674_v37, %v6172_v35  ;;  %5425 = vadd.xlane.f32.xlu0 %v5222_v51  ;;  %v12482_v37 = vld [vmem:[#allocation169_spill] sm:$0xff] }
 0xe81   :  { %5431 = vadd.xlane.f32.xlu1 %v5225_v6  ;;  %v5286_v58 = vpop.xlane.xlu0 %5285  ;;  %v6174_v16 = vsel %vm503_vm5, %v5678_v10, %v6173_v54  ;;  %7478 = vtanh.f32 %v12482_v37  ;;  %v7471_v10 = vpop.eup %7470 }
 0xe82   :  { %v5682_v33 = vrot.slane %v5286_v58, %v12472_v59  ;;  %v5292_v56 = vpop.xlane.xlu1 %5291  ;;  %7480 = vtanh.f32 %v11074_v36 }
 0xe83   :  { %v5694_v61 = vrot.slane %v5292_v56, %v12472_v59  ;;  %7482 = vtanh.f32 %v12483_v3 }
 0xe84   :  { %v6175_v12 = vsel %vm505_vm6, %v5682_v33, %v6174_v16  ;;  %5429 = vadd.xlane.f32.xlu0 %v5224_v24  ;;  %v5232_v16 = vmul.f32 %v7469_v31, %v10806_v2  ;;  %v7473_v33 = vpop.eup %7472  ;;  %v5235_v24 = vmul.f32 %v7471_v10, %v10806_v2 }
 0xe85   :  { %5435 = vadd.xlane.f32.xlu1 %v5227_v55  ;;  %v5290_v49 = vpop.xlane.xlu0 %5289  ;;  %v6176_v1 = vsel %vm507_vm7, %v5686_v34, %v6175_v12  ;;  %v7475_v57 = vpop.eup %7474  ;;  %v12484_v55 = vld [vmem:[#allocation171_spill] sm:$0xff] }
 0xe86   :  { %v5690_v9 = vrot.slane %v5290_v49, %v12472_v59  ;;  %v5296_v42 = vpop.xlane.xlu1 %5295  ;;  %7484 = vtanh.f32 %v12484_v55  ;;  %v5234_v49 = vmul.f32 %v7473_v33, %v10806_v2  ;;  %v12490_v33 = vld [vmem:[#allocation177_spill] sm:$0xff] }
 0xe87   :  { %v5702_v38 = vrot.slane %v5296_v42, %v12472_v59  ;;  %7486 = vtanh.f32 %v12485_v25  ;;  %v12492_v25 = vld [vmem:[#allocation179_spill] sm:$0xff] }
 0xe88   :  { %5433 = vadd.xlane.f32.xlu0 %v5226_v46  ;;  %v11367_v7 = vsel %vm509_vm8, %v5690_v9, %v6176_v1  ;;  %v7477_v1 = vpop.eup %7476  ;;  %v5237_v9 = vmul.f32 %v7475_v57, %v10806_v2  ;;  %7488 = vtanh.f32 %v12486_v43  ;;  %v12493_v43 = vld [vmem:[#allocation180_spill] sm:$0xff] }
 0xe89   :  { %5439 = vadd.xlane.f32.xlu1 %v5229_v8  ;;  %v5294_v53 = vpop.xlane.xlu0 %5293  ;;  %v5236_v2 = vmul.f32 %v11408_v41, %v7477_v1 }
 0xe8a   :  { %v5698_v17 = vrot.slane %v5294_v53, %v12472_v59  ;;  %v5300_v29 = vpop.xlane.xlu1 %5299 }
 0xe8b   :  { %v5710_v51 = vrot.slane %v5300_v29, %v12472_v59  ;;  %v7479_v42 = vpop.eup %7478 }
 0xe8c   :  { %v6178_v13 = vsel %vm497_vm2, %v5698_v17, %v5694_v61  ;;  %5437 = vadd.xlane.f32.xlu0 %v5228_v52  ;;  %v12487_v61 = vld [vmem:[#allocation174_spill] sm:$0xff]  ;;  %v7481_v17 = vpop.eup %7480  ;;  %v5239_v52 = vmul.f32 %v11408_v41, %v7479_v42 }
 0xe8d   :  { %5443 = vadd.xlane.f32.xlu1 %v5231_v0  ;;  %v5298_v27 = vpop.xlane.xlu0 %5297  ;;  %v6179_v48 = vsel %vm499_vm3, %v5702_v38, %v6178_v13  ;;  %7490 = vtanh.f32 %v12487_v61  ;;  %v7483_v30 = vpop.eup %7482 }
 0xe8e   :  { %v5706_v35 = vrot.slane %v5298_v27, %v12472_v59  ;;  %v5304_v45 = vpop.xlane.xlu1 %5303  ;;  %7492 = vtanh.f32 %v11101_v26  ;;  %v5238_v27 = vmul.f32 %v11408_v41, %v7481_v17 }
 0xe8f   :  { %v5718_v56 = vrot.slane %v5304_v45, %v12472_v59  ;;  %7494 = vtanh.f32 %v11106_v40  ;;  %v5244_v45 = vmul.f32 %v11408_v41, %v7483_v30 }
 0xe90   :  { %v6180_v6 = vsel %vm501_vm4, %v5706_v35, %v6179_v48  ;;  %5441 = vadd.xlane.f32.xlu0 %v5230_v14  ;;  %v7485_v48 = vpop.eup %7484 }
 0xe91   :  { %5447 = vadd.xlane.f32.xlu1 %v5233_v18  ;;  %v5302_v21 = vpop.xlane.xlu0 %5301  ;;  %v6181_v28 = vsel %vm503_vm5, %v5710_v51, %v6180_v6  ;;  %v7487_v14 = vpop.eup %7486  ;;  %v12488_v51 = vld [vmem:[#allocation175_spill] sm:$0xff]  ;;  %v5243_v40 = vmul.f32 %v11408_v41, %v7485_v48  ;;  %v12489_v6 = vld [vmem:[#allocation176_spill] sm:$0xff] }
 0xe92   :  { %v5714_v54 = vrot.slane %v5302_v21, %v12472_v59  ;;  %v5308_v58 = vpop.xlane.xlu1 %5307  ;;  %7496 = vtanh.f32 %v12488_v51  ;;  %v7489_v21 = vpop.eup %7488 }
 0xe93   :  { %v5726_v8 = vrot.slane %v5308_v58, %v12472_v59  ;;  %7498 = vtanh.f32 %v12489_v6  ;;  %v12496_v6 = vld [vmem:[#allocation183_spill] sm:$0xff] }
 0xe94   :  { %v6182_v50 = vsel %vm505_vm6, %v5714_v54, %v6181_v28  ;;  %5445 = vadd.xlane.f32.xlu0 %v5232_v16  ;;  %v5240_v54 = vmul.f32 %v11408_v41, %v7487_v14  ;;  %7500 = vtanh.f32 %v12490_v33 }
 0xe95   :  { %5451 = vadd.xlane.f32.xlu1 %v5235_v24  ;;  %v5306_v34 = vpop.xlane.xlu0 %5305  ;;  %v6183_v36 = vsel %vm507_vm7, %v5718_v56, %v6182_v50  ;;  %v5245_v50 = vmul.f32 %v11408_v41, %v7489_v21 }
 0xe96   :  { %v5722_v39 = vrot.slane %v5306_v34, %v12472_v59  ;;  %v5312_v12 = vpop.xlane.xlu1 %5311  ;;  %v12491_v34 = vld [vmem:[#allocation178_spill] sm:$0xff] }
 0xe97   :  { %v5734_v29 = vrot.slane %v5312_v12, %v12472_v59  ;;  %v7491_v58 = vpop.eup %7490  ;;  %7502 = vtanh.f32 %v12491_v34 }
 0xe98   :  { %5449 = vadd.xlane.f32.xlu0 %v5234_v49  ;;  %v11400_v46 = vsel %vm509_vm8, %v5722_v39, %v6183_v36  ;;  %v7493_v55 = vpop.eup %7492  ;;  %v5251_v36 = vmul.f32 %v11408_v41, %v7491_v58  ;;  %7504 = vtanh.f32 %v12492_v25  ;;  %v12497_v58 = vld [vmem:[#allocation184_spill] sm:$0xff] }
 0xe99   :  { %5455 = vadd.xlane.f32.xlu1 %v5237_v9  ;;  %v5310_v62 = vpop.xlane.xlu0 %5309  ;;  %v7495_v39 = vpop.eup %7494  ;;  %7506 = vtanh.f32 %v12493_v43 }
 0xe9a   :  { %v5730_v11 = vrot.slane %v5310_v62, %v12472_v59  ;;  %v5316_v53 = vpop.xlane.xlu1 %5315  ;;  %v5246_v62 = vmul.f32 %v11408_v41, %v7493_v55  ;;  %7508 = vtanh.f32 %v11137_v4 }
 0xe9b   :  { %v5742_v35 = vrot.slane %v5316_v53, %v12472_v59  ;;  %v5241_v53 = vmul.f32 %v11408_v41, %v7495_v39  ;;  %7510 = vtanh.f32 %v11142_v60 }
 0xe9c   :  { %v6185_v23 = vsel %vm497_vm2, %v5730_v11, %v5726_v8  ;;  %5453 = vadd.xlane.f32.xlu0 %v5236_v2  ;;  %v7497_v8 = vpop.eup %7496 }
 0xe9d   :  { %5459 = vadd.xlane.f32.xlu1 %v5239_v52  ;;  %v5314_v38 = vpop.xlane.xlu0 %5313  ;;  %v6186_v0 = vsel %vm499_vm3, %v5734_v29, %v6185_v23  ;;  %v7499_v2 = vpop.eup %7498  ;;  %v5252_v23 = vmul.f32 %v11408_v41, %v7497_v8 }
 0xe9e   :  { %v5738_v32 = vrot.slane %v5314_v38, %v12472_v59  ;;  %v5320_v13 = vpop.xlane.xlu1 %5319  ;;  %v7501_v38 = vpop.eup %7500 }
 0xe9f   :  { %v5750_v28 = vrot.slane %v5320_v13, %v12472_v59  ;;  %v5247_v60 = vmul.f32 %v11408_v41, %v7501_v38  ;;  %v12500_v38 = vld [vmem:[#allocation187_spill] sm:$0xff] }
 0xea0   :  { %v6187_v37 = vsel %vm501_vm4, %v5738_v32, %v6186_v0  ;;  %5457 = vadd.xlane.f32.xlu0 %v5238_v27  ;;  %v5253_v32 = vmul.f32 %v11408_v41, %v7499_v2 }
 0xea1   :  { %5469 = vadd.xlane.f32.xlu1 %v5244_v45  ;;  %v5318_v31 = vpop.xlane.xlu0 %5317  ;;  %v6188_v26 = vsel %vm503_vm5, %v5742_v35, %v6187_v37  ;;  %v7503_v13 = vpop.eup %7502  ;;  %v12494_v35 = vld [vmem:[#allocation181_spill] sm:$0xff]  ;;  %v12495_v37 = vld [vmem:[#allocation182_spill] sm:$0xff] }
 0xea2   :  { %v5746_v18 = vrot.slane %v5318_v31, %v12472_v59  ;;  %v5324_v10 = vpop.xlane.xlu1 %5323  ;;  %7512 = vtanh.f32 %v12494_v35  ;;  %v7505_v31 = vpop.eup %7504 }
 0xea3   :  { %v5758_v1 = vrot.slane %v5324_v10, %v12472_v59  ;;  %7514 = vtanh.f32 %v12495_v37  ;;  %v7507_v51 = vpop.eup %7506 }
 0xea4   :  { %v6189_v16 = vsel %vm505_vm6, %v5746_v18, %v6188_v26  ;;  %5467 = vadd.xlane.f32.xlu0 %v5243_v40  ;;  %v5248_v26 = vmul.f32 %v11408_v41, %v7503_v13  ;;  %7516 = vtanh.f32 %v12496_v6  ;;  %v12501_v13 = vld [vmem:[#allocation188_spill] sm:$0xff] }
 0xea5   :  { %5461 = vadd.xlane.f32.xlu1 %v5240_v54  ;;  %v5322_v3 = vpop.xlane.xlu0 %5321  ;;  %v6190_v56 = vsel %vm507_vm7, %v5750_v28, %v6189_v16  ;;  %v5242_v54 = vmul.f32 %v11408_v41, %v7505_v31  ;;  %7518 = vtanh.f32 %v12497_v58  ;;  %v7509_v16 = vpop.eup %7508 }
 0xea6   :  { %v5754_v24 = vrot.slane %v5322_v3, %v12472_v59  ;;  %v5328_v57 = vpop.xlane.xlu1 %5327  ;;  %v5259_v3 = vmul.f32 %v11408_v41, %v7507_v51  ;;  %v5254_v39 = vmul.f32 %v11408_v41, %v7509_v16  ;;  %v12502_v51 = vld [vmem:[#allocation189_spill] sm:$0xff] }
 0xea7   :  { %v5766_v11 = vrot.slane %v5328_v57, %v12472_v59 }
 0xea8   :  { %5471 = vadd.xlane.f32.xlu0 %v5245_v50  ;;  %v11438_v12 = vsel %vm509_vm8, %v5754_v24, %v6190_v56  ;;  %v7511_v56 = vpop.eup %7510  ;;  %v12498_v50 = vld [vmem:[#allocation185_spill] sm:$0xff] }
 0xea9   :  { %5483 = vadd.xlane.f32.xlu1 %v5251_v36  ;;  %v5326_v49 = vpop.xlane.xlu0 %5325  ;;  %7520 = vtanh.f32 %v12498_v50 }
 0xeaa   :  { %v5762_v9 = vrot.slane %v5326_v49, %v12472_v59  ;;  %v5332_v42 = vpop.xlane.xlu1 %5331  ;;  %v12499_v49 = vld [vmem:[#allocation186_spill] sm:$0xff] }
 0xeab   :  { %v5774_v0 = vrot.slane %v5332_v42, %v12472_v59  ;;  %7522 = vtanh.f32 %v12499_v49 }
 0xeac   :  { %v6192_v61 = vsel %vm497_vm2, %v5762_v9, %v5758_v1  ;;  %5473 = vadd.xlane.f32.xlu0 %v5246_v62  ;;  %v7513_v25 = vpop.eup %7512  ;;  %v5249_v9 = vmul.f32 %v11408_v41, %v7511_v56  ;;  %7524 = vtanh.f32 %v11173_v19 }
 0xead   :  { %5463 = vadd.xlane.f32.xlu1 %v5241_v53  ;;  %v5330_v17 = vpop.xlane.xlu0 %5329  ;;  %v6193_v29 = vsel %vm499_vm3, %v5766_v11, %v6192_v61  ;;  %v7515_v42 = vpop.eup %7514  ;;  %v5260_v2 = vmul.f32 %v11408_v41, %v7513_v25  ;;  %7526 = vtanh.f32 %v11178_v5 }
 0xeae   :  { %v5770_v52 = vrot.slane %v5330_v17, %v12472_v59  ;;  %v5336_v30 = vpop.xlane.xlu1 %5335  ;;  %v7517_v61 = vpop.eup %7516  ;;  %7528 = vtanh.f32 %v12500_v38 }
 0xeaf   :  { %v5782_v10 = vrot.slane %v5336_v30, %v12472_v59  ;;  %v5255_v5 = vmul.f32 %v11408_v41, %v7517_v61  ;;  %7530 = vtanh.f32 %v12501_v13 }
 0xeb0   :  { %v6194_v27 = vsel %vm501_vm4, %v5770_v52, %v6193_v29  ;;  %5485 = vadd.xlane.f32.xlu0 %v5252_v23  ;;  %v5261_v29 = vmul.f32 %v11408_v41, %v7515_v42  ;;  %v7519_v52 = vpop.eup %7518  ;;  %7532 = vtanh.f32 %v11190_v47  ;;  %v12503_v47 = vld [vmem:[#allocation190_spill] sm:$0xff] }
 0xeb1   :  { %5487 = vadd.xlane.f32.xlu1 %v5253_v32  ;;  %v5334_v48 = vpop.xlane.xlu0 %5333  ;;  %v6195_v4 = vsel %vm503_vm5, %v5774_v0, %v6194_v27  ;;  %7534 = vtanh.f32 %v12502_v51 }
 0xeb2   :  { %v5778_v45 = vrot.slane %v5334_v48, %v12472_v59  ;;  %v5340_v14 = vpop.xlane.xlu1 %5339  ;;  %7536 = vtanh.f32 %v12503_v47 }
 0xeb3   :  { %v5790_v34 = vrot.slane %v5340_v14, %v12472_v59  ;;  %v7521_v27 = vpop.eup %7520  ;;  %7538 = vtanh.f32 %v11205_v15 }
 0xeb4   :  { %v6196_v18 = vsel %vm505_vm6, %v5778_v45, %v6195_v4  ;;  %5475 = vadd.xlane.f32.xlu0 %v5247_v60  ;;  %v5256_v4 = vmul.f32 %v11408_v41, %v7519_v52 }
 0xeb5   :  { %5477 = vadd.xlane.f32.xlu1 %v5248_v26  ;;  %v5338_v40 = vpop.xlane.xlu0 %5337  ;;  %v6197_v33 = vsel %vm507_vm7, %v5782_v10, %v6196_v18  ;;  %v7523_v35 = vpop.eup %7522  ;;  %v5250_v26 = vmul.f32 %v11408_v41, %v7521_v27 }
 0xeb6   :  { %v5786_v21 = vrot.slane %v5338_v40, %v12472_v59  ;;  %v5344_v28 = vpop.xlane.xlu1 %5343  ;;  %v7525_v18 = vpop.eup %7524  ;;  %v5267_v10 = vmul.f32 %v11408_v41, %v7523_v35 }
 0xeb7   :  { %v5798_v1 = vrot.slane %v5344_v28, %v12472_v59  ;;  %v7527_v40 = vpop.eup %7526  ;;  %v5262_v16 = vmul.f32 %v11408_v41, %v7525_v18 }
 0xeb8   :  { %5465 = vadd.xlane.f32.xlu0 %v5242_v54  ;;  %v11471_v24 = vsel %vm509_vm8, %v5786_v21, %v6197_v33  ;;  %v5257_v56 = vmul.f32 %v11408_v41, %v7527_v40 }
 0xeb9   :  { %5499 = vadd.xlane.f32.xlu1 %v5259_v3  ;;  %v5342_v57 = vpop.xlane.xlu0 %5341  ;;  %v7529_v3 = vpop.eup %7528 }
 0xeba   :  { %v5794_v55 = vrot.slane %v5342_v57, %v12472_v59  ;;  %v5348_v36 = vpop.xlane.xlu1 %5347  ;;  %v7531_v57 = vpop.eup %7530  ;;  %v5268_v15 = vmul.f32 %v11408_v41, %v7529_v3 }
 0xebb   :  { %v5806_v17 = vrot.slane %v5348_v36, %v12472_v59  ;;  %v12504_v36 = vld [vmem:[#allocation191_spill] sm:$0xff]  ;;  %v7533_v25 = vpop.eup %7532 }
 0xebc   :  { %v6199_v62 = vsel %vm497_vm2, %v5794_v55, %v5790_v34  ;;  %5489 = vadd.xlane.f32.xlu0 %v5254_v39  ;;  %7540 = vtanh.f32 %v12504_v36  ;;  %v7535_v42 = vpop.eup %7534 }
 0xebd   :  { %5479 = vadd.xlane.f32.xlu1 %v5249_v9  ;;  %v5346_v43 = vpop.xlane.xlu0 %5345  ;;  %v6200_v8 = vsel %vm499_vm3, %v5798_v1, %v6199_v62  ;;  %7542 = vtanh.f32 %v11214_v22  ;;  %v5269_v9 = vmul.f32 %v11408_v41, %v7531_v57  ;;  %v5263_v22 = vmul.f32 %v11408_v41, %v7533_v25  ;;  %v7537_v61 = vpop.eup %7536 }
 0xebe   :  { %v5802_v11 = vrot.slane %v5346_v43, %v12472_v59  ;;  %v5352_v53 = vpop.xlane.xlu1 %5351  ;;  %v7539_v52 = vpop.eup %7538 }
 0xebf   :  { %v5814_v48 = vrot.slane %v5352_v53, %v12472_v59 }
 0xec0   :  { %v6201_v30 = vsel %vm501_vm4, %v5802_v11, %v6200_v8  ;;  %5501 = vadd.xlane.f32.xlu0 %v5260_v2  ;;  %v12505_v11 = vld [vmem:[#allocation192_spill] sm:$0xff] }
 0xec1   :  { %5503 = vadd.xlane.f32.xlu1 %v5261_v29  ;;  %v5350_v23 = vpop.xlane.xlu0 %5349  ;;  %v6202_v19 = vsel %vm503_vm5, %v5806_v17, %v6201_v30  ;;  %7544 = vtanh.f32 %v12505_v11  ;;  %v5264_v29 = vmul.f32 %v11408_v41, %v7535_v42 }
 0xec2   :  { %v5810_v0 = vrot.slane %v5350_v23, %v12472_v59  ;;  %v5356_v32 = vpop.xlane.xlu1 %5355  ;;  %7546 = vtanh.f32 %v11222_v44  ;;  %v5258_v44 = vmul.f32 %v11408_v41, %v7537_v61 }
 0xec3   :  { %v5822_v28 = vrot.slane %v5356_v32, %v12472_v59  ;;  %7548 = vtanh.f32 %v11226_v20 }
 0xec4   :  { %v6203_v45 = vsel %vm505_vm6, %v5810_v0, %v6202_v19  ;;  %5491 = vadd.xlane.f32.xlu0 %v5255_v5  ;;  %v5265_v5 = vmul.f32 %v11408_v41, %v7539_v52  ;;  %7550 = vtanh.f32 %v11231_v63 }
 0xec5   :  { %5493 = vadd.xlane.f32.xlu1 %v5256_v4  ;;  %v5354_v14 = vpop.xlane.xlu0 %5353  ;;  %v6204_v60 = vsel %vm507_vm7, %v5814_v48, %v6203_v45 }
 0xec6   :  { %v5818_v37 = vrot.slane %v5354_v14, %v12472_v59  ;;  %v5360_v31 = vpop.xlane.xlu1 %5359  ;;  %v7541_v32 = vpop.eup %7540 }
 0xec7   :  { %v5830_v33 = vrot.slane %v5360_v31, %v12472_v59  ;;  %v7543_v13 = vpop.eup %7542  ;;  %v5270_v45 = vmul.f32 %v11408_v41, %v7541_v32 }
 0xec8   :  { %5481 = vadd.xlane.f32.xlu0 %v5250_v26  ;;  %v11504_v6 = vsel %vm509_vm8, %v5818_v37, %v6204_v60  ;;  %v5266_v37 = vmul.f32 %v11408_v41, %v7543_v13 }
 0xec9   :  { %5515 = vadd.xlane.f32.xlu1 %v5267_v10  ;;  %v5358_v21 = vpop.xlane.xlu0 %5357 }
 0xeca   :  { %v5826_v54 = vrot.slane %v5358_v21, %v12472_v59  ;;  %v5364_v58 = vpop.xlane.xlu1 %5363 }
 0xecb   :  { %v5838_v1 = vrot.slane %v5364_v58, %v12472_v59  ;;  %v7545_v14 = vpop.eup %7544 }
 0xecc   :  { %v6206_v50 = vsel %vm497_vm2, %v5826_v54, %v5822_v28  ;;  %5505 = vadd.xlane.f32.xlu0 %v5262_v16  ;;  %v7547_v31 = vpop.eup %7546  ;;  %v5271_v40 = vmul.f32 %v11408_v41, %v7545_v14 }
 0xecd   :  { %5495 = vadd.xlane.f32.xlu1 %v5257_v56  ;;  %v5362_v34 = vpop.xlane.xlu0 %5361  ;;  %v6207_v55 = vsel %vm499_vm3, %v5830_v33, %v6206_v50  ;;  %v7549_v21 = vpop.eup %7548  ;;  %v5273_v28 = vmul.f32 %v11408_v41, %v7547_v31 }
 0xece   :  { %v5834_v39 = vrot.slane %v5362_v34, %v12472_v59  ;;  %v5368_v49 = vpop.xlane.xlu1 %5367  ;;  %v5272_v56 = vmul.f32 %v11408_v41, %v7549_v21  ;;  %v7551_v57 = vpop.eup %7550 }
 0xecf   :  { %v5846_v17 = vrot.slane %v5368_v49, %v12472_v59 }
 0xed0   :  { %v6208_v62 = vsel %vm501_vm4, %v5834_v39, %v6207_v55  ;;  %5517 = vadd.xlane.f32.xlu0 %v5268_v15  ;;  %v5274_v15 = vmul.f32 %v11408_v41, %v7551_v57 }
 0xed1   :  { %5519 = vadd.xlane.f32.xlu1 %v5269_v9  ;;  %v5366_v43 = vpop.xlane.xlu0 %5365  ;;  %v6209_v8 = vsel %vm503_vm5, %v5838_v1, %v6208_v62 }
 0xed2   :  { %v5842_v53 = vrot.slane %v5366_v43, %v12472_v59  ;;  %v5372_v2 = vpop.xlane.xlu1 %5371 }
 0xed3   :  { %v5854_v20 = vrot.slane %v5372_v2, %v12472_v59 }
 0xed4   :  { %v6210_v30 = vsel %vm505_vm6, %v5842_v53, %v6209_v8  ;;  %5507 = vadd.xlane.f32.xlu0 %v5263_v22 }
 0xed5   :  { %5509 = vadd.xlane.f32.xlu1 %v5264_v29  ;;  %v5370_v23 = vpop.xlane.xlu0 %5369  ;;  %v6211_v19 = vsel %vm507_vm7, %v5846_v17, %v6210_v30 }
 0xed6   :  { %v5850_v38 = vrot.slane %v5370_v23, %v12472_v59  ;;  %v5376_v0 = vpop.xlane.xlu1 %5375 }
 0xed7   :  { %v5862_v60 = vrot.slane %v5376_v0, %v12472_v59 }
 0xed8   :  { %5497 = vadd.xlane.f32.xlu0 %v5258_v44  ;;  %v11536_v27 = vsel %vm509_vm8, %v5850_v38, %v6211_v19 }
 0xed9   :  { %5511 = vadd.xlane.f32.xlu1 %v5265_v5  ;;  %v5374_v48 = vpop.xlane.xlu0 %5373 }
 0xeda   :  { %v5858_v4 = vrot.slane %v5374_v48, %v12472_v59  ;;  %v5380_v35 = vpop.xlane.xlu1 %5379 }
 0xedb   :  { %v5870_v47 = vrot.slane %v5380_v35, %v12472_v59 }
 0xedc   :  { %v6213_v26 = vsel %vm497_vm2, %v5858_v4, %v5854_v20  ;;  %5521 = vadd.xlane.f32.xlu0 %v5270_v45 }
 0xedd   :  { %5513 = vadd.xlane.f32.xlu1 %v5266_v37  ;;  %v5378_v51 = vpop.xlane.xlu0 %5377  ;;  %v6214_v63 = vsel %vm499_vm3, %v5862_v60, %v6213_v26 }
 0xede   :  { %v5866_v18 = vrot.slane %v5378_v51, %v12472_v59  ;;  %v5384_v10 = vpop.xlane.xlu1 %5383 }
 0xedf   :  { %v5878_v50 = vrot.slane %v5384_v10, %v12472_v59 }
 0xee0   :  { %v6215_v54 = vsel %vm501_vm4, %v5866_v18, %v6214_v63  ;;  %5523 = vadd.xlane.f32.xlu0 %v5271_v40 }
 0xee1   :  { %5527 = vadd.xlane.f32.xlu1 %v5273_v28  ;;  %v5382_v58 = vpop.xlane.xlu0 %5381  ;;  %v6216_v16 = vsel %vm503_vm5, %v5870_v47, %v6215_v54 }
 0xee2   :  { %v5874_v3 = vrot.slane %v5382_v58, %v12472_v59  ;;  %v5388_v33 = vpop.xlane.xlu1 %5387 }
 0xee3   :  { %v5886_v9 = vrot.slane %v5388_v33, %v12472_v59 }
 0xee4   :  { %v6217_v34 = vsel %vm505_vm6, %v5874_v3, %v6216_v16  ;;  %5525 = vadd.xlane.f32.xlu0 %v5272_v56 }
 0xee5   :  { %v5386_v55 = vpop.xlane.xlu0 %5385  ;;  %v6218_v36 = vsel %vm507_vm7, %v5878_v50, %v6217_v34 }
 0xee6   :  { %v5882_v39 = vrot.slane %v5386_v55, %v12472_v59  ;;  %v5392_v49 = vpop.xlane.xlu1 %5391 }
 0xee7   :  { %v5894_v43 = vrot.slane %v5392_v49, %v12472_v59 }
 0xee8   :  { %5529 = vadd.xlane.f32.xlu0 %v5274_v15  ;;  %v11560_v25 = vsel %vm509_vm8, %v5882_v39, %v6218_v36 }
 0xee9   :  { %v5390_v1 = vpop.xlane.xlu0 %5389 }
 0xeea   :  { %v5890_v42 = vrot.slane %v5390_v1, %v12472_v59  ;;  %v5396_v62 = vpop.xlane.xlu1 %5395 }
 0xeec   :  { %v6220_v8 = vsel %vm497_vm2, %v5890_v42, %v5886_v9 }
 0xeed   :  { %v5394_v11 = vpop.xlane.xlu0 %5393  ;;  %v6221_v53 = vsel %vm499_vm3, %v5894_v43, %v6220_v8 }
 0xeee   :  { %v11567_v2 = vpop.xlane.xlu1 %5399  ;;  %v5898_v26 = vrot.slane %v5394_v11, %v12472_v59 }
 0xeef   :  { %v5910_v57 = vrot.slane %v11567_v2, %v12472_v59 }
 0xef0   :  { %v6222_v18 = vsel %vm501_vm4, %v5898_v26, %v6221_v53 }
 0xef1   :  { %v5398_v41 = vpop.xlane.xlu0 %5397 }
 0xef2   :  { %v5404_v22 = vpop.xlane.xlu1 %5403 }
 0xef5   :  { %v11569_v61 = vpop.xlane.xlu0 %5401 }
 0xef6   :  { %v5408_v17 = vpop.xlane.xlu1 %5407  ;;  %v5914_v16 = vrot.slane %v11569_v61, %v12472_v59 }
 0xef7   :  { %v5926_v28 = vrot.slane %v5408_v17, %v12472_v59 }
 0xef9   :  { %v5406_v29 = vpop.xlane.xlu0 %5405 }
 0xefa   :  { %v5412_v52 = vpop.xlane.xlu1 %5411 }
 0xefd   :  { %v5410_v30 = vpop.xlane.xlu0 %5409 }
 0xefe   :  { %v11571_v23 = vpop.xlane.xlu1 %5415  ;;  %v5930_v21 = vrot.slane %v5410_v30, %v12472_v59 }
 0xeff   :  { %v5942_v8 = vrot.slane %v11571_v23, %v12472_v59 }
 0xf01   :  { %v5414_v19 = vpop.xlane.xlu0 %5413 }
 0xf02   :  { %v5420_v38 = vpop.xlane.xlu1 %5419  ;;  %v5938_v34 = vrot.slane %v5414_v19, %v12472_v59 }
 0xf03   :  { %v5950_v33 = vrot.slane %v5420_v38, %v12472_v59 }
 0xf05   :  { %v11573_v0 = vpop.xlane.xlu0 %5417 }
 0xf06   :  { %v5424_v44 = vpop.xlane.xlu1 %5423  ;;  %v5946_v53 = vrot.slane %v11573_v0, %v12472_v59 }
 0xf07   :  { %v5958_v15 = vrot.slane %v5424_v44, %v12472_v59 }
 0xf09   :  { %v5422_v32 = vpop.xlane.xlu0 %5421 }
 0xf0a   :  { %v11575_v5 = vpop.xlane.xlu1 %5427  ;;  %v5954_v54 = vrot.slane %v5422_v32, %v12472_v59 }
 0xf0c   :  { %v6234_v36 = vsel %vm497_vm2, %v5954_v54, %v5950_v33 }
 0xf0d   :  { %v5426_v13 = vpop.xlane.xlu0 %5425  ;;  %v6235_v2 = vsel %vm499_vm3, %v5958_v15, %v6234_v36 }
 0xf0e   :  { %v11577_v48 = vpop.xlane.xlu1 %5431  ;;  %v5962_v39 = vrot.slane %v5426_v13, %v12472_v59 }
 0xf11   :  { %v11579_v20 = vpop.xlane.xlu0 %5429 }
 0xf12   :  { %v5436_v4 = vpop.xlane.xlu1 %5435 }
 0xf13   :  { %v5982_v42 = vrot.slane %v5436_v4, %v12472_v59  ;;  %v5974_v4 = vrot.slane %v11577_v48, %v12472_v59 }
 0xf14   :  { %6299 = vxpose.xlu1.b32.start [1/16] (narrow) %v11367_v7, 8  ;;  %v5922_v7 = vrot.slane %v5406_v29, %v12472_v59  ;;  %v5966_v29 = vrot.slane %v11575_v5, %v12472_v59 }
 0xf15   :  { %v11582_v35 = vpop.xlane.xlu0 %5433 }
 0xf16   :  { %v5440_v45 = vpop.xlane.xlu1 %5439  ;;  %v5978_v13 = vrot.slane %v11582_v35, %v12472_v59 }
 0xf18   :  { %6300 = vxpose.xlu1.b32.cont [2/16] (narrow) %v11400_v46, 8  ;;  %v5918_v46 = vrot.slane %v5404_v22, %v12472_v59  ;;  %v5970_v22 = vrot.slane %v11579_v20, %v12472_v59 }
 0xf19   :  { %v5438_v14 = vpop.xlane.xlu0 %5437 }
 0xf1a   :  { %v11585_v60 = vpop.xlane.xlu1 %5443  ;;  %v6227_v40 = vsel %vm497_vm2, %v5922_v7, %v5918_v46  ;;  %v5986_v49 = vrot.slane %v5438_v14, %v12472_v59 }
 0xf1b   :  { %v6228_v3 = vsel %vm499_vm3, %v5926_v28, %v6227_v40 }
 0xf1c   :  { %6301 = vxpose.xlu1.b32.cont [3/16] (narrow) %v11438_v12, 8  ;;  %v5906_v12 = vrot.slane %v5398_v41, %v12472_v59  ;;  %v6229_v50 = vsel %vm501_vm4, %v5930_v21, %v6228_v3  ;;  %v6236_v41 = vsel %vm501_vm4, %v5962_v39, %v6235_v2  ;;  %v6241_v61 = vsel %vm497_vm2, %v5986_v49, %v5982_v42 }
 0xf1d   :  { %v5442_v37 = vpop.xlane.xlu0 %5441  ;;  %v6237_v19 = vsel %vm503_vm5, %v5966_v29, %v6236_v41 }
 0xf1e   :  { %v11588_v31 = vpop.xlane.xlu1 %5447  ;;  %v5994_v17 = vrot.slane %v5442_v37, %v12472_v59  ;;  %v6238_v32 = vsel %vm505_vm6, %v5970_v22, %v6237_v19 }
 0xf1f   :  { %v6239_v35 = vsel %vm507_vm7, %v5974_v4, %v6238_v32  ;;  %v6006_v48 = vrot.slane %v11588_v31, %v12472_v59 }
 0xf20   :  { %6302 = vxpose.xlu1.b32.cont [4/16] (narrow) %v11471_v24, 8  ;;  %v5902_v24 = vrot.slane %v5396_v62, %v12472_v59  ;;  %v6240_v46 = vsel %vm509_vm8, %v5978_v13, %v6239_v35 }
 0xf21   :  { %v11592_v51 = vpop.xlane.xlu0 %5445 }
 0xf22   :  { %v11595_v63 = vpop.xlane.xlu1 %5451  ;;  %v6002_v20 = vrot.slane %v11592_v51, %v12472_v59 }
 0xf23   :  { %v6014_v21 = vrot.slane %v11595_v63, %v12472_v59 }
 0xf24   :  { %6303 = vxpose.xlu1.b32.cont [5/16] (narrow) %v11504_v6, 8  ;;  %v6223_v6 = vsel %vm503_vm5, %v5902_v24, %v6222_v18 }
 0xf25   :  { %v11601_v10 = vpop.xlane.xlu0 %5449  ;;  %v6224_v58 = vsel %vm505_vm6, %v5906_v12, %v6223_v6 }
 0xf26   :  { %v11606_v47 = vpop.xlane.xlu1 %5455  ;;  %v6225_v1 = vsel %vm507_vm7, %v5910_v57, %v6224_v58  ;;  %v6010_v51 = vrot.slane %v11601_v10, %v12472_v59 }
 0xf27   :  { %v6226_v43 = vsel %vm509_vm8, %v5914_v16, %v6225_v1  ;;  %v6022_v6 = vrot.slane %v11606_v47, %v12472_v59 }
 0xf28   :  { %6304 = vxpose.xlu1.b32.cont [6/16] (narrow) %v11536_v27, 8  ;;  %v5934_v27 = vrot.slane %v5412_v52, %v12472_v59  ;;  %v5990_v52 = vrot.slane %v5440_v45, %v12472_v59  ;;  %v5998_v45 = vrot.slane %v11585_v60, %v12472_v59 }
 0xf29   :  { %v5454_v56 = vpop.xlane.xlu0 %5453 }
 0xf2a   :  { %v11621_v55 = vpop.xlane.xlu1 %5459  ;;  %v6230_v9 = vsel %vm503_vm5, %v5934_v27, %v6229_v50  ;;  %v6242_v38 = vsel %vm499_vm3, %v5990_v52, %v6241_v61  ;;  %v6018_v18 = vrot.slane %v5454_v56, %v12472_v59 }
 0xf2b   :  { %v6231_v11 = vsel %vm505_vm6, %v5938_v34, %v6230_v9  ;;  %v6243_v5 = vsel %vm501_vm4, %v5994_v17, %v6242_v38 }
 0xf2c   :  { %6305 = vxpose.xlu1.b32.cont [7/16] (narrow) %v11560_v25, 8  ;;  %v6232_v23 = vsel %vm507_vm7, %v5942_v8, %v6231_v11  ;;  %v6244_v37 = vsel %vm503_vm5, %v5998_v45, %v6243_v5  ;;  %v6248_v10 = vsel %vm497_vm2, %v6018_v18, %v6014_v21 }
 0xf2d   :  { %v5458_v62 = vpop.xlane.xlu0 %5457  ;;  %v6233_v44 = vsel %vm509_vm8, %v5946_v53, %v6232_v23  ;;  %v6245_v7 = vsel %vm505_vm6, %v6002_v20, %v6244_v37  ;;  %v6249_v58 = vsel %vm499_vm3, %v6022_v6, %v6248_v10 }
 0xf2e   :  { %v11639_v25 = vpop.xlane.xlu1 %5469  ;;  %v6246_v24 = vsel %vm507_vm7, %v6006_v48, %v6245_v7  ;;  %v6026_v54 = vrot.slane %v5458_v62, %v12472_v59 }
 0xf2f   :  { %v6247_v40 = vsel %vm509_vm8, %v6010_v51, %v6246_v24 }
 0xf30   :  { %6306 = vxpose.xlu1.b32.cont [8/16] (narrow) %v6226_v43, 8  ;;  %v6250_v63 = vsel %vm501_vm4, %v6026_v54, %v6249_v58 }
 0xf31   :  { %v11649_v30 = vpop.xlane.xlu0 %5467 }
 0xf32   :  { %v5462_v0 = vpop.xlane.xlu1 %5461 }
 0xf33   :  { %v6034_v3 = vrot.slane %v5462_v0, %v12472_v59 }
 0xf34   :  { %6307 = vxpose.xlu1.b32.cont [9/16] (narrow) %v6233_v44, 8 }
 0xf35   :  { %v11665_v14 = vpop.xlane.xlu0 %5471 }
 0xf36   :  { %v11668_v26 = vpop.xlane.xlu1 %5483 }
 0xf38   :  { %6308 = vxpose.xlu1.b32.cont [10/16] (narrow) %v6240_v46, 8 }
 0xf39   :  { %v5474_v60 = vpop.xlane.xlu0 %5473 }
 0xf3a   :  { %v5464_v12 = vpop.xlane.xlu1 %5463 }
 0xf3c   :  { %6309 = vxpose.xlu1.b32.cont [11/16] (narrow) %v6247_v40, 8 }
 0xf3d   :  { %v11682_v28 = vpop.xlane.xlu0 %5485 }
 0xf3e   :  { %v11686_v31 = vpop.xlane.xlu1 %5487 }
 0xf41   :  { %v5476_v16 = vpop.xlane.xlu0 %5475 }
 0xf42   :  { %v5478_v33 = vpop.xlane.xlu1 %5477 }
 0xf43   :  { %7693 = shalt.err (!%p7690_p4)
}
 0xf44   :  { %s7694_s26 = scalar_lea.hbm %s11808_s15, 128 }
 0xf45   :  { %p7695_p5 = scmp.ne.s32.totalorder %s11808_s15, %s7694_s26  ;;  %p7698_p6 = scmp.lt.u32.totalorder %s7694_s26, %s11808_s15 }
 0xf47   :  { %p7700_p7 = pnand %p7698_p6, %p7695_p5 }
 0xf49   :  { %7703 = shalt.err (!%p7700_p7)
}
 0xf4a   :  { %6342 = dma.vmem_to_hbm [thread:$0]  %s6340_s7, 128, %s11808_s15, [#allocation3]   ;;  %v6030_v47 = vrot.slane %v11621_v55, %v12472_v59  ;;  %v6038_v56 = vrot.slane %v5464_v12, %v12472_v59  ;;  %v5466_v50 = vpop.xlane.xlu0 %5465  ;;  %v5500_v36 = vpop.xlane.xlu1 %5499  ;;  %v6046_v55 = vrot.slane %v11649_v30, %v12472_v59  ;;  %v6054_v9 = vrot.slane %v11665_v14, %v12472_v59 }
 0xf4b   :  { %v6042_v27 = vrot.slane %v5466_v50, %v12472_v59  ;;  %v6050_v62 = vrot.slane %v11639_v25, %v12472_v59  ;;  %v6058_v43 = vrot.slane %v5474_v60, %v12472_v59  ;;  %v6062_v11 = vrot.slane %v5476_v16, %v12472_v59  ;;  %s7737_s15 = smov [#allocation4]  }
 0xf4c   :  { %v6251_v57 = vsel %vm503_vm5, %v6030_v47, %v6250_v63  ;;  %v6066_v61 = vrot.slane %v5478_v33, %v12472_v59  ;;  %v6082_v32 = vrot.slane %v11682_v28, %v12472_v59  ;;  %v6078_v5 = vrot.slane %v11668_v26, %v12472_v59  ;;  %s6349_s29 = sshll.u32 %s7737_s15, 4  ;;  %s6350_s29 = int_to_ptr.vmem [resolvable:$true] %s6349_s29 }
 0xf4d   :  { %v6252_v34 = vsel %vm505_vm6, %v6034_v3, %v6251_v57  ;;  %v6255_v53 = vsel %vm497_vm2, %v6050_v62, %v6046_v55  ;;  %v6086_v20 = vrot.slane %v11686_v31, %v12472_v59  ;;  %v6110_v46 = vrot.slane %v5500_v36, %v12472_v59  ;;  %s7704_s30 = scalar_lea.vmem %s6350_s29, 128  ;;  %p7709_p9 = scmp.lt.s32.totalorder %s6350_s29, %s6350_s29 }
 0xf4e   :  { %v6253_v39 = vsel %vm507_vm7, %v6038_v56, %v6252_v34  ;;  %v5490_v15 = vpop.xlane.xlu0 %5489  ;;  %v5480_v1 = vpop.xlane.xlu1 %5479  ;;  %v6256_v2 = vsel %vm499_vm3, %v6054_v9, %v6255_v53  ;;  %v6262_v45 = vsel %vm497_vm2, %v6082_v32, %v6078_v5  ;;  %p7705_p8 = scmp.ne.s32.totalorder %s6350_s29, %s7704_s30  ;;  %p7710_p10 = scmp.lt.s32.totalorder %s7704_s30, %s7704_s30 }
 0xf4f   :  { %v6254_v49 = vsel %vm509_vm8, %v6042_v27, %v6253_v39  ;;  %v6257_v22 = vsel %vm501_vm4, %v6058_v43, %v6256_v2  ;;  %v6070_v52 = vrot.slane %v5480_v1, %v12472_v59  ;;  %v6090_v14 = vrot.slane %v5490_v15, %v12472_v59 }
 0xf50   :  { %6310 = vxpose.xlu1.b32.cont [12/16] (narrow) %v6254_v49, 8  ;;  %v6258_v29 = vsel %vm503_vm5, %v6062_v11, %v6257_v22  ;;  %v6263_v51 = vsel %vm499_vm3, %v6086_v20, %v6262_v45  ;;  %p7711_p11 = por %p7710_p10, %p7709_p9 }
 0xf51   :  { %v6259_v30 = vsel %vm505_vm6, %v6066_v61, %v6258_v29  ;;  %v6264_v26 = vsel %vm501_vm4, %v6090_v14, %v6263_v51 }
 0xf52   :  { %v5502_v42 = vpop.xlane.xlu0 %5501  ;;  %v5504_v8 = vpop.xlane.xlu1 %5503  ;;  %v6260_v38 = vsel %vm507_vm7, %v6070_v52, %v6259_v30  ;;  %p7712_p12 = pnand %p7711_p11, %p7705_p8 }
 0xf53   :  { %v6114_v35 = vrot.slane %v5502_v42, %v12472_v59  ;;  %v6118_v60 = vrot.slane %v5504_v8, %v12472_v59 }
 0xf55   :  { %v6269_v24 = vsel %vm497_vm2, %v6114_v35, %v6110_v46 }
 0xf56   :  { %v5492_v41 = vpop.xlane.xlu0 %5491  ;;  %v5494_v17 = vpop.xlane.xlu1 %5493  ;;  %v6270_v31 = vsel %vm499_vm3, %v6118_v60, %v6269_v24 }
 0xf57   :  { %v6094_v7 = vrot.slane %v5492_v41, %v12472_v59  ;;  %v6098_v18 = vrot.slane %v5494_v17, %v12472_v59 }
 0xf59   :  { %v6265_v40 = vsel %vm503_vm5, %v6094_v7, %v6264_v26 }
 0xf5a   :  { %v5482_v25 = vpop.xlane.xlu0 %5481  ;;  %v5516_v19 = vpop.xlane.xlu1 %5515  ;;  %v6266_v6 = vsel %vm505_vm6, %v6098_v18, %v6265_v40 }
 0xf5b   :  { %v6074_v23 = vrot.slane %v5482_v25, %v12472_v59  ;;  %v6142_v49 = vrot.slane %v5516_v19, %v12472_v59 }
 0xf5d   :  { %v6261_v0 = vsel %vm509_vm8, %v6074_v23, %v6260_v38 }
 0xf5e   :  { %v5506_v44 = vpop.xlane.xlu0 %5505  ;;  %6311 = vxpose.xlu1.b32.cont [13/16] (narrow) %v6261_v0, 8  ;;  %v5496_v13 = vpop.xlane.xlu1 %5495 }
 0xf5f   :  { %v6122_v21 = vrot.slane %v5506_v44, %v12472_v59  ;;  %v6102_v28 = vrot.slane %v5496_v13, %v12472_v59 }
 0xf61   :  { %v6271_v63 = vsel %vm501_vm4, %v6122_v21, %v6270_v31  ;;  %v6267_v3 = vsel %vm507_vm7, %v6102_v28, %v6266_v6 }
 0xf62   :  { %v5518_v4 = vpop.xlane.xlu0 %5517  ;;  %v5520_v37 = vpop.xlane.xlu1 %5519 }
 0xf63   :  { %v6146_v34 = vrot.slane %v5518_v4, %v12472_v59  ;;  %v6150_v1 = vrot.slane %v5520_v37, %v12472_v59 }
 0xf65   :  { %v6276_v42 = vsel %vm497_vm2, %v6146_v34, %v6142_v49 }
 0xf66   :  { %v5508_v48 = vpop.xlane.xlu0 %5507  ;;  %v5510_v12 = vpop.xlane.xlu1 %5509  ;;  %v6277_v8 = vsel %vm499_vm3, %v6150_v1, %v6276_v42 }
 0xf67   :  { %v6126_v10 = vrot.slane %v5508_v48, %v12472_v59  ;;  %v6130_v33 = vrot.slane %v5510_v12, %v12472_v59 }
 0xf69   :  { %v6272_v47 = vsel %vm503_vm5, %v6126_v10, %v6271_v63 }
 0xf6a   :  { %v5498_v54 = vpop.xlane.xlu0 %5497  ;;  %v5512_v16 = vpop.xlane.xlu1 %5511  ;;  %v6273_v36 = vsel %vm505_vm6, %v6130_v33, %v6272_v47 }
 0xf6b   :  { %v6106_v58 = vrot.slane %v5498_v54, %v12472_v59  ;;  %v6134_v56 = vrot.slane %v5512_v16, %v12472_v59 }
 0xf6d   :  { %v6268_v57 = vsel %vm509_vm8, %v6106_v58, %v6267_v3  ;;  %v6274_v15 = vsel %vm507_vm7, %v6134_v56, %v6273_v36 }
 0xf6e   :  { %v5522_v50 = vpop.xlane.xlu0 %5521  ;;  %6312 = vxpose.xlu1.b32.cont [14/16] (narrow) %v6268_v57, 8  ;;  %v5514_v27 = vpop.xlane.xlu1 %5513 }
 0xf6f   :  { %v6138_v39 = vrot.slane %v5514_v27, %v12472_v59  ;;  %v6154_v62 = vrot.slane %v5522_v50, %v12472_v59 }
 0xf71   :  { %v6275_v9 = vsel %vm509_vm8, %v6138_v39, %v6274_v15  ;;  %v6278_v53 = vsel %vm501_vm4, %v6154_v62, %v6277_v8 }
 0xf72   :  { %v5524_v55 = vpop.xlane.xlu0 %5523  ;;  %6313 = vxpose.xlu1.b32.cont [15/16] (narrow) %v6275_v9, 8  ;;  %v5528_v2 = vpop.xlane.xlu1 %5527 }
 0xf73   :  { %v6158_v43 = vrot.slane %v5524_v55, %v12472_v59  ;;  %v6166_v17 = vrot.slane %v5528_v2, %v12472_v59 }
 0xf75   :  { %v6279_v22 = vsel %vm503_vm5, %v6158_v43, %v6278_v53 }
 0xf76   :  { %v5526_v11 = vpop.xlane.xlu0 %5525 }
 0xf77   :  { %v6162_v41 = vrot.slane %v5526_v11, %v12472_v59 }
 0xf79   :  { %v6280_v61 = vsel %vm505_vm6, %v6162_v41, %v6279_v22 }
 0xf7a   :  { %v5530_v29 = vpop.xlane.xlu0 %5529  ;;  %v6281_v25 = vsel %vm507_vm7, %v6166_v17, %v6280_v61 }
 0xf7b   :  { %v6170_v52 = vrot.slane %v5530_v29, %v12472_v59 }
 0xf7d   :  { %v6282_v30 = vsel %vm509_vm8, %v6170_v52, %v6281_v25 }
 0xf7e   :  { %6314 = vxpose.xlu1.b32.end [16/16] (narrow) %v6282_v30, 8 }
 0xfc2   :  { %v6315_v23 = vpop.trf.xlu1 }
 0xfc3   :  { %v6331_v38 = vsel %vm3287_vm11, %v6315_v23, -1e+30 }
 0xfc4   :  { %6332 = vst [vmem:[#allocation4] sm:$0xff] %v6331_v38 }
 0xfc5   :  { %7715 = shalt.err (!%p7712_p12)
}
 0xfc6   :  { %s7716_s17 = scalar_lea.hbm %s11809_s16, 128 }
 0xfc7   :  { %p7717_p13 = scmp.ne.s32.totalorder %s11809_s16, %s7716_s17  ;;  %p7720_p0 = scmp.lt.u32.totalorder %s7716_s17, %s11809_s16 }
 0xfc9   :  { %p7722_p1 = pnand %p7720_p0, %p7717_p13 }
 0xfcb   :  { %7725 = shalt.err (!%p7722_p1)
}
 0xfcc   :  { %6352 = dma.vmem_to_hbm [thread:$0]  %s6350_s29, 128, %s11809_s16, [#allocation5]  }
 0xfcd   :  { %7726 = dma.done.wait [#allocation3], 128  }
 0xfce   :  { %7727 = vsyncadd [#allocation3], 4294967168 }
 0xfcf   :  { %7728 = dma.done.wait [#allocation5], 128  }
 0xfd0   :  { %7729 = vsyncadd [#allocation5], 4294967168 }
 0xfd1   :  { %6359 = vsyncpa [#allocation3], 1 }
 0xfd2   :  { %6360 = vsyncpa [#allocation5], 1 }

</bundles_post_ra>
